<compile_context>
chip_gen: v6e
topology: v6e:2x2x1
jax: 0.10.0
libtpu: 0.0.40
codegen_flags: <defaults>
</compile_context>

<pallas_src>
import jax
import jax.numpy as jnp
from jax.experimental import pallas as pl
from jax.experimental.pallas import tpu as pltpu


def _lstm_step(gates, c, H):
    """PyTorch LSTM cell from pre-activation gates (order i, f, g, o along 4H).

    One sigmoid over the whole 4H block (single EUP pass) instead of three separate
    64-lane sigmoids; tanh only on the g slice. All math in f32.
    """
    sig = jax.nn.sigmoid(gates)
    i = sig[:, 0 * H:1 * H]
    f = sig[:, 1 * H:2 * H]
    o = sig[:, 3 * H:4 * H]
    g = jnp.tanh(gates[:, 2 * H:3 * H])
    c_new = f * c + i * g
    h_new = o * jnp.tanh(c_new)
    return h_new, c_new


def seq2seq_kernel(
    # inputs
    x_ref,                                     # (B, S)  f32
    enc_wih_ref, enc_whh_ref, enc_b_ref,       # (1,4H) f32, (H,4H) bf16, (1,4H) f32
    emb_w_ref, emb_b_ref,                      # (1,H) f32, (1,H) f32
    attn_we_ref, attn_wh_ref, attn_b_ref,      # (H,S) bf16, (H,S) bf16, (1,S) f32
    comb_we_ref, comb_wa_ref, comb_b_ref,      # (H,H) bf16, (H,H) bf16, (1,H) f32
    dec_wih_ref, dec_whh_ref, dec_b_ref,       # (H,4H) bf16, (H,4H) bf16, (1,4H) f32
    out_w_ref, out_b_ref,                      # (1,H) f32, (1,1) f32
    # outputs
    pred_ref,                                  # (B, T)   f32
    attn_out_ref,                              # (B, T*S) f32
    # scratch
    xg_scratch,                                # (B, S, 4H) f32 VMEM
    enc_scratch,                               # (B, S, H)  f32 VMEM
):
    B, S = x_ref.shape
    H = emb_w_ref.shape[1]
    T = pred_ref.shape[1]
    f32 = jnp.float32
    bf16 = jnp.bfloat16

    x = x_ref[...]                             # (B, S)

    # Precompute all encoder input projections off the recurrence chain:
    #   xg[b, t, :] = x[b, t] * W_ih(1->4H) + (b_ih + b_hh)
    xg_scratch[...] = x[:, :, None] * enc_wih_ref[...] + enc_b_ref[...]

    # ---------------- Encoder: single-layer LSTM over S timesteps -----------
    h = jnp.zeros((B, H), f32)
    c = jnp.zeros((B, H), f32)
    for t in range(S):                         # small static trip count -> unrolled
        # only h @ W_hh (bf16 MXU push, f32 acc) is on the per-step chain.
        gates = xg_scratch[:, t, :] + jnp.dot(
            h.astype(bf16), enc_whh_ref[...], preferred_element_type=f32)
        h, c = _lstm_step(gates, c, H)
        enc_scratch[:, t, :] = h               # encoder_outputs[:, t, :] (hidden under
                                               # the MXU-latency-bound recurrence)

    # -------- Decoder constants: only small broadcasted biases hoisted ------
    emb_w = emb_w_ref[...]                             # (1, H)
    emb_b = jnp.broadcast_to(emb_b_ref[...], (B, H))
    attn_b = jnp.broadcast_to(attn_b_ref[...], (B, S))
    comb_b = jnp.broadcast_to(comb_b_ref[...], (B, H))
    dec_b = jnp.broadcast_to(dec_b_ref[...], (B, 4 * H))
    out_w = out_w_ref[...]                             # (1, H)
    out_b = out_b_ref[...]                             # (1, 1)

    dec_input = x[:, S - 1:S]                  # encoder_inputs[:, -1, -1:] -> (B, 1)

    preds = []
    attns = []
    for _ in range(T):
        # cast once; both h-dependent matmuls (attn_wh, dec_whh) depend only on this
        # and can be issued at the top of the step by the scheduler.
        h_bf = h.astype(bf16)

        # embedding (dropout identity in eval): (B,1)x(1,H) outer product on the VPU.
        embedded = dec_input * emb_w + emb_b                          # (B, H)
        emb_bf = embedded.astype(bf16)

        # attention logits: Linear(2H -> S) split into two half matmuls (no concat).
        logits = (jnp.dot(emb_bf, attn_we_ref[...], preferred_element_type=f32)
                  + jnp.dot(h_bf, attn_wh_ref[...], preferred_element_type=f32)
                  + attn_b)                                           # (B, S)
        m = jnp.max(logits, axis=1, keepdims=True)
        e = jnp.exp(logits - m)
        attn_soft = e * pl.reciprocal(jnp.sum(e, axis=1, keepdims=True),
                                      approx=False)                   # (B, S)

        # attn_applied = bmm(attn[:,None,:], encoder_outputs)[:,0,:]
        # pure VPU weighted sum over S (no tiny per-batch MXU pushes).
        attn_applied = jnp.sum(attn_soft[:, :, None] * enc_scratch[...],
                               axis=1)                                # (B, H)

        # attn_combine + ReLU: Linear(2H -> H) split into two half matmuls.
        comb = jnp.maximum(
            jnp.dot(emb_bf, comb_we_ref[...], preferred_element_type=f32)
            + jnp.dot(attn_applied.astype(bf16), comb_wa_ref[...],
                      preferred_element_type=f32)
            + comb_b, 0.0)                                            # (B, H)

        # decoder LSTM cell: W_ih / W_hh halves issued as two bf16 matmuls.
        gates = (jnp.dot(comb.astype(bf16), dec_wih_ref[...],
                         preferred_element_type=f32)
                 + jnp.dot(h_bf, dec_whh_ref[...], preferred_element_type=f32)
                 + dec_b)                                             # (B, 4H)
        h, c = _lstm_step(gates, c, H)

        # output projection (H -> 1) + ReLU: VPU multiply + lane reduce, no N=1 MXU.
        pred = jnp.maximum(
            jnp.sum(h * out_w, axis=1, keepdims=True) + out_b, 0.0)   # (B, 1)

        preds.append(pred)
        attns.append(attn_soft)
        dec_input = pred           # teacher_forcing_ratio == 0 -> feed prediction back

    # Single lane-dense output writes after the loop (no per-step masked stores).
    pred_ref[...] = jnp.concatenate(preds, axis=1)          # (B, T)
    attn_out_ref[...] = jnp.concatenate(attns, axis=1)      # (B, T*S)


def attn_lstm_forward(x, sampled_target, params):
    """Pallas implementation of Attn_LSTM.forward (teacher_forcing_ratio=0)."""
    B, S = x.shape
    T = sampled_target.shape[1]
    H = params["emb_w"].shape[1]

    # Pre-split / pre-cast MXU weight operands outside the kernel (free XLA ops).
    bf = lambda a: a.astype(jnp.bfloat16)
    inputs = (
        x.astype(jnp.float32),
        params["enc_wih"], bf(params["enc_whh"]), params["enc_b"],
        params["emb_w"], params["emb_b"],
        bf(params["attn_w"][:H]), bf(params["attn_w"][H:]), params["attn_b"],
        bf(params["comb_w"][:H]), bf(params["comb_w"][H:]), params["comb_b"],
        bf(params["dec_wih"]), bf(params["dec_whh"]), params["dec_b"],
        params["out_w"], params["out_b"],
    )

    pred_bt, attn_flat = pl.pallas_call(
        seq2seq_kernel,
        out_shape=(
            jax.ShapeDtypeStruct((B, T), jnp.float32),
            jax.ShapeDtypeStruct((B, T * S), jnp.float32),
        ),
        in_specs=[pl.BlockSpec(memory_space=pltpu.MemorySpace.VMEM)] * len(inputs),
        out_specs=(
            pl.BlockSpec(memory_space=pltpu.MemorySpace.VMEM),
            pl.BlockSpec(memory_space=pltpu.MemorySpace.VMEM),
        ),
        scratch_shapes=[
            pltpu.VMEM((B, S, 4 * H), jnp.float32),   # precomputed encoder x-gates
            pltpu.VMEM((B, S, H), jnp.float32),       # encoder outputs
        ],
    )(*inputs)

    pre_y = pred_bt.reshape(sampled_target.shape)            # (B, T)
    attn_weights = attn_flat.reshape(B, T, S)                # (B, T, S)
    return pre_y, attn_weights


def init_params(key, S, H=64, out_dim=1):
    """Deterministic synthetic parameters matching the PyTorch module shapes.

    Linear/LSTM weights are stored pre-transposed as (in_features, out_features)
    except `out_w`, which keeps PyTorch's (out_dim, in_features)=(1, H) shape so the
    kernel can do a broadcast-multiply + lane reduce. LSTM gate order is PyTorch's
    (i, f, g, o); b_ih + b_hh are pre-summed.
    """
    ks = jax.random.split(key, 12)
    u = lambda k, shp, scale=0.1: (jax.random.uniform(k, shp, jnp.float32) - 0.5) * 2 * scale
    params = {
        # encoder: nn.LSTM(input_dim=1, hid=H, n_layers=1, batch_first)
        "enc_wih": u(ks[0], (1, 4 * H)),
        "enc_whh": u(ks[1], (H, 4 * H)),
        "enc_b":   u(ks[2], (1, 4 * H)),
        # decoder.embedding: Linear(out_dim=1 -> H)
        "emb_w":   u(ks[3], (out_dim, H)),
        "emb_b":   u(ks[4], (1, H)),
        # decoder.attn: Linear(2H -> max_length=S)
        "attn_w":  u(ks[5], (2 * H, S)),
        "attn_b":  u(ks[6], (1, S)),
        # decoder.attn_combine: Linear(2H -> H)
        "comb_w":  u(ks[7], (2 * H, H)),
        "comb_b":  u(ks[8], (1, H)),
        # decoder.lstm: LSTM(H -> H)
        "dec_wih": u(ks[9], (H, 4 * H)),
        "dec_whh": u(ks[10], (H, 4 * H)),
        "dec_b":   u(ks[11], (1, 4 * H)),
        # decoder.out: Linear(H -> out_dim=1), PyTorch weight shape (1, H)
        "out_w":   u(jax.random.fold_in(key, 100), (out_dim, H)),
        "out_b":   u(jax.random.fold_in(key, 101), (1, out_dim)),
    }
    return params


if __name__ == "__main__":
    # args.interval * args.lag = 16 (encoder sequence / attention max_length)
    # args.window * args.horizon = 8 (prediction length), hid_dim = 64 (module default)
    B, S, T, H = 4, 16, 8, 64

    key = jax.random.PRNGKey(0)
    kx, kt, kp = jax.random.split(key, 3)
    x = jax.random.normal(kx, (B, S), jnp.float32)
    sampled_target = jax.random.normal(kt, (B, T), jnp.float32)
    params = init_params(kp, S, H)

    # TODO(synk): dropout (p=0.1) is treated as identity (inference semantics);
    # a training-mode PyTorch forward with active dropout will not match. bf16 MXU
    # operands introduce a small, bounded deviation from an all-f32 reference.
    pre_y, attn_weights = jax.jit(attn_lstm_forward)(x, sampled_target, params)
    jax.block_until_ready((pre_y, attn_weights))

    assert pre_y.shape == sampled_target.shape, pre_y.shape
    assert attn_weights.shape == (B, T, S), attn_weights.shape
    assert bool(jnp.all(jnp.isfinite(pre_y))) and bool(jnp.all(jnp.isfinite(attn_weights)))
    print("KERNEL_OK")
</pallas_src>

<mosaic_0001>
module attributes {stable_mosaic.version = 11 : i64} {
  func.func @seq2seq_kernel(%arg0: memref<4x16xf32, #tpu.memory_space<vmem>>, %arg1: memref<1x256xf32, #tpu.memory_space<vmem>>, %arg2: memref<64x256xbf16, #tpu.memory_space<vmem>>, %arg3: memref<1x256xf32, #tpu.memory_space<vmem>>, %arg4: memref<1x64xf32, #tpu.memory_space<vmem>>, %arg5: memref<1x64xf32, #tpu.memory_space<vmem>>, %arg6: memref<64x16xbf16, #tpu.memory_space<vmem>>, %arg7: memref<64x16xbf16, #tpu.memory_space<vmem>>, %arg8: memref<1x16xf32, #tpu.memory_space<vmem>>, %arg9: memref<64x64xbf16, #tpu.memory_space<vmem>>, %arg10: memref<64x64xbf16, #tpu.memory_space<vmem>>, %arg11: memref<1x64xf32, #tpu.memory_space<vmem>>, %arg12: memref<64x256xbf16, #tpu.memory_space<vmem>>, %arg13: memref<64x256xbf16, #tpu.memory_space<vmem>>, %arg14: memref<1x256xf32, #tpu.memory_space<vmem>>, %arg15: memref<1x64xf32, #tpu.memory_space<vmem>>, %arg16: memref<1x1xf32, #tpu.memory_space<vmem>>, %arg17: memref<4x8xf32, #tpu.memory_space<vmem>>, %arg18: memref<4x128xf32, #tpu.memory_space<vmem>>, %arg19: memref<4x16x256xf32, #tpu.memory_space<vmem>>, %arg20: memref<4x16x64xf32, #tpu.memory_space<vmem>>) attributes {dimension_semantics = [], scalar_prefetch = 0 : i64, scratch_operands = 2 : i64, tpu.core_type = #tpu.core_type<tc>} {
    %c0 = arith.constant 0 : index
    %c0_0 = arith.constant 0 : index
    %0 = vector.load %arg0[%c0, %c0_0] : memref<4x16xf32, #tpu.memory_space<vmem>>, vector<4x16xf32>
    %1 = vector.shape_cast %0 : vector<4x16xf32> to vector<4x16x1xf32>
    %c0_1 = arith.constant 0 : index
    %c0_2 = arith.constant 0 : index
    %2 = vector.load %arg1[%c0_1, %c0_2] : memref<1x256xf32, #tpu.memory_space<vmem>>, vector<1x256xf32>
    %3 = vector.shape_cast %2 : vector<1x256xf32> to vector<1x1x256xf32>
    %4 = vector.broadcast %1 : vector<4x16x1xf32> to vector<4x16x256xf32>
    %5 = vector.broadcast %3 : vector<1x1x256xf32> to vector<4x16x256xf32>
    %6 = arith.mulf %4, %5 : vector<4x16x256xf32>
    %c0_3 = arith.constant 0 : index
    %c0_4 = arith.constant 0 : index
    %7 = vector.load %arg3[%c0_3, %c0_4] : memref<1x256xf32, #tpu.memory_space<vmem>>, vector<1x256xf32>
    %8 = vector.shape_cast %7 : vector<1x256xf32> to vector<1x1x256xf32>
    %9 = vector.broadcast %8 : vector<1x1x256xf32> to vector<4x16x256xf32>
    %10 = arith.addf %6, %9 : vector<4x16x256xf32>
    %c0_5 = arith.constant 0 : index
    %c0_6 = arith.constant 0 : index
    %c0_7 = arith.constant 0 : index
    %11 = vector.load %arg19[%c0_5, %c0_6, %c0_7] : memref<4x16x256xf32, #tpu.memory_space<vmem>>, vector<4x16x256xf32>
    tpu.vector_store %arg19[%c0_5, %c0_6, %c0_7], %10 {strides = array<i32>} : memref<4x16x256xf32, #tpu.memory_space<vmem>>, vector<4x16x256xf32>,
    %cst = arith.constant 0.000000e+00 : f32
    %12 = vector.broadcast %cst : f32 to vector<4x64xf32>
    %cst_8 = arith.constant 0.000000e+00 : f32
    %13 = vector.broadcast %cst_8 : f32 to vector<4x64xf32>
    %c0_9 = arith.constant 0 : index
    %c0_10 = arith.constant 0 : index
    %c0_11 = arith.constant 0 : index
    %14 = vector.load %arg19[%c0_9, %c0_10, %c0_11] : memref<4x16x256xf32, #tpu.memory_space<vmem>>, vector<4x1x256xf32>
    %15 = vector.shape_cast %14 : vector<4x1x256xf32> to vector<4x256xf32>
    %16 = arith.truncf %12 : vector<4x64xf32> to vector<4x64xbf16>
    %c0_12 = arith.constant 0 : index
    %c0_13 = arith.constant 0 : index
    %17 = vector.load %arg2[%c0_12, %c0_13] : memref<64x256xbf16, #tpu.memory_space<vmem>>, vector<64x256xbf16>
    %cst_14 = arith.constant dense<0.000000e+00> : vector<4x256xf32>
    %18 = tpu.matmul %16, %17, %cst_14 {dimension_numbers = #tpu.dot_dimension_numbers<[1], [0], [0], [1], [0, 0, 1, 1], [], []>} : vector<4x64xbf16>, vector<64x256xbf16>, vector<4x256xf32> -> vector<4x256xf32>
    %19 = arith.addf %15, %18 : vector<4x256xf32>
    %20 = arith.negf %19 : vector<4x256xf32>
    %21 = math.exp %20 : vector<4x256xf32>
    %cst_15 = arith.constant 1.000000e+00 : f32
    %22 = vector.broadcast %cst_15 : f32 to vector<4x256xf32>
    %23 = arith.addf %22, %21 : vector<4x256xf32>
    %24 = arith.divf %22, %23 : vector<4x256xf32>
    %25 = vector.extract_strided_slice %24 {offsets = [0, 0], sizes = [4, 64], strides = [1, 1]} : vector<4x256xf32> to vector<4x64xf32>
    %26 = vector.extract_strided_slice %24 {offsets = [0, 64], sizes = [4, 64], strides = [1, 1]} : vector<4x256xf32> to vector<4x64xf32>
    %27 = vector.extract_strided_slice %24 {offsets = [0, 192], sizes = [4, 64], strides = [1, 1]} : vector<4x256xf32> to vector<4x64xf32>
    %28 = vector.extract_strided_slice %19 {offsets = [0, 128], sizes = [4, 64], strides = [1, 1]} : vector<4x256xf32> to vector<4x64xf32>
    %29 = math.tanh %28 : vector<4x64xf32>
    %30 = arith.mulf %26, %13 : vector<4x64xf32>
    %31 = arith.mulf %25, %29 : vector<4x64xf32>
    %32 = arith.addf %30, %31 : vector<4x64xf32>
    %33 = math.tanh %32 : vector<4x64xf32>
    %34 = arith.mulf %27, %33 : vector<4x64xf32>
    %c0_16 = arith.constant 0 : index
    %c0_17 = arith.constant 0 : index
    %c0_18 = arith.constant 0 : index
    %35 = vector.load %arg20[%c0_16, %c0_17, %c0_18] : memref<4x16x64xf32, #tpu.memory_space<vmem>>, vector<4x1x64xf32>
    %36 = vector.shape_cast %35 : vector<4x1x64xf32> to vector<4x64xf32>
    %37 = vector.shape_cast %34 : vector<4x64xf32> to vector<4x1x64xf32>
    tpu.vector_store %arg20[%c0_16, %c0_17, %c0_18], %37 {strides = array<i32>} : memref<4x16x64xf32, #tpu.memory_space<vmem>>, vector<4x1x64xf32>,
    %c0_19 = arith.constant 0 : index
    %c1 = arith.constant 1 : index
    %c0_20 = arith.constant 0 : index
    %38 = vector.load %arg19[%c0_19, %c1, %c0_20] : memref<4x16x256xf32, #tpu.memory_space<vmem>>, vector<4x1x256xf32>
    %39 = vector.shape_cast %38 : vector<4x1x256xf32> to vector<4x256xf32>
    %40 = arith.truncf %34 : vector<4x64xf32> to vector<4x64xbf16>
    %c0_21 = arith.constant 0 : index
    %c0_22 = arith.constant 0 : index
    %41 = vector.load %arg2[%c0_21, %c0_22] : memref<64x256xbf16, #tpu.memory_space<vmem>>, vector<64x256xbf16>
    %cst_23 = arith.constant dense<0.000000e+00> : vector<4x256xf32>
    %42 = tpu.matmul %40, %41, %cst_23 {dimension_numbers = #tpu.dot_dimension_numbers<[1], [0], [0], [1], [0, 0, 1, 1], [], []>} : vector<4x64xbf16>, vector<64x256xbf16>, vector<4x256xf32> -> vector<4x256xf32>
    %43 = arith.addf %39, %42 : vector<4x256xf32>
    %44 = arith.negf %43 : vector<4x256xf32>
    %45 = math.exp %44 : vector<4x256xf32>
    %cst_24 = arith.constant 1.000000e+00 : f32
    %46 = vector.broadcast %cst_24 : f32 to vector<4x256xf32>
    %47 = arith.addf %46, %45 : vector<4x256xf32>
    %48 = arith.divf %46, %47 : vector<4x256xf32>
    %49 = vector.extract_strided_slice %48 {offsets = [0, 0], sizes = [4, 64], strides = [1, 1]} : vector<4x256xf32> to vector<4x64xf32>
    %50 = vector.extract_strided_slice %48 {offsets = [0, 64], sizes = [4, 64], strides = [1, 1]} : vector<4x256xf32> to vector<4x64xf32>
    %51 = vector.extract_strided_slice %48 {offsets = [0, 192], sizes = [4, 64], strides = [1, 1]} : vector<4x256xf32> to vector<4x64xf32>
    %52 = vector.extract_strided_slice %43 {offsets = [0, 128], sizes = [4, 64], strides = [1, 1]} : vector<4x256xf32> to vector<4x64xf32>
    %53 = math.tanh %52 : vector<4x64xf32>
    %54 = arith.mulf %50, %32 : vector<4x64xf32>
    %55 = arith.mulf %49, %53 : vector<4x64xf32>
    %56 = arith.addf %54, %55 : vector<4x64xf32>
    %57 = math.tanh %56 : vector<4x64xf32>
    %58 = arith.mulf %51, %57 : vector<4x64xf32>
    %c0_25 = arith.constant 0 : index
    %c1_26 = arith.constant 1 : index
    %c0_27 = arith.constant 0 : index
    %59 = vector.load %arg20[%c0_25, %c1_26, %c0_27] : memref<4x16x64xf32, #tpu.memory_space<vmem>>, vector<4x1x64xf32>
    %60 = vector.shape_cast %59 : vector<4x1x64xf32> to vector<4x64xf32>
    %61 = vector.shape_cast %58 : vector<4x64xf32> to vector<4x1x64xf32>
    tpu.vector_store %arg20[%c0_25, %c1_26, %c0_27], %61 {strides = array<i32>} : memref<4x16x64xf32, #tpu.memory_space<vmem>>, vector<4x1x64xf32>,
    %c0_28 = arith.constant 0 : index
    %c2 = arith.constant 2 : index
    %c0_29 = arith.constant 0 : index
    %62 = vector.load %arg19[%c0_28, %c2, %c0_29] : memref<4x16x256xf32, #tpu.memory_space<vmem>>, vector<4x1x256xf32>
    %63 = vector.shape_cast %62 : vector<4x1x256xf32> to vector<4x256xf32>
    %64 = arith.truncf %58 : vector<4x64xf32> to vector<4x64xbf16>
    %c0_30 = arith.constant 0 : index
    %c0_31 = arith.constant 0 : index
    %65 = vector.load %arg2[%c0_30, %c0_31] : memref<64x256xbf16, #tpu.memory_space<vmem>>, vector<64x256xbf16>
    %cst_32 = arith.constant dense<0.000000e+00> : vector<4x256xf32>
    %66 = tpu.matmul %64, %65, %cst_32 {dimension_numbers = #tpu.dot_dimension_numbers<[1], [0], [0], [1], [0, 0, 1, 1], [], []>} : vector<4x64xbf16>, vector<64x256xbf16>, vector<4x256xf32> -> vector<4x256xf32>
    %67 = arith.addf %63, %66 : vector<4x256xf32>
    %68 = arith.negf %67 : vector<4x256xf32>
    %69 = math.exp %68 : vector<4x256xf32>
    %cst_33 = arith.constant 1.000000e+00 : f32
    %70 = vector.broadcast %cst_33 : f32 to vector<4x256xf32>
    %71 = arith.addf %70, %69 : vector<4x256xf32>
    %72 = arith.divf %70, %71 : vector<4x256xf32>
    %73 = vector.extract_strided_slice %72 {offsets = [0, 0], sizes = [4, 64], strides = [1, 1]} : vector<4x256xf32> to vector<4x64xf32>
    %74 = vector.extract_strided_slice %72 {offsets = [0, 64], sizes = [4, 64], strides = [1, 1]} : vector<4x256xf32> to vector<4x64xf32>
    %75 = vector.extract_strided_slice %72 {offsets = [0, 192], sizes = [4, 64], strides = [1, 1]} : vector<4x256xf32> to vector<4x64xf32>
    %76 = vector.extract_strided_slice %67 {offsets = [0, 128], sizes = [4, 64], strides = [1, 1]} : vector<4x256xf32> to vector<4x64xf32>
    %77 = math.tanh %76 : vector<4x64xf32>
    %78 = arith.mulf %74, %56 : vector<4x64xf32>
    %79 = arith.mulf %73, %77 : vector<4x64xf32>
    %80 = arith.addf %78, %79 : vector<4x64xf32>
    %81 = math.tanh %80 : vector<4x64xf32>
    %82 = arith.mulf %75, %81 : vector<4x64xf32>
    %c0_34 = arith.constant 0 : index
    %c2_35 = arith.constant 2 : index
    %c0_36 = arith.constant 0 : index
    %83 = vector.load %arg20[%c0_34, %c2_35, %c0_36] : memref<4x16x64xf32, #tpu.memory_space<vmem>>, vector<4x1x64xf32>
    %84 = vector.shape_cast %83 : vector<4x1x64xf32> to vector<4x64xf32>
    %85 = vector.shape_cast %82 : vector<4x64xf32> to vector<4x1x64xf32>
    tpu.vector_store %arg20[%c0_34, %c2_35, %c0_36], %85 {strides = array<i32>} : memref<4x16x64xf32, #tpu.memory_space<vmem>>, vector<4x1x64xf32>,
    %c0_37 = arith.constant 0 : index
    %c3 = arith.constant 3 : index
    %c0_38 = arith.constant 0 : index
    %86 = vector.load %arg19[%c0_37, %c3, %c0_38] : memref<4x16x256xf32, #tpu.memory_space<vmem>>, vector<4x1x256xf32>
    %87 = vector.shape_cast %86 : vector<4x1x256xf32> to vector<4x256xf32>
    %88 = arith.truncf %82 : vector<4x64xf32> to vector<4x64xbf16>
    %c0_39 = arith.constant 0 : index
    %c0_40 = arith.constant 0 : index
    %89 = vector.load %arg2[%c0_39, %c0_40] : memref<64x256xbf16, #tpu.memory_space<vmem>>, vector<64x256xbf16>
    %cst_41 = arith.constant dense<0.000000e+00> : vector<4x256xf32>
    %90 = tpu.matmul %88, %89, %cst_41 {dimension_numbers = #tpu.dot_dimension_numbers<[1], [0], [0], [1], [0, 0, 1, 1], [], []>} : vector<4x64xbf16>, vector<64x256xbf16>, vector<4x256xf32> -> vector<4x256xf32>
    %91 = arith.addf %87, %90 : vector<4x256xf32>
    %92 = arith.negf %91 : vector<4x256xf32>
    %93 = math.exp %92 : vector<4x256xf32>
    %cst_42 = arith.constant 1.000000e+00 : f32
    %94 = vector.broadcast %cst_42 : f32 to vector<4x256xf32>
    %95 = arith.addf %94, %93 : vector<4x256xf32>
    %96 = arith.divf %94, %95 : vector<4x256xf32>
    %97 = vector.extract_strided_slice %96 {offsets = [0, 0], sizes = [4, 64], strides = [1, 1]} : vector<4x256xf32> to vector<4x64xf32>
    %98 = vector.extract_strided_slice %96 {offsets = [0, 64], sizes = [4, 64], strides = [1, 1]} : vector<4x256xf32> to vector<4x64xf32>
    %99 = vector.extract_strided_slice %96 {offsets = [0, 192], sizes = [4, 64], strides = [1, 1]} : vector<4x256xf32> to vector<4x64xf32>
    %100 = vector.extract_strided_slice %91 {offsets = [0, 128], sizes = [4, 64], strides = [1, 1]} : vector<4x256xf32> to vector<4x64xf32>
    %101 = math.tanh %100 : vector<4x64xf32>
    %102 = arith.mulf %98, %80 : vector<4x64xf32>
    %103 = arith.mulf %97, %101 : vector<4x64xf32>
    %104 = arith.addf %102, %103 : vector<4x64xf32>
    %105 = math.tanh %104 : vector<4x64xf32>
    %106 = arith.mulf %99, %105 : vector<4x64xf32>
    %c0_43 = arith.constant 0 : index
    %c3_44 = arith.constant 3 : index
    %c0_45 = arith.constant 0 : index
    %107 = vector.load %arg20[%c0_43, %c3_44, %c0_45] : memref<4x16x64xf32, #tpu.memory_space<vmem>>, vector<4x1x64xf32>
    %108 = vector.shape_cast %107 : vector<4x1x64xf32> to vector<4x64xf32>
    %109 = vector.shape_cast %106 : vector<4x64xf32> to vector<4x1x64xf32>
    tpu.vector_store %arg20[%c0_43, %c3_44, %c0_45], %109 {strides = array<i32>} : memref<4x16x64xf32, #tpu.memory_space<vmem>>, vector<4x1x64xf32>,
    %c0_46 = arith.constant 0 : index
    %c4 = arith.constant 4 : index
    %c0_47 = arith.constant 0 : index
    %110 = vector.load %arg19[%c0_46, %c4, %c0_47] : memref<4x16x256xf32, #tpu.memory_space<vmem>>, vector<4x1x256xf32>
    %111 = vector.shape_cast %110 : vector<4x1x256xf32> to vector<4x256xf32>
    %112 = arith.truncf %106 : vector<4x64xf32> to vector<4x64xbf16>
    %c0_48 = arith.constant 0 : index
    %c0_49 = arith.constant 0 : index
    %113 = vector.load %arg2[%c0_48, %c0_49] : memref<64x256xbf16, #tpu.memory_space<vmem>>, vector<64x256xbf16>
    %cst_50 = arith.constant dense<0.000000e+00> : vector<4x256xf32>
    %114 = tpu.matmul %112, %113, %cst_50 {dimension_numbers = #tpu.dot_dimension_numbers<[1], [0], [0], [1], [0, 0, 1, 1], [], []>} : vector<4x64xbf16>, vector<64x256xbf16>, vector<4x256xf32> -> vector<4x256xf32>
    %115 = arith.addf %111, %114 : vector<4x256xf32>
    %116 = arith.negf %115 : vector<4x256xf32>
    %117 = math.exp %116 : vector<4x256xf32>
    %cst_51 = arith.constant 1.000000e+00 : f32
    %118 = vector.broadcast %cst_51 : f32 to vector<4x256xf32>
    %119 = arith.addf %118, %117 : vector<4x256xf32>
    %120 = arith.divf %118, %119 : vector<4x256xf32>
    %121 = vector.extract_strided_slice %120 {offsets = [0, 0], sizes = [4, 64], strides = [1, 1]} : vector<4x256xf32> to vector<4x64xf32>
    %122 = vector.extract_strided_slice %120 {offsets = [0, 64], sizes = [4, 64], strides = [1, 1]} : vector<4x256xf32> to vector<4x64xf32>
    %123 = vector.extract_strided_slice %120 {offsets = [0, 192], sizes = [4, 64], strides = [1, 1]} : vector<4x256xf32> to vector<4x64xf32>
    %124 = vector.extract_strided_slice %115 {offsets = [0, 128], sizes = [4, 64], strides = [1, 1]} : vector<4x256xf32> to vector<4x64xf32>
    %125 = math.tanh %124 : vector<4x64xf32>
    %126 = arith.mulf %122, %104 : vector<4x64xf32>
    %127 = arith.mulf %121, %125 : vector<4x64xf32>
    %128 = arith.addf %126, %127 : vector<4x64xf32>
    %129 = math.tanh %128 : vector<4x64xf32>
    %130 = arith.mulf %123, %129 : vector<4x64xf32>
    %c0_52 = arith.constant 0 : index
    %c4_53 = arith.constant 4 : index
    %c0_54 = arith.constant 0 : index
    %131 = vector.load %arg20[%c0_52, %c4_53, %c0_54] : memref<4x16x64xf32, #tpu.memory_space<vmem>>, vector<4x1x64xf32>
    %132 = vector.shape_cast %131 : vector<4x1x64xf32> to vector<4x64xf32>
    %133 = vector.shape_cast %130 : vector<4x64xf32> to vector<4x1x64xf32>
    tpu.vector_store %arg20[%c0_52, %c4_53, %c0_54], %133 {strides = array<i32>} : memref<4x16x64xf32, #tpu.memory_space<vmem>>, vector<4x1x64xf32>,
    %c0_55 = arith.constant 0 : index
    %c5 = arith.constant 5 : index
    %c0_56 = arith.constant 0 : index
    %134 = vector.load %arg19[%c0_55, %c5, %c0_56] : memref<4x16x256xf32, #tpu.memory_space<vmem>>, vector<4x1x256xf32>
    %135 = vector.shape_cast %134 : vector<4x1x256xf32> to vector<4x256xf32>
    %136 = arith.truncf %130 : vector<4x64xf32> to vector<4x64xbf16>
    %c0_57 = arith.constant 0 : index
    %c0_58 = arith.constant 0 : index
    %137 = vector.load %arg2[%c0_57, %c0_58] : memref<64x256xbf16, #tpu.memory_space<vmem>>, vector<64x256xbf16>
    %cst_59 = arith.constant dense<0.000000e+00> : vector<4x256xf32>
    %138 = tpu.matmul %136, %137, %cst_59 {dimension_numbers = #tpu.dot_dimension_numbers<[1], [0], [0], [1], [0, 0, 1, 1], [], []>} : vector<4x64xbf16>, vector<64x256xbf16>, vector<4x256xf32> -> vector<4x256xf32>
    %139 = arith.addf %135, %138 : vector<4x256xf32>
    %140 = arith.negf %139 : vector<4x256xf32>
    %141 = math.exp %140 : vector<4x256xf32>
    %cst_60 = arith.constant 1.000000e+00 : f32
    %142 = vector.broadcast %cst_60 : f32 to vector<4x256xf32>
    %143 = arith.addf %142, %141 : vector<4x256xf32>
    %144 = arith.divf %142, %143 : vector<4x256xf32>
    %145 = vector.extract_strided_slice %144 {offsets = [0, 0], sizes = [4, 64], strides = [1, 1]} : vector<4x256xf32> to vector<4x64xf32>
    %146 = vector.extract_strided_slice %144 {offsets = [0, 64], sizes = [4, 64], strides = [1, 1]} : vector<4x256xf32> to vector<4x64xf32>
    %147 = vector.extract_strided_slice %144 {offsets = [0, 192], sizes = [4, 64], strides = [1, 1]} : vector<4x256xf32> to vector<4x64xf32>
    %148 = vector.extract_strided_slice %139 {offsets = [0, 128], sizes = [4, 64], strides = [1, 1]} : vector<4x256xf32> to vector<4x64xf32>
    %149 = math.tanh %148 : vector<4x64xf32>
    %150 = arith.mulf %146, %128 : vector<4x64xf32>
    %151 = arith.mulf %145, %149 : vector<4x64xf32>
    %152 = arith.addf %150, %151 : vector<4x64xf32>
    %153 = math.tanh %152 : vector<4x64xf32>
    %154 = arith.mulf %147, %153 : vector<4x64xf32>
    %c0_61 = arith.constant 0 : index
    %c5_62 = arith.constant 5 : index
    %c0_63 = arith.constant 0 : index
    %155 = vector.load %arg20[%c0_61, %c5_62, %c0_63] : memref<4x16x64xf32, #tpu.memory_space<vmem>>, vector<4x1x64xf32>
    %156 = vector.shape_cast %155 : vector<4x1x64xf32> to vector<4x64xf32>
    %157 = vector.shape_cast %154 : vector<4x64xf32> to vector<4x1x64xf32>
    tpu.vector_store %arg20[%c0_61, %c5_62, %c0_63], %157 {strides = array<i32>} : memref<4x16x64xf32, #tpu.memory_space<vmem>>, vector<4x1x64xf32>,
    %c0_64 = arith.constant 0 : index
    %c6 = arith.constant 6 : index
    %c0_65 = arith.constant 0 : index
    %158 = vector.load %arg19[%c0_64, %c6, %c0_65] : memref<4x16x256xf32, #tpu.memory_space<vmem>>, vector<4x1x256xf32>
    %159 = vector.shape_cast %158 : vector<4x1x256xf32> to vector<4x256xf32>
    %160 = arith.truncf %154 : vector<4x64xf32> to vector<4x64xbf16>
    %c0_66 = arith.constant 0 : index
    %c0_67 = arith.constant 0 : index
    %161 = vector.load %arg2[%c0_66, %c0_67] : memref<64x256xbf16, #tpu.memory_space<vmem>>, vector<64x256xbf16>
    %cst_68 = arith.constant dense<0.000000e+00> : vector<4x256xf32>
    %162 = tpu.matmul %160, %161, %cst_68 {dimension_numbers = #tpu.dot_dimension_numbers<[1], [0], [0], [1], [0, 0, 1, 1], [], []>} : vector<4x64xbf16>, vector<64x256xbf16>, vector<4x256xf32> -> vector<4x256xf32>
    %163 = arith.addf %159, %162 : vector<4x256xf32>
    %164 = arith.negf %163 : vector<4x256xf32>
    %165 = math.exp %164 : vector<4x256xf32>
    %cst_69 = arith.constant 1.000000e+00 : f32
    %166 = vector.broadcast %cst_69 : f32 to vector<4x256xf32>
    %167 = arith.addf %166, %165 : vector<4x256xf32>
    %168 = arith.divf %166, %167 : vector<4x256xf32>
    %169 = vector.extract_strided_slice %168 {offsets = [0, 0], sizes = [4, 64], strides = [1, 1]} : vector<4x256xf32> to vector<4x64xf32>
    %170 = vector.extract_strided_slice %168 {offsets = [0, 64], sizes = [4, 64], strides = [1, 1]} : vector<4x256xf32> to vector<4x64xf32>
    %171 = vector.extract_strided_slice %168 {offsets = [0, 192], sizes = [4, 64], strides = [1, 1]} : vector<4x256xf32> to vector<4x64xf32>
    %172 = vector.extract_strided_slice %163 {offsets = [0, 128], sizes = [4, 64], strides = [1, 1]} : vector<4x256xf32> to vector<4x64xf32>
    %173 = math.tanh %172 : vector<4x64xf32>
    %174 = arith.mulf %170, %152 : vector<4x64xf32>
    %175 = arith.mulf %169, %173 : vector<4x64xf32>
    %176 = arith.addf %174, %175 : vector<4x64xf32>
    %177 = math.tanh %176 : vector<4x64xf32>
    %178 = arith.mulf %171, %177 : vector<4x64xf32>
    %c0_70 = arith.constant 0 : index
    %c6_71 = arith.constant 6 : index
    %c0_72 = arith.constant 0 : index
    %179 = vector.load %arg20[%c0_70, %c6_71, %c0_72] : memref<4x16x64xf32, #tpu.memory_space<vmem>>, vector<4x1x64xf32>
    %180 = vector.shape_cast %179 : vector<4x1x64xf32> to vector<4x64xf32>
    %181 = vector.shape_cast %178 : vector<4x64xf32> to vector<4x1x64xf32>
    tpu.vector_store %arg20[%c0_70, %c6_71, %c0_72], %181 {strides = array<i32>} : memref<4x16x64xf32, #tpu.memory_space<vmem>>, vector<4x1x64xf32>,
    %c0_73 = arith.constant 0 : index
    %c7 = arith.constant 7 : index
    %c0_74 = arith.constant 0 : index
    %182 = vector.load %arg19[%c0_73, %c7, %c0_74] : memref<4x16x256xf32, #tpu.memory_space<vmem>>, vector<4x1x256xf32>
    %183 = vector.shape_cast %182 : vector<4x1x256xf32> to vector<4x256xf32>
    %184 = arith.truncf %178 : vector<4x64xf32> to vector<4x64xbf16>
    %c0_75 = arith.constant 0 : index
    %c0_76 = arith.constant 0 : index
    %185 = vector.load %arg2[%c0_75, %c0_76] : memref<64x256xbf16, #tpu.memory_space<vmem>>, vector<64x256xbf16>
    %cst_77 = arith.constant dense<0.000000e+00> : vector<4x256xf32>
    %186 = tpu.matmul %184, %185, %cst_77 {dimension_numbers = #tpu.dot_dimension_numbers<[1], [0], [0], [1], [0, 0, 1, 1], [], []>} : vector<4x64xbf16>, vector<64x256xbf16>, vector<4x256xf32> -> vector<4x256xf32>
    %187 = arith.addf %183, %186 : vector<4x256xf32>
    %188 = arith.negf %187 : vector<4x256xf32>
    %189 = math.exp %188 : vector<4x256xf32>
    %cst_78 = arith.constant 1.000000e+00 : f32
    %190 = vector.broadcast %cst_78 : f32 to vector<4x256xf32>
    %191 = arith.addf %190, %189 : vector<4x256xf32>
    %192 = arith.divf %190, %191 : vector<4x256xf32>
    %193 = vector.extract_strided_slice %192 {offsets = [0, 0], sizes = [4, 64], strides = [1, 1]} : vector<4x256xf32> to vector<4x64xf32>
    %194 = vector.extract_strided_slice %192 {offsets = [0, 64], sizes = [4, 64], strides = [1, 1]} : vector<4x256xf32> to vector<4x64xf32>
    %195 = vector.extract_strided_slice %192 {offsets = [0, 192], sizes = [4, 64], strides = [1, 1]} : vector<4x256xf32> to vector<4x64xf32>
    %196 = vector.extract_strided_slice %187 {offsets = [0, 128], sizes = [4, 64], strides = [1, 1]} : vector<4x256xf32> to vector<4x64xf32>
    %197 = math.tanh %196 : vector<4x64xf32>
    %198 = arith.mulf %194, %176 : vector<4x64xf32>
    %199 = arith.mulf %193, %197 : vector<4x64xf32>
    %200 = arith.addf %198, %199 : vector<4x64xf32>
    %201 = math.tanh %200 : vector<4x64xf32>
    %202 = arith.mulf %195, %201 : vector<4x64xf32>
    %c0_79 = arith.constant 0 : index
    %c7_80 = arith.constant 7 : index
    %c0_81 = arith.constant 0 : index
    %203 = vector.load %arg20[%c0_79, %c7_80, %c0_81] : memref<4x16x64xf32, #tpu.memory_space<vmem>>, vector<4x1x64xf32>
    %204 = vector.shape_cast %203 : vector<4x1x64xf32> to vector<4x64xf32>
    %205 = vector.shape_cast %202 : vector<4x64xf32> to vector<4x1x64xf32>
    tpu.vector_store %arg20[%c0_79, %c7_80, %c0_81], %205 {strides = array<i32>} : memref<4x16x64xf32, #tpu.memory_space<vmem>>, vector<4x1x64xf32>,
    %c0_82 = arith.constant 0 : index
    %c8 = arith.constant 8 : index
    %c0_83 = arith.constant 0 : index
    %206 = vector.load %arg19[%c0_82, %c8, %c0_83] : memref<4x16x256xf32, #tpu.memory_space<vmem>>, vector<4x1x256xf32>
    %207 = vector.shape_cast %206 : vector<4x1x256xf32> to vector<4x256xf32>
    %208 = arith.truncf %202 : vector<4x64xf32> to vector<4x64xbf16>
    %c0_84 = arith.constant 0 : index
    %c0_85 = arith.constant 0 : index
    %209 = vector.load %arg2[%c0_84, %c0_85] : memref<64x256xbf16, #tpu.memory_space<vmem>>, vector<64x256xbf16>
    %cst_86 = arith.constant dense<0.000000e+00> : vector<4x256xf32>
    %210 = tpu.matmul %208, %209, %cst_86 {dimension_numbers = #tpu.dot_dimension_numbers<[1], [0], [0], [1], [0, 0, 1, 1], [], []>} : vector<4x64xbf16>, vector<64x256xbf16>, vector<4x256xf32> -> vector<4x256xf32>
    %211 = arith.addf %207, %210 : vector<4x256xf32>
    %212 = arith.negf %211 : vector<4x256xf32>
    %213 = math.exp %212 : vector<4x256xf32>
    %cst_87 = arith.constant 1.000000e+00 : f32
    %214 = vector.broadcast %cst_87 : f32 to vector<4x256xf32>
    %215 = arith.addf %214, %213 : vector<4x256xf32>
    %216 = arith.divf %214, %215 : vector<4x256xf32>
    %217 = vector.extract_strided_slice %216 {offsets = [0, 0], sizes = [4, 64], strides = [1, 1]} : vector<4x256xf32> to vector<4x64xf32>
    %218 = vector.extract_strided_slice %216 {offsets = [0, 64], sizes = [4, 64], strides = [1, 1]} : vector<4x256xf32> to vector<4x64xf32>
    %219 = vector.extract_strided_slice %216 {offsets = [0, 192], sizes = [4, 64], strides = [1, 1]} : vector<4x256xf32> to vector<4x64xf32>
    %220 = vector.extract_strided_slice %211 {offsets = [0, 128], sizes = [4, 64], strides = [1, 1]} : vector<4x256xf32> to vector<4x64xf32>
    %221 = math.tanh %220 : vector<4x64xf32>
    %222 = arith.mulf %218, %200 : vector<4x64xf32>
    %223 = arith.mulf %217, %221 : vector<4x64xf32>
    %224 = arith.addf %222, %223 : vector<4x64xf32>
    %225 = math.tanh %224 : vector<4x64xf32>
    %226 = arith.mulf %219, %225 : vector<4x64xf32>
    %c0_88 = arith.constant 0 : index
    %c8_89 = arith.constant 8 : index
    %c0_90 = arith.constant 0 : index
    %227 = vector.load %arg20[%c0_88, %c8_89, %c0_90] : memref<4x16x64xf32, #tpu.memory_space<vmem>>, vector<4x1x64xf32>
    %228 = vector.shape_cast %227 : vector<4x1x64xf32> to vector<4x64xf32>
    %229 = vector.shape_cast %226 : vector<4x64xf32> to vector<4x1x64xf32>
    tpu.vector_store %arg20[%c0_88, %c8_89, %c0_90], %229 {strides = array<i32>} : memref<4x16x64xf32, #tpu.memory_space<vmem>>, vector<4x1x64xf32>,
    %c0_91 = arith.constant 0 : index
    %c9 = arith.constant 9 : index
    %c0_92 = arith.constant 0 : index
    %230 = vector.load %arg19[%c0_91, %c9, %c0_92] : memref<4x16x256xf32, #tpu.memory_space<vmem>>, vector<4x1x256xf32>
    %231 = vector.shape_cast %230 : vector<4x1x256xf32> to vector<4x256xf32>
    %232 = arith.truncf %226 : vector<4x64xf32> to vector<4x64xbf16>
    %c0_93 = arith.constant 0 : index
    %c0_94 = arith.constant 0 : index
    %233 = vector.load %arg2[%c0_93, %c0_94] : memref<64x256xbf16, #tpu.memory_space<vmem>>, vector<64x256xbf16>
    %cst_95 = arith.constant dense<0.000000e+00> : vector<4x256xf32>
    %234 = tpu.matmul %232, %233, %cst_95 {dimension_numbers = #tpu.dot_dimension_numbers<[1], [0], [0], [1], [0, 0, 1, 1], [], []>} : vector<4x64xbf16>, vector<64x256xbf16>, vector<4x256xf32> -> vector<4x256xf32>
    %235 = arith.addf %231, %234 : vector<4x256xf32>
    %236 = arith.negf %235 : vector<4x256xf32>
    %237 = math.exp %236 : vector<4x256xf32>
    %cst_96 = arith.constant 1.000000e+00 : f32
    %238 = vector.broadcast %cst_96 : f32 to vector<4x256xf32>
    %239 = arith.addf %238, %237 : vector<4x256xf32>
    %240 = arith.divf %238, %239 : vector<4x256xf32>
    %241 = vector.extract_strided_slice %240 {offsets = [0, 0], sizes = [4, 64], strides = [1, 1]} : vector<4x256xf32> to vector<4x64xf32>
    %242 = vector.extract_strided_slice %240 {offsets = [0, 64], sizes = [4, 64], strides = [1, 1]} : vector<4x256xf32> to vector<4x64xf32>
    %243 = vector.extract_strided_slice %240 {offsets = [0, 192], sizes = [4, 64], strides = [1, 1]} : vector<4x256xf32> to vector<4x64xf32>
    %244 = vector.extract_strided_slice %235 {offsets = [0, 128], sizes = [4, 64], strides = [1, 1]} : vector<4x256xf32> to vector<4x64xf32>
    %245 = math.tanh %244 : vector<4x64xf32>
    %246 = arith.mulf %242, %224 : vector<4x64xf32>
    %247 = arith.mulf %241, %245 : vector<4x64xf32>
    %248 = arith.addf %246, %247 : vector<4x64xf32>
    %249 = math.tanh %248 : vector<4x64xf32>
    %250 = arith.mulf %243, %249 : vector<4x64xf32>
    %c0_97 = arith.constant 0 : index
    %c9_98 = arith.constant 9 : index
    %c0_99 = arith.constant 0 : index
    %251 = vector.load %arg20[%c0_97, %c9_98, %c0_99] : memref<4x16x64xf32, #tpu.memory_space<vmem>>, vector<4x1x64xf32>
    %252 = vector.shape_cast %251 : vector<4x1x64xf32> to vector<4x64xf32>
    %253 = vector.shape_cast %250 : vector<4x64xf32> to vector<4x1x64xf32>
    tpu.vector_store %arg20[%c0_97, %c9_98, %c0_99], %253 {strides = array<i32>} : memref<4x16x64xf32, #tpu.memory_space<vmem>>, vector<4x1x64xf32>,
    %c0_100 = arith.constant 0 : index
    %c10 = arith.constant 10 : index
    %c0_101 = arith.constant 0 : index
    %254 = vector.load %arg19[%c0_100, %c10, %c0_101] : memref<4x16x256xf32, #tpu.memory_space<vmem>>, vector<4x1x256xf32>
    %255 = vector.shape_cast %254 : vector<4x1x256xf32> to vector<4x256xf32>
    %256 = arith.truncf %250 : vector<4x64xf32> to vector<4x64xbf16>
    %c0_102 = arith.constant 0 : index
    %c0_103 = arith.constant 0 : index
    %257 = vector.load %arg2[%c0_102, %c0_103] : memref<64x256xbf16, #tpu.memory_space<vmem>>, vector<64x256xbf16>
    %cst_104 = arith.constant dense<0.000000e+00> : vector<4x256xf32>
    %258 = tpu.matmul %256, %257, %cst_104 {dimension_numbers = #tpu.dot_dimension_numbers<[1], [0], [0], [1], [0, 0, 1, 1], [], []>} : vector<4x64xbf16>, vector<64x256xbf16>, vector<4x256xf32> -> vector<4x256xf32>
    %259 = arith.addf %255, %258 : vector<4x256xf32>
    %260 = arith.negf %259 : vector<4x256xf32>
    %261 = math.exp %260 : vector<4x256xf32>
    %cst_105 = arith.constant 1.000000e+00 : f32
    %262 = vector.broadcast %cst_105 : f32 to vector<4x256xf32>
    %263 = arith.addf %262, %261 : vector<4x256xf32>
    %264 = arith.divf %262, %263 : vector<4x256xf32>
    %265 = vector.extract_strided_slice %264 {offsets = [0, 0], sizes = [4, 64], strides = [1, 1]} : vector<4x256xf32> to vector<4x64xf32>
    %266 = vector.extract_strided_slice %264 {offsets = [0, 64], sizes = [4, 64], strides = [1, 1]} : vector<4x256xf32> to vector<4x64xf32>
    %267 = vector.extract_strided_slice %264 {offsets = [0, 192], sizes = [4, 64], strides = [1, 1]} : vector<4x256xf32> to vector<4x64xf32>
    %268 = vector.extract_strided_slice %259 {offsets = [0, 128], sizes = [4, 64], strides = [1, 1]} : vector<4x256xf32> to vector<4x64xf32>
    %269 = math.tanh %268 : vector<4x64xf32>
    %270 = arith.mulf %266, %248 : vector<4x64xf32>
    %271 = arith.mulf %265, %269 : vector<4x64xf32>
    %272 = arith.addf %270, %271 : vector<4x64xf32>
    %273 = math.tanh %272 : vector<4x64xf32>
    %274 = arith.mulf %267, %273 : vector<4x64xf32>
    %c0_106 = arith.constant 0 : index
    %c10_107 = arith.constant 10 : index
    %c0_108 = arith.constant 0 : index
    %275 = vector.load %arg20[%c0_106, %c10_107, %c0_108] : memref<4x16x64xf32, #tpu.memory_space<vmem>>, vector<4x1x64xf32>
    %276 = vector.shape_cast %275 : vector<4x1x64xf32> to vector<4x64xf32>
    %277 = vector.shape_cast %274 : vector<4x64xf32> to vector<4x1x64xf32>
    tpu.vector_store %arg20[%c0_106, %c10_107, %c0_108], %277 {strides = array<i32>} : memref<4x16x64xf32, #tpu.memory_space<vmem>>, vector<4x1x64xf32>,
    %c0_109 = arith.constant 0 : index
    %c11 = arith.constant 11 : index
    %c0_110 = arith.constant 0 : index
    %278 = vector.load %arg19[%c0_109, %c11, %c0_110] : memref<4x16x256xf32, #tpu.memory_space<vmem>>, vector<4x1x256xf32>
    %279 = vector.shape_cast %278 : vector<4x1x256xf32> to vector<4x256xf32>
    %280 = arith.truncf %274 : vector<4x64xf32> to vector<4x64xbf16>
    %c0_111 = arith.constant 0 : index
    %c0_112 = arith.constant 0 : index
    %281 = vector.load %arg2[%c0_111, %c0_112] : memref<64x256xbf16, #tpu.memory_space<vmem>>, vector<64x256xbf16>
    %cst_113 = arith.constant dense<0.000000e+00> : vector<4x256xf32>
    %282 = tpu.matmul %280, %281, %cst_113 {dimension_numbers = #tpu.dot_dimension_numbers<[1], [0], [0], [1], [0, 0, 1, 1], [], []>} : vector<4x64xbf16>, vector<64x256xbf16>, vector<4x256xf32> -> vector<4x256xf32>
    %283 = arith.addf %279, %282 : vector<4x256xf32>
    %284 = arith.negf %283 : vector<4x256xf32>
    %285 = math.exp %284 : vector<4x256xf32>
    %cst_114 = arith.constant 1.000000e+00 : f32
    %286 = vector.broadcast %cst_114 : f32 to vector<4x256xf32>
    %287 = arith.addf %286, %285 : vector<4x256xf32>
    %288 = arith.divf %286, %287 : vector<4x256xf32>
    %289 = vector.extract_strided_slice %288 {offsets = [0, 0], sizes = [4, 64], strides = [1, 1]} : vector<4x256xf32> to vector<4x64xf32>
    %290 = vector.extract_strided_slice %288 {offsets = [0, 64], sizes = [4, 64], strides = [1, 1]} : vector<4x256xf32> to vector<4x64xf32>
    %291 = vector.extract_strided_slice %288 {offsets = [0, 192], sizes = [4, 64], strides = [1, 1]} : vector<4x256xf32> to vector<4x64xf32>
    %292 = vector.extract_strided_slice %283 {offsets = [0, 128], sizes = [4, 64], strides = [1, 1]} : vector<4x256xf32> to vector<4x64xf32>
    %293 = math.tanh %292 : vector<4x64xf32>
    %294 = arith.mulf %290, %272 : vector<4x64xf32>
    %295 = arith.mulf %289, %293 : vector<4x64xf32>
    %296 = arith.addf %294, %295 : vector<4x64xf32>
    %297 = math.tanh %296 : vector<4x64xf32>
    %298 = arith.mulf %291, %297 : vector<4x64xf32>
    %c0_115 = arith.constant 0 : index
    %c11_116 = arith.constant 11 : index
    %c0_117 = arith.constant 0 : index
    %299 = vector.load %arg20[%c0_115, %c11_116, %c0_117] : memref<4x16x64xf32, #tpu.memory_space<vmem>>, vector<4x1x64xf32>
    %300 = vector.shape_cast %299 : vector<4x1x64xf32> to vector<4x64xf32>
    %301 = vector.shape_cast %298 : vector<4x64xf32> to vector<4x1x64xf32>
    tpu.vector_store %arg20[%c0_115, %c11_116, %c0_117], %301 {strides = array<i32>} : memref<4x16x64xf32, #tpu.memory_space<vmem>>, vector<4x1x64xf32>,
    %c0_118 = arith.constant 0 : index
    %c12 = arith.constant 12 : index
    %c0_119 = arith.constant 0 : index
    %302 = vector.load %arg19[%c0_118, %c12, %c0_119] : memref<4x16x256xf32, #tpu.memory_space<vmem>>, vector<4x1x256xf32>
    %303 = vector.shape_cast %302 : vector<4x1x256xf32> to vector<4x256xf32>
    %304 = arith.truncf %298 : vector<4x64xf32> to vector<4x64xbf16>
    %c0_120 = arith.constant 0 : index
    %c0_121 = arith.constant 0 : index
    %305 = vector.load %arg2[%c0_120, %c0_121] : memref<64x256xbf16, #tpu.memory_space<vmem>>, vector<64x256xbf16>
    %cst_122 = arith.constant dense<0.000000e+00> : vector<4x256xf32>
    %306 = tpu.matmul %304, %305, %cst_122 {dimension_numbers = #tpu.dot_dimension_numbers<[1], [0], [0], [1], [0, 0, 1, 1], [], []>} : vector<4x64xbf16>, vector<64x256xbf16>, vector<4x256xf32> -> vector<4x256xf32>
    %307 = arith.addf %303, %306 : vector<4x256xf32>
    %308 = arith.negf %307 : vector<4x256xf32>
    %309 = math.exp %308 : vector<4x256xf32>
    %cst_123 = arith.constant 1.000000e+00 : f32
    %310 = vector.broadcast %cst_123 : f32 to vector<4x256xf32>
    %311 = arith.addf %310, %309 : vector<4x256xf32>
    %312 = arith.divf %310, %311 : vector<4x256xf32>
    %313 = vector.extract_strided_slice %312 {offsets = [0, 0], sizes = [4, 64], strides = [1, 1]} : vector<4x256xf32> to vector<4x64xf32>
    %314 = vector.extract_strided_slice %312 {offsets = [0, 64], sizes = [4, 64], strides = [1, 1]} : vector<4x256xf32> to vector<4x64xf32>
    %315 = vector.extract_strided_slice %312 {offsets = [0, 192], sizes = [4, 64], strides = [1, 1]} : vector<4x256xf32> to vector<4x64xf32>
    %316 = vector.extract_strided_slice %307 {offsets = [0, 128], sizes = [4, 64], strides = [1, 1]} : vector<4x256xf32> to vector<4x64xf32>
    %317 = math.tanh %316 : vector<4x64xf32>
    %318 = arith.mulf %314, %296 : vector<4x64xf32>
    %319 = arith.mulf %313, %317 : vector<4x64xf32>
    %320 = arith.addf %318, %319 : vector<4x64xf32>
    %321 = math.tanh %320 : vector<4x64xf32>
    %322 = arith.mulf %315, %321 : vector<4x64xf32>
    %c0_124 = arith.constant 0 : index
    %c12_125 = arith.constant 12 : index
    %c0_126 = arith.constant 0 : index
    %323 = vector.load %arg20[%c0_124, %c12_125, %c0_126] : memref<4x16x64xf32, #tpu.memory_space<vmem>>, vector<4x1x64xf32>
    %324 = vector.shape_cast %323 : vector<4x1x64xf32> to vector<4x64xf32>
    %325 = vector.shape_cast %322 : vector<4x64xf32> to vector<4x1x64xf32>
    tpu.vector_store %arg20[%c0_124, %c12_125, %c0_126], %325 {strides = array<i32>} : memref<4x16x64xf32, #tpu.memory_space<vmem>>, vector<4x1x64xf32>,
    %c0_127 = arith.constant 0 : index
    %c13 = arith.constant 13 : index
    %c0_128 = arith.constant 0 : index
    %326 = vector.load %arg19[%c0_127, %c13, %c0_128] : memref<4x16x256xf32, #tpu.memory_space<vmem>>, vector<4x1x256xf32>
    %327 = vector.shape_cast %326 : vector<4x1x256xf32> to vector<4x256xf32>
    %328 = arith.truncf %322 : vector<4x64xf32> to vector<4x64xbf16>
    %c0_129 = arith.constant 0 : index
    %c0_130 = arith.constant 0 : index
    %329 = vector.load %arg2[%c0_129, %c0_130] : memref<64x256xbf16, #tpu.memory_space<vmem>>, vector<64x256xbf16>
    %cst_131 = arith.constant dense<0.000000e+00> : vector<4x256xf32>
    %330 = tpu.matmul %328, %329, %cst_131 {dimension_numbers = #tpu.dot_dimension_numbers<[1], [0], [0], [1], [0, 0, 1, 1], [], []>} : vector<4x64xbf16>, vector<64x256xbf16>, vector<4x256xf32> -> vector<4x256xf32>
    %331 = arith.addf %327, %330 : vector<4x256xf32>
    %332 = arith.negf %331 : vector<4x256xf32>
    %333 = math.exp %332 : vector<4x256xf32>
    %cst_132 = arith.constant 1.000000e+00 : f32
    %334 = vector.broadcast %cst_132 : f32 to vector<4x256xf32>
    %335 = arith.addf %334, %333 : vector<4x256xf32>
    %336 = arith.divf %334, %335 : vector<4x256xf32>
    %337 = vector.extract_strided_slice %336 {offsets = [0, 0], sizes = [4, 64], strides = [1, 1]} : vector<4x256xf32> to vector<4x64xf32>
    %338 = vector.extract_strided_slice %336 {offsets = [0, 64], sizes = [4, 64], strides = [1, 1]} : vector<4x256xf32> to vector<4x64xf32>
    %339 = vector.extract_strided_slice %336 {offsets = [0, 192], sizes = [4, 64], strides = [1, 1]} : vector<4x256xf32> to vector<4x64xf32>
    %340 = vector.extract_strided_slice %331 {offsets = [0, 128], sizes = [4, 64], strides = [1, 1]} : vector<4x256xf32> to vector<4x64xf32>
    %341 = math.tanh %340 : vector<4x64xf32>
    %342 = arith.mulf %338, %320 : vector<4x64xf32>
    %343 = arith.mulf %337, %341 : vector<4x64xf32>
    %344 = arith.addf %342, %343 : vector<4x64xf32>
    %345 = math.tanh %344 : vector<4x64xf32>
    %346 = arith.mulf %339, %345 : vector<4x64xf32>
    %c0_133 = arith.constant 0 : index
    %c13_134 = arith.constant 13 : index
    %c0_135 = arith.constant 0 : index
    %347 = vector.load %arg20[%c0_133, %c13_134, %c0_135] : memref<4x16x64xf32, #tpu.memory_space<vmem>>, vector<4x1x64xf32>
    %348 = vector.shape_cast %347 : vector<4x1x64xf32> to vector<4x64xf32>
    %349 = vector.shape_cast %346 : vector<4x64xf32> to vector<4x1x64xf32>
    tpu.vector_store %arg20[%c0_133, %c13_134, %c0_135], %349 {strides = array<i32>} : memref<4x16x64xf32, #tpu.memory_space<vmem>>, vector<4x1x64xf32>,
    %c0_136 = arith.constant 0 : index
    %c14 = arith.constant 14 : index
    %c0_137 = arith.constant 0 : index
    %350 = vector.load %arg19[%c0_136, %c14, %c0_137] : memref<4x16x256xf32, #tpu.memory_space<vmem>>, vector<4x1x256xf32>
    %351 = vector.shape_cast %350 : vector<4x1x256xf32> to vector<4x256xf32>
    %352 = arith.truncf %346 : vector<4x64xf32> to vector<4x64xbf16>
    %c0_138 = arith.constant 0 : index
    %c0_139 = arith.constant 0 : index
    %353 = vector.load %arg2[%c0_138, %c0_139] : memref<64x256xbf16, #tpu.memory_space<vmem>>, vector<64x256xbf16>
    %cst_140 = arith.constant dense<0.000000e+00> : vector<4x256xf32>
    %354 = tpu.matmul %352, %353, %cst_140 {dimension_numbers = #tpu.dot_dimension_numbers<[1], [0], [0], [1], [0, 0, 1, 1], [], []>} : vector<4x64xbf16>, vector<64x256xbf16>, vector<4x256xf32> -> vector<4x256xf32>
    %355 = arith.addf %351, %354 : vector<4x256xf32>
    %356 = arith.negf %355 : vector<4x256xf32>
    %357 = math.exp %356 : vector<4x256xf32>
    %cst_141 = arith.constant 1.000000e+00 : f32
    %358 = vector.broadcast %cst_141 : f32 to vector<4x256xf32>
    %359 = arith.addf %358, %357 : vector<4x256xf32>
    %360 = arith.divf %358, %359 : vector<4x256xf32>
    %361 = vector.extract_strided_slice %360 {offsets = [0, 0], sizes = [4, 64], strides = [1, 1]} : vector<4x256xf32> to vector<4x64xf32>
    %362 = vector.extract_strided_slice %360 {offsets = [0, 64], sizes = [4, 64], strides = [1, 1]} : vector<4x256xf32> to vector<4x64xf32>
    %363 = vector.extract_strided_slice %360 {offsets = [0, 192], sizes = [4, 64], strides = [1, 1]} : vector<4x256xf32> to vector<4x64xf32>
    %364 = vector.extract_strided_slice %355 {offsets = [0, 128], sizes = [4, 64], strides = [1, 1]} : vector<4x256xf32> to vector<4x64xf32>
    %365 = math.tanh %364 : vector<4x64xf32>
    %366 = arith.mulf %362, %344 : vector<4x64xf32>
    %367 = arith.mulf %361, %365 : vector<4x64xf32>
    %368 = arith.addf %366, %367 : vector<4x64xf32>
    %369 = math.tanh %368 : vector<4x64xf32>
    %370 = arith.mulf %363, %369 : vector<4x64xf32>
    %c0_142 = arith.constant 0 : index
    %c14_143 = arith.constant 14 : index
    %c0_144 = arith.constant 0 : index
    %371 = vector.load %arg20[%c0_142, %c14_143, %c0_144] : memref<4x16x64xf32, #tpu.memory_space<vmem>>, vector<4x1x64xf32>
    %372 = vector.shape_cast %371 : vector<4x1x64xf32> to vector<4x64xf32>
    %373 = vector.shape_cast %370 : vector<4x64xf32> to vector<4x1x64xf32>
    tpu.vector_store %arg20[%c0_142, %c14_143, %c0_144], %373 {strides = array<i32>} : memref<4x16x64xf32, #tpu.memory_space<vmem>>, vector<4x1x64xf32>,
    %c0_145 = arith.constant 0 : index
    %c15 = arith.constant 15 : index
    %c0_146 = arith.constant 0 : index
    %374 = vector.load %arg19[%c0_145, %c15, %c0_146] : memref<4x16x256xf32, #tpu.memory_space<vmem>>, vector<4x1x256xf32>
    %375 = vector.shape_cast %374 : vector<4x1x256xf32> to vector<4x256xf32>
    %376 = arith.truncf %370 : vector<4x64xf32> to vector<4x64xbf16>
    %c0_147 = arith.constant 0 : index
    %c0_148 = arith.constant 0 : index
    %377 = vector.load %arg2[%c0_147, %c0_148] : memref<64x256xbf16, #tpu.memory_space<vmem>>, vector<64x256xbf16>
    %cst_149 = arith.constant dense<0.000000e+00> : vector<4x256xf32>
    %378 = tpu.matmul %376, %377, %cst_149 {dimension_numbers = #tpu.dot_dimension_numbers<[1], [0], [0], [1], [0, 0, 1, 1], [], []>} : vector<4x64xbf16>, vector<64x256xbf16>, vector<4x256xf32> -> vector<4x256xf32>
    %379 = arith.addf %375, %378 : vector<4x256xf32>
    %380 = arith.negf %379 : vector<4x256xf32>
    %381 = math.exp %380 : vector<4x256xf32>
    %cst_150 = arith.constant 1.000000e+00 : f32
    %382 = vector.broadcast %cst_150 : f32 to vector<4x256xf32>
    %383 = arith.addf %382, %381 : vector<4x256xf32>
    %384 = arith.divf %382, %383 : vector<4x256xf32>
    %385 = vector.extract_strided_slice %384 {offsets = [0, 0], sizes = [4, 64], strides = [1, 1]} : vector<4x256xf32> to vector<4x64xf32>
    %386 = vector.extract_strided_slice %384 {offsets = [0, 64], sizes = [4, 64], strides = [1, 1]} : vector<4x256xf32> to vector<4x64xf32>
    %387 = vector.extract_strided_slice %384 {offsets = [0, 192], sizes = [4, 64], strides = [1, 1]} : vector<4x256xf32> to vector<4x64xf32>
    %388 = vector.extract_strided_slice %379 {offsets = [0, 128], sizes = [4, 64], strides = [1, 1]} : vector<4x256xf32> to vector<4x64xf32>
    %389 = math.tanh %388 : vector<4x64xf32>
    %390 = arith.mulf %386, %368 : vector<4x64xf32>
    %391 = arith.mulf %385, %389 : vector<4x64xf32>
    %392 = arith.addf %390, %391 : vector<4x64xf32>
    %393 = math.tanh %392 : vector<4x64xf32>
    %394 = arith.mulf %387, %393 : vector<4x64xf32>
    %c0_151 = arith.constant 0 : index
    %c15_152 = arith.constant 15 : index
    %c0_153 = arith.constant 0 : index
    %395 = vector.load %arg20[%c0_151, %c15_152, %c0_153] : memref<4x16x64xf32, #tpu.memory_space<vmem>>, vector<4x1x64xf32>
    %396 = vector.shape_cast %395 : vector<4x1x64xf32> to vector<4x64xf32>
    %397 = vector.shape_cast %394 : vector<4x64xf32> to vector<4x1x64xf32>
    tpu.vector_store %arg20[%c0_151, %c15_152, %c0_153], %397 {strides = array<i32>} : memref<4x16x64xf32, #tpu.memory_space<vmem>>, vector<4x1x64xf32>,
    %c0_154 = arith.constant 0 : index
    %c0_155 = arith.constant 0 : index
    %398 = vector.load %arg4[%c0_154, %c0_155] : memref<1x64xf32, #tpu.memory_space<vmem>>, vector<1x64xf32>
    %c0_156 = arith.constant 0 : index
    %c0_157 = arith.constant 0 : index
    %399 = vector.load %arg5[%c0_156, %c0_157] : memref<1x64xf32, #tpu.memory_space<vmem>>, vector<1x64xf32>
    %400 = vector.shape_cast %399 : vector<1x64xf32> to vector<1x64xf32>
    %401 = vector.broadcast %400 : vector<1x64xf32> to vector<4x64xf32>
    %c0_158 = arith.constant 0 : index
    %c0_159 = arith.constant 0 : index
    %402 = vector.load %arg8[%c0_158, %c0_159] : memref<1x16xf32, #tpu.memory_space<vmem>>, vector<1x16xf32>
    %403 = vector.shape_cast %402 : vector<1x16xf32> to vector<1x16xf32>
    %404 = vector.broadcast %403 : vector<1x16xf32> to vector<4x16xf32>
    %c0_160 = arith.constant 0 : index
    %c0_161 = arith.constant 0 : index
    %405 = vector.load %arg11[%c0_160, %c0_161] : memref<1x64xf32, #tpu.memory_space<vmem>>, vector<1x64xf32>
    %406 = vector.shape_cast %405 : vector<1x64xf32> to vector<1x64xf32>
    %407 = vector.broadcast %406 : vector<1x64xf32> to vector<4x64xf32>
    %c0_162 = arith.constant 0 : index
    %c0_163 = arith.constant 0 : index
    %408 = vector.load %arg14[%c0_162, %c0_163] : memref<1x256xf32, #tpu.memory_space<vmem>>, vector<1x256xf32>
    %409 = vector.shape_cast %408 : vector<1x256xf32> to vector<1x256xf32>
    %410 = vector.broadcast %409 : vector<1x256xf32> to vector<4x256xf32>
    %c0_164 = arith.constant 0 : index
    %c0_165 = arith.constant 0 : index
    %411 = vector.load %arg15[%c0_164, %c0_165] : memref<1x64xf32, #tpu.memory_space<vmem>>, vector<1x64xf32>
    %c0_166 = arith.constant 0 : index
    %c0_167 = arith.constant 0 : index
    %412 = vector.load %arg16[%c0_166, %c0_167] : memref<1x1xf32, #tpu.memory_space<vmem>>, vector<1x1xf32>
    %413 = vector.extract_strided_slice %0 {offsets = [0, 15], sizes = [4, 1], strides = [1, 1]} : vector<4x16xf32> to vector<4x1xf32>
    %414 = arith.truncf %394 : vector<4x64xf32> to vector<4x64xbf16>
    %415 = vector.broadcast %413 : vector<4x1xf32> to vector<4x64xf32>
    %416 = vector.broadcast %398 : vector<1x64xf32> to vector<4x64xf32>
    %417 = arith.mulf %415, %416 : vector<4x64xf32>
    %418 = arith.addf %417, %401 : vector<4x64xf32>
    %419 = arith.truncf %418 : vector<4x64xf32> to vector<4x64xbf16>
    %c0_168 = arith.constant 0 : index
    %c0_169 = arith.constant 0 : index
    %420 = vector.load %arg6[%c0_168, %c0_169] : memref<64x16xbf16, #tpu.memory_space<vmem>>, vector<64x16xbf16>
    %cst_170 = arith.constant dense<0.000000e+00> : vector<4x16xf32>
    %421 = tpu.matmul %419, %420, %cst_170 {dimension_numbers = #tpu.dot_dimension_numbers<[1], [0], [0], [1], [0, 0, 1, 1], [], []>} : vector<4x64xbf16>, vector<64x16xbf16>, vector<4x16xf32> -> vector<4x16xf32>
    %c0_171 = arith.constant 0 : index
    %c0_172 = arith.constant 0 : index
    %422 = vector.load %arg7[%c0_171, %c0_172] : memref<64x16xbf16, #tpu.memory_space<vmem>>, vector<64x16xbf16>
    %cst_173 = arith.constant dense<0.000000e+00> : vector<4x16xf32>
    %423 = tpu.matmul %414, %422, %cst_173 {dimension_numbers = #tpu.dot_dimension_numbers<[1], [0], [0], [1], [0, 0, 1, 1], [], []>} : vector<4x64xbf16>, vector<64x16xbf16>, vector<4x16xf32> -> vector<4x16xf32>
    %424 = arith.addf %421, %423 : vector<4x16xf32>
    %425 = arith.addf %424, %404 : vector<4x16xf32>
    %cst_174 = arith.constant dense<0xFF800000> : vector<4xf32>
    %426 = vector.multi_reduction <maximumf>, %425, %cst_174 [1] : vector<4x16xf32> to vector<4xf32>
    %427 = vector.shape_cast %426 : vector<4xf32> to vector<4x1xf32>
    %428 = vector.broadcast %427 : vector<4x1xf32> to vector<4x16xf32>
    %429 = arith.subf %425, %428 : vector<4x16xf32>
    %430 = math.exp %429 : vector<4x16xf32>
    %cst_175 = arith.constant dense<0.000000e+00> : vector<4xf32>
    %431 = vector.multi_reduction <add>, %430, %cst_175 [1] : vector<4x16xf32> to vector<4xf32>
    %432 = vector.shape_cast %431 : vector<4xf32> to vector<4x1xf32>
    %433 = tpu.reciprocal %432 : vector<4x1xf32> -> vector<4x1xf32>
    %434 = vector.broadcast %433 : vector<4x1xf32> to vector<4x16xf32>
    %435 = arith.mulf %430, %434 : vector<4x16xf32>
    %436 = vector.shape_cast %435 : vector<4x16xf32> to vector<4x16x1xf32>
    %c0_176 = arith.constant 0 : index
    %c0_177 = arith.constant 0 : index
    %c0_178 = arith.constant 0 : index
    %437 = vector.load %arg20[%c0_176, %c0_177, %c0_178] : memref<4x16x64xf32, #tpu.memory_space<vmem>>, vector<4x16x64xf32>
    %438 = vector.broadcast %436 : vector<4x16x1xf32> to vector<4x16x64xf32>
    %439 = arith.mulf %438, %437 : vector<4x16x64xf32>
    %cst_179 = arith.constant dense<0.000000e+00> : vector<4x64xf32>
    %440 = vector.multi_reduction <add>, %439, %cst_179 [1] : vector<4x16x64xf32> to vector<4x64xf32>
    %c0_180 = arith.constant 0 : index
    %c0_181 = arith.constant 0 : index
    %441 = vector.load %arg9[%c0_180, %c0_181] : memref<64x64xbf16, #tpu.memory_space<vmem>>, vector<64x64xbf16>
    %cst_182 = arith.constant dense<0.000000e+00> : vector<4x64xf32>
    %442 = tpu.matmul %419, %441, %cst_182 {dimension_numbers = #tpu.dot_dimension_numbers<[1], [0], [0], [1], [0, 0, 1, 1], [], []>} : vector<4x64xbf16>, vector<64x64xbf16>, vector<4x64xf32> -> vector<4x64xf32>
    %443 = arith.truncf %440 : vector<4x64xf32> to vector<4x64xbf16>
    %c0_183 = arith.constant 0 : index
    %c0_184 = arith.constant 0 : index
    %444 = vector.load %arg10[%c0_183, %c0_184] : memref<64x64xbf16, #tpu.memory_space<vmem>>, vector<64x64xbf16>
    %cst_185 = arith.constant dense<0.000000e+00> : vector<4x64xf32>
    %445 = tpu.matmul %443, %444, %cst_185 {dimension_numbers = #tpu.dot_dimension_numbers<[1], [0], [0], [1], [0, 0, 1, 1], [], []>} : vector<4x64xbf16>, vector<64x64xbf16>, vector<4x64xf32> -> vector<4x64xf32>
    %446 = arith.addf %442, %445 : vector<4x64xf32>
    %447 = arith.addf %446, %407 : vector<4x64xf32>
    %cst_186 = arith.constant 0.000000e+00 : f32
    %448 = vector.broadcast %cst_186 : f32 to vector<4x64xf32>
    %449 = arith.maximumf %447, %448 : vector<4x64xf32>
    %450 = arith.truncf %449 : vector<4x64xf32> to vector<4x64xbf16>
    %c0_187 = arith.constant 0 : index
    %c0_188 = arith.constant 0 : index
    %451 = vector.load %arg12[%c0_187, %c0_188] : memref<64x256xbf16, #tpu.memory_space<vmem>>, vector<64x256xbf16>
    %cst_189 = arith.constant dense<0.000000e+00> : vector<4x256xf32>
    %452 = tpu.matmul %450, %451, %cst_189 {dimension_numbers = #tpu.dot_dimension_numbers<[1], [0], [0], [1], [0, 0, 1, 1], [], []>} : vector<4x64xbf16>, vector<64x256xbf16>, vector<4x256xf32> -> vector<4x256xf32>
    %c0_190 = arith.constant 0 : index
    %c0_191 = arith.constant 0 : index
    %453 = vector.load %arg13[%c0_190, %c0_191] : memref<64x256xbf16, #tpu.memory_space<vmem>>, vector<64x256xbf16>
    %cst_192 = arith.constant dense<0.000000e+00> : vector<4x256xf32>
    %454 = tpu.matmul %414, %453, %cst_192 {dimension_numbers = #tpu.dot_dimension_numbers<[1], [0], [0], [1], [0, 0, 1, 1], [], []>} : vector<4x64xbf16>, vector<64x256xbf16>, vector<4x256xf32> -> vector<4x256xf32>
    %455 = arith.addf %452, %454 : vector<4x256xf32>
    %456 = arith.addf %455, %410 : vector<4x256xf32>
    %457 = arith.negf %456 : vector<4x256xf32>
    %458 = math.exp %457 : vector<4x256xf32>
    %cst_193 = arith.constant 1.000000e+00 : f32
    %459 = vector.broadcast %cst_193 : f32 to vector<4x256xf32>
    %460 = arith.addf %459, %458 : vector<4x256xf32>
    %461 = arith.divf %459, %460 : vector<4x256xf32>
    %462 = vector.extract_strided_slice %461 {offsets = [0, 0], sizes = [4, 64], strides = [1, 1]} : vector<4x256xf32> to vector<4x64xf32>
    %463 = vector.extract_strided_slice %461 {offsets = [0, 64], sizes = [4, 64], strides = [1, 1]} : vector<4x256xf32> to vector<4x64xf32>
    %464 = vector.extract_strided_slice %461 {offsets = [0, 192], sizes = [4, 64], strides = [1, 1]} : vector<4x256xf32> to vector<4x64xf32>
    %465 = vector.extract_strided_slice %456 {offsets = [0, 128], sizes = [4, 64], strides = [1, 1]} : vector<4x256xf32> to vector<4x64xf32>
    %466 = math.tanh %465 : vector<4x64xf32>
    %467 = arith.mulf %463, %392 : vector<4x64xf32>
    %468 = arith.mulf %462, %466 : vector<4x64xf32>
    %469 = arith.addf %467, %468 : vector<4x64xf32>
    %470 = math.tanh %469 : vector<4x64xf32>
    %471 = arith.mulf %464, %470 : vector<4x64xf32>
    %472 = vector.broadcast %411 : vector<1x64xf32> to vector<4x64xf32>
    %473 = arith.mulf %471, %472 : vector<4x64xf32>
    %cst_194 = arith.constant dense<0.000000e+00> : vector<4xf32>
    %474 = vector.multi_reduction <add>, %473, %cst_194 [1] : vector<4x64xf32> to vector<4xf32>
    %475 = vector.shape_cast %474 : vector<4xf32> to vector<4x1xf32>
    %476 = vector.broadcast %412 : vector<1x1xf32> to vector<4x1xf32>
    %477 = arith.addf %475, %476 : vector<4x1xf32>
    %cst_195 = arith.constant 0.000000e+00 : f32
    %478 = vector.broadcast %cst_195 : f32 to vector<4x1xf32>
    %479 = arith.maximumf %477, %478 : vector<4x1xf32>
    %480 = arith.truncf %471 : vector<4x64xf32> to vector<4x64xbf16>
    %481 = vector.broadcast %479 : vector<4x1xf32> to vector<4x64xf32>
    %482 = vector.broadcast %398 : vector<1x64xf32> to vector<4x64xf32>
    %483 = arith.mulf %481, %482 : vector<4x64xf32>
    %484 = arith.addf %483, %401 : vector<4x64xf32>
    %485 = arith.truncf %484 : vector<4x64xf32> to vector<4x64xbf16>
    %c0_196 = arith.constant 0 : index
    %c0_197 = arith.constant 0 : index
    %486 = vector.load %arg6[%c0_196, %c0_197] : memref<64x16xbf16, #tpu.memory_space<vmem>>, vector<64x16xbf16>
    %cst_198 = arith.constant dense<0.000000e+00> : vector<4x16xf32>
    %487 = tpu.matmul %485, %486, %cst_198 {dimension_numbers = #tpu.dot_dimension_numbers<[1], [0], [0], [1], [0, 0, 1, 1], [], []>} : vector<4x64xbf16>, vector<64x16xbf16>, vector<4x16xf32> -> vector<4x16xf32>
    %c0_199 = arith.constant 0 : index
    %c0_200 = arith.constant 0 : index
    %488 = vector.load %arg7[%c0_199, %c0_200] : memref<64x16xbf16, #tpu.memory_space<vmem>>, vector<64x16xbf16>
    %cst_201 = arith.constant dense<0.000000e+00> : vector<4x16xf32>
    %489 = tpu.matmul %480, %488, %cst_201 {dimension_numbers = #tpu.dot_dimension_numbers<[1], [0], [0], [1], [0, 0, 1, 1], [], []>} : vector<4x64xbf16>, vector<64x16xbf16>, vector<4x16xf32> -> vector<4x16xf32>
    %490 = arith.addf %487, %489 : vector<4x16xf32>
    %491 = arith.addf %490, %404 : vector<4x16xf32>
    %cst_202 = arith.constant dense<0xFF800000> : vector<4xf32>
    %492 = vector.multi_reduction <maximumf>, %491, %cst_202 [1] : vector<4x16xf32> to vector<4xf32>
    %493 = vector.shape_cast %492 : vector<4xf32> to vector<4x1xf32>
    %494 = vector.broadcast %493 : vector<4x1xf32> to vector<4x16xf32>
    %495 = arith.subf %491, %494 : vector<4x16xf32>
    %496 = math.exp %495 : vector<4x16xf32>
    %cst_203 = arith.constant dense<0.000000e+00> : vector<4xf32>
    %497 = vector.multi_reduction <add>, %496, %cst_203 [1] : vector<4x16xf32> to vector<4xf32>
    %498 = vector.shape_cast %497 : vector<4xf32> to vector<4x1xf32>
    %499 = tpu.reciprocal %498 : vector<4x1xf32> -> vector<4x1xf32>
    %500 = vector.broadcast %499 : vector<4x1xf32> to vector<4x16xf32>
    %501 = arith.mulf %496, %500 : vector<4x16xf32>
    %502 = vector.shape_cast %501 : vector<4x16xf32> to vector<4x16x1xf32>
    %c0_204 = arith.constant 0 : index
    %c0_205 = arith.constant 0 : index
    %c0_206 = arith.constant 0 : index
    %503 = vector.load %arg20[%c0_204, %c0_205, %c0_206] : memref<4x16x64xf32, #tpu.memory_space<vmem>>, vector<4x16x64xf32>
    %504 = vector.broadcast %502 : vector<4x16x1xf32> to vector<4x16x64xf32>
    %505 = arith.mulf %504, %503 : vector<4x16x64xf32>
    %cst_207 = arith.constant dense<0.000000e+00> : vector<4x64xf32>
    %506 = vector.multi_reduction <add>, %505, %cst_207 [1] : vector<4x16x64xf32> to vector<4x64xf32>
    %c0_208 = arith.constant 0 : index
    %c0_209 = arith.constant 0 : index
    %507 = vector.load %arg9[%c0_208, %c0_209] : memref<64x64xbf16, #tpu.memory_space<vmem>>, vector<64x64xbf16>
    %cst_210 = arith.constant dense<0.000000e+00> : vector<4x64xf32>
    %508 = tpu.matmul %485, %507, %cst_210 {dimension_numbers = #tpu.dot_dimension_numbers<[1], [0], [0], [1], [0, 0, 1, 1], [], []>} : vector<4x64xbf16>, vector<64x64xbf16>, vector<4x64xf32> -> vector<4x64xf32>
    %509 = arith.truncf %506 : vector<4x64xf32> to vector<4x64xbf16>
    %c0_211 = arith.constant 0 : index
    %c0_212 = arith.constant 0 : index
    %510 = vector.load %arg10[%c0_211, %c0_212] : memref<64x64xbf16, #tpu.memory_space<vmem>>, vector<64x64xbf16>
    %cst_213 = arith.constant dense<0.000000e+00> : vector<4x64xf32>
    %511 = tpu.matmul %509, %510, %cst_213 {dimension_numbers = #tpu.dot_dimension_numbers<[1], [0], [0], [1], [0, 0, 1, 1], [], []>} : vector<4x64xbf16>, vector<64x64xbf16>, vector<4x64xf32> -> vector<4x64xf32>
    %512 = arith.addf %508, %511 : vector<4x64xf32>
    %513 = arith.addf %512, %407 : vector<4x64xf32>
    %cst_214 = arith.constant 0.000000e+00 : f32
    %514 = vector.broadcast %cst_214 : f32 to vector<4x64xf32>
    %515 = arith.maximumf %513, %514 : vector<4x64xf32>
    %516 = arith.truncf %515 : vector<4x64xf32> to vector<4x64xbf16>
    %c0_215 = arith.constant 0 : index
    %c0_216 = arith.constant 0 : index
    %517 = vector.load %arg12[%c0_215, %c0_216] : memref<64x256xbf16, #tpu.memory_space<vmem>>, vector<64x256xbf16>
    %cst_217 = arith.constant dense<0.000000e+00> : vector<4x256xf32>
    %518 = tpu.matmul %516, %517, %cst_217 {dimension_numbers = #tpu.dot_dimension_numbers<[1], [0], [0], [1], [0, 0, 1, 1], [], []>} : vector<4x64xbf16>, vector<64x256xbf16>, vector<4x256xf32> -> vector<4x256xf32>
    %c0_218 = arith.constant 0 : index
    %c0_219 = arith.constant 0 : index
    %519 = vector.load %arg13[%c0_218, %c0_219] : memref<64x256xbf16, #tpu.memory_space<vmem>>, vector<64x256xbf16>
    %cst_220 = arith.constant dense<0.000000e+00> : vector<4x256xf32>
    %520 = tpu.matmul %480, %519, %cst_220 {dimension_numbers = #tpu.dot_dimension_numbers<[1], [0], [0], [1], [0, 0, 1, 1], [], []>} : vector<4x64xbf16>, vector<64x256xbf16>, vector<4x256xf32> -> vector<4x256xf32>
    %521 = arith.addf %518, %520 : vector<4x256xf32>
    %522 = arith.addf %521, %410 : vector<4x256xf32>
    %523 = arith.negf %522 : vector<4x256xf32>
    %524 = math.exp %523 : vector<4x256xf32>
    %cst_221 = arith.constant 1.000000e+00 : f32
    %525 = vector.broadcast %cst_221 : f32 to vector<4x256xf32>
    %526 = arith.addf %525, %524 : vector<4x256xf32>
    %527 = arith.divf %525, %526 : vector<4x256xf32>
    %528 = vector.extract_strided_slice %527 {offsets = [0, 0], sizes = [4, 64], strides = [1, 1]} : vector<4x256xf32> to vector<4x64xf32>
    %529 = vector.extract_strided_slice %527 {offsets = [0, 64], sizes = [4, 64], strides = [1, 1]} : vector<4x256xf32> to vector<4x64xf32>
    %530 = vector.extract_strided_slice %527 {offsets = [0, 192], sizes = [4, 64], strides = [1, 1]} : vector<4x256xf32> to vector<4x64xf32>
    %531 = vector.extract_strided_slice %522 {offsets = [0, 128], sizes = [4, 64], strides = [1, 1]} : vector<4x256xf32> to vector<4x64xf32>
    %532 = math.tanh %531 : vector<4x64xf32>
    %533 = arith.mulf %529, %469 : vector<4x64xf32>
    %534 = arith.mulf %528, %532 : vector<4x64xf32>
    %535 = arith.addf %533, %534 : vector<4x64xf32>
    %536 = math.tanh %535 : vector<4x64xf32>
    %537 = arith.mulf %530, %536 : vector<4x64xf32>
    %538 = vector.broadcast %411 : vector<1x64xf32> to vector<4x64xf32>
    %539 = arith.mulf %537, %538 : vector<4x64xf32>
    %cst_222 = arith.constant dense<0.000000e+00> : vector<4xf32>
    %540 = vector.multi_reduction <add>, %539, %cst_222 [1] : vector<4x64xf32> to vector<4xf32>
    %541 = vector.shape_cast %540 : vector<4xf32> to vector<4x1xf32>
    %542 = vector.broadcast %412 : vector<1x1xf32> to vector<4x1xf32>
    %543 = arith.addf %541, %542 : vector<4x1xf32>
    %cst_223 = arith.constant 0.000000e+00 : f32
    %544 = vector.broadcast %cst_223 : f32 to vector<4x1xf32>
    %545 = arith.maximumf %543, %544 : vector<4x1xf32>
    %546 = arith.truncf %537 : vector<4x64xf32> to vector<4x64xbf16>
    %547 = vector.broadcast %545 : vector<4x1xf32> to vector<4x64xf32>
    %548 = vector.broadcast %398 : vector<1x64xf32> to vector<4x64xf32>
    %549 = arith.mulf %547, %548 : vector<4x64xf32>
    %550 = arith.addf %549, %401 : vector<4x64xf32>
    %551 = arith.truncf %550 : vector<4x64xf32> to vector<4x64xbf16>
    %c0_224 = arith.constant 0 : index
    %c0_225 = arith.constant 0 : index
    %552 = vector.load %arg6[%c0_224, %c0_225] : memref<64x16xbf16, #tpu.memory_space<vmem>>, vector<64x16xbf16>
    %cst_226 = arith.constant dense<0.000000e+00> : vector<4x16xf32>
    %553 = tpu.matmul %551, %552, %cst_226 {dimension_numbers = #tpu.dot_dimension_numbers<[1], [0], [0], [1], [0, 0, 1, 1], [], []>} : vector<4x64xbf16>, vector<64x16xbf16>, vector<4x16xf32> -> vector<4x16xf32>
    %c0_227 = arith.constant 0 : index
    %c0_228 = arith.constant 0 : index
    %554 = vector.load %arg7[%c0_227, %c0_228] : memref<64x16xbf16, #tpu.memory_space<vmem>>, vector<64x16xbf16>
    %cst_229 = arith.constant dense<0.000000e+00> : vector<4x16xf32>
    %555 = tpu.matmul %546, %554, %cst_229 {dimension_numbers = #tpu.dot_dimension_numbers<[1], [0], [0], [1], [0, 0, 1, 1], [], []>} : vector<4x64xbf16>, vector<64x16xbf16>, vector<4x16xf32> -> vector<4x16xf32>
    %556 = arith.addf %553, %555 : vector<4x16xf32>
    %557 = arith.addf %556, %404 : vector<4x16xf32>
    %cst_230 = arith.constant dense<0xFF800000> : vector<4xf32>
    %558 = vector.multi_reduction <maximumf>, %557, %cst_230 [1] : vector<4x16xf32> to vector<4xf32>
    %559 = vector.shape_cast %558 : vector<4xf32> to vector<4x1xf32>
    %560 = vector.broadcast %559 : vector<4x1xf32> to vector<4x16xf32>
    %561 = arith.subf %557, %560 : vector<4x16xf32>
    %562 = math.exp %561 : vector<4x16xf32>
    %cst_231 = arith.constant dense<0.000000e+00> : vector<4xf32>
    %563 = vector.multi_reduction <add>, %562, %cst_231 [1] : vector<4x16xf32> to vector<4xf32>
    %564 = vector.shape_cast %563 : vector<4xf32> to vector<4x1xf32>
    %565 = tpu.reciprocal %564 : vector<4x1xf32> -> vector<4x1xf32>
    %566 = vector.broadcast %565 : vector<4x1xf32> to vector<4x16xf32>
    %567 = arith.mulf %562, %566 : vector<4x16xf32>
    %568 = vector.shape_cast %567 : vector<4x16xf32> to vector<4x16x1xf32>
    %c0_232 = arith.constant 0 : index
    %c0_233 = arith.constant 0 : index
    %c0_234 = arith.constant 0 : index
    %569 = vector.load %arg20[%c0_232, %c0_233, %c0_234] : memref<4x16x64xf32, #tpu.memory_space<vmem>>, vector<4x16x64xf32>
    %570 = vector.broadcast %568 : vector<4x16x1xf32> to vector<4x16x64xf32>
    %571 = arith.mulf %570, %569 : vector<4x16x64xf32>
    %cst_235 = arith.constant dense<0.000000e+00> : vector<4x64xf32>
    %572 = vector.multi_reduction <add>, %571, %cst_235 [1] : vector<4x16x64xf32> to vector<4x64xf32>
    %c0_236 = arith.constant 0 : index
    %c0_237 = arith.constant 0 : index
    %573 = vector.load %arg9[%c0_236, %c0_237] : memref<64x64xbf16, #tpu.memory_space<vmem>>, vector<64x64xbf16>
    %cst_238 = arith.constant dense<0.000000e+00> : vector<4x64xf32>
    %574 = tpu.matmul %551, %573, %cst_238 {dimension_numbers = #tpu.dot_dimension_numbers<[1], [0], [0], [1], [0, 0, 1, 1], [], []>} : vector<4x64xbf16>, vector<64x64xbf16>, vector<4x64xf32> -> vector<4x64xf32>
    %575 = arith.truncf %572 : vector<4x64xf32> to vector<4x64xbf16>
    %c0_239 = arith.constant 0 : index
    %c0_240 = arith.constant 0 : index
    %576 = vector.load %arg10[%c0_239, %c0_240] : memref<64x64xbf16, #tpu.memory_space<vmem>>, vector<64x64xbf16>
    %cst_241 = arith.constant dense<0.000000e+00> : vector<4x64xf32>
    %577 = tpu.matmul %575, %576, %cst_241 {dimension_numbers = #tpu.dot_dimension_numbers<[1], [0], [0], [1], [0, 0, 1, 1], [], []>} : vector<4x64xbf16>, vector<64x64xbf16>, vector<4x64xf32> -> vector<4x64xf32>
    %578 = arith.addf %574, %577 : vector<4x64xf32>
    %579 = arith.addf %578, %407 : vector<4x64xf32>
    %cst_242 = arith.constant 0.000000e+00 : f32
    %580 = vector.broadcast %cst_242 : f32 to vector<4x64xf32>
    %581 = arith.maximumf %579, %580 : vector<4x64xf32>
    %582 = arith.truncf %581 : vector<4x64xf32> to vector<4x64xbf16>
    %c0_243 = arith.constant 0 : index
    %c0_244 = arith.constant 0 : index
    %583 = vector.load %arg12[%c0_243, %c0_244] : memref<64x256xbf16, #tpu.memory_space<vmem>>, vector<64x256xbf16>
    %cst_245 = arith.constant dense<0.000000e+00> : vector<4x256xf32>
    %584 = tpu.matmul %582, %583, %cst_245 {dimension_numbers = #tpu.dot_dimension_numbers<[1], [0], [0], [1], [0, 0, 1, 1], [], []>} : vector<4x64xbf16>, vector<64x256xbf16>, vector<4x256xf32> -> vector<4x256xf32>
    %c0_246 = arith.constant 0 : index
    %c0_247 = arith.constant 0 : index
    %585 = vector.load %arg13[%c0_246, %c0_247] : memref<64x256xbf16, #tpu.memory_space<vmem>>, vector<64x256xbf16>
    %cst_248 = arith.constant dense<0.000000e+00> : vector<4x256xf32>
    %586 = tpu.matmul %546, %585, %cst_248 {dimension_numbers = #tpu.dot_dimension_numbers<[1], [0], [0], [1], [0, 0, 1, 1], [], []>} : vector<4x64xbf16>, vector<64x256xbf16>, vector<4x256xf32> -> vector<4x256xf32>
    %587 = arith.addf %584, %586 : vector<4x256xf32>
    %588 = arith.addf %587, %410 : vector<4x256xf32>
    %589 = arith.negf %588 : vector<4x256xf32>
    %590 = math.exp %589 : vector<4x256xf32>
    %cst_249 = arith.constant 1.000000e+00 : f32
    %591 = vector.broadcast %cst_249 : f32 to vector<4x256xf32>
    %592 = arith.addf %591, %590 : vector<4x256xf32>
    %593 = arith.divf %591, %592 : vector<4x256xf32>
    %594 = vector.extract_strided_slice %593 {offsets = [0, 0], sizes = [4, 64], strides = [1, 1]} : vector<4x256xf32> to vector<4x64xf32>
    %595 = vector.extract_strided_slice %593 {offsets = [0, 64], sizes = [4, 64], strides = [1, 1]} : vector<4x256xf32> to vector<4x64xf32>
    %596 = vector.extract_strided_slice %593 {offsets = [0, 192], sizes = [4, 64], strides = [1, 1]} : vector<4x256xf32> to vector<4x64xf32>
    %597 = vector.extract_strided_slice %588 {offsets = [0, 128], sizes = [4, 64], strides = [1, 1]} : vector<4x256xf32> to vector<4x64xf32>
    %598 = math.tanh %597 : vector<4x64xf32>
    %599 = arith.mulf %595, %535 : vector<4x64xf32>
    %600 = arith.mulf %594, %598 : vector<4x64xf32>
    %601 = arith.addf %599, %600 : vector<4x64xf32>
    %602 = math.tanh %601 : vector<4x64xf32>
    %603 = arith.mulf %596, %602 : vector<4x64xf32>
    %604 = vector.broadcast %411 : vector<1x64xf32> to vector<4x64xf32>
    %605 = arith.mulf %603, %604 : vector<4x64xf32>
    %cst_250 = arith.constant dense<0.000000e+00> : vector<4xf32>
    %606 = vector.multi_reduction <add>, %605, %cst_250 [1] : vector<4x64xf32> to vector<4xf32>
    %607 = vector.shape_cast %606 : vector<4xf32> to vector<4x1xf32>
    %608 = vector.broadcast %412 : vector<1x1xf32> to vector<4x1xf32>
    %609 = arith.addf %607, %608 : vector<4x1xf32>
    %cst_251 = arith.constant 0.000000e+00 : f32
    %610 = vector.broadcast %cst_251 : f32 to vector<4x1xf32>
    %611 = arith.maximumf %609, %610 : vector<4x1xf32>
    %612 = arith.truncf %603 : vector<4x64xf32> to vector<4x64xbf16>
    %613 = vector.broadcast %611 : vector<4x1xf32> to vector<4x64xf32>
    %614 = vector.broadcast %398 : vector<1x64xf32> to vector<4x64xf32>
    %615 = arith.mulf %613, %614 : vector<4x64xf32>
    %616 = arith.addf %615, %401 : vector<4x64xf32>
    %617 = arith.truncf %616 : vector<4x64xf32> to vector<4x64xbf16>
    %c0_252 = arith.constant 0 : index
    %c0_253 = arith.constant 0 : index
    %618 = vector.load %arg6[%c0_252, %c0_253] : memref<64x16xbf16, #tpu.memory_space<vmem>>, vector<64x16xbf16>
    %cst_254 = arith.constant dense<0.000000e+00> : vector<4x16xf32>
    %619 = tpu.matmul %617, %618, %cst_254 {dimension_numbers = #tpu.dot_dimension_numbers<[1], [0], [0], [1], [0, 0, 1, 1], [], []>} : vector<4x64xbf16>, vector<64x16xbf16>, vector<4x16xf32> -> vector<4x16xf32>
    %c0_255 = arith.constant 0 : index
    %c0_256 = arith.constant 0 : index
    %620 = vector.load %arg7[%c0_255, %c0_256] : memref<64x16xbf16, #tpu.memory_space<vmem>>, vector<64x16xbf16>
    %cst_257 = arith.constant dense<0.000000e+00> : vector<4x16xf32>
    %621 = tpu.matmul %612, %620, %cst_257 {dimension_numbers = #tpu.dot_dimension_numbers<[1], [0], [0], [1], [0, 0, 1, 1], [], []>} : vector<4x64xbf16>, vector<64x16xbf16>, vector<4x16xf32> -> vector<4x16xf32>
    %622 = arith.addf %619, %621 : vector<4x16xf32>
    %623 = arith.addf %622, %404 : vector<4x16xf32>
    %cst_258 = arith.constant dense<0xFF800000> : vector<4xf32>
    %624 = vector.multi_reduction <maximumf>, %623, %cst_258 [1] : vector<4x16xf32> to vector<4xf32>
    %625 = vector.shape_cast %624 : vector<4xf32> to vector<4x1xf32>
    %626 = vector.broadcast %625 : vector<4x1xf32> to vector<4x16xf32>
    %627 = arith.subf %623, %626 : vector<4x16xf32>
    %628 = math.exp %627 : vector<4x16xf32>
    %cst_259 = arith.constant dense<0.000000e+00> : vector<4xf32>
    %629 = vector.multi_reduction <add>, %628, %cst_259 [1] : vector<4x16xf32> to vector<4xf32>
    %630 = vector.shape_cast %629 : vector<4xf32> to vector<4x1xf32>
    %631 = tpu.reciprocal %630 : vector<4x1xf32> -> vector<4x1xf32>
    %632 = vector.broadcast %631 : vector<4x1xf32> to vector<4x16xf32>
    %633 = arith.mulf %628, %632 : vector<4x16xf32>
    %634 = vector.shape_cast %633 : vector<4x16xf32> to vector<4x16x1xf32>
    %c0_260 = arith.constant 0 : index
    %c0_261 = arith.constant 0 : index
    %c0_262 = arith.constant 0 : index
    %635 = vector.load %arg20[%c0_260, %c0_261, %c0_262] : memref<4x16x64xf32, #tpu.memory_space<vmem>>, vector<4x16x64xf32>
    %636 = vector.broadcast %634 : vector<4x16x1xf32> to vector<4x16x64xf32>
    %637 = arith.mulf %636, %635 : vector<4x16x64xf32>
    %cst_263 = arith.constant dense<0.000000e+00> : vector<4x64xf32>
    %638 = vector.multi_reduction <add>, %637, %cst_263 [1] : vector<4x16x64xf32> to vector<4x64xf32>
    %c0_264 = arith.constant 0 : index
    %c0_265 = arith.constant 0 : index
    %639 = vector.load %arg9[%c0_264, %c0_265] : memref<64x64xbf16, #tpu.memory_space<vmem>>, vector<64x64xbf16>
    %cst_266 = arith.constant dense<0.000000e+00> : vector<4x64xf32>
    %640 = tpu.matmul %617, %639, %cst_266 {dimension_numbers = #tpu.dot_dimension_numbers<[1], [0], [0], [1], [0, 0, 1, 1], [], []>} : vector<4x64xbf16>, vector<64x64xbf16>, vector<4x64xf32> -> vector<4x64xf32>
    %641 = arith.truncf %638 : vector<4x64xf32> to vector<4x64xbf16>
    %c0_267 = arith.constant 0 : index
    %c0_268 = arith.constant 0 : index
    %642 = vector.load %arg10[%c0_267, %c0_268] : memref<64x64xbf16, #tpu.memory_space<vmem>>, vector<64x64xbf16>
    %cst_269 = arith.constant dense<0.000000e+00> : vector<4x64xf32>
    %643 = tpu.matmul %641, %642, %cst_269 {dimension_numbers = #tpu.dot_dimension_numbers<[1], [0], [0], [1], [0, 0, 1, 1], [], []>} : vector<4x64xbf16>, vector<64x64xbf16>, vector<4x64xf32> -> vector<4x64xf32>
    %644 = arith.addf %640, %643 : vector<4x64xf32>
    %645 = arith.addf %644, %407 : vector<4x64xf32>
    %cst_270 = arith.constant 0.000000e+00 : f32
    %646 = vector.broadcast %cst_270 : f32 to vector<4x64xf32>
    %647 = arith.maximumf %645, %646 : vector<4x64xf32>
    %648 = arith.truncf %647 : vector<4x64xf32> to vector<4x64xbf16>
    %c0_271 = arith.constant 0 : index
    %c0_272 = arith.constant 0 : index
    %649 = vector.load %arg12[%c0_271, %c0_272] : memref<64x256xbf16, #tpu.memory_space<vmem>>, vector<64x256xbf16>
    %cst_273 = arith.constant dense<0.000000e+00> : vector<4x256xf32>
    %650 = tpu.matmul %648, %649, %cst_273 {dimension_numbers = #tpu.dot_dimension_numbers<[1], [0], [0], [1], [0, 0, 1, 1], [], []>} : vector<4x64xbf16>, vector<64x256xbf16>, vector<4x256xf32> -> vector<4x256xf32>
    %c0_274 = arith.constant 0 : index
    %c0_275 = arith.constant 0 : index
    %651 = vector.load %arg13[%c0_274, %c0_275] : memref<64x256xbf16, #tpu.memory_space<vmem>>, vector<64x256xbf16>
    %cst_276 = arith.constant dense<0.000000e+00> : vector<4x256xf32>
    %652 = tpu.matmul %612, %651, %cst_276 {dimension_numbers = #tpu.dot_dimension_numbers<[1], [0], [0], [1], [0, 0, 1, 1], [], []>} : vector<4x64xbf16>, vector<64x256xbf16>, vector<4x256xf32> -> vector<4x256xf32>
    %653 = arith.addf %650, %652 : vector<4x256xf32>
    %654 = arith.addf %653, %410 : vector<4x256xf32>
    %655 = arith.negf %654 : vector<4x256xf32>
    %656 = math.exp %655 : vector<4x256xf32>
    %cst_277 = arith.constant 1.000000e+00 : f32
    %657 = vector.broadcast %cst_277 : f32 to vector<4x256xf32>
    %658 = arith.addf %657, %656 : vector<4x256xf32>
    %659 = arith.divf %657, %658 : vector<4x256xf32>
    %660 = vector.extract_strided_slice %659 {offsets = [0, 0], sizes = [4, 64], strides = [1, 1]} : vector<4x256xf32> to vector<4x64xf32>
    %661 = vector.extract_strided_slice %659 {offsets = [0, 64], sizes = [4, 64], strides = [1, 1]} : vector<4x256xf32> to vector<4x64xf32>
    %662 = vector.extract_strided_slice %659 {offsets = [0, 192], sizes = [4, 64], strides = [1, 1]} : vector<4x256xf32> to vector<4x64xf32>
    %663 = vector.extract_strided_slice %654 {offsets = [0, 128], sizes = [4, 64], strides = [1, 1]} : vector<4x256xf32> to vector<4x64xf32>
    %664 = math.tanh %663 : vector<4x64xf32>
    %665 = arith.mulf %661, %601 : vector<4x64xf32>
    %666 = arith.mulf %660, %664 : vector<4x64xf32>
    %667 = arith.addf %665, %666 : vector<4x64xf32>
    %668 = math.tanh %667 : vector<4x64xf32>
    %669 = arith.mulf %662, %668 : vector<4x64xf32>
    %670 = vector.broadcast %411 : vector<1x64xf32> to vector<4x64xf32>
    %671 = arith.mulf %669, %670 : vector<4x64xf32>
    %cst_278 = arith.constant dense<0.000000e+00> : vector<4xf32>
    %672 = vector.multi_reduction <add>, %671, %cst_278 [1] : vector<4x64xf32> to vector<4xf32>
    %673 = vector.shape_cast %672 : vector<4xf32> to vector<4x1xf32>
    %674 = vector.broadcast %412 : vector<1x1xf32> to vector<4x1xf32>
    %675 = arith.addf %673, %674 : vector<4x1xf32>
    %cst_279 = arith.constant 0.000000e+00 : f32
    %676 = vector.broadcast %cst_279 : f32 to vector<4x1xf32>
    %677 = arith.maximumf %675, %676 : vector<4x1xf32>
    %678 = arith.truncf %669 : vector<4x64xf32> to vector<4x64xbf16>
    %679 = vector.broadcast %677 : vector<4x1xf32> to vector<4x64xf32>
    %680 = vector.broadcast %398 : vector<1x64xf32> to vector<4x64xf32>
    %681 = arith.mulf %679, %680 : vector<4x64xf32>
    %682 = arith.addf %681, %401 : vector<4x64xf32>
    %683 = arith.truncf %682 : vector<4x64xf32> to vector<4x64xbf16>
    %c0_280 = arith.constant 0 : index
    %c0_281 = arith.constant 0 : index
    %684 = vector.load %arg6[%c0_280, %c0_281] : memref<64x16xbf16, #tpu.memory_space<vmem>>, vector<64x16xbf16>
    %cst_282 = arith.constant dense<0.000000e+00> : vector<4x16xf32>
    %685 = tpu.matmul %683, %684, %cst_282 {dimension_numbers = #tpu.dot_dimension_numbers<[1], [0], [0], [1], [0, 0, 1, 1], [], []>} : vector<4x64xbf16>, vector<64x16xbf16>, vector<4x16xf32> -> vector<4x16xf32>
    %c0_283 = arith.constant 0 : index
    %c0_284 = arith.constant 0 : index
    %686 = vector.load %arg7[%c0_283, %c0_284] : memref<64x16xbf16, #tpu.memory_space<vmem>>, vector<64x16xbf16>
    %cst_285 = arith.constant dense<0.000000e+00> : vector<4x16xf32>
    %687 = tpu.matmul %678, %686, %cst_285 {dimension_numbers = #tpu.dot_dimension_numbers<[1], [0], [0], [1], [0, 0, 1, 1], [], []>} : vector<4x64xbf16>, vector<64x16xbf16>, vector<4x16xf32> -> vector<4x16xf32>
    %688 = arith.addf %685, %687 : vector<4x16xf32>
    %689 = arith.addf %688, %404 : vector<4x16xf32>
    %cst_286 = arith.constant dense<0xFF800000> : vector<4xf32>
    %690 = vector.multi_reduction <maximumf>, %689, %cst_286 [1] : vector<4x16xf32> to vector<4xf32>
    %691 = vector.shape_cast %690 : vector<4xf32> to vector<4x1xf32>
    %692 = vector.broadcast %691 : vector<4x1xf32> to vector<4x16xf32>
    %693 = arith.subf %689, %692 : vector<4x16xf32>
    %694 = math.exp %693 : vector<4x16xf32>
    %cst_287 = arith.constant dense<0.000000e+00> : vector<4xf32>
    %695 = vector.multi_reduction <add>, %694, %cst_287 [1] : vector<4x16xf32> to vector<4xf32>
    %696 = vector.shape_cast %695 : vector<4xf32> to vector<4x1xf32>
    %697 = tpu.reciprocal %696 : vector<4x1xf32> -> vector<4x1xf32>
    %698 = vector.broadcast %697 : vector<4x1xf32> to vector<4x16xf32>
    %699 = arith.mulf %694, %698 : vector<4x16xf32>
    %700 = vector.shape_cast %699 : vector<4x16xf32> to vector<4x16x1xf32>
    %c0_288 = arith.constant 0 : index
    %c0_289 = arith.constant 0 : index
    %c0_290 = arith.constant 0 : index
    %701 = vector.load %arg20[%c0_288, %c0_289, %c0_290] : memref<4x16x64xf32, #tpu.memory_space<vmem>>, vector<4x16x64xf32>
    %702 = vector.broadcast %700 : vector<4x16x1xf32> to vector<4x16x64xf32>
    %703 = arith.mulf %702, %701 : vector<4x16x64xf32>
    %cst_291 = arith.constant dense<0.000000e+00> : vector<4x64xf32>
    %704 = vector.multi_reduction <add>, %703, %cst_291 [1] : vector<4x16x64xf32> to vector<4x64xf32>
    %c0_292 = arith.constant 0 : index
    %c0_293 = arith.constant 0 : index
    %705 = vector.load %arg9[%c0_292, %c0_293] : memref<64x64xbf16, #tpu.memory_space<vmem>>, vector<64x64xbf16>
    %cst_294 = arith.constant dense<0.000000e+00> : vector<4x64xf32>
    %706 = tpu.matmul %683, %705, %cst_294 {dimension_numbers = #tpu.dot_dimension_numbers<[1], [0], [0], [1], [0, 0, 1, 1], [], []>} : vector<4x64xbf16>, vector<64x64xbf16>, vector<4x64xf32> -> vector<4x64xf32>
    %707 = arith.truncf %704 : vector<4x64xf32> to vector<4x64xbf16>
    %c0_295 = arith.constant 0 : index
    %c0_296 = arith.constant 0 : index
    %708 = vector.load %arg10[%c0_295, %c0_296] : memref<64x64xbf16, #tpu.memory_space<vmem>>, vector<64x64xbf16>
    %cst_297 = arith.constant dense<0.000000e+00> : vector<4x64xf32>
    %709 = tpu.matmul %707, %708, %cst_297 {dimension_numbers = #tpu.dot_dimension_numbers<[1], [0], [0], [1], [0, 0, 1, 1], [], []>} : vector<4x64xbf16>, vector<64x64xbf16>, vector<4x64xf32> -> vector<4x64xf32>
    %710 = arith.addf %706, %709 : vector<4x64xf32>
    %711 = arith.addf %710, %407 : vector<4x64xf32>
    %cst_298 = arith.constant 0.000000e+00 : f32
    %712 = vector.broadcast %cst_298 : f32 to vector<4x64xf32>
    %713 = arith.maximumf %711, %712 : vector<4x64xf32>
    %714 = arith.truncf %713 : vector<4x64xf32> to vector<4x64xbf16>
    %c0_299 = arith.constant 0 : index
    %c0_300 = arith.constant 0 : index
    %715 = vector.load %arg12[%c0_299, %c0_300] : memref<64x256xbf16, #tpu.memory_space<vmem>>, vector<64x256xbf16>
    %cst_301 = arith.constant dense<0.000000e+00> : vector<4x256xf32>
    %716 = tpu.matmul %714, %715, %cst_301 {dimension_numbers = #tpu.dot_dimension_numbers<[1], [0], [0], [1], [0, 0, 1, 1], [], []>} : vector<4x64xbf16>, vector<64x256xbf16>, vector<4x256xf32> -> vector<4x256xf32>
    %c0_302 = arith.constant 0 : index
    %c0_303 = arith.constant 0 : index
    %717 = vector.load %arg13[%c0_302, %c0_303] : memref<64x256xbf16, #tpu.memory_space<vmem>>, vector<64x256xbf16>
    %cst_304 = arith.constant dense<0.000000e+00> : vector<4x256xf32>
    %718 = tpu.matmul %678, %717, %cst_304 {dimension_numbers = #tpu.dot_dimension_numbers<[1], [0], [0], [1], [0, 0, 1, 1], [], []>} : vector<4x64xbf16>, vector<64x256xbf16>, vector<4x256xf32> -> vector<4x256xf32>
    %719 = arith.addf %716, %718 : vector<4x256xf32>
    %720 = arith.addf %719, %410 : vector<4x256xf32>
    %721 = arith.negf %720 : vector<4x256xf32>
    %722 = math.exp %721 : vector<4x256xf32>
    %cst_305 = arith.constant 1.000000e+00 : f32
    %723 = vector.broadcast %cst_305 : f32 to vector<4x256xf32>
    %724 = arith.addf %723, %722 : vector<4x256xf32>
    %725 = arith.divf %723, %724 : vector<4x256xf32>
    %726 = vector.extract_strided_slice %725 {offsets = [0, 0], sizes = [4, 64], strides = [1, 1]} : vector<4x256xf32> to vector<4x64xf32>
    %727 = vector.extract_strided_slice %725 {offsets = [0, 64], sizes = [4, 64], strides = [1, 1]} : vector<4x256xf32> to vector<4x64xf32>
    %728 = vector.extract_strided_slice %725 {offsets = [0, 192], sizes = [4, 64], strides = [1, 1]} : vector<4x256xf32> to vector<4x64xf32>
    %729 = vector.extract_strided_slice %720 {offsets = [0, 128], sizes = [4, 64], strides = [1, 1]} : vector<4x256xf32> to vector<4x64xf32>
    %730 = math.tanh %729 : vector<4x64xf32>
    %731 = arith.mulf %727, %667 : vector<4x64xf32>
    %732 = arith.mulf %726, %730 : vector<4x64xf32>
    %733 = arith.addf %731, %732 : vector<4x64xf32>
    %734 = math.tanh %733 : vector<4x64xf32>
    %735 = arith.mulf %728, %734 : vector<4x64xf32>
    %736 = vector.broadcast %411 : vector<1x64xf32> to vector<4x64xf32>
    %737 = arith.mulf %735, %736 : vector<4x64xf32>
    %cst_306 = arith.constant dense<0.000000e+00> : vector<4xf32>
    %738 = vector.multi_reduction <add>, %737, %cst_306 [1] : vector<4x64xf32> to vector<4xf32>
    %739 = vector.shape_cast %738 : vector<4xf32> to vector<4x1xf32>
    %740 = vector.broadcast %412 : vector<1x1xf32> to vector<4x1xf32>
    %741 = arith.addf %739, %740 : vector<4x1xf32>
    %cst_307 = arith.constant 0.000000e+00 : f32
    %742 = vector.broadcast %cst_307 : f32 to vector<4x1xf32>
    %743 = arith.maximumf %741, %742 : vector<4x1xf32>
    %744 = arith.truncf %735 : vector<4x64xf32> to vector<4x64xbf16>
    %745 = vector.broadcast %743 : vector<4x1xf32> to vector<4x64xf32>
    %746 = vector.broadcast %398 : vector<1x64xf32> to vector<4x64xf32>
    %747 = arith.mulf %745, %746 : vector<4x64xf32>
    %748 = arith.addf %747, %401 : vector<4x64xf32>
    %749 = arith.truncf %748 : vector<4x64xf32> to vector<4x64xbf16>
    %c0_308 = arith.constant 0 : index
    %c0_309 = arith.constant 0 : index
    %750 = vector.load %arg6[%c0_308, %c0_309] : memref<64x16xbf16, #tpu.memory_space<vmem>>, vector<64x16xbf16>
    %cst_310 = arith.constant dense<0.000000e+00> : vector<4x16xf32>
    %751 = tpu.matmul %749, %750, %cst_310 {dimension_numbers = #tpu.dot_dimension_numbers<[1], [0], [0], [1], [0, 0, 1, 1], [], []>} : vector<4x64xbf16>, vector<64x16xbf16>, vector<4x16xf32> -> vector<4x16xf32>
    %c0_311 = arith.constant 0 : index
    %c0_312 = arith.constant 0 : index
    %752 = vector.load %arg7[%c0_311, %c0_312] : memref<64x16xbf16, #tpu.memory_space<vmem>>, vector<64x16xbf16>
    %cst_313 = arith.constant dense<0.000000e+00> : vector<4x16xf32>
    %753 = tpu.matmul %744, %752, %cst_313 {dimension_numbers = #tpu.dot_dimension_numbers<[1], [0], [0], [1], [0, 0, 1, 1], [], []>} : vector<4x64xbf16>, vector<64x16xbf16>, vector<4x16xf32> -> vector<4x16xf32>
    %754 = arith.addf %751, %753 : vector<4x16xf32>
    %755 = arith.addf %754, %404 : vector<4x16xf32>
    %cst_314 = arith.constant dense<0xFF800000> : vector<4xf32>
    %756 = vector.multi_reduction <maximumf>, %755, %cst_314 [1] : vector<4x16xf32> to vector<4xf32>
    %757 = vector.shape_cast %756 : vector<4xf32> to vector<4x1xf32>
    %758 = vector.broadcast %757 : vector<4x1xf32> to vector<4x16xf32>
    %759 = arith.subf %755, %758 : vector<4x16xf32>
    %760 = math.exp %759 : vector<4x16xf32>
    %cst_315 = arith.constant dense<0.000000e+00> : vector<4xf32>
    %761 = vector.multi_reduction <add>, %760, %cst_315 [1] : vector<4x16xf32> to vector<4xf32>
    %762 = vector.shape_cast %761 : vector<4xf32> to vector<4x1xf32>
    %763 = tpu.reciprocal %762 : vector<4x1xf32> -> vector<4x1xf32>
    %764 = vector.broadcast %763 : vector<4x1xf32> to vector<4x16xf32>
    %765 = arith.mulf %760, %764 : vector<4x16xf32>
    %766 = vector.shape_cast %765 : vector<4x16xf32> to vector<4x16x1xf32>
    %c0_316 = arith.constant 0 : index
    %c0_317 = arith.constant 0 : index
    %c0_318 = arith.constant 0 : index
    %767 = vector.load %arg20[%c0_316, %c0_317, %c0_318] : memref<4x16x64xf32, #tpu.memory_space<vmem>>, vector<4x16x64xf32>
    %768 = vector.broadcast %766 : vector<4x16x1xf32> to vector<4x16x64xf32>
    %769 = arith.mulf %768, %767 : vector<4x16x64xf32>
    %cst_319 = arith.constant dense<0.000000e+00> : vector<4x64xf32>
    %770 = vector.multi_reduction <add>, %769, %cst_319 [1] : vector<4x16x64xf32> to vector<4x64xf32>
    %c0_320 = arith.constant 0 : index
    %c0_321 = arith.constant 0 : index
    %771 = vector.load %arg9[%c0_320, %c0_321] : memref<64x64xbf16, #tpu.memory_space<vmem>>, vector<64x64xbf16>
    %cst_322 = arith.constant dense<0.000000e+00> : vector<4x64xf32>
    %772 = tpu.matmul %749, %771, %cst_322 {dimension_numbers = #tpu.dot_dimension_numbers<[1], [0], [0], [1], [0, 0, 1, 1], [], []>} : vector<4x64xbf16>, vector<64x64xbf16>, vector<4x64xf32> -> vector<4x64xf32>
    %773 = arith.truncf %770 : vector<4x64xf32> to vector<4x64xbf16>
    %c0_323 = arith.constant 0 : index
    %c0_324 = arith.constant 0 : index
    %774 = vector.load %arg10[%c0_323, %c0_324] : memref<64x64xbf16, #tpu.memory_space<vmem>>, vector<64x64xbf16>
    %cst_325 = arith.constant dense<0.000000e+00> : vector<4x64xf32>
    %775 = tpu.matmul %773, %774, %cst_325 {dimension_numbers = #tpu.dot_dimension_numbers<[1], [0], [0], [1], [0, 0, 1, 1], [], []>} : vector<4x64xbf16>, vector<64x64xbf16>, vector<4x64xf32> -> vector<4x64xf32>
    %776 = arith.addf %772, %775 : vector<4x64xf32>
    %777 = arith.addf %776, %407 : vector<4x64xf32>
    %cst_326 = arith.constant 0.000000e+00 : f32
    %778 = vector.broadcast %cst_326 : f32 to vector<4x64xf32>
    %779 = arith.maximumf %777, %778 : vector<4x64xf32>
    %780 = arith.truncf %779 : vector<4x64xf32> to vector<4x64xbf16>
    %c0_327 = arith.constant 0 : index
    %c0_328 = arith.constant 0 : index
    %781 = vector.load %arg12[%c0_327, %c0_328] : memref<64x256xbf16, #tpu.memory_space<vmem>>, vector<64x256xbf16>
    %cst_329 = arith.constant dense<0.000000e+00> : vector<4x256xf32>
    %782 = tpu.matmul %780, %781, %cst_329 {dimension_numbers = #tpu.dot_dimension_numbers<[1], [0], [0], [1], [0, 0, 1, 1], [], []>} : vector<4x64xbf16>, vector<64x256xbf16>, vector<4x256xf32> -> vector<4x256xf32>
    %c0_330 = arith.constant 0 : index
    %c0_331 = arith.constant 0 : index
    %783 = vector.load %arg13[%c0_330, %c0_331] : memref<64x256xbf16, #tpu.memory_space<vmem>>, vector<64x256xbf16>
    %cst_332 = arith.constant dense<0.000000e+00> : vector<4x256xf32>
    %784 = tpu.matmul %744, %783, %cst_332 {dimension_numbers = #tpu.dot_dimension_numbers<[1], [0], [0], [1], [0, 0, 1, 1], [], []>} : vector<4x64xbf16>, vector<64x256xbf16>, vector<4x256xf32> -> vector<4x256xf32>
    %785 = arith.addf %782, %784 : vector<4x256xf32>
    %786 = arith.addf %785, %410 : vector<4x256xf32>
    %787 = arith.negf %786 : vector<4x256xf32>
    %788 = math.exp %787 : vector<4x256xf32>
    %cst_333 = arith.constant 1.000000e+00 : f32
    %789 = vector.broadcast %cst_333 : f32 to vector<4x256xf32>
    %790 = arith.addf %789, %788 : vector<4x256xf32>
    %791 = arith.divf %789, %790 : vector<4x256xf32>
    %792 = vector.extract_strided_slice %791 {offsets = [0, 0], sizes = [4, 64], strides = [1, 1]} : vector<4x256xf32> to vector<4x64xf32>
    %793 = vector.extract_strided_slice %791 {offsets = [0, 64], sizes = [4, 64], strides = [1, 1]} : vector<4x256xf32> to vector<4x64xf32>
    %794 = vector.extract_strided_slice %791 {offsets = [0, 192], sizes = [4, 64], strides = [1, 1]} : vector<4x256xf32> to vector<4x64xf32>
    %795 = vector.extract_strided_slice %786 {offsets = [0, 128], sizes = [4, 64], strides = [1, 1]} : vector<4x256xf32> to vector<4x64xf32>
    %796 = math.tanh %795 : vector<4x64xf32>
    %797 = arith.mulf %793, %733 : vector<4x64xf32>
    %798 = arith.mulf %792, %796 : vector<4x64xf32>
    %799 = arith.addf %797, %798 : vector<4x64xf32>
    %800 = math.tanh %799 : vector<4x64xf32>
    %801 = arith.mulf %794, %800 : vector<4x64xf32>
    %802 = vector.broadcast %411 : vector<1x64xf32> to vector<4x64xf32>
    %803 = arith.mulf %801, %802 : vector<4x64xf32>
    %cst_334 = arith.constant dense<0.000000e+00> : vector<4xf32>
    %804 = vector.multi_reduction <add>, %803, %cst_334 [1] : vector<4x64xf32> to vector<4xf32>
    %805 = vector.shape_cast %804 : vector<4xf32> to vector<4x1xf32>
    %806 = vector.broadcast %412 : vector<1x1xf32> to vector<4x1xf32>
    %807 = arith.addf %805, %806 : vector<4x1xf32>
    %cst_335 = arith.constant 0.000000e+00 : f32
    %808 = vector.broadcast %cst_335 : f32 to vector<4x1xf32>
    %809 = arith.maximumf %807, %808 : vector<4x1xf32>
    %810 = arith.truncf %801 : vector<4x64xf32> to vector<4x64xbf16>
    %811 = vector.broadcast %809 : vector<4x1xf32> to vector<4x64xf32>
    %812 = vector.broadcast %398 : vector<1x64xf32> to vector<4x64xf32>
    %813 = arith.mulf %811, %812 : vector<4x64xf32>
    %814 = arith.addf %813, %401 : vector<4x64xf32>
    %815 = arith.truncf %814 : vector<4x64xf32> to vector<4x64xbf16>
    %c0_336 = arith.constant 0 : index
    %c0_337 = arith.constant 0 : index
    %816 = vector.load %arg6[%c0_336, %c0_337] : memref<64x16xbf16, #tpu.memory_space<vmem>>, vector<64x16xbf16>
    %cst_338 = arith.constant dense<0.000000e+00> : vector<4x16xf32>
    %817 = tpu.matmul %815, %816, %cst_338 {dimension_numbers = #tpu.dot_dimension_numbers<[1], [0], [0], [1], [0, 0, 1, 1], [], []>} : vector<4x64xbf16>, vector<64x16xbf16>, vector<4x16xf32> -> vector<4x16xf32>
    %c0_339 = arith.constant 0 : index
    %c0_340 = arith.constant 0 : index
    %818 = vector.load %arg7[%c0_339, %c0_340] : memref<64x16xbf16, #tpu.memory_space<vmem>>, vector<64x16xbf16>
    %cst_341 = arith.constant dense<0.000000e+00> : vector<4x16xf32>
    %819 = tpu.matmul %810, %818, %cst_341 {dimension_numbers = #tpu.dot_dimension_numbers<[1], [0], [0], [1], [0, 0, 1, 1], [], []>} : vector<4x64xbf16>, vector<64x16xbf16>, vector<4x16xf32> -> vector<4x16xf32>
    %820 = arith.addf %817, %819 : vector<4x16xf32>
    %821 = arith.addf %820, %404 : vector<4x16xf32>
    %cst_342 = arith.constant dense<0xFF800000> : vector<4xf32>
    %822 = vector.multi_reduction <maximumf>, %821, %cst_342 [1] : vector<4x16xf32> to vector<4xf32>
    %823 = vector.shape_cast %822 : vector<4xf32> to vector<4x1xf32>
    %824 = vector.broadcast %823 : vector<4x1xf32> to vector<4x16xf32>
    %825 = arith.subf %821, %824 : vector<4x16xf32>
    %826 = math.exp %825 : vector<4x16xf32>
    %cst_343 = arith.constant dense<0.000000e+00> : vector<4xf32>
    %827 = vector.multi_reduction <add>, %826, %cst_343 [1] : vector<4x16xf32> to vector<4xf32>
    %828 = vector.shape_cast %827 : vector<4xf32> to vector<4x1xf32>
    %829 = tpu.reciprocal %828 : vector<4x1xf32> -> vector<4x1xf32>
    %830 = vector.broadcast %829 : vector<4x1xf32> to vector<4x16xf32>
    %831 = arith.mulf %826, %830 : vector<4x16xf32>
    %832 = vector.shape_cast %831 : vector<4x16xf32> to vector<4x16x1xf32>
    %c0_344 = arith.constant 0 : index
    %c0_345 = arith.constant 0 : index
    %c0_346 = arith.constant 0 : index
    %833 = vector.load %arg20[%c0_344, %c0_345, %c0_346] : memref<4x16x64xf32, #tpu.memory_space<vmem>>, vector<4x16x64xf32>
    %834 = vector.broadcast %832 : vector<4x16x1xf32> to vector<4x16x64xf32>
    %835 = arith.mulf %834, %833 : vector<4x16x64xf32>
    %cst_347 = arith.constant dense<0.000000e+00> : vector<4x64xf32>
    %836 = vector.multi_reduction <add>, %835, %cst_347 [1] : vector<4x16x64xf32> to vector<4x64xf32>
    %c0_348 = arith.constant 0 : index
    %c0_349 = arith.constant 0 : index
    %837 = vector.load %arg9[%c0_348, %c0_349] : memref<64x64xbf16, #tpu.memory_space<vmem>>, vector<64x64xbf16>
    %cst_350 = arith.constant dense<0.000000e+00> : vector<4x64xf32>
    %838 = tpu.matmul %815, %837, %cst_350 {dimension_numbers = #tpu.dot_dimension_numbers<[1], [0], [0], [1], [0, 0, 1, 1], [], []>} : vector<4x64xbf16>, vector<64x64xbf16>, vector<4x64xf32> -> vector<4x64xf32>
    %839 = arith.truncf %836 : vector<4x64xf32> to vector<4x64xbf16>
    %c0_351 = arith.constant 0 : index
    %c0_352 = arith.constant 0 : index
    %840 = vector.load %arg10[%c0_351, %c0_352] : memref<64x64xbf16, #tpu.memory_space<vmem>>, vector<64x64xbf16>
    %cst_353 = arith.constant dense<0.000000e+00> : vector<4x64xf32>
    %841 = tpu.matmul %839, %840, %cst_353 {dimension_numbers = #tpu.dot_dimension_numbers<[1], [0], [0], [1], [0, 0, 1, 1], [], []>} : vector<4x64xbf16>, vector<64x64xbf16>, vector<4x64xf32> -> vector<4x64xf32>
    %842 = arith.addf %838, %841 : vector<4x64xf32>
    %843 = arith.addf %842, %407 : vector<4x64xf32>
    %cst_354 = arith.constant 0.000000e+00 : f32
    %844 = vector.broadcast %cst_354 : f32 to vector<4x64xf32>
    %845 = arith.maximumf %843, %844 : vector<4x64xf32>
    %846 = arith.truncf %845 : vector<4x64xf32> to vector<4x64xbf16>
    %c0_355 = arith.constant 0 : index
    %c0_356 = arith.constant 0 : index
    %847 = vector.load %arg12[%c0_355, %c0_356] : memref<64x256xbf16, #tpu.memory_space<vmem>>, vector<64x256xbf16>
    %cst_357 = arith.constant dense<0.000000e+00> : vector<4x256xf32>
    %848 = tpu.matmul %846, %847, %cst_357 {dimension_numbers = #tpu.dot_dimension_numbers<[1], [0], [0], [1], [0, 0, 1, 1], [], []>} : vector<4x64xbf16>, vector<64x256xbf16>, vector<4x256xf32> -> vector<4x256xf32>
    %c0_358 = arith.constant 0 : index
    %c0_359 = arith.constant 0 : index
    %849 = vector.load %arg13[%c0_358, %c0_359] : memref<64x256xbf16, #tpu.memory_space<vmem>>, vector<64x256xbf16>
    %cst_360 = arith.constant dense<0.000000e+00> : vector<4x256xf32>
    %850 = tpu.matmul %810, %849, %cst_360 {dimension_numbers = #tpu.dot_dimension_numbers<[1], [0], [0], [1], [0, 0, 1, 1], [], []>} : vector<4x64xbf16>, vector<64x256xbf16>, vector<4x256xf32> -> vector<4x256xf32>
    %851 = arith.addf %848, %850 : vector<4x256xf32>
    %852 = arith.addf %851, %410 : vector<4x256xf32>
    %853 = arith.negf %852 : vector<4x256xf32>
    %854 = math.exp %853 : vector<4x256xf32>
    %cst_361 = arith.constant 1.000000e+00 : f32
    %855 = vector.broadcast %cst_361 : f32 to vector<4x256xf32>
    %856 = arith.addf %855, %854 : vector<4x256xf32>
    %857 = arith.divf %855, %856 : vector<4x256xf32>
    %858 = vector.extract_strided_slice %857 {offsets = [0, 0], sizes = [4, 64], strides = [1, 1]} : vector<4x256xf32> to vector<4x64xf32>
    %859 = vector.extract_strided_slice %857 {offsets = [0, 64], sizes = [4, 64], strides = [1, 1]} : vector<4x256xf32> to vector<4x64xf32>
    %860 = vector.extract_strided_slice %857 {offsets = [0, 192], sizes = [4, 64], strides = [1, 1]} : vector<4x256xf32> to vector<4x64xf32>
    %861 = vector.extract_strided_slice %852 {offsets = [0, 128], sizes = [4, 64], strides = [1, 1]} : vector<4x256xf32> to vector<4x64xf32>
    %862 = math.tanh %861 : vector<4x64xf32>
    %863 = arith.mulf %859, %799 : vector<4x64xf32>
    %864 = arith.mulf %858, %862 : vector<4x64xf32>
    %865 = arith.addf %863, %864 : vector<4x64xf32>
    %866 = math.tanh %865 : vector<4x64xf32>
    %867 = arith.mulf %860, %866 : vector<4x64xf32>
    %868 = vector.broadcast %411 : vector<1x64xf32> to vector<4x64xf32>
    %869 = arith.mulf %867, %868 : vector<4x64xf32>
    %cst_362 = arith.constant dense<0.000000e+00> : vector<4xf32>
    %870 = vector.multi_reduction <add>, %869, %cst_362 [1] : vector<4x64xf32> to vector<4xf32>
    %871 = vector.shape_cast %870 : vector<4xf32> to vector<4x1xf32>
    %872 = vector.broadcast %412 : vector<1x1xf32> to vector<4x1xf32>
    %873 = arith.addf %871, %872 : vector<4x1xf32>
    %cst_363 = arith.constant 0.000000e+00 : f32
    %874 = vector.broadcast %cst_363 : f32 to vector<4x1xf32>
    %875 = arith.maximumf %873, %874 : vector<4x1xf32>
    %876 = arith.truncf %867 : vector<4x64xf32> to vector<4x64xbf16>
    %877 = vector.broadcast %875 : vector<4x1xf32> to vector<4x64xf32>
    %878 = vector.broadcast %398 : vector<1x64xf32> to vector<4x64xf32>
    %879 = arith.mulf %877, %878 : vector<4x64xf32>
    %880 = arith.addf %879, %401 : vector<4x64xf32>
    %881 = arith.truncf %880 : vector<4x64xf32> to vector<4x64xbf16>
    %c0_364 = arith.constant 0 : index
    %c0_365 = arith.constant 0 : index
    %882 = vector.load %arg6[%c0_364, %c0_365] : memref<64x16xbf16, #tpu.memory_space<vmem>>, vector<64x16xbf16>
    %cst_366 = arith.constant dense<0.000000e+00> : vector<4x16xf32>
    %883 = tpu.matmul %881, %882, %cst_366 {dimension_numbers = #tpu.dot_dimension_numbers<[1], [0], [0], [1], [0, 0, 1, 1], [], []>} : vector<4x64xbf16>, vector<64x16xbf16>, vector<4x16xf32> -> vector<4x16xf32>
    %c0_367 = arith.constant 0 : index
    %c0_368 = arith.constant 0 : index
    %884 = vector.load %arg7[%c0_367, %c0_368] : memref<64x16xbf16, #tpu.memory_space<vmem>>, vector<64x16xbf16>
    %cst_369 = arith.constant dense<0.000000e+00> : vector<4x16xf32>
    %885 = tpu.matmul %876, %884, %cst_369 {dimension_numbers = #tpu.dot_dimension_numbers<[1], [0], [0], [1], [0, 0, 1, 1], [], []>} : vector<4x64xbf16>, vector<64x16xbf16>, vector<4x16xf32> -> vector<4x16xf32>
    %886 = arith.addf %883, %885 : vector<4x16xf32>
    %887 = arith.addf %886, %404 : vector<4x16xf32>
    %cst_370 = arith.constant dense<0xFF800000> : vector<4xf32>
    %888 = vector.multi_reduction <maximumf>, %887, %cst_370 [1] : vector<4x16xf32> to vector<4xf32>
    %889 = vector.shape_cast %888 : vector<4xf32> to vector<4x1xf32>
    %890 = vector.broadcast %889 : vector<4x1xf32> to vector<4x16xf32>
    %891 = arith.subf %887, %890 : vector<4x16xf32>
    %892 = math.exp %891 : vector<4x16xf32>
    %cst_371 = arith.constant dense<0.000000e+00> : vector<4xf32>
    %893 = vector.multi_reduction <add>, %892, %cst_371 [1] : vector<4x16xf32> to vector<4xf32>
    %894 = vector.shape_cast %893 : vector<4xf32> to vector<4x1xf32>
    %895 = tpu.reciprocal %894 : vector<4x1xf32> -> vector<4x1xf32>
    %896 = vector.broadcast %895 : vector<4x1xf32> to vector<4x16xf32>
    %897 = arith.mulf %892, %896 : vector<4x16xf32>
    %898 = vector.shape_cast %897 : vector<4x16xf32> to vector<4x16x1xf32>
    %c0_372 = arith.constant 0 : index
    %c0_373 = arith.constant 0 : index
    %c0_374 = arith.constant 0 : index
    %899 = vector.load %arg20[%c0_372, %c0_373, %c0_374] : memref<4x16x64xf32, #tpu.memory_space<vmem>>, vector<4x16x64xf32>
    %900 = vector.broadcast %898 : vector<4x16x1xf32> to vector<4x16x64xf32>
    %901 = arith.mulf %900, %899 : vector<4x16x64xf32>
    %cst_375 = arith.constant dense<0.000000e+00> : vector<4x64xf32>
    %902 = vector.multi_reduction <add>, %901, %cst_375 [1] : vector<4x16x64xf32> to vector<4x64xf32>
    %c0_376 = arith.constant 0 : index
    %c0_377 = arith.constant 0 : index
    %903 = vector.load %arg9[%c0_376, %c0_377] : memref<64x64xbf16, #tpu.memory_space<vmem>>, vector<64x64xbf16>
    %cst_378 = arith.constant dense<0.000000e+00> : vector<4x64xf32>
    %904 = tpu.matmul %881, %903, %cst_378 {dimension_numbers = #tpu.dot_dimension_numbers<[1], [0], [0], [1], [0, 0, 1, 1], [], []>} : vector<4x64xbf16>, vector<64x64xbf16>, vector<4x64xf32> -> vector<4x64xf32>
    %905 = arith.truncf %902 : vector<4x64xf32> to vector<4x64xbf16>
    %c0_379 = arith.constant 0 : index
    %c0_380 = arith.constant 0 : index
    %906 = vector.load %arg10[%c0_379, %c0_380] : memref<64x64xbf16, #tpu.memory_space<vmem>>, vector<64x64xbf16>
    %cst_381 = arith.constant dense<0.000000e+00> : vector<4x64xf32>
    %907 = tpu.matmul %905, %906, %cst_381 {dimension_numbers = #tpu.dot_dimension_numbers<[1], [0], [0], [1], [0, 0, 1, 1], [], []>} : vector<4x64xbf16>, vector<64x64xbf16>, vector<4x64xf32> -> vector<4x64xf32>
    %908 = arith.addf %904, %907 : vector<4x64xf32>
    %909 = arith.addf %908, %407 : vector<4x64xf32>
    %cst_382 = arith.constant 0.000000e+00 : f32
    %910 = vector.broadcast %cst_382 : f32 to vector<4x64xf32>
    %911 = arith.maximumf %909, %910 : vector<4x64xf32>
    %912 = arith.truncf %911 : vector<4x64xf32> to vector<4x64xbf16>
    %c0_383 = arith.constant 0 : index
    %c0_384 = arith.constant 0 : index
    %913 = vector.load %arg12[%c0_383, %c0_384] : memref<64x256xbf16, #tpu.memory_space<vmem>>, vector<64x256xbf16>
    %cst_385 = arith.constant dense<0.000000e+00> : vector<4x256xf32>
    %914 = tpu.matmul %912, %913, %cst_385 {dimension_numbers = #tpu.dot_dimension_numbers<[1], [0], [0], [1], [0, 0, 1, 1], [], []>} : vector<4x64xbf16>, vector<64x256xbf16>, vector<4x256xf32> -> vector<4x256xf32>
    %c0_386 = arith.constant 0 : index
    %c0_387 = arith.constant 0 : index
    %915 = vector.load %arg13[%c0_386, %c0_387] : memref<64x256xbf16, #tpu.memory_space<vmem>>, vector<64x256xbf16>
    %cst_388 = arith.constant dense<0.000000e+00> : vector<4x256xf32>
    %916 = tpu.matmul %876, %915, %cst_388 {dimension_numbers = #tpu.dot_dimension_numbers<[1], [0], [0], [1], [0, 0, 1, 1], [], []>} : vector<4x64xbf16>, vector<64x256xbf16>, vector<4x256xf32> -> vector<4x256xf32>
    %917 = arith.addf %914, %916 : vector<4x256xf32>
    %918 = arith.addf %917, %410 : vector<4x256xf32>
    %919 = arith.negf %918 : vector<4x256xf32>
    %920 = math.exp %919 : vector<4x256xf32>
    %cst_389 = arith.constant 1.000000e+00 : f32
    %921 = vector.broadcast %cst_389 : f32 to vector<4x256xf32>
    %922 = arith.addf %921, %920 : vector<4x256xf32>
    %923 = arith.divf %921, %922 : vector<4x256xf32>
    %924 = vector.extract_strided_slice %923 {offsets = [0, 0], sizes = [4, 64], strides = [1, 1]} : vector<4x256xf32> to vector<4x64xf32>
    %925 = vector.extract_strided_slice %923 {offsets = [0, 64], sizes = [4, 64], strides = [1, 1]} : vector<4x256xf32> to vector<4x64xf32>
    %926 = vector.extract_strided_slice %923 {offsets = [0, 192], sizes = [4, 64], strides = [1, 1]} : vector<4x256xf32> to vector<4x64xf32>
    %927 = vector.extract_strided_slice %918 {offsets = [0, 128], sizes = [4, 64], strides = [1, 1]} : vector<4x256xf32> to vector<4x64xf32>
    %928 = math.tanh %927 : vector<4x64xf32>
    %929 = arith.mulf %925, %865 : vector<4x64xf32>
    %930 = arith.mulf %924, %928 : vector<4x64xf32>
    %931 = arith.addf %929, %930 : vector<4x64xf32>
    %932 = math.tanh %931 : vector<4x64xf32>
    %933 = arith.mulf %926, %932 : vector<4x64xf32>
    %934 = vector.broadcast %411 : vector<1x64xf32> to vector<4x64xf32>
    %935 = arith.mulf %933, %934 : vector<4x64xf32>
    %cst_390 = arith.constant dense<0.000000e+00> : vector<4xf32>
    %936 = vector.multi_reduction <add>, %935, %cst_390 [1] : vector<4x64xf32> to vector<4xf32>
    %937 = vector.shape_cast %936 : vector<4xf32> to vector<4x1xf32>
    %938 = vector.broadcast %412 : vector<1x1xf32> to vector<4x1xf32>
    %939 = arith.addf %937, %938 : vector<4x1xf32>
    %cst_391 = arith.constant 0.000000e+00 : f32
    %940 = vector.broadcast %cst_391 : f32 to vector<4x1xf32>
    %941 = arith.maximumf %939, %940 : vector<4x1xf32>
    %942 = tpu.concatenate %479, %545, %611, %677, %743, %809, %875, %941 in 1 : vector<4x1xf32>, vector<4x1xf32>, vector<4x1xf32>, vector<4x1xf32>, vector<4x1xf32>, vector<4x1xf32>, vector<4x1xf32>, vector<4x1xf32> -> vector<4x8xf32>
    %c0_392 = arith.constant 0 : index
    %c0_393 = arith.constant 0 : index
    %943 = vector.load %arg17[%c0_392, %c0_393] : memref<4x8xf32, #tpu.memory_space<vmem>>, vector<4x8xf32>
    tpu.vector_store %arg17[%c0_392, %c0_393], %942 {strides = array<i32>} : memref<4x8xf32, #tpu.memory_space<vmem>>, vector<4x8xf32>,
    %944 = tpu.concatenate %435, %501, %567, %633, %699, %765, %831, %897 in 1 : vector<4x16xf32>, vector<4x16xf32>, vector<4x16xf32>, vector<4x16xf32>, vector<4x16xf32>, vector<4x16xf32>, vector<4x16xf32>, vector<4x16xf32> -> vector<4x128xf32>
    %c0_394 = arith.constant 0 : index
    %c0_395 = arith.constant 0 : index
    %945 = vector.load %arg18[%c0_394, %c0_395] : memref<4x128xf32, #tpu.memory_space<vmem>>, vector<4x128xf32>
    tpu.vector_store %arg18[%c0_394, %c0_395], %944 {strides = array<i32>} : memref<4x128xf32, #tpu.memory_space<vmem>>, vector<4x128xf32>,
    return
  }
}

</mosaic_0001>

<bundles_post_ra>
// kernel: attn_lstm_forward.1
= control target key start
LH: loop header
LB: loop body
LE: loop exit
PB: predicated region body
PF: predicated region fallthrough
CT: control target
= control target key end

     0   :  { %s12711_s0 = inlined_call_operand.vmem [shape: f32[4,16], index: 0, kind: input, shape index: {}]   ;;  %s12712_s1 = inlined_call_operand.vmem [shape: f32[1,256], index: 1, kind: input, shape index: {}]   ;;  %s12713_s2 = inlined_call_operand.vmem [shape: bf16[64,256], index: 2, kind: input, shape index: {}]   ;;  %s12714_s3 = inlined_call_operand.vmem [shape: f32[1,256], index: 3, kind: input, shape index: {}]   ;;  %s12715_s4 = inlined_call_operand.vmem [shape: f32[1,64], index: 4, kind: input, shape index: {}]   ;;  %s12716_s5 = inlined_call_operand.vmem [shape: f32[1,64], index: 5, kind: input, shape index: {}]   ;;  %s12717_s6 = inlined_call_operand.vmem [shape: bf16[64,16], index: 6, kind: input, shape index: {}]   ;;  %s12718_s7 = inlined_call_operand.vmem [shape: bf16[64,16], index: 7, kind: input, shape index: {}]   ;;  %s12719_s8 = inlined_call_operand.vmem [shape: f32[1,16], index: 8, kind: input, shape index: {}]   ;;  %s12720_s9 = inlined_call_operand.vmem [shape: bf16[64,64], index: 9, kind: input, shape index: {}]   ;;  %s12721_s10 = inlined_call_operand.vmem [shape: bf16[64,64], index: 10, kind: input, shape index: {}]   ;;  %s12722_s11 = inlined_call_operand.vmem [shape: f32[1,64], index: 11, kind: input, shape index: {}]   ;;  %s12723_s12 = inlined_call_operand.vmem [shape: bf16[64,256], index: 12, kind: input, shape index: {}]   ;;  %s12724_s13 = inlined_call_operand.vmem [shape: bf16[64,256], index: 13, kind: input, shape index: {}]   ;;  %s12725_s14 = inlined_call_operand.vmem [shape: f32[1,256], index: 14, kind: input, shape index: {}]   ;;  %s12726_s15 = inlined_call_operand.vmem [shape: f32[1,64], index: 15, kind: input, shape index: {}]   ;;  %s12727_s16 = inlined_call_operand.<no memory space> [shape: f32[1,1], index: 16, kind: input, shape index: {}]   ;;  %s12728_s17 = inlined_call_operand.hbm [shape: f32[4,8], index: 17, kind: output, shape index: {0}]   ;;  %s12729_s18 = inlined_call_operand.vmem [shape: f32[4,128], index: 18, kind: output, shape index: {1}]  }
   0x1   :  { %12822 = sst [smem:[#allocation38_spill]] %s12711_s0  ;;  %v24_v0 = vstv %s12727_s16 }
   0x2   :  { %12823 = sst [smem:[#allocation39_spill]] %s12712_s1  ;;  %25 = vst [vmem:[#allocation4] sm:$0x1] %v24_v0 }
   0x3   :  { %12824 = sst [smem:[#allocation40_spill]] %s12713_s2 }
   0x4   :  { %s12825_s0 = sld [smem:[#allocation40_spill]]  ;;  %v63_v2 = vlaneseq  ;;  %v12734_v4 = vmov 0  }
   0x5   :  { %270 = vmatprep.mubr.bf16.mxu0 %v12734_v4  ;;  %544 = vmatprep.mubr.bf16.mxu1 %v12734_v4  ;;  %s12828_s26 = sld [smem:[#allocation38_spill]] }
   0x6   :  { %v10118_v6 = vshrl.u32 %v63_v2, 7  ;;  %9143 = vset.pattern.permute.xlu1 %v12734_v4 }
   0x8   :  { %v10134_v9 = vsub.s32 1, %v10118_v6  ;;  %v10137_v10 = vsub.s32 0, %v10118_v6  ;;  %v10144_v12 = vsub.s32 2, %v10118_v6  ;;  %v10147_v13 = vsub.s32 3, %v10118_v6 }
   0xa   :  { %v9144_v1 = vld [vmem:[%s12825_s0 + $0x34] ss:$8 sps:$4 sm:$0xff]   ;;  %v10109_v3 = vld [vmem:[%s12825_s0 + $0x30] ss:$8 sps:$4 sm:$0xff]   ;;  %v10116_v5 = vld [vmem:[%s12825_s0 + $0x24] ss:$8 sps:$4 sm:$0xff]  }
   0xb   :  { %246 = vmatprep.subr.bf16.mxu0 %v9144_v1  ;;  %520 = vmatprep.subr.bf16.mxu1 %v9144_v1  ;;  %v10124_v7 = vld [vmem:[%s12825_s0 + $0x20] ss:$8 sps:$4 sm:$0xff]   ;;  %v10131_v8 = vld [vmem:[%s12825_s0 + $0x14] ss:$8 sps:$4 sm:$0xff]   ;;  %12826 = vst [vmem:[#allocation8_spill] sm:$0xff] %v10134_v9  ;;  %12827 = vst [vmem:[#allocation9_spill] sm:$0xff] %v10137_v10 }
   0xc   :  { %247 = vmatpush1.bf16.msra.mxu0 %v10109_v3  ;;  %521 = vmatpush1.bf16.msra.mxu1 %v10109_v3  ;;  %v62_v11 = vld [vmem:[%s12828_s26] sm:$0xf]  ;;  %12829 = vst [vmem:[#allocation10_spill] sm:$0xff] %v10144_v12  ;;  %12830 = vst [vmem:[#allocation11_spill] sm:$0xff] %v10147_v13  ;;  %v10153_v14 = vld [vmem:[%s12825_s0 + $0x10] ss:$8 sps:$4 sm:$0xff]  }
   0xd   :  { %248 = vmatprep.subr.bf16.mxu0 %v10116_v5  ;;  %522 = vmatprep.subr.bf16.mxu1 %v10116_v5  ;;  %v10158_v15 = vld [vmem:[%s12825_s0 + $0x4] ss:$8 sps:$4 sm:$0xff]   ;;  %v10161_v16 = vrot.slane %v62_v11, %v10134_v9  ;;  %v10164_v17 = vrot.slane %v62_v11, %v10137_v10  ;;  %v10170_v18 = vrot.slane %v62_v11, %v10144_v12  ;;  %v10175_v19 = vld [vmem:[%s12825_s0] ss:$8 sps:$4 sm:$0xff]  }
   0xe   :  { %v10179_v20 = vrot.slane %v62_v11, %v10147_v13 }
   0xf   :  { %79 = vbcast.lane.b32.xlu0 %v10161_v16, 256  ;;  %68 = vbcast.lane.b32.xlu1 %v10164_v17, 256 }
  0x10   :  { %249 = vmatpush1.bf16.msra.mxu0 %v10124_v7  ;;  %523 = vmatpush1.bf16.msra.mxu1 %v10124_v7 }
  0x11   :  { %250 = vmatprep.subr.bf16.mxu0 %v10131_v8  ;;  %524 = vmatprep.subr.bf16.mxu1 %v10131_v8 }
  0x13   :  { %90 = vbcast.lane.b32.xlu0 %v10170_v18, 256  ;;  %101 = vbcast.lane.b32.xlu1 %v10179_v20, 256 }
  0x14   :  { %251 = vmatpush1.bf16.msra.mxu0 %v10153_v14  ;;  %525 = vmatpush1.bf16.msra.mxu1 %v10153_v14 }
  0x15   :  { %252 = vmatprep.subr.bf16.mxu0 %v10158_v15  ;;  %526 = vmatprep.subr.bf16.mxu1 %v10158_v15 }
  0x18   :  { %253 = vmatpush1.bf16.msra.mxu0 %v10175_v19  ;;  %527 = vmatpush1.bf16.msra.mxu1 %v10175_v19 }
  0x19   :  { %790 = vmatprep.subr.bf16.mxu0 %v9144_v1  ;;  %1060 = vmatprep.subr.bf16.mxu1 %v9144_v1 }
  0x1b   :  { %271 = vmatmul.mubr.bf16.vlgmr.msra.gmra.mxu0 %v12734_v4 }
  0x1c   :  { %791 = vmatpush1.bf16.msra.mxu0 %v10109_v3  ;;  %814 = vmatprep.mubr.bf16.mxu0 %v12734_v4 }
  0x1d   :  { %792 = vmatprep.subr.bf16.mxu0 %v10116_v5 }
  0x20   :  { %793 = vmatpush1.bf16.msra.mxu0 %v10124_v7 }
  0x21   :  { %794 = vmatprep.subr.bf16.mxu0 %v10131_v8 }
  0x24   :  { %795 = vmatpush1.bf16.msra.mxu0 %v10153_v14 }
  0x25   :  { %796 = vmatprep.subr.bf16.mxu0 %v10158_v15 }
  0x26   :  { %26 = vsyncpa [#allocation6], 0  ;;  %s12831_s16 = sld [smem:[#allocation39_spill]]  ;;  %v135_v22 = vld [vmem:[%s12714_s3] sm:$0x3]  ;;  %s9987_s3 = smov 64  }
  0x27   :  { %v10213_v25 = vrot.slane %v135_v22, %v10137_v10  ;;  %v10216_v26 = vrot.slane %v135_v22, %v10134_v9  ;;  %v9986_v47 = vmov 1966171168   ;;  %vm426_vm0 = vcmask 516096   ;;  %s9995_s29 = smov 32   ;;  %s9997_s30 = smov 48  }
  0x28   :  { %797 = vmatpush1.bf16.msra.mxu0 %v10175_v19  ;;  %v283_v48 = vunpack.c.l.s4 %v9986_v47  ;;  %vm460_vm1 = vcmask 1041409   ;;  %vm463_vm2 = vcmask 1042434   ;;  %vm466_vm3 = vcmask 1043459   ;;  %s9998_s19 = smov 5   ;;  %s10000_s1 = smov 96  }
  0x29   :  { %vm234_vm4 = vcmask 523264   ;;  %vm9990_vm5 = vmmov 0   ;;  %vm4704_vm6 = vcmask 125952   ;;  %vm5225_vm7 = vcmask 519168   ;;  %s10001_s20 = smov 6   ;;  %s10002_s21 = smov 7  }
  0x2a   :  { %v284_v49 = vunpack.c.0.s8 %v283_v48  ;;  %vm8192_vm8 = vcmask 7168   ;;  %vm8194_vm9 = vcmask 15360   ;;  %vm8196_vm10 = vcmask 23552  }
  0x2b   :  { %vm8198_vm11 = vcmask 31744   ;;  %vm8236_vm12 = vcmask 130048   ;;  %vm8200_vm13 = vcmask 39936   ;;  %vm8238_vm14 = vcmask 261120  }
  0x2c   :  { %v107_v21 = vld [vmem:[%s12831_s16] sm:$0x3]  ;;  %v10235_v51 = vsub.s32 %v284_v49, %v10118_v6  ;;  %vm8202_vm15 = vcmask 48128  }
  0x2d   :  { %v10207_v23 = vrot.slane %v107_v21, %v10137_v10  ;;  %v10210_v24 = vrot.slane %v107_v21, %v10134_v9 }
  0x81   :  { %v80_v27 = vpop.permute.xlu0 %79  ;;  %v69_v30 = vpop.permute.xlu1 %68 }
  0x82   :  { %v123_v28 = vmul.f32 %v10207_v23, %v80_v27  ;;  %v124_v29 = vmul.f32 %v10210_v24, %v80_v27  ;;  %v119_v31 = vmul.f32 %v10207_v23, %v69_v30  ;;  %v120_v32 = vmul.f32 %v10210_v24, %v69_v30 }
  0x84   :  { %v151_v33 = vadd.f32 %v10213_v25, %v123_v28  ;;  %v152_v34 = vadd.f32 %v10216_v26, %v124_v29  ;;  %v147_v35 = vadd.f32 %v10213_v25, %v119_v31  ;;  %v148_v36 = vadd.f32 %v10216_v26, %v120_v32 }
  0x85   :  { %v91_v37 = vpop.permute.xlu0 %90  ;;  %v102_v40 = vpop.permute.xlu1 %101 }
  0x86   :  { %167 = vst [vmem:[#allocation2 + $0x20] sm:$0xff] %v151_v33  ;;  %168 = vst [vmem:[#allocation2 + $0x28] sm:$0xff] %v152_v34  ;;  %v127_v38 = vmul.f32 %v10207_v23, %v91_v37  ;;  %v128_v39 = vmul.f32 %v10210_v24, %v91_v37  ;;  %v131_v41 = vmul.f32 %v10207_v23, %v102_v40 }
  0x87   :  { %163 = vst [vmem:[#allocation2] sm:$0xff] %v147_v35  ;;  %164 = vst [vmem:[#allocation2 + $0x8] sm:$0xff] %v148_v36  ;;  %v132_v42 = vmul.f32 %v10210_v24, %v102_v40 }
  0x88   :  { %v155_v43 = vadd.f32 %v10213_v25, %v127_v38  ;;  %v156_v44 = vadd.f32 %v10216_v26, %v128_v39  ;;  %v159_v45 = vadd.f32 %v10213_v25, %v131_v41 }
  0x89   :  { %v160_v46 = vadd.f32 %v10216_v26, %v132_v42 }
  0x8a   :  { %171 = vst [vmem:[#allocation2 + $0x40] sm:$0xff] %v155_v43  ;;  %172 = vst [vmem:[#allocation2 + $0x48] sm:$0xff] %v156_v44 }
  0x8b   :  { %175 = vst [vmem:[#allocation2 + $0x60] sm:$0xff] %v159_v45  ;;  %176 = vst [vmem:[#allocation2 + $0x68] sm:$0xff] %v160_v46 }
  0x8d   :  { %v181_v0 = vld [vmem:[#allocation2 + $0x20] ss:$8 sm:$0x3] }
  0x8e   :  { %v179_v56 = vld [vmem:[#allocation2] ss:$8 sm:$0x3] }
  0x91   :  { %v183_v60 = vld [vmem:[#allocation2 + $0x40] ss:$8 sm:$0x3] }
  0x92   :  { %v185_v1 = vld [vmem:[#allocation2 + $0x60] ss:$8 sm:$0x3] }
  0xdb   :  { %v272_v50 = vpop.f32.mrf.mxu0 }
  0xdd   :  { %v274_v52 = vpop.f32.mrf.mxu0 }
  0xde   :  { %v281_v53 = vcombine.low %v272_v50, %v274_v52 }
  0xdf   :  { %v276_v54 = vpop.f32.mrf.mxu0 }
  0xe0   :  { %v288_v55 = vrot.slane %v281_v53, %v10235_v51 }
  0xe1   :  { %v277_v57 = vpop.f32.mrf.mxu0 }
  0xe2   :  { %v289_v58 = vcombine.high %v288_v55, %v288_v55  ;;  %v296_v59 = vrot.slane %v288_v55, %v10235_v51 }
  0xe4   :  { %v303_v61 = vrot.slane %v289_v58, %v10235_v51  ;;  %v304_v62 = vcombine.high %v296_v59, %v296_v59  ;;  %v310_v63 = vadd.f32 %v296_v59, %v179_v56 }
  0xe6   :  { %v305_v2 = vcombine.high %v303_v61, %v303_v61  ;;  %v311_v6 = vadd.f32 %v303_v61, %v181_v0  ;;  %v312_v11 = vadd.f32 %v304_v62, %v183_v60  ;;  %v8276_v21 = vmul.f32 -1.442695, %v310_v63 }
  0xe7   :  { %v342_v40 = vrot.slane %v310_v63, 1 }
  0xe8   :  { %v313_v22 = vadd.f32 %v305_v2, %v185_v1  ;;  %9232 = vpow2.f32 %v8276_v21  ;;  %v8277_v27 = vmul.f32 -1.442695, %v311_v6  ;;  %v8278_v28 = vmul.f32 -1.442695, %v312_v11 }
  0xe9   :  { %v343_v30 = vrot.slane %v311_v6, 1  ;;  %v344_v32 = vrot.slane %v312_v11, 1 }
  0xea   :  { %9234 = vpow2.f32 %v8277_v27  ;;  %v8279_v29 = vmul.f32 -1.442695, %v313_v22  ;;  %v345_v41 = vrot.slane %v313_v22, 1 }
  0xeb   :  { %9236 = vpow2.f32 %v8278_v28 }
  0xec   :  { %9238 = vpow2.f32 %v8279_v29 }
  0xed   :  { %9240 = vtanh.f32 %v343_v30 }
  0xee   :  { %9242 = vtanh.f32 %v344_v32 }
  0xf5   :  { %v9233_v31 = vpop.eup %9232 }
  0xf6   :  { %v326_v35 = vadd.f32 1.0, %v9233_v31 }
  0xf7   :  { %v9235_v33 = vpop.eup %9234 }
  0xf8   :  { %v9237_v34 = vpop.eup %9236  ;;  %v327_v36 = vadd.f32 1.0, %v9235_v33 }
  0xf9   :  { %v9239_v37 = vpop.eup %9238  ;;  %v328_v38 = vadd.f32 1.0, %v9237_v34 }
  0xfa   :  { %v329_v39 = vadd.f32 1.0, %v9239_v37  ;;  %9244 = vrcp.f32 %v327_v36  ;;  %v9241_v42 = vpop.eup %9240 }
  0xfb   :  { %9246 = vrcp.f32 %v328_v38  ;;  %v9243_v43 = vpop.eup %9242 }
  0xfc   :  { %9248 = vrcp.f32 %v326_v35 }
  0xfd   :  { %9250 = vrcp.f32 %v329_v39 }
  0xfe   :  { %9252 = vtanh.f32 %v342_v40 }
  0xff   :  { %9254 = vtanh.f32 %v345_v41 }
 0x107   :  { %v9245_v44 = vpop.eup %9244 }
 0x108   :  { %v9247_v45 = vpop.eup %9246  ;;  %v359_v46 = vmul.f32 %v9245_v44, %v9241_v42  ;;  %v355_v55 = vmul.f32 0.0, %v9245_v44 }
 0x109   :  { %v9249_v47 = vpop.eup %9248  ;;  %v360_v48 = vmul.f32 %v9247_v45, %v9243_v43  ;;  %v356_v57 = vmul.f32 0.0, %v9247_v45 }
 0x10a   :  { %v9251_v49 = vpop.eup %9250  ;;  %368 = vrot.lane.b32.xlu0 %v359_v46, %s9987_s3  ;;  %v354_v61 = vmul.f32 0.0, %v9249_v47 }
 0x10b   :  { %v9253_v50 = vpop.eup %9252  ;;  %370 = vrot.lane.b32.xlu1 %v360_v48, %s9987_s3  ;;  %v357_v63 = vmul.f32 0.0, %v9251_v49 }
 0x10c   :  { %v9255_v52 = vpop.eup %9254  ;;  %v358_v53 = vmul.f32 %v9253_v50, %v9249_v47 }
 0x10d   :  { %v361_v54 = vmul.f32 %v9255_v52, %v9251_v49 }
 0x10e   :  { %366 = vrot.lane.b32.xlu0 %v358_v53, %s9987_s3 }
 0x10f   :  { %372 = vrot.lane.b32.xlu1 %v361_v54, %s9987_s3 }
 0x112   :  { %392 = vrot.lane.b32.xlu0 %v9245_v44, %s9987_s3 }
 0x113   :  { %394 = vrot.lane.b32.xlu1 %v9247_v45, %s9987_s3 }
 0x116   :  { %390 = vrot.lane.b32.xlu0 %v9249_v47, %s9987_s3 }
 0x117   :  { %396 = vrot.lane.b32.xlu1 %v9251_v49, %s9987_s3 }
 0x17c   :  { %v369_v56 = vpop.permute.xlu0 %368 }
 0x17d   :  { %v10248_v58 = vadd.f32 %v369_v56, %v355_v55  ;;  %v371_v59 = vpop.permute.xlu1 %370 }
 0x17e   :  { %v10250_v60 = vadd.f32 %v371_v59, %v356_v57 }
 0x17f   :  { %9256 = vtanh.f32 %v10248_v58 }
 0x180   :  { %9258 = vtanh.f32 %v10250_v60  ;;  %v367_v62 = vpop.permute.xlu0 %366 }
 0x181   :  { %v10254_v0 = vadd.f32 %v367_v62, %v354_v61  ;;  %v373_v1 = vpop.permute.xlu1 %372 }
 0x182   :  { %v10256_v2 = vadd.f32 %v373_v1, %v357_v63 }
 0x183   :  { %9260 = vtanh.f32 %v10254_v0 }
 0x184   :  { %9262 = vtanh.f32 %v10256_v2  ;;  %v393_v27 = vpop.permute.xlu0 %392 }
 0x185   :  { %v395_v28 = vpop.permute.xlu1 %394  ;;  %v399_v31 = vrot.slane %v393_v27, 1  ;;  %v436_v27 = vld [vmem:[#allocation2 + $0x41] ss:$8 sm:$0x3] }
 0x186   :  { %v400_v32 = vrot.slane %v395_v28, 1 }
 0x188   :  { %v391_v29 = vpop.permute.xlu0 %390 }
 0x189   :  { %v397_v30 = vpop.permute.xlu1 %396  ;;  %v398_v37 = vrot.slane %v391_v29, 1 }
 0x18a   :  { %v401_v39 = vrot.slane %v397_v30, 1  ;;  %v438_v30 = vld [vmem:[#allocation2 + $0x61] ss:$8 sm:$0x3] }
 0x18c   :  { %v9257_v6 = vpop.eup %9256 }
 0x18d   :  { %v9259_v11 = vpop.eup %9258  ;;  %412 = vrot.lane.b32.xlu0 %v9257_v6, %s9987_s3 }
 0x18e   :  { %414 = vrot.lane.b32.xlu1 %v9259_v11, %s9987_s3 }
 0x190   :  { %v9261_v21 = vpop.eup %9260 }
 0x191   :  { %v9263_v22 = vpop.eup %9262  ;;  %410 = vrot.lane.b32.xlu0 %v9261_v21, %s9987_s3  ;;  %v432_v21 = vld [vmem:[#allocation2 + $0x1] ss:$8 sm:$0x3] }
 0x192   :  { %416 = vrot.lane.b32.xlu1 %v9263_v22, %s9987_s3 }
 0x1ff   :  { %v413_v33 = vpop.permute.xlu0 %412 }
 0x200   :  { %v423_v34 = vmul.f32 %v413_v33, %v399_v31  ;;  %v415_v35 = vpop.permute.xlu1 %414 }
 0x201   :  { %v424_v36 = vmul.f32 %v415_v35, %v400_v32 }
 0x202   :  { %428 = vst.msk [vmem:[#allocation3 + $0x10] sm:$0x1] %vm426_vm0, %v423_v34  ;;  %v440_v38 = vpack.c.bf16 %v423_v34, %v423_v34 }
 0x203   :  { %429 = vst.msk [vmem:[#allocation3 + $0x20] sm:$0x1] %vm426_vm0, %v424_v36  ;;  %v441_v40 = vpack.c.bf16 %v424_v36, %v424_v36  ;;  %v411_v41 = vpop.permute.xlu0 %410 }
 0x204   :  { %v456_v42 = vunpack.c.l.b16 %v440_v38  ;;  %v422_v43 = vmul.f32 %v411_v41, %v398_v37  ;;  %v417_v44 = vpop.permute.xlu1 %416 }
 0x205   :  { %v457_v45 = vunpack.c.l.b16 %v441_v40  ;;  %v425_v46 = vmul.f32 %v417_v44, %v401_v39 }
 0x206   :  { %427 = vst.msk [vmem:[#allocation3] sm:$0x1] %vm426_vm0, %v422_v43  ;;  %v439_v47 = vpack.c.bf16 %v422_v43, %v422_v43  ;;  %v459_v49 = vrot.slane %v456_v42, 7 }
 0x207   :  { %430 = vst.msk [vmem:[#allocation3 + $0x30] sm:$0x1] %vm426_vm0, %v425_v46  ;;  %v442_v48 = vpack.c.bf16 %v425_v46, %v425_v46  ;;  %v462_v52 = vrot.slane %v457_v45, 6 }
 0x208   :  { %v455_v50 = vunpack.c.l.b16 %v439_v47 }
 0x209   :  { %v458_v53 = vunpack.c.l.b16 %v442_v48 }
 0x20a   :  { %v461_v54 = vsel %vm460_vm1, %v459_v49, %v455_v50 }
 0x20b   :  { %v465_v55 = vrot.slane %v458_v53, 5  ;;  %v464_v56 = vsel %vm463_vm2, %v462_v52, %v461_v54 }
 0x20d   :  { %v467_v57 = vsel %vm466_vm3, %v465_v55, %v464_v56 }
 0x20e   :  { %v468_v59 = vpack.c.b16 %v467_v57, %v467_v57 }
 0x210   :  { %8288 = vmatmul.mubr.msk.bf16.vlgmr.msra.gmra.mxu1 %vm234_vm4, %v468_v59 }
 0x211   :  { %1061 = vmatpush1.bf16.msra.mxu1 %v10109_v3  ;;  %1084 = vmatprep.mubr.bf16.mxu1 %v12734_v4 }
 0x212   :  { %1062 = vmatprep.subr.bf16.mxu1 %v10116_v5 }
 0x215   :  { %1063 = vmatpush1.bf16.msra.mxu1 %v10124_v7 }
 0x216   :  { %1064 = vmatprep.subr.bf16.mxu1 %v10131_v8 }
 0x219   :  { %1065 = vmatpush1.bf16.msra.mxu1 %v10153_v14  ;;  %v434_v14 = vld [vmem:[#allocation2 + $0x21] ss:$8 sm:$0x3] }
 0x21a   :  { %1066 = vmatprep.subr.bf16.mxu1 %v10158_v15 }
 0x21d   :  { %1067 = vmatpush1.bf16.msra.mxu1 %v10175_v19 }
 0x2d0   :  { %v546_v61 = vpop.f32.mrf.mxu1 }
 0x2d2   :  { %v548_v62 = vpop.f32.mrf.mxu1 }
 0x2d3   :  { %v555_v63 = vcombine.low %v546_v61, %v548_v62 }
 0x2d4   :  { %v550_v1 = vpop.f32.mrf.mxu1 }
 0x2d5   :  { %v562_v3 = vrot.slane %v555_v63, %v10235_v51 }
 0x2d6   :  { %v551_v6 = vpop.f32.mrf.mxu1 }
 0x2d7   :  { %v563_v11 = vcombine.high %v562_v3, %v562_v3  ;;  %v570_v5 = vrot.slane %v562_v3, %v10235_v51 }
 0x2d9   :  { %v577_v7 = vrot.slane %v563_v11, %v10235_v51  ;;  %v578_v8 = vcombine.high %v570_v5, %v570_v5  ;;  %v584_v22 = vadd.f32 %v570_v5, %v432_v21 }
 0x2db   :  { %v579_v15 = vcombine.high %v577_v7, %v577_v7  ;;  %v585_v28 = vadd.f32 %v577_v7, %v434_v14  ;;  %v586_v19 = vadd.f32 %v578_v8, %v436_v27  ;;  %v8289_v29 = vmul.f32 -1.442695, %v584_v22 }
 0x2dc   :  { %v616_v45 = vrot.slane %v584_v22, 1 }
 0x2dd   :  { %v587_v31 = vadd.f32 %v579_v15, %v438_v30  ;;  %9264 = vpow2.f32 %v8289_v29  ;;  %v8290_v32 = vmul.f32 -1.442695, %v585_v28  ;;  %v8291_v33 = vmul.f32 -1.442695, %v586_v19 }
 0x2de   :  { %v617_v35 = vrot.slane %v585_v28, 1  ;;  %v618_v37 = vrot.slane %v586_v19, 1 }
 0x2df   :  { %9266 = vpow2.f32 %v8290_v32  ;;  %v8292_v34 = vmul.f32 -1.442695, %v587_v31  ;;  %v619_v46 = vrot.slane %v587_v31, 1 }
 0x2e0   :  { %9268 = vpow2.f32 %v8291_v33 }
 0x2e1   :  { %9270 = vpow2.f32 %v8292_v34 }
 0x2e2   :  { %9272 = vtanh.f32 %v617_v35 }
 0x2e3   :  { %9274 = vtanh.f32 %v618_v37 }
 0x2ea   :  { %v9265_v36 = vpop.eup %9264 }
 0x2eb   :  { %v600_v40 = vadd.f32 1.0, %v9265_v36 }
 0x2ec   :  { %v9267_v38 = vpop.eup %9266 }
 0x2ed   :  { %v9269_v39 = vpop.eup %9268  ;;  %v601_v41 = vadd.f32 1.0, %v9267_v38 }
 0x2ee   :  { %v9271_v42 = vpop.eup %9270  ;;  %v602_v43 = vadd.f32 1.0, %v9269_v39 }
 0x2ef   :  { %v603_v44 = vadd.f32 1.0, %v9271_v42  ;;  %9276 = vrcp.f32 %v601_v41  ;;  %v9273_v47 = vpop.eup %9272 }
 0x2f0   :  { %9278 = vrcp.f32 %v602_v43  ;;  %v9275_v48 = vpop.eup %9274 }
 0x2f1   :  { %9280 = vrcp.f32 %v600_v40 }
 0x2f2   :  { %9282 = vrcp.f32 %v603_v44 }
 0x2f3   :  { %9284 = vtanh.f32 %v616_v45 }
 0x2f4   :  { %9286 = vtanh.f32 %v619_v46 }
 0x2fc   :  { %v9277_v49 = vpop.eup %9276 }
 0x2fd   :  { %v9279_v50 = vpop.eup %9278  ;;  %v633_v52 = vmul.f32 %v9277_v49, %v9273_v47  ;;  %v629_v62 = vmul.f32 %v9277_v49, %v10248_v58 }
 0x2fe   :  { %v9281_v53 = vpop.eup %9280  ;;  %v634_v54 = vmul.f32 %v9279_v50, %v9275_v48  ;;  %v630_v63 = vmul.f32 %v9279_v50, %v10250_v60 }
 0x2ff   :  { %v9283_v55 = vpop.eup %9282  ;;  %642 = vrot.lane.b32.xlu0 %v633_v52, %s9987_s3  ;;  %v628_v5 = vmul.f32 %v9281_v53, %v10254_v0 }
 0x300   :  { %v9285_v56 = vpop.eup %9284  ;;  %644 = vrot.lane.b32.xlu1 %v634_v54, %s9987_s3  ;;  %v631_v7 = vmul.f32 %v9283_v55, %v10256_v2 }
 0x301   :  { %v9287_v57 = vpop.eup %9286  ;;  %v632_v59 = vmul.f32 %v9285_v56, %v9281_v53 }
 0x302   :  { %v635_v61 = vmul.f32 %v9287_v57, %v9283_v55 }
 0x303   :  { %640 = vrot.lane.b32.xlu0 %v632_v59, %s9987_s3 }
 0x304   :  { %646 = vrot.lane.b32.xlu1 %v635_v61, %s9987_s3 }
 0x307   :  { %666 = vrot.lane.b32.xlu0 %v9277_v49, %s9987_s3 }
 0x308   :  { %668 = vrot.lane.b32.xlu1 %v9279_v50, %s9987_s3 }
 0x30b   :  { %664 = vrot.lane.b32.xlu0 %v9281_v53, %s9987_s3 }
 0x30c   :  { %670 = vrot.lane.b32.xlu1 %v9283_v55, %s9987_s3 }
 0x371   :  { %v643_v1 = vpop.permute.xlu0 %642 }
 0x372   :  { %v645_v3 = vpop.permute.xlu1 %644  ;;  %v10293_v6 = vadd.f32 %v643_v1, %v629_v62 }
 0x373   :  { %v10295_v11 = vadd.f32 %v645_v3, %v630_v63 }
 0x374   :  { %9288 = vtanh.f32 %v10293_v6 }
 0x375   :  { %9290 = vtanh.f32 %v10295_v11  ;;  %v641_v21 = vpop.permute.xlu0 %640 }
 0x376   :  { %v10301_v8 = vadd.f32 %v641_v21, %v628_v5  ;;  %v647_v58 = vpop.permute.xlu1 %646  ;;  %v705_v21 = vld [vmem:[#allocation2 + $0x2] ss:$8 sm:$0x3] }
 0x377   :  { %v10303_v22 = vadd.f32 %v647_v58, %v631_v7 }
 0x378   :  { %9292 = vtanh.f32 %v10301_v8 }
 0x379   :  { %9294 = vtanh.f32 %v10303_v22  ;;  %v667_v2 = vpop.permute.xlu0 %666 }
 0x37a   :  { %v669_v15 = vpop.permute.xlu1 %668  ;;  %v673_v29 = vrot.slane %v667_v2, 1 }
 0x37b   :  { %v674_v30 = vrot.slane %v669_v15, 1 }
 0x37d   :  { %v665_v28 = vpop.permute.xlu0 %664 }
 0x37e   :  { %v671_v19 = vpop.permute.xlu1 %670  ;;  %v672_v35 = vrot.slane %v665_v28, 1 }
 0x37f   :  { %v675_v37 = vrot.slane %v671_v19, 1  ;;  %v711_v19 = vld [vmem:[#allocation2 + $0x62] ss:$8 sm:$0x3] }
 0x381   :  { %v9289_v60 = vpop.eup %9288 }
 0x382   :  { %v9291_v14 = vpop.eup %9290  ;;  %686 = vrot.lane.b32.xlu0 %v9289_v60, %s9987_s3 }
 0x383   :  { %688 = vrot.lane.b32.xlu1 %v9291_v14, %s9987_s3  ;;  %v707_v14 = vld [vmem:[#allocation2 + $0x22] ss:$8 sm:$0x3] }
 0x385   :  { %v9293_v0 = vpop.eup %9292 }
 0x386   :  { %v9295_v27 = vpop.eup %9294  ;;  %684 = vrot.lane.b32.xlu0 %v9293_v0, %s9987_s3  ;;  %v709_v0 = vld [vmem:[#allocation2 + $0x42] ss:$8 sm:$0x3] }
 0x387   :  { %690 = vrot.lane.b32.xlu1 %v9295_v27, %s9987_s3 }
 0x3f4   :  { %v687_v31 = vpop.permute.xlu0 %686 }
 0x3f5   :  { %v697_v32 = vmul.f32 %v687_v31, %v673_v29  ;;  %v689_v33 = vpop.permute.xlu1 %688 }
 0x3f6   :  { %v698_v34 = vmul.f32 %v689_v33, %v674_v30 }
 0x3f7   :  { %701 = vst.msk [vmem:[#allocation3 + $0x11] sm:$0x1] %vm426_vm0, %v697_v32  ;;  %v713_v36 = vpack.c.bf16 %v697_v32, %v697_v32 }
 0x3f8   :  { %702 = vst.msk [vmem:[#allocation3 + $0x21] sm:$0x1] %vm426_vm0, %v698_v34  ;;  %v714_v38 = vpack.c.bf16 %v698_v34, %v698_v34  ;;  %v685_v39 = vpop.permute.xlu0 %684 }
 0x3f9   :  { %v729_v40 = vunpack.c.l.b16 %v713_v36  ;;  %v696_v41 = vmul.f32 %v685_v39, %v672_v35  ;;  %v691_v42 = vpop.permute.xlu1 %690 }
 0x3fa   :  { %v730_v43 = vunpack.c.l.b16 %v714_v38  ;;  %v699_v44 = vmul.f32 %v691_v42, %v675_v37 }
 0x3fb   :  { %700 = vst.msk [vmem:[#allocation3 + $0x1] sm:$0x1] %vm426_vm0, %v696_v41  ;;  %v712_v45 = vpack.c.bf16 %v696_v41, %v696_v41  ;;  %v732_v47 = vrot.slane %v729_v40, 7 }
 0x3fc   :  { %703 = vst.msk [vmem:[#allocation3 + $0x31] sm:$0x1] %vm426_vm0, %v699_v44  ;;  %v715_v46 = vpack.c.bf16 %v699_v44, %v699_v44  ;;  %v734_v49 = vrot.slane %v730_v43, 6 }
 0x3fd   :  { %v728_v48 = vunpack.c.l.b16 %v712_v45 }
 0x3fe   :  { %v731_v50 = vunpack.c.l.b16 %v715_v46 }
 0x3ff   :  { %v733_v52 = vsel %vm460_vm1, %v732_v47, %v728_v48 }
 0x400   :  { %v735_v53 = vsel %vm463_vm2, %v734_v49, %v733_v52  ;;  %v736_v54 = vrot.slane %v731_v50, 5 }
 0x402   :  { %v737_v55 = vsel %vm466_vm3, %v736_v54, %v735_v53 }
 0x403   :  { %v738_v56 = vpack.c.b16 %v737_v55, %v737_v55 }
 0x405   :  { %8301 = vmatmul.mubr.msk.bf16.vlgmr.msra.gmra.mxu0 %vm234_vm4, %v738_v56 }
 0x406   :  { %1354 = vmatprep.mubr.bf16.mxu0 %v12734_v4 }
 0x4c5   :  { %v816_v57 = vpop.f32.mrf.mxu0 }
 0x4c7   :  { %v818_v59 = vpop.f32.mrf.mxu0 }
 0x4c8   :  { %v825_v61 = vcombine.low %v816_v57, %v818_v59 }
 0x4c9   :  { %v820_v62 = vpop.f32.mrf.mxu0 }
 0x4ca   :  { %v832_v63 = vrot.slane %v825_v61, %v10235_v51 }
 0x4cb   :  { %v821_v1 = vpop.f32.mrf.mxu0 }
 0x4cc   :  { %v833_v3 = vcombine.high %v832_v63, %v832_v63  ;;  %v840_v5 = vrot.slane %v832_v63, %v10235_v51 }
 0x4ce   :  { %v847_v7 = vrot.slane %v833_v3, %v10235_v51  ;;  %v848_v58 = vcombine.high %v840_v5, %v840_v5  ;;  %v854_v60 = vadd.f32 %v840_v5, %v705_v21 }
 0x4d0   :  { %v849_v27 = vcombine.high %v847_v7, %v847_v7  ;;  %v855_v2 = vadd.f32 %v847_v7, %v707_v14  ;;  %v856_v15 = vadd.f32 %v848_v58, %v709_v0  ;;  %v8302_v28 = vmul.f32 -1.442695, %v854_v60 }
 0x4d1   :  { %v886_v43 = vrot.slane %v854_v60, 1 }
 0x4d2   :  { %v857_v29 = vadd.f32 %v849_v27, %v711_v19  ;;  %9296 = vpow2.f32 %v8302_v28  ;;  %v8303_v30 = vmul.f32 -1.442695, %v855_v2  ;;  %v8304_v31 = vmul.f32 -1.442695, %v856_v15 }
 0x4d3   :  { %v887_v33 = vrot.slane %v855_v2, 1  ;;  %v888_v35 = vrot.slane %v856_v15, 1 }
 0x4d4   :  { %9298 = vpow2.f32 %v8303_v30  ;;  %v8305_v32 = vmul.f32 -1.442695, %v857_v29  ;;  %v889_v44 = vrot.slane %v857_v29, 1 }
 0x4d5   :  { %9300 = vpow2.f32 %v8304_v31 }
 0x4d6   :  { %9302 = vpow2.f32 %v8305_v32 }
 0x4d7   :  { %9304 = vtanh.f32 %v887_v33 }
 0x4d8   :  { %9306 = vtanh.f32 %v888_v35 }
 0x4df   :  { %v9297_v34 = vpop.eup %9296 }
 0x4e0   :  { %v870_v38 = vadd.f32 1.0, %v9297_v34 }
 0x4e1   :  { %v9299_v36 = vpop.eup %9298 }
 0x4e2   :  { %v9301_v37 = vpop.eup %9300  ;;  %v871_v39 = vadd.f32 1.0, %v9299_v36 }
 0x4e3   :  { %v9303_v40 = vpop.eup %9302  ;;  %v872_v41 = vadd.f32 1.0, %v9301_v37 }
 0x4e4   :  { %v873_v42 = vadd.f32 1.0, %v9303_v40  ;;  %9308 = vrcp.f32 %v871_v39  ;;  %v9305_v45 = vpop.eup %9304 }
 0x4e5   :  { %9310 = vrcp.f32 %v872_v41  ;;  %v9307_v46 = vpop.eup %9306 }
 0x4e6   :  { %9312 = vrcp.f32 %v870_v38 }
 0x4e7   :  { %9314 = vrcp.f32 %v873_v42 }
 0x4e8   :  { %9316 = vtanh.f32 %v886_v43 }
 0x4e9   :  { %9318 = vtanh.f32 %v889_v44 }
 0x4f1   :  { %v9309_v47 = vpop.eup %9308 }
 0x4f2   :  { %v9311_v48 = vpop.eup %9310  ;;  %v903_v49 = vmul.f32 %v9309_v47, %v9305_v45  ;;  %v899_v59 = vmul.f32 %v9309_v47, %v10293_v6 }
 0x4f3   :  { %v9313_v50 = vpop.eup %9312  ;;  %v904_v52 = vmul.f32 %v9311_v48, %v9307_v46  ;;  %v900_v61 = vmul.f32 %v9311_v48, %v10295_v11 }
 0x4f4   :  { %v9315_v53 = vpop.eup %9314  ;;  %912 = vrot.lane.b32.xlu0 %v903_v49, %s9987_s3  ;;  %v898_v5 = vmul.f32 %v9313_v50, %v10301_v8 }
 0x4f5   :  { %v9317_v54 = vpop.eup %9316  ;;  %914 = vrot.lane.b32.xlu1 %v904_v52, %s9987_s3  ;;  %v901_v7 = vmul.f32 %v9315_v53, %v10303_v22 }
 0x4f6   :  { %v9319_v55 = vpop.eup %9318  ;;  %v902_v56 = vmul.f32 %v9317_v54, %v9313_v50 }
 0x4f7   :  { %v905_v57 = vmul.f32 %v9319_v55, %v9315_v53 }
 0x4f8   :  { %910 = vrot.lane.b32.xlu0 %v902_v56, %s9987_s3 }
 0x4f9   :  { %916 = vrot.lane.b32.xlu1 %v905_v57, %s9987_s3 }
 0x4fc   :  { %936 = vrot.lane.b32.xlu0 %v9309_v47, %s9987_s3 }
 0x4fd   :  { %938 = vrot.lane.b32.xlu1 %v9311_v48, %s9987_s3 }
 0x500   :  { %934 = vrot.lane.b32.xlu0 %v9313_v50, %s9987_s3 }
 0x501   :  { %940 = vrot.lane.b32.xlu1 %v9315_v53, %s9987_s3 }
 0x566   :  { %v913_v62 = vpop.permute.xlu0 %912 }
 0x567   :  { %v915_v63 = vpop.permute.xlu1 %914  ;;  %v10333_v1 = vadd.f32 %v913_v62, %v899_v59 }
 0x568   :  { %v10335_v3 = vadd.f32 %v915_v63, %v900_v61 }
 0x569   :  { %9320 = vtanh.f32 %v10333_v1 }
 0x56a   :  { %9322 = vtanh.f32 %v10335_v3  ;;  %v911_v21 = vpop.permute.xlu0 %910 }
 0x56b   :  { %v10341_v58 = vadd.f32 %v911_v21, %v898_v5  ;;  %v917_v6 = vpop.permute.xlu1 %916  ;;  %v975_v21 = vld [vmem:[#allocation2 + $0x3] ss:$8 sm:$0x3] }
 0x56c   :  { %v10343_v60 = vadd.f32 %v917_v6, %v901_v7 }
 0x56d   :  { %9324 = vtanh.f32 %v10341_v58 }
 0x56e   :  { %9326 = vtanh.f32 %v10343_v60  ;;  %v937_v22 = vpop.permute.xlu0 %936 }
 0x56f   :  { %v939_v27 = vpop.permute.xlu1 %938  ;;  %v943_v28 = vrot.slane %v937_v22, 1 }
 0x570   :  { %v944_v19 = vrot.slane %v939_v27, 1 }
 0x572   :  { %v935_v2 = vpop.permute.xlu0 %934 }
 0x573   :  { %v941_v15 = vpop.permute.xlu1 %940  ;;  %v942_v33 = vrot.slane %v935_v2, 1 }
 0x574   :  { %v945_v35 = vrot.slane %v941_v15, 1  ;;  %v981_v15 = vld [vmem:[#allocation2 + $0x63] ss:$8 sm:$0x3] }
 0x576   :  { %v9321_v11 = vpop.eup %9320 }
 0x577   :  { %v9323_v14 = vpop.eup %9322  ;;  %956 = vrot.lane.b32.xlu0 %v9321_v11, %s9987_s3 }
 0x578   :  { %958 = vrot.lane.b32.xlu1 %v9323_v14, %s9987_s3  ;;  %v977_v14 = vld [vmem:[#allocation2 + $0x23] ss:$8 sm:$0x3] }
 0x57a   :  { %v9325_v8 = vpop.eup %9324 }
 0x57b   :  { %v9327_v0 = vpop.eup %9326  ;;  %954 = vrot.lane.b32.xlu0 %v9325_v8, %s9987_s3  ;;  %v979_v8 = vld [vmem:[#allocation2 + $0x43] ss:$8 sm:$0x3] }
 0x57c   :  { %960 = vrot.lane.b32.xlu1 %v9327_v0, %s9987_s3 }
 0x5e9   :  { %v957_v29 = vpop.permute.xlu0 %956 }
 0x5ea   :  { %v967_v30 = vmul.f32 %v957_v29, %v943_v28  ;;  %v959_v31 = vpop.permute.xlu1 %958 }
 0x5eb   :  { %v968_v32 = vmul.f32 %v959_v31, %v944_v19 }
 0x5ec   :  { %971 = vst.msk [vmem:[#allocation3 + $0x12] sm:$0x1] %vm426_vm0, %v967_v30  ;;  %v983_v34 = vpack.c.bf16 %v967_v30, %v967_v30 }
 0x5ed   :  { %972 = vst.msk [vmem:[#allocation3 + $0x22] sm:$0x1] %vm426_vm0, %v968_v32  ;;  %v984_v36 = vpack.c.bf16 %v968_v32, %v968_v32  ;;  %v955_v37 = vpop.permute.xlu0 %954 }
 0x5ee   :  { %v999_v38 = vunpack.c.l.b16 %v983_v34  ;;  %v966_v39 = vmul.f32 %v955_v37, %v942_v33  ;;  %v961_v40 = vpop.permute.xlu1 %960 }
 0x5ef   :  { %v1000_v41 = vunpack.c.l.b16 %v984_v36  ;;  %v969_v42 = vmul.f32 %v961_v40, %v945_v35 }
 0x5f0   :  { %970 = vst.msk [vmem:[#allocation3 + $0x2] sm:$0x1] %vm426_vm0, %v966_v39  ;;  %v982_v43 = vpack.c.bf16 %v966_v39, %v966_v39  ;;  %v1002_v45 = vrot.slane %v999_v38, 7 }
 0x5f1   :  { %973 = vst.msk [vmem:[#allocation3 + $0x32] sm:$0x1] %vm426_vm0, %v969_v42  ;;  %v985_v44 = vpack.c.bf16 %v969_v42, %v969_v42  ;;  %v1004_v47 = vrot.slane %v1000_v41, 6 }
 0x5f2   :  { %v998_v46 = vunpack.c.l.b16 %v982_v43 }
 0x5f3   :  { %v1001_v48 = vunpack.c.l.b16 %v985_v44 }
 0x5f4   :  { %v1003_v49 = vsel %vm460_vm1, %v1002_v45, %v998_v46 }
 0x5f5   :  { %v1005_v50 = vsel %vm463_vm2, %v1004_v47, %v1003_v49  ;;  %v1006_v52 = vrot.slane %v1001_v48, 5 }
 0x5f7   :  { %v1007_v53 = vsel %vm466_vm3, %v1006_v52, %v1005_v50 }
 0x5f8   :  { %v1008_v54 = vpack.c.b16 %v1007_v53, %v1007_v53 }
 0x5fa   :  { %8314 = vmatmul.mubr.msk.bf16.vlgmr.msra.gmra.mxu1 %vm234_vm4, %v1008_v54 }
 0x5fb   :  { %1624 = vmatprep.mubr.bf16.mxu1 %v12734_v4 }
 0x6ba   :  { %v1086_v55 = vpop.f32.mrf.mxu1 }
 0x6bc   :  { %v1088_v56 = vpop.f32.mrf.mxu1 }
 0x6bd   :  { %v1095_v57 = vcombine.low %v1086_v55, %v1088_v56  ;;  %v10371_v56 = vld [vmem:[%s12825_s0 + $0x30] ss:$8 sps:$4 sm:$0xff]  }
 0x6be   :  { %v1090_v59 = vpop.f32.mrf.mxu1 }
 0x6bf   :  { %v1102_v61 = vrot.slane %v1095_v57, %v10235_v51  ;;  %v9158_v57 = vld [vmem:[%s12825_s0 + $0x34] ss:$8 sps:$4 sm:$0xff]  }
 0x6c0   :  { %v1091_v62 = vpop.f32.mrf.mxu1  ;;  %1330 = vmatprep.subr.bf16.mxu0 %v9158_v57  ;;  %1600 = vmatprep.subr.bf16.mxu1 %v9158_v57 }
 0x6c1   :  { %v1103_v63 = vcombine.high %v1102_v61, %v1102_v61  ;;  %v1110_v5 = vrot.slane %v1102_v61, %v10235_v51  ;;  %1331 = vmatpush1.bf16.msra.mxu0 %v10371_v56  ;;  %1601 = vmatpush1.bf16.msra.mxu1 %v10371_v56 }
 0x6c3   :  { %v1117_v7 = vrot.slane %v1103_v63, %v10235_v51  ;;  %v1118_v6 = vcombine.high %v1110_v5, %v1110_v5  ;;  %v1124_v11 = vadd.f32 %v1110_v5, %v975_v21 }
 0x6c5   :  { %v1119_v0 = vcombine.high %v1117_v7, %v1117_v7  ;;  %v1125_v22 = vadd.f32 %v1117_v7, %v977_v14  ;;  %v1126_v27 = vadd.f32 %v1118_v6, %v979_v8  ;;  %v8315_v2 = vmul.f32 -1.442695, %v1124_v11 }
 0x6c6   :  { %v1156_v41 = vrot.slane %v1124_v11, 1 }
 0x6c7   :  { %v1127_v28 = vadd.f32 %v1119_v0, %v981_v15  ;;  %9328 = vpow2.f32 %v8315_v2  ;;  %v8316_v19 = vmul.f32 -1.442695, %v1125_v22  ;;  %v8317_v29 = vmul.f32 -1.442695, %v1126_v27  ;;  %v10419_v0 = vld [vmem:[%s12825_s0 + $0x10] ss:$8 sps:$4 sm:$0xff]  }
 0x6c8   :  { %v1157_v31 = vrot.slane %v1125_v22, 1  ;;  %v1158_v33 = vrot.slane %v1126_v27, 1  ;;  %v10429_v2 = vld [vmem:[%s12825_s0 + $0x4] ss:$8 sps:$4 sm:$0xff]   ;;  %v10435_v15 = vld [vmem:[%s12825_s0] ss:$8 sps:$4 sm:$0xff]  }
 0x6c9   :  { %9330 = vpow2.f32 %v8316_v19  ;;  %v8318_v30 = vmul.f32 -1.442695, %v1127_v28  ;;  %v1159_v42 = vrot.slane %v1127_v28, 1 }
 0x6ca   :  { %9332 = vpow2.f32 %v8317_v29 }
 0x6cb   :  { %9334 = vpow2.f32 %v8318_v30 }
 0x6cc   :  { %9336 = vtanh.f32 %v1157_v31 }
 0x6cd   :  { %9338 = vtanh.f32 %v1158_v33 }
 0x6d4   :  { %v9329_v32 = vpop.eup %9328 }
 0x6d5   :  { %v1140_v36 = vadd.f32 1.0, %v9329_v32 }
 0x6d6   :  { %v9331_v34 = vpop.eup %9330 }
 0x6d7   :  { %v9333_v35 = vpop.eup %9332  ;;  %v1141_v37 = vadd.f32 1.0, %v9331_v34 }
 0x6d8   :  { %v9335_v38 = vpop.eup %9334  ;;  %v1142_v39 = vadd.f32 1.0, %v9333_v35 }
 0x6d9   :  { %v1143_v40 = vadd.f32 1.0, %v9335_v38  ;;  %9340 = vrcp.f32 %v1141_v37  ;;  %v9337_v43 = vpop.eup %9336 }
 0x6da   :  { %9342 = vrcp.f32 %v1142_v39  ;;  %v9339_v44 = vpop.eup %9338 }
 0x6db   :  { %9344 = vrcp.f32 %v1140_v36 }
 0x6dc   :  { %9346 = vrcp.f32 %v1143_v40 }
 0x6dd   :  { %9348 = vtanh.f32 %v1156_v41 }
 0x6de   :  { %9350 = vtanh.f32 %v1159_v42 }
 0x6e6   :  { %v9341_v45 = vpop.eup %9340 }
 0x6e7   :  { %v9343_v46 = vpop.eup %9342  ;;  %v1173_v47 = vmul.f32 %v9341_v45, %v9337_v43  ;;  %v1169_v59 = vmul.f32 %v9341_v45, %v10333_v1 }
 0x6e8   :  { %v9345_v48 = vpop.eup %9344  ;;  %v1174_v49 = vmul.f32 %v9343_v46, %v9339_v44  ;;  %v1170_v61 = vmul.f32 %v9343_v46, %v10335_v3  ;;  %v10400_v3 = vld [vmem:[%s12825_s0 + $0x24] ss:$8 sps:$4 sm:$0xff]  }
 0x6e9   :  { %v9347_v50 = vpop.eup %9346  ;;  %1182 = vrot.lane.b32.xlu0 %v1173_v47, %s9987_s3  ;;  %v1168_v7 = vmul.f32 %v9345_v48, %v10341_v58  ;;  %v10405_v58 = vld [vmem:[%s12825_s0 + $0x20] ss:$8 sps:$4 sm:$0xff]   ;;  %1332 = vmatprep.subr.bf16.mxu0 %v10400_v3 }
 0x6ea   :  { %v9349_v52 = vpop.eup %9348  ;;  %1184 = vrot.lane.b32.xlu1 %v1174_v49, %s9987_s3  ;;  %v1171_v11 = vmul.f32 %v9347_v50, %v10343_v60  ;;  %1602 = vmatprep.subr.bf16.mxu1 %v10400_v3  ;;  %v10414_v60 = vld [vmem:[%s12825_s0 + $0x14] ss:$8 sps:$4 sm:$0xff]  }
 0x6eb   :  { %v9351_v53 = vpop.eup %9350  ;;  %v1172_v54 = vmul.f32 %v9349_v52, %v9345_v48  ;;  %1333 = vmatpush1.bf16.msra.mxu0 %v10405_v58  ;;  %1603 = vmatpush1.bf16.msra.mxu1 %v10405_v58 }
 0x6ec   :  { %v1175_v55 = vmul.f32 %v9351_v53, %v9347_v50  ;;  %1334 = vmatprep.subr.bf16.mxu0 %v10414_v60  ;;  %1604 = vmatprep.subr.bf16.mxu1 %v10414_v60 }
 0x6ed   :  { %1180 = vrot.lane.b32.xlu0 %v1172_v54, %s9987_s3 }
 0x6ee   :  { %1186 = vrot.lane.b32.xlu1 %v1175_v55, %s9987_s3 }
 0x6ef   :  { %1335 = vmatpush1.bf16.msra.mxu0 %v10419_v0  ;;  %1605 = vmatpush1.bf16.msra.mxu1 %v10419_v0 }
 0x6f0   :  { %1336 = vmatprep.subr.bf16.mxu0 %v10429_v2  ;;  %1606 = vmatprep.subr.bf16.mxu1 %v10429_v2 }
 0x6f1   :  { %1206 = vrot.lane.b32.xlu0 %v9341_v45, %s9987_s3 }
 0x6f2   :  { %1208 = vrot.lane.b32.xlu1 %v9343_v46, %s9987_s3 }
 0x6f3   :  { %1337 = vmatpush1.bf16.msra.mxu0 %v10435_v15  ;;  %1607 = vmatpush1.bf16.msra.mxu1 %v10435_v15 }
 0x6f4   :  { %1870 = vmatprep.subr.bf16.mxu0 %v9158_v57  ;;  %2140 = vmatprep.subr.bf16.mxu1 %v9158_v57 }
 0x6f5   :  { %1204 = vrot.lane.b32.xlu0 %v9345_v48, %s9987_s3 }
 0x6f6   :  { %1210 = vrot.lane.b32.xlu1 %v9347_v50, %s9987_s3 }
 0x75b   :  { %v1183_v62 = vpop.permute.xlu0 %1182 }
 0x75c   :  { %v1185_v63 = vpop.permute.xlu1 %1184  ;;  %v10383_v5 = vadd.f32 %v1183_v62, %v1169_v59 }
 0x75d   :  { %v10385_v21 = vadd.f32 %v1185_v63, %v1170_v61 }
 0x75e   :  { %9352 = vtanh.f32 %v10383_v5 }
 0x75f   :  { %9354 = vtanh.f32 %v10385_v21  ;;  %v1181_v6 = vpop.permute.xlu0 %1180 }
 0x760   :  { %v10391_v14 = vadd.f32 %v1181_v6, %v1168_v7  ;;  %v1187_v1 = vpop.permute.xlu1 %1186 }
 0x761   :  { %v10393_v8 = vadd.f32 %v1187_v1, %v1171_v11 }
 0x762   :  { %9356 = vtanh.f32 %v10391_v14 }
 0x763   :  { %9358 = vtanh.f32 %v10393_v8  ;;  %v1207_v29 = vpop.permute.xlu0 %1206 }
 0x764   :  { %v1209_v30 = vpop.permute.xlu1 %1208  ;;  %v1213_v33 = vrot.slane %v1207_v29, 1  ;;  %v1245_v29 = vld [vmem:[#allocation2 + $0x4] ss:$8 sm:$0x3] }
 0x765   :  { %v1214_v34 = vrot.slane %v1209_v30, 1 }
 0x767   :  { %v1205_v31 = vpop.permute.xlu0 %1204 }
 0x768   :  { %v1211_v32 = vpop.permute.xlu1 %1210  ;;  %v1212_v39 = vrot.slane %v1205_v31, 1 }
 0x769   :  { %v1215_v41 = vrot.slane %v1211_v32, 1 }
 0x76b   :  { %v9353_v22 = vpop.eup %9352 }
 0x76c   :  { %v9355_v27 = vpop.eup %9354  ;;  %1226 = vrot.lane.b32.xlu0 %v9353_v22, %s9987_s3 }
 0x76d   :  { %1228 = vrot.lane.b32.xlu1 %v9355_v27, %s9987_s3 }
 0x76f   :  { %v9357_v28 = vpop.eup %9356 }
 0x770   :  { %v9359_v19 = vpop.eup %9358  ;;  %1224 = vrot.lane.b32.xlu0 %v9357_v28, %s9987_s3 }
 0x771   :  { %1230 = vrot.lane.b32.xlu1 %v9359_v19, %s9987_s3 }
 0x7de   :  { %v1227_v35 = vpop.permute.xlu0 %1226 }
 0x7df   :  { %v1237_v36 = vmul.f32 %v1227_v35, %v1213_v33  ;;  %v1229_v37 = vpop.permute.xlu1 %1228  ;;  %v1247_v33 = vld [vmem:[#allocation2 + $0x24] ss:$8 sm:$0x3] }
 0x7e0   :  { %v1238_v38 = vmul.f32 %v1229_v37, %v1214_v34  ;;  %v1249_v34 = vld [vmem:[#allocation2 + $0x44] ss:$8 sm:$0x3] }
 0x7e1   :  { %1241 = vst.msk [vmem:[#allocation3 + $0x13] sm:$0x1] %vm426_vm0, %v1237_v36  ;;  %v1253_v40 = vpack.c.bf16 %v1237_v36, %v1237_v36 }
 0x7e2   :  { %1242 = vst.msk [vmem:[#allocation3 + $0x23] sm:$0x1] %vm426_vm0, %v1238_v38  ;;  %v1254_v42 = vpack.c.bf16 %v1238_v38, %v1238_v38  ;;  %v1225_v43 = vpop.permute.xlu0 %1224 }
 0x7e3   :  { %v1269_v44 = vunpack.c.l.b16 %v1253_v40  ;;  %v1236_v45 = vmul.f32 %v1225_v43, %v1212_v39  ;;  %v1231_v46 = vpop.permute.xlu1 %1230  ;;  %v1251_v39 = vld [vmem:[#allocation2 + $0x64] ss:$8 sm:$0x3] }
 0x7e4   :  { %v1270_v47 = vunpack.c.l.b16 %v1254_v42  ;;  %v1239_v48 = vmul.f32 %v1231_v46, %v1215_v41 }
 0x7e5   :  { %1240 = vst.msk [vmem:[#allocation3 + $0x3] sm:$0x1] %vm426_vm0, %v1236_v45  ;;  %v1252_v49 = vpack.c.bf16 %v1236_v45, %v1236_v45  ;;  %v1272_v52 = vrot.slane %v1269_v44, 7 }
 0x7e6   :  { %1243 = vst.msk [vmem:[#allocation3 + $0x33] sm:$0x1] %vm426_vm0, %v1239_v48  ;;  %v1255_v50 = vpack.c.bf16 %v1239_v48, %v1239_v48  ;;  %v1274_v54 = vrot.slane %v1270_v47, 6 }
 0x7e7   :  { %v1268_v53 = vunpack.c.l.b16 %v1252_v49 }
 0x7e8   :  { %v1271_v55 = vunpack.c.l.b16 %v1255_v50 }
 0x7e9   :  { %v1273_v57 = vsel %vm460_vm1, %v1272_v52, %v1268_v53 }
 0x7ea   :  { %v1275_v59 = vsel %vm463_vm2, %v1274_v54, %v1273_v57  ;;  %v1276_v61 = vrot.slane %v1271_v55, 5 }
 0x7ec   :  { %v1277_v62 = vsel %vm466_vm3, %v1276_v61, %v1275_v59 }
 0x7ed   :  { %v1278_v63 = vpack.c.b16 %v1277_v62, %v1277_v62 }
 0x7ef   :  { %8327 = vmatmul.mubr.msk.bf16.vlgmr.msra.gmra.mxu0 %vm234_vm4, %v1278_v63 }
 0x7f0   :  { %1871 = vmatpush1.bf16.msra.mxu0 %v10371_v56  ;;  %1894 = vmatprep.mubr.bf16.mxu0 %v12734_v4 }
 0x7f1   :  { %1872 = vmatprep.subr.bf16.mxu0 %v10400_v3 }
 0x7f4   :  { %1873 = vmatpush1.bf16.msra.mxu0 %v10405_v58 }
 0x7f5   :  { %1874 = vmatprep.subr.bf16.mxu0 %v10414_v60 }
 0x7f8   :  { %1875 = vmatpush1.bf16.msra.mxu0 %v10419_v0 }
 0x7f9   :  { %1876 = vmatprep.subr.bf16.mxu0 %v10429_v2 }
 0x7fc   :  { %1877 = vmatpush1.bf16.msra.mxu0 %v10435_v15 }
 0x8af   :  { %v1356_v7 = vpop.f32.mrf.mxu0 }
 0x8b1   :  { %v1358_v6 = vpop.f32.mrf.mxu0 }
 0x8b2   :  { %v1365_v11 = vcombine.low %v1356_v7, %v1358_v6 }
 0x8b3   :  { %v1360_v1 = vpop.f32.mrf.mxu0 }
 0x8b4   :  { %v1372_v22 = vrot.slane %v1365_v11, %v10235_v51 }
 0x8b5   :  { %v1361_v27 = vpop.f32.mrf.mxu0 }
 0x8b6   :  { %v1373_v28 = vcombine.high %v1372_v22, %v1372_v22  ;;  %v1380_v19 = vrot.slane %v1372_v22, %v10235_v51 }
 0x8b8   :  { %v1387_v30 = vrot.slane %v1373_v28, %v10235_v51  ;;  %v1388_v31 = vcombine.high %v1380_v19, %v1380_v19  ;;  %v1394_v32 = vadd.f32 %v1380_v19, %v1245_v29 }
 0x8ba   :  { %v1389_v35 = vcombine.high %v1387_v30, %v1387_v30  ;;  %v1395_v36 = vadd.f32 %v1387_v30, %v1247_v33  ;;  %v1396_v37 = vadd.f32 %v1388_v31, %v1249_v34  ;;  %v8328_v38 = vmul.f32 -1.442695, %v1394_v32 }
 0x8bb   :  { %v1426_v55 = vrot.slane %v1394_v32, 1 }
 0x8bc   :  { %v1397_v40 = vadd.f32 %v1389_v35, %v1251_v39  ;;  %9360 = vpow2.f32 %v8328_v38  ;;  %v8329_v41 = vmul.f32 -1.442695, %v1395_v36  ;;  %v8330_v42 = vmul.f32 -1.442695, %v1396_v37 }
 0x8bd   :  { %v1427_v44 = vrot.slane %v1395_v36, 1  ;;  %v1428_v46 = vrot.slane %v1396_v37, 1 }
 0x8be   :  { %9362 = vpow2.f32 %v8329_v41  ;;  %v8331_v43 = vmul.f32 -1.442695, %v1397_v40  ;;  %v1429_v57 = vrot.slane %v1397_v40, 1 }
 0x8bf   :  { %9364 = vpow2.f32 %v8330_v42 }
 0x8c0   :  { %9366 = vpow2.f32 %v8331_v43 }
 0x8c1   :  { %9368 = vtanh.f32 %v1427_v44 }
 0x8c2   :  { %9370 = vtanh.f32 %v1428_v46 }
 0x8c9   :  { %v9361_v45 = vpop.eup %9360 }
 0x8ca   :  { %v1410_v49 = vadd.f32 1.0, %v9361_v45 }
 0x8cb   :  { %v9363_v47 = vpop.eup %9362 }
 0x8cc   :  { %v9365_v48 = vpop.eup %9364  ;;  %v1411_v50 = vadd.f32 1.0, %v9363_v47 }
 0x8cd   :  { %v9367_v52 = vpop.eup %9366  ;;  %v1412_v53 = vadd.f32 1.0, %v9365_v48 }
 0x8ce   :  { %v1413_v54 = vadd.f32 1.0, %v9367_v52  ;;  %9372 = vrcp.f32 %v1411_v50  ;;  %v9369_v59 = vpop.eup %9368 }
 0x8cf   :  { %9374 = vrcp.f32 %v1412_v53  ;;  %v9371_v61 = vpop.eup %9370 }
 0x8d0   :  { %9376 = vrcp.f32 %v1410_v49 }
 0x8d1   :  { %9378 = vrcp.f32 %v1413_v54 }
 0x8d2   :  { %9380 = vtanh.f32 %v1426_v55 }
 0x8d3   :  { %9382 = vtanh.f32 %v1429_v57 }
 0x8db   :  { %v9373_v62 = vpop.eup %9372 }
 0x8dc   :  { %v9375_v63 = vpop.eup %9374  ;;  %v1443_v7 = vmul.f32 %v9373_v62, %v9369_v59  ;;  %v1439_v29 = vmul.f32 %v9373_v62, %v10383_v5 }
 0x8dd   :  { %v9377_v6 = vpop.eup %9376  ;;  %v1444_v11 = vmul.f32 %v9375_v63, %v9371_v61  ;;  %v1440_v30 = vmul.f32 %v9375_v63, %v10385_v21 }
 0x8de   :  { %v9379_v1 = vpop.eup %9378  ;;  %1452 = vrot.lane.b32.xlu0 %v1443_v7, %s9987_s3  ;;  %v1438_v35 = vmul.f32 %v9377_v6, %v10391_v14 }
 0x8df   :  { %v9381_v22 = vpop.eup %9380  ;;  %1454 = vrot.lane.b32.xlu1 %v1444_v11, %s9987_s3  ;;  %v1441_v37 = vmul.f32 %v9379_v1, %v10393_v8 }
 0x8e0   :  { %v9383_v27 = vpop.eup %9382  ;;  %v1442_v28 = vmul.f32 %v9381_v22, %v9377_v6 }
 0x8e1   :  { %v1445_v19 = vmul.f32 %v9383_v27, %v9379_v1 }
 0x8e2   :  { %1450 = vrot.lane.b32.xlu0 %v1442_v28, %s9987_s3 }
 0x8e3   :  { %1456 = vrot.lane.b32.xlu1 %v1445_v19, %s9987_s3 }
 0x8e6   :  { %1476 = vrot.lane.b32.xlu0 %v9373_v62, %s9987_s3 }
 0x8e7   :  { %1478 = vrot.lane.b32.xlu1 %v9375_v63, %s9987_s3 }
 0x8ea   :  { %1474 = vrot.lane.b32.xlu0 %v9377_v6, %s9987_s3 }
 0x8eb   :  { %1480 = vrot.lane.b32.xlu1 %v9379_v1, %s9987_s3 }
 0x950   :  { %v1453_v31 = vpop.permute.xlu0 %1452 }
 0x951   :  { %v1455_v32 = vpop.permute.xlu1 %1454  ;;  %v10472_v33 = vadd.f32 %v1453_v31, %v1439_v29 }
 0x952   :  { %v10474_v34 = vadd.f32 %v1455_v32, %v1440_v30 }
 0x953   :  { %9384 = vtanh.f32 %v10472_v33 }
 0x954   :  { %9386 = vtanh.f32 %v10474_v34  ;;  %v1451_v36 = vpop.permute.xlu0 %1450 }
 0x955   :  { %v10480_v38 = vadd.f32 %v1451_v36, %v1438_v35  ;;  %v1457_v5 = vpop.permute.xlu1 %1456 }
 0x956   :  { %v10482_v39 = vadd.f32 %v1457_v5, %v1441_v37 }
 0x957   :  { %9388 = vtanh.f32 %v10480_v38 }
 0x958   :  { %9390 = vtanh.f32 %v10482_v39  ;;  %v1477_v8 = vpop.permute.xlu0 %1476 }
 0x959   :  { %v1479_v42 = vpop.permute.xlu1 %1478  ;;  %v1483_v45 = vrot.slane %v1477_v8, 1  ;;  %v1519_v8 = vld [vmem:[#allocation2 + $0x45] ss:$8 sm:$0x3] }
 0x95a   :  { %v1484_v46 = vrot.slane %v1479_v42, 1 }
 0x95c   :  { %v1475_v43 = vpop.permute.xlu0 %1474 }
 0x95d   :  { %v1481_v44 = vpop.permute.xlu1 %1480  ;;  %v1482_v52 = vrot.slane %v1475_v43, 1 }
 0x95e   :  { %v1485_v54 = vrot.slane %v1481_v44, 1  ;;  %v1521_v44 = vld [vmem:[#allocation2 + $0x65] ss:$8 sm:$0x3] }
 0x960   :  { %v9385_v21 = vpop.eup %9384 }
 0x961   :  { %v9387_v40 = vpop.eup %9386  ;;  %1496 = vrot.lane.b32.xlu0 %v9385_v21, %s9987_s3 }
 0x962   :  { %1498 = vrot.lane.b32.xlu1 %v9387_v40, %s9987_s3 }
 0x964   :  { %v9389_v14 = vpop.eup %9388 }
 0x965   :  { %v9391_v41 = vpop.eup %9390  ;;  %1494 = vrot.lane.b32.xlu0 %v9389_v14, %s9987_s3  ;;  %v1515_v14 = vld [vmem:[#allocation2 + $0x5] ss:$8 sm:$0x3] }
 0x966   :  { %1500 = vrot.lane.b32.xlu1 %v9391_v41, %s9987_s3 }
 0x9d3   :  { %v1497_v47 = vpop.permute.xlu0 %1496 }
 0x9d4   :  { %v1507_v48 = vmul.f32 %v1497_v47, %v1483_v45  ;;  %v1499_v49 = vpop.permute.xlu1 %1498 }
 0x9d5   :  { %v1508_v50 = vmul.f32 %v1499_v49, %v1484_v46 }
 0x9d6   :  { %1511 = vst.msk [vmem:[#allocation3 + $0x14] sm:$0x1] %vm426_vm0, %v1507_v48  ;;  %v1523_v53 = vpack.c.bf16 %v1507_v48, %v1507_v48 }
 0x9d7   :  { %1512 = vst.msk [vmem:[#allocation3 + $0x24] sm:$0x1] %vm426_vm0, %v1508_v50  ;;  %v1524_v55 = vpack.c.bf16 %v1508_v50, %v1508_v50  ;;  %v1495_v57 = vpop.permute.xlu0 %1494 }
 0x9d8   :  { %v1539_v59 = vunpack.c.l.b16 %v1523_v53  ;;  %v1506_v61 = vmul.f32 %v1495_v57, %v1482_v52  ;;  %v1501_v62 = vpop.permute.xlu1 %1500 }
 0x9d9   :  { %v1540_v63 = vunpack.c.l.b16 %v1524_v55  ;;  %v1509_v7 = vmul.f32 %v1501_v62, %v1485_v54 }
 0x9da   :  { %1510 = vst.msk [vmem:[#allocation3 + $0x4] sm:$0x1] %vm426_vm0, %v1506_v61  ;;  %v1522_v6 = vpack.c.bf16 %v1506_v61, %v1506_v61  ;;  %v1542_v1 = vrot.slane %v1539_v59, 7 }
 0x9db   :  { %1513 = vst.msk [vmem:[#allocation3 + $0x34] sm:$0x1] %vm426_vm0, %v1509_v7  ;;  %v1525_v11 = vpack.c.bf16 %v1509_v7, %v1509_v7  ;;  %v1544_v27 = vrot.slane %v1540_v63, 6 }
 0x9dc   :  { %v1538_v22 = vunpack.c.l.b16 %v1522_v6 }
 0x9dd   :  { %v1541_v28 = vunpack.c.l.b16 %v1525_v11 }
 0x9de   :  { %v1543_v19 = vsel %vm460_vm1, %v1542_v1, %v1538_v22 }
 0x9df   :  { %v1545_v29 = vsel %vm463_vm2, %v1544_v27, %v1543_v19  ;;  %v1546_v30 = vrot.slane %v1541_v28, 5 }
 0x9e1   :  { %v1547_v31 = vsel %vm466_vm3, %v1546_v30, %v1545_v29 }
 0x9e2   :  { %v1548_v32 = vpack.c.b16 %v1547_v31, %v1547_v31 }
 0x9e4   :  { %8340 = vmatmul.mubr.msk.bf16.vlgmr.msra.gmra.mxu1 %vm234_vm4, %v1548_v32 }
 0x9e5   :  { %2141 = vmatpush1.bf16.msra.mxu1 %v10371_v56  ;;  %2164 = vmatprep.mubr.bf16.mxu1 %v12734_v4 }
 0x9e6   :  { %2142 = vmatprep.subr.bf16.mxu1 %v10400_v3 }
 0x9e9   :  { %2143 = vmatpush1.bf16.msra.mxu1 %v10405_v58 }
 0x9ea   :  { %2144 = vmatprep.subr.bf16.mxu1 %v10414_v60 }
 0x9ed   :  { %2145 = vmatpush1.bf16.msra.mxu1 %v10419_v0  ;;  %v1517_v0 = vld [vmem:[#allocation2 + $0x25] ss:$8 sm:$0x3] }
 0x9ee   :  { %2146 = vmatprep.subr.bf16.mxu1 %v10429_v2 }
 0x9f1   :  { %2147 = vmatpush1.bf16.msra.mxu1 %v10435_v15 }
 0xaa4   :  { %v1626_v35 = vpop.f32.mrf.mxu1 }
 0xaa6   :  { %v1628_v36 = vpop.f32.mrf.mxu1 }
 0xaa7   :  { %v1635_v37 = vcombine.low %v1626_v35, %v1628_v36 }
 0xaa8   :  { %v1630_v5 = vpop.f32.mrf.mxu1 }
 0xaa9   :  { %v1642_v56 = vrot.slane %v1635_v37, %v10235_v51 }
 0xaaa   :  { %v1631_v21 = vpop.f32.mrf.mxu1 }
 0xaab   :  { %v1643_v40 = vcombine.high %v1642_v56, %v1642_v56  ;;  %v1650_v3 = vrot.slane %v1642_v56, %v10235_v51 }
 0xaad   :  { %v1657_v58 = vrot.slane %v1643_v40, %v10235_v51  ;;  %v1658_v60 = vcombine.high %v1650_v3, %v1650_v3  ;;  %v1664_v41 = vadd.f32 %v1650_v3, %v1515_v14 }
 0xaaf   :  { %v1659_v2 = vcombine.high %v1657_v58, %v1657_v58  ;;  %v1665_v42 = vadd.f32 %v1657_v58, %v1517_v0  ;;  %v1666_v15 = vadd.f32 %v1658_v60, %v1519_v8  ;;  %v8341_v43 = vmul.f32 -1.442695, %v1664_v41 }
 0xab0   :  { %v1696_v63 = vrot.slane %v1664_v41, 1 }
 0xab1   :  { %v1667_v45 = vadd.f32 %v1659_v2, %v1521_v44  ;;  %9392 = vpow2.f32 %v8341_v43  ;;  %v8342_v46 = vmul.f32 -1.442695, %v1665_v42  ;;  %v8343_v47 = vmul.f32 -1.442695, %v1666_v15 }
 0xab2   :  { %v1697_v49 = vrot.slane %v1665_v42, 1  ;;  %v1698_v52 = vrot.slane %v1666_v15, 1 }
 0xab3   :  { %9394 = vpow2.f32 %v8342_v46  ;;  %v8344_v48 = vmul.f32 -1.442695, %v1667_v45  ;;  %v1699_v7 = vrot.slane %v1667_v45, 1 }
 0xab4   :  { %9396 = vpow2.f32 %v8343_v47 }
 0xab5   :  { %9398 = vpow2.f32 %v8344_v48 }
 0xab6   :  { %9400 = vtanh.f32 %v1697_v49 }
 0xab7   :  { %9402 = vtanh.f32 %v1698_v52 }
 0xabe   :  { %v9393_v50 = vpop.eup %9392 }
 0xabf   :  { %v1680_v55 = vadd.f32 1.0, %v9393_v50 }
 0xac0   :  { %v9395_v53 = vpop.eup %9394 }
 0xac1   :  { %v9397_v54 = vpop.eup %9396  ;;  %v1681_v57 = vadd.f32 1.0, %v9395_v53 }
 0xac2   :  { %v9399_v59 = vpop.eup %9398  ;;  %v1682_v61 = vadd.f32 1.0, %v9397_v54 }
 0xac3   :  { %v1683_v62 = vadd.f32 1.0, %v9399_v59  ;;  %9404 = vrcp.f32 %v1681_v57  ;;  %v9401_v6 = vpop.eup %9400 }
 0xac4   :  { %9406 = vrcp.f32 %v1682_v61  ;;  %v9403_v11 = vpop.eup %9402 }
 0xac5   :  { %9408 = vrcp.f32 %v1680_v55 }
 0xac6   :  { %9410 = vrcp.f32 %v1683_v62 }
 0xac7   :  { %9412 = vtanh.f32 %v1696_v63 }
 0xac8   :  { %9414 = vtanh.f32 %v1699_v7 }
 0xad0   :  { %v9405_v1 = vpop.eup %9404 }
 0xad1   :  { %v9407_v22 = vpop.eup %9406  ;;  %v1713_v27 = vmul.f32 %v9405_v1, %v9401_v6  ;;  %v1709_v36 = vmul.f32 %v9405_v1, %v10472_v33 }
 0xad2   :  { %v9409_v28 = vpop.eup %9408  ;;  %v1714_v19 = vmul.f32 %v9407_v22, %v9403_v11  ;;  %v1710_v37 = vmul.f32 %v9407_v22, %v10474_v34 }
 0xad3   :  { %v9411_v29 = vpop.eup %9410  ;;  %1722 = vrot.lane.b32.xlu0 %v1713_v27, %s9987_s3  ;;  %v1708_v3 = vmul.f32 %v9409_v28, %v10480_v38 }
 0xad4   :  { %v9413_v30 = vpop.eup %9412  ;;  %1724 = vrot.lane.b32.xlu1 %v1714_v19, %s9987_s3  ;;  %v1711_v58 = vmul.f32 %v9411_v29, %v10482_v39 }
 0xad5   :  { %v9415_v31 = vpop.eup %9414  ;;  %v1712_v32 = vmul.f32 %v9413_v30, %v9409_v28 }
 0xad6   :  { %v1715_v35 = vmul.f32 %v9415_v31, %v9411_v29 }
 0xad7   :  { %1720 = vrot.lane.b32.xlu0 %v1712_v32, %s9987_s3 }
 0xad8   :  { %1726 = vrot.lane.b32.xlu1 %v1715_v35, %s9987_s3 }
 0xadb   :  { %1746 = vrot.lane.b32.xlu0 %v9405_v1, %s9987_s3 }
 0xadc   :  { %1748 = vrot.lane.b32.xlu1 %v9407_v22, %s9987_s3 }
 0xadf   :  { %1744 = vrot.lane.b32.xlu0 %v9409_v28, %s9987_s3 }
 0xae0   :  { %1750 = vrot.lane.b32.xlu1 %v9411_v29, %s9987_s3 }
 0xb45   :  { %v1723_v5 = vpop.permute.xlu0 %1722 }
 0xb46   :  { %v1725_v56 = vpop.permute.xlu1 %1724  ;;  %v10519_v21 = vadd.f32 %v1723_v5, %v1709_v36 }
 0xb47   :  { %v10521_v40 = vadd.f32 %v1725_v56, %v1710_v37 }
 0xb48   :  { %9416 = vtanh.f32 %v10519_v21 }
 0xb49   :  { %9418 = vtanh.f32 %v10521_v40  ;;  %v1721_v14 = vpop.permute.xlu0 %1720 }
 0xb4a   :  { %v10527_v60 = vadd.f32 %v1721_v14, %v1708_v3  ;;  %v1727_v33 = vpop.permute.xlu1 %1726  ;;  %v1785_v14 = vld [vmem:[#allocation2 + $0x6] ss:$8 sm:$0x3] }
 0xb4b   :  { %v10529_v41 = vadd.f32 %v1727_v33, %v1711_v58 }
 0xb4c   :  { %9420 = vtanh.f32 %v10527_v60 }
 0xb4d   :  { %9422 = vtanh.f32 %v10529_v41  ;;  %v1747_v39 = vpop.permute.xlu0 %1746 }
 0xb4e   :  { %v1749_v2 = vpop.permute.xlu1 %1748  ;;  %v1753_v43 = vrot.slane %v1747_v39, 1 }
 0xb4f   :  { %v1754_v44 = vrot.slane %v1749_v2, 1 }
 0xb51   :  { %v1745_v42 = vpop.permute.xlu0 %1744 }
 0xb52   :  { %v1751_v15 = vpop.permute.xlu1 %1750  ;;  %v1752_v49 = vrot.slane %v1745_v42, 1 }
 0xb53   :  { %v1755_v52 = vrot.slane %v1751_v15, 1  ;;  %v1791_v15 = vld [vmem:[#allocation2 + $0x66] ss:$8 sm:$0x3] }
 0xb55   :  { %v9417_v34 = vpop.eup %9416 }
 0xb56   :  { %v9419_v0 = vpop.eup %9418  ;;  %1766 = vrot.lane.b32.xlu0 %v9417_v34, %s9987_s3 }
 0xb57   :  { %1768 = vrot.lane.b32.xlu1 %v9419_v0, %s9987_s3  ;;  %v1787_v0 = vld [vmem:[#allocation2 + $0x26] ss:$8 sm:$0x3] }
 0xb59   :  { %v9421_v38 = vpop.eup %9420 }
 0xb5a   :  { %v9423_v8 = vpop.eup %9422  ;;  %1764 = vrot.lane.b32.xlu0 %v9421_v38, %s9987_s3  ;;  %v1789_v38 = vld [vmem:[#allocation2 + $0x46] ss:$8 sm:$0x3] }
 0xb5b   :  { %1770 = vrot.lane.b32.xlu1 %v9423_v8, %s9987_s3 }
 0xbc8   :  { %v1767_v45 = vpop.permute.xlu0 %1766 }
 0xbc9   :  { %v1777_v46 = vmul.f32 %v1767_v45, %v1753_v43  ;;  %v1769_v47 = vpop.permute.xlu1 %1768 }
 0xbca   :  { %v1778_v48 = vmul.f32 %v1769_v47, %v1754_v44 }
 0xbcb   :  { %1781 = vst.msk [vmem:[#allocation3 + $0x15] sm:$0x1] %vm426_vm0, %v1777_v46  ;;  %v1793_v50 = vpack.c.bf16 %v1777_v46, %v1777_v46 }
 0xbcc   :  { %1782 = vst.msk [vmem:[#allocation3 + $0x25] sm:$0x1] %vm426_vm0, %v1778_v48  ;;  %v1794_v53 = vpack.c.bf16 %v1778_v48, %v1778_v48  ;;  %v1765_v54 = vpop.permute.xlu0 %1764 }
 0xbcd   :  { %v1809_v55 = vunpack.c.l.b16 %v1793_v50  ;;  %v1776_v57 = vmul.f32 %v1765_v54, %v1752_v49  ;;  %v1771_v59 = vpop.permute.xlu1 %1770 }
 0xbce   :  { %v1810_v61 = vunpack.c.l.b16 %v1794_v53  ;;  %v1779_v62 = vmul.f32 %v1771_v59, %v1755_v52 }
 0xbcf   :  { %1780 = vst.msk [vmem:[#allocation3 + $0x5] sm:$0x1] %vm426_vm0, %v1776_v57  ;;  %v1792_v63 = vpack.c.bf16 %v1776_v57, %v1776_v57  ;;  %v1812_v6 = vrot.slane %v1809_v55, 7 }
 0xbd0   :  { %1783 = vst.msk [vmem:[#allocation3 + $0x35] sm:$0x1] %vm426_vm0, %v1779_v62  ;;  %v1795_v7 = vpack.c.bf16 %v1779_v62, %v1779_v62  ;;  %v1814_v1 = vrot.slane %v1810_v61, 6 }
 0xbd1   :  { %v1808_v11 = vunpack.c.l.b16 %v1792_v63 }
 0xbd2   :  { %v1811_v22 = vunpack.c.l.b16 %v1795_v7 }
 0xbd3   :  { %v1813_v27 = vsel %vm460_vm1, %v1812_v6, %v1808_v11 }
 0xbd4   :  { %v1815_v28 = vsel %vm463_vm2, %v1814_v1, %v1813_v27  ;;  %v1816_v19 = vrot.slane %v1811_v22, 5 }
 0xbd6   :  { %v1817_v29 = vsel %vm466_vm3, %v1816_v19, %v1815_v28 }
 0xbd7   :  { %v1818_v30 = vpack.c.b16 %v1817_v29, %v1817_v29 }
 0xbd9   :  { %8353 = vmatmul.mubr.msk.bf16.vlgmr.msra.gmra.mxu0 %vm234_vm4, %v1818_v30 }
 0xbda   :  { %2434 = vmatprep.mubr.bf16.mxu0 %v12734_v4 }
 0xc99   :  { %v1896_v31 = vpop.f32.mrf.mxu0 }
 0xc9b   :  { %v1898_v32 = vpop.f32.mrf.mxu0 }
 0xc9c   :  { %v1905_v35 = vcombine.low %v1896_v31, %v1898_v32 }
 0xc9d   :  { %v1900_v36 = vpop.f32.mrf.mxu0 }
 0xc9e   :  { %v1912_v37 = vrot.slane %v1905_v35, %v10235_v51 }
 0xc9f   :  { %v1901_v5 = vpop.f32.mrf.mxu0 }
 0xca0   :  { %v1913_v56 = vcombine.high %v1912_v37, %v1912_v37  ;;  %v1920_v3 = vrot.slane %v1912_v37, %v10235_v51 }
 0xca2   :  { %v1927_v58 = vrot.slane %v1913_v56, %v10235_v51  ;;  %v1928_v33 = vcombine.high %v1920_v3, %v1920_v3  ;;  %v1934_v34 = vadd.f32 %v1920_v3, %v1785_v14 }
 0xca4   :  { %v1929_v8 = vcombine.high %v1927_v58, %v1927_v58  ;;  %v1935_v39 = vadd.f32 %v1927_v58, %v1787_v0  ;;  %v1936_v2 = vadd.f32 %v1928_v33, %v1789_v38  ;;  %v8354_v42 = vmul.f32 -1.442695, %v1934_v34 }
 0xca5   :  { %v1966_v61 = vrot.slane %v1934_v34, 1 }
 0xca6   :  { %v1937_v43 = vadd.f32 %v1929_v8, %v1791_v15  ;;  %9424 = vpow2.f32 %v8354_v42  ;;  %v8355_v44 = vmul.f32 -1.442695, %v1935_v39  ;;  %v8356_v45 = vmul.f32 -1.442695, %v1936_v2 }
 0xca7   :  { %v1967_v47 = vrot.slane %v1935_v39, 1  ;;  %v1968_v49 = vrot.slane %v1936_v2, 1 }
 0xca8   :  { %9426 = vpow2.f32 %v8355_v44  ;;  %v8357_v46 = vmul.f32 -1.442695, %v1937_v43  ;;  %v1969_v62 = vrot.slane %v1937_v43, 1 }
 0xca9   :  { %9428 = vpow2.f32 %v8356_v45 }
 0xcaa   :  { %9430 = vpow2.f32 %v8357_v46 }
 0xcab   :  { %9432 = vtanh.f32 %v1967_v47 }
 0xcac   :  { %9434 = vtanh.f32 %v1968_v49 }
 0xcb3   :  { %v9425_v48 = vpop.eup %9424 }
 0xcb4   :  { %v1950_v53 = vadd.f32 1.0, %v9425_v48 }
 0xcb5   :  { %v9427_v50 = vpop.eup %9426 }
 0xcb6   :  { %v9429_v52 = vpop.eup %9428  ;;  %v1951_v54 = vadd.f32 1.0, %v9427_v50 }
 0xcb7   :  { %v9431_v55 = vpop.eup %9430  ;;  %v1952_v57 = vadd.f32 1.0, %v9429_v52 }
 0xcb8   :  { %v1953_v59 = vadd.f32 1.0, %v9431_v55  ;;  %9436 = vrcp.f32 %v1951_v54  ;;  %v9433_v63 = vpop.eup %9432 }
 0xcb9   :  { %9438 = vrcp.f32 %v1952_v57  ;;  %v9435_v7 = vpop.eup %9434 }
 0xcba   :  { %9440 = vrcp.f32 %v1950_v53 }
 0xcbb   :  { %9442 = vrcp.f32 %v1953_v59 }
 0xcbc   :  { %9444 = vtanh.f32 %v1966_v61 }
 0xcbd   :  { %9446 = vtanh.f32 %v1969_v62 }
 0xcc5   :  { %v9437_v6 = vpop.eup %9436 }
 0xcc6   :  { %v9439_v11 = vpop.eup %9438  ;;  %v1983_v1 = vmul.f32 %v9437_v6, %v9433_v63  ;;  %v1979_v32 = vmul.f32 %v9437_v6, %v10519_v21 }
 0xcc7   :  { %v9441_v22 = vpop.eup %9440  ;;  %v1984_v27 = vmul.f32 %v9439_v11, %v9435_v7  ;;  %v1980_v35 = vmul.f32 %v9439_v11, %v10521_v40 }
 0xcc8   :  { %v9443_v28 = vpop.eup %9442  ;;  %1992 = vrot.lane.b32.xlu0 %v1983_v1, %s9987_s3  ;;  %v1978_v3 = vmul.f32 %v9441_v22, %v10527_v60 }
 0xcc9   :  { %v9445_v19 = vpop.eup %9444  ;;  %1994 = vrot.lane.b32.xlu1 %v1984_v27, %s9987_s3  ;;  %v1981_v58 = vmul.f32 %v9443_v28, %v10529_v41 }
 0xcca   :  { %v9447_v29 = vpop.eup %9446  ;;  %v1982_v30 = vmul.f32 %v9445_v19, %v9441_v22 }
 0xccb   :  { %v1985_v31 = vmul.f32 %v9447_v29, %v9443_v28 }
 0xccc   :  { %1990 = vrot.lane.b32.xlu0 %v1982_v30, %s9987_s3 }
 0xccd   :  { %1996 = vrot.lane.b32.xlu1 %v1985_v31, %s9987_s3 }
 0xcd0   :  { %2016 = vrot.lane.b32.xlu0 %v9437_v6, %s9987_s3 }
 0xcd1   :  { %2018 = vrot.lane.b32.xlu1 %v9439_v11, %s9987_s3 }
 0xcd4   :  { %2014 = vrot.lane.b32.xlu0 %v9441_v22, %s9987_s3 }
 0xcd5   :  { %2020 = vrot.lane.b32.xlu1 %v9443_v28, %s9987_s3 }
 0xd3a   :  { %v1993_v36 = vpop.permute.xlu0 %1992 }
 0xd3b   :  { %v1995_v37 = vpop.permute.xlu1 %1994  ;;  %v10559_v5 = vadd.f32 %v1993_v36, %v1979_v32 }
 0xd3c   :  { %v10561_v56 = vadd.f32 %v1995_v37, %v1980_v35 }
 0xd3d   :  { %9448 = vtanh.f32 %v10559_v5 }
 0xd3e   :  { %9450 = vtanh.f32 %v10561_v56  ;;  %v1991_v14 = vpop.permute.xlu0 %1990 }
 0xd3f   :  { %v10567_v33 = vadd.f32 %v1991_v14, %v1978_v3  ;;  %v1997_v21 = vpop.permute.xlu1 %1996  ;;  %v2055_v14 = vld [vmem:[#allocation2 + $0x7] ss:$8 sm:$0x3] }
 0xd40   :  { %v10569_v34 = vadd.f32 %v1997_v21, %v1981_v58 }
 0xd41   :  { %9452 = vtanh.f32 %v10567_v33 }
 0xd42   :  { %9454 = vtanh.f32 %v10569_v34  ;;  %v2017_v41 = vpop.permute.xlu0 %2016 }
 0xd43   :  { %v2019_v8 = vpop.permute.xlu1 %2018  ;;  %v2023_v42 = vrot.slane %v2017_v41, 1 }
 0xd44   :  { %v2024_v15 = vrot.slane %v2019_v8, 1 }
 0xd46   :  { %v2015_v39 = vpop.permute.xlu0 %2014 }
 0xd47   :  { %v2021_v2 = vpop.permute.xlu1 %2020  ;;  %v2022_v47 = vrot.slane %v2015_v39, 1 }
 0xd48   :  { %v2025_v49 = vrot.slane %v2021_v2, 1  ;;  %v2061_v2 = vld [vmem:[#allocation2 + $0x67] ss:$8 sm:$0x3] }
 0xd4a   :  { %v9449_v40 = vpop.eup %9448 }
 0xd4b   :  { %v9451_v0 = vpop.eup %9450  ;;  %2036 = vrot.lane.b32.xlu0 %v9449_v40, %s9987_s3 }
 0xd4c   :  { %2038 = vrot.lane.b32.xlu1 %v9451_v0, %s9987_s3  ;;  %v2057_v0 = vld [vmem:[#allocation2 + $0x27] ss:$8 sm:$0x3] }
 0xd4e   :  { %v9453_v60 = vpop.eup %9452 }
 0xd4f   :  { %v9455_v38 = vpop.eup %9454  ;;  %2034 = vrot.lane.b32.xlu0 %v9453_v60, %s9987_s3  ;;  %v2059_v60 = vld [vmem:[#allocation2 + $0x47] ss:$8 sm:$0x3] }
 0xd50   :  { %2040 = vrot.lane.b32.xlu1 %v9455_v38, %s9987_s3 }
 0xdbd   :  { %v2037_v43 = vpop.permute.xlu0 %2036 }
 0xdbe   :  { %v2047_v44 = vmul.f32 %v2037_v43, %v2023_v42  ;;  %v2039_v45 = vpop.permute.xlu1 %2038 }
 0xdbf   :  { %v2048_v46 = vmul.f32 %v2039_v45, %v2024_v15 }
 0xdc0   :  { %2051 = vst.msk [vmem:[#allocation3 + $0x16] sm:$0x1] %vm426_vm0, %v2047_v44  ;;  %v2063_v48 = vpack.c.bf16 %v2047_v44, %v2047_v44 }
 0xdc1   :  { %2052 = vst.msk [vmem:[#allocation3 + $0x26] sm:$0x1] %vm426_vm0, %v2048_v46  ;;  %v2064_v50 = vpack.c.bf16 %v2048_v46, %v2048_v46  ;;  %v2035_v52 = vpop.permute.xlu0 %2034 }
 0xdc2   :  { %v2079_v53 = vunpack.c.l.b16 %v2063_v48  ;;  %v2046_v54 = vmul.f32 %v2035_v52, %v2022_v47  ;;  %v2041_v55 = vpop.permute.xlu1 %2040 }
 0xdc3   :  { %v2080_v57 = vunpack.c.l.b16 %v2064_v50  ;;  %v2049_v59 = vmul.f32 %v2041_v55, %v2025_v49 }
 0xdc4   :  { %2050 = vst.msk [vmem:[#allocation3 + $0x6] sm:$0x1] %vm426_vm0, %v2046_v54  ;;  %v2062_v61 = vpack.c.bf16 %v2046_v54, %v2046_v54  ;;  %v2082_v63 = vrot.slane %v2079_v53, 7 }
 0xdc5   :  { %2053 = vst.msk [vmem:[#allocation3 + $0x36] sm:$0x1] %vm426_vm0, %v2049_v59  ;;  %v2065_v62 = vpack.c.bf16 %v2049_v59, %v2049_v59  ;;  %v2084_v6 = vrot.slane %v2080_v57, 6 }
 0xdc6   :  { %v2078_v7 = vunpack.c.l.b16 %v2062_v61 }
 0xdc7   :  { %v2081_v11 = vunpack.c.l.b16 %v2065_v62 }
 0xdc8   :  { %v2083_v1 = vsel %vm460_vm1, %v2082_v63, %v2078_v7 }
 0xdc9   :  { %v2085_v22 = vsel %vm463_vm2, %v2084_v6, %v2083_v1  ;;  %v2086_v27 = vrot.slane %v2081_v11, 5 }
 0xdcb   :  { %v2087_v28 = vsel %vm466_vm3, %v2086_v27, %v2085_v22 }
 0xdcc   :  { %v2088_v19 = vpack.c.b16 %v2087_v28, %v2087_v28 }
 0xdce   :  { %8366 = vmatmul.mubr.msk.bf16.vlgmr.msra.gmra.mxu1 %vm234_vm4, %v2088_v19 }
 0xdcf   :  { %2704 = vmatprep.mubr.bf16.mxu1 %v12734_v4 }
 0xe8e   :  { %v2166_v29 = vpop.f32.mrf.mxu1 }
 0xe90   :  { %v2168_v30 = vpop.f32.mrf.mxu1 }
 0xe91   :  { %v2175_v31 = vcombine.low %v2166_v29, %v2168_v30  ;;  %v10597_v30 = vld [vmem:[%s12825_s0 + $0x30] ss:$8 sps:$4 sm:$0xff]  }
 0xe92   :  { %v2170_v32 = vpop.f32.mrf.mxu1 }
 0xe93   :  { %v2182_v35 = vrot.slane %v2175_v31, %v10235_v51  ;;  %v9170_v31 = vld [vmem:[%s12825_s0 + $0x34] ss:$8 sps:$4 sm:$0xff]  }
 0xe94   :  { %v2171_v36 = vpop.f32.mrf.mxu1  ;;  %2410 = vmatprep.subr.bf16.mxu0 %v9170_v31  ;;  %2680 = vmatprep.subr.bf16.mxu1 %v9170_v31 }
 0xe95   :  { %v2183_v37 = vcombine.high %v2182_v35, %v2182_v35  ;;  %v2190_v3 = vrot.slane %v2182_v35, %v10235_v51  ;;  %2411 = vmatpush1.bf16.msra.mxu0 %v10597_v30  ;;  %2681 = vmatpush1.bf16.msra.mxu1 %v10597_v30 }
 0xe97   :  { %v2197_v58 = vrot.slane %v2183_v37, %v10235_v51  ;;  %v2198_v21 = vcombine.high %v2190_v3, %v2190_v3  ;;  %v2204_v40 = vadd.f32 %v2190_v3, %v2055_v14 }
 0xe99   :  { %v2199_v38 = vcombine.high %v2197_v58, %v2197_v58  ;;  %v2205_v41 = vadd.f32 %v2197_v58, %v2057_v0  ;;  %v2206_v8 = vadd.f32 %v2198_v21, %v2059_v60  ;;  %v8367_v39 = vmul.f32 -1.442695, %v2204_v40 }
 0xe9a   :  { %v2236_v57 = vrot.slane %v2204_v40, 1 }
 0xe9b   :  { %v2207_v42 = vadd.f32 %v2199_v38, %v2061_v2  ;;  %9456 = vpow2.f32 %v8367_v39  ;;  %v8368_v15 = vmul.f32 -1.442695, %v2205_v41  ;;  %v8369_v43 = vmul.f32 -1.442695, %v2206_v8  ;;  %v10645_v38 = vld [vmem:[%s12825_s0 + $0x10] ss:$8 sps:$4 sm:$0xff]  }
 0xe9c   :  { %v2237_v45 = vrot.slane %v2205_v41, 1  ;;  %v2238_v47 = vrot.slane %v2206_v8, 1  ;;  %v10655_v39 = vld [vmem:[%s12825_s0 + $0x4] ss:$8 sps:$4 sm:$0xff]   ;;  %v10661_v2 = vld [vmem:[%s12825_s0] ss:$8 sps:$4 sm:$0xff]  }
 0xe9d   :  { %9458 = vpow2.f32 %v8368_v15  ;;  %v8370_v44 = vmul.f32 -1.442695, %v2207_v42  ;;  %v2239_v59 = vrot.slane %v2207_v42, 1 }
 0xe9e   :  { %9460 = vpow2.f32 %v8369_v43 }
 0xe9f   :  { %9462 = vpow2.f32 %v8370_v44 }
 0xea0   :  { %9464 = vtanh.f32 %v2237_v45 }
 0xea1   :  { %9466 = vtanh.f32 %v2238_v47 }
 0xea8   :  { %v9457_v46 = vpop.eup %9456 }
 0xea9   :  { %v2220_v50 = vadd.f32 1.0, %v9457_v46 }
 0xeaa   :  { %v9459_v48 = vpop.eup %9458 }
 0xeab   :  { %v9461_v49 = vpop.eup %9460  ;;  %v2221_v52 = vadd.f32 1.0, %v9459_v48 }
 0xeac   :  { %v9463_v53 = vpop.eup %9462  ;;  %v2222_v54 = vadd.f32 1.0, %v9461_v49 }
 0xead   :  { %v2223_v55 = vadd.f32 1.0, %v9463_v53  ;;  %9468 = vrcp.f32 %v2221_v52  ;;  %v9465_v61 = vpop.eup %9464 }
 0xeae   :  { %9470 = vrcp.f32 %v2222_v54  ;;  %v9467_v62 = vpop.eup %9466 }
 0xeaf   :  { %9472 = vrcp.f32 %v2220_v50 }
 0xeb0   :  { %9474 = vrcp.f32 %v2223_v55 }
 0xeb1   :  { %9476 = vtanh.f32 %v2236_v57 }
 0xeb2   :  { %9478 = vtanh.f32 %v2239_v59 }
 0xeba   :  { %v9469_v63 = vpop.eup %9468 }
 0xebb   :  { %v9471_v7 = vpop.eup %9470  ;;  %v2253_v6 = vmul.f32 %v9469_v63, %v9465_v61  ;;  %v2249_v32 = vmul.f32 %v9469_v63, %v10559_v5 }
 0xebc   :  { %v9473_v11 = vpop.eup %9472  ;;  %v2254_v1 = vmul.f32 %v9471_v7, %v9467_v62  ;;  %v2250_v35 = vmul.f32 %v9471_v7, %v10561_v56  ;;  %v10626_v56 = vld [vmem:[%s12825_s0 + $0x24] ss:$8 sps:$4 sm:$0xff]  }
 0xebd   :  { %v9475_v22 = vpop.eup %9474  ;;  %2262 = vrot.lane.b32.xlu0 %v2253_v6, %s9987_s3  ;;  %v2248_v58 = vmul.f32 %v9473_v11, %v10567_v33  ;;  %v10631_v33 = vld [vmem:[%s12825_s0 + $0x20] ss:$8 sps:$4 sm:$0xff]   ;;  %2412 = vmatprep.subr.bf16.mxu0 %v10626_v56 }
 0xebe   :  { %v9477_v27 = vpop.eup %9476  ;;  %2264 = vrot.lane.b32.xlu1 %v2254_v1, %s9987_s3  ;;  %v2251_v40 = vmul.f32 %v9475_v22, %v10569_v34  ;;  %2682 = vmatprep.subr.bf16.mxu1 %v10626_v56  ;;  %v10640_v34 = vld [vmem:[%s12825_s0 + $0x14] ss:$8 sps:$4 sm:$0xff]  }
 0xebf   :  { %v9479_v28 = vpop.eup %9478  ;;  %v2252_v19 = vmul.f32 %v9477_v27, %v9473_v11  ;;  %2413 = vmatpush1.bf16.msra.mxu0 %v10631_v33  ;;  %2683 = vmatpush1.bf16.msra.mxu1 %v10631_v33 }
 0xec0   :  { %v2255_v29 = vmul.f32 %v9479_v28, %v9475_v22  ;;  %2414 = vmatprep.subr.bf16.mxu0 %v10640_v34  ;;  %2684 = vmatprep.subr.bf16.mxu1 %v10640_v34 }
 0xec1   :  { %2260 = vrot.lane.b32.xlu0 %v2252_v19, %s9987_s3 }
 0xec2   :  { %2266 = vrot.lane.b32.xlu1 %v2255_v29, %s9987_s3 }
 0xec3   :  { %2415 = vmatpush1.bf16.msra.mxu0 %v10645_v38  ;;  %2685 = vmatpush1.bf16.msra.mxu1 %v10645_v38 }
 0xec4   :  { %2416 = vmatprep.subr.bf16.mxu0 %v10655_v39  ;;  %2686 = vmatprep.subr.bf16.mxu1 %v10655_v39 }
 0xec5   :  { %2286 = vrot.lane.b32.xlu0 %v9469_v63, %s9987_s3 }
 0xec6   :  { %2288 = vrot.lane.b32.xlu1 %v9471_v7, %s9987_s3 }
 0xec7   :  { %2417 = vmatpush1.bf16.msra.mxu0 %v10661_v2  ;;  %2687 = vmatpush1.bf16.msra.mxu1 %v10661_v2 }
 0xec8   :  { %2950 = vmatprep.subr.bf16.mxu0 %v9170_v31  ;;  %3220 = vmatprep.subr.bf16.mxu1 %v9170_v31 }
 0xec9   :  { %2284 = vrot.lane.b32.xlu0 %v9473_v11, %s9987_s3 }
 0xeca   :  { %2290 = vrot.lane.b32.xlu1 %v9475_v22, %s9987_s3 }
 0xf2f   :  { %v2263_v36 = vpop.permute.xlu0 %2262 }
 0xf30   :  { %v2265_v37 = vpop.permute.xlu1 %2264  ;;  %v10609_v3 = vadd.f32 %v2263_v36, %v2249_v32 }
 0xf31   :  { %v10611_v14 = vadd.f32 %v2265_v37, %v2250_v35 }
 0xf32   :  { %9480 = vtanh.f32 %v10609_v3 }
 0xf33   :  { %9482 = vtanh.f32 %v10611_v14  ;;  %v2261_v21 = vpop.permute.xlu0 %2260 }
 0xf34   :  { %v10617_v0 = vadd.f32 %v2261_v21, %v2248_v58  ;;  %v2267_v5 = vpop.permute.xlu1 %2266 }
 0xf35   :  { %v10619_v60 = vadd.f32 %v2267_v5, %v2251_v40 }
 0xf36   :  { %9484 = vtanh.f32 %v10617_v0 }
 0xf37   :  { %9486 = vtanh.f32 %v10619_v60  ;;  %v2287_v43 = vpop.permute.xlu0 %2286 }
 0xf38   :  { %v2289_v44 = vpop.permute.xlu1 %2288  ;;  %v2293_v47 = vrot.slane %v2287_v43, 1 }
 0xf39   :  { %v2294_v48 = vrot.slane %v2289_v44, 1 }
 0xf3b   :  { %v2285_v45 = vpop.permute.xlu0 %2284 }
 0xf3c   :  { %v2291_v46 = vpop.permute.xlu1 %2290  ;;  %v2292_v54 = vrot.slane %v2285_v45, 1 }
 0xf3d   :  { %v2295_v55 = vrot.slane %v2291_v46, 1 }
 0xf3f   :  { %v9481_v41 = vpop.eup %9480 }
 0xf40   :  { %v9483_v8 = vpop.eup %9482  ;;  %2306 = vrot.lane.b32.xlu0 %v9481_v41, %s9987_s3 }
 0xf41   :  { %2308 = vrot.lane.b32.xlu1 %v9483_v8, %s9987_s3 }
 0xf43   :  { %v9485_v42 = vpop.eup %9484 }
 0xf44   :  { %v9487_v15 = vpop.eup %9486  ;;  %2304 = vrot.lane.b32.xlu0 %v9485_v42, %s9987_s3 }
 0xf45   :  { %2310 = vrot.lane.b32.xlu1 %v9487_v15, %s9987_s3 }
 0xf48   :  { %83 = vbcast.lane.b32.xlu0 %v10161_v16, 264 }
 0xf49   :  { %94 = vbcast.lane.b32.xlu1 %v10170_v18, 264 }
 0xf4c   :  { %72 = vbcast.lane.b32.xlu0 %v10164_v17, 264 }
 0xf4d   :  { %105 = vbcast.lane.b32.xlu1 %v10179_v20, 264 }
 0xfb2   :  { %v2307_v49 = vpop.permute.xlu0 %2306 }
 0xfb3   :  { %v2317_v50 = vmul.f32 %v2307_v49, %v2293_v47  ;;  %v2309_v52 = vpop.permute.xlu1 %2308 }
 0xfb4   :  { %v2318_v53 = vmul.f32 %v2309_v52, %v2294_v48 }
 0xfb5   :  { %2321 = vst.msk [vmem:[#allocation3 + $0x17] sm:$0x1] %vm426_vm0, %v2317_v50  ;;  %v2333_v16 = vpack.c.bf16 %v2317_v50, %v2317_v50 }
 0xfb6   :  { %2322 = vst.msk [vmem:[#allocation3 + $0x27] sm:$0x1] %vm426_vm0, %v2318_v53  ;;  %v2334_v17 = vpack.c.bf16 %v2318_v53, %v2318_v53  ;;  %v2305_v18 = vpop.permute.xlu0 %2304 }
 0xfb7   :  { %v2349_v20 = vunpack.c.l.b16 %v2333_v16  ;;  %v2316_v57 = vmul.f32 %v2305_v18, %v2292_v54  ;;  %v2311_v59 = vpop.permute.xlu1 %2310 }
 0xfb8   :  { %v2350_v61 = vunpack.c.l.b16 %v2334_v17  ;;  %v2319_v62 = vmul.f32 %v2311_v59, %v2295_v55 }
 0xfb9   :  { %2320 = vst.msk [vmem:[#allocation3 + $0x7] sm:$0x1] %vm426_vm0, %v2316_v57  ;;  %v2332_v63 = vpack.c.bf16 %v2316_v57, %v2316_v57  ;;  %v2352_v11 = vrot.slane %v2349_v20, 7 }
 0xfba   :  { %2323 = vst.msk [vmem:[#allocation3 + $0x37] sm:$0x1] %vm426_vm0, %v2319_v62  ;;  %v2335_v7 = vpack.c.bf16 %v2319_v62, %v2319_v62  ;;  %v84_v6 = vpop.permute.xlu0 %83  ;;  %v2354_v19 = vrot.slane %v2350_v61, 6 }
 0xfbb   :  { %v2348_v1 = vunpack.c.l.b16 %v2332_v63  ;;  %v125_v22 = vmul.f32 %v10207_v23, %v84_v6  ;;  %v126_v27 = vmul.f32 %v10210_v24, %v84_v6  ;;  %v95_v28 = vpop.permute.xlu1 %94 }
 0xfbc   :  { %v2351_v29 = vunpack.c.l.b16 %v2335_v7  ;;  %v129_v31 = vmul.f32 %v10207_v23, %v95_v28  ;;  %v130_v32 = vmul.f32 %v10210_v24, %v95_v28 }
 0xfbd   :  { %v2353_v35 = vsel %vm460_vm1, %v2352_v11, %v2348_v1  ;;  %v153_v36 = vadd.f32 %v10213_v25, %v125_v22  ;;  %v154_v37 = vadd.f32 %v10216_v26, %v126_v27 }
 0xfbe   :  { %v2355_v58 = vsel %vm463_vm2, %v2354_v19, %v2353_v35  ;;  %v2356_v21 = vrot.slane %v2351_v29, 5  ;;  %v73_v40 = vpop.permute.xlu0 %72  ;;  %v157_v5 = vadd.f32 %v10213_v25, %v129_v31  ;;  %v158_v41 = vadd.f32 %v10216_v26, %v130_v32 }
 0xfbf   :  { %169 = vst [vmem:[#allocation2 + $0x30] sm:$0xff] %v153_v36  ;;  %170 = vst [vmem:[#allocation2 + $0x38] sm:$0xff] %v154_v37  ;;  %v121_v8 = vmul.f32 %v10207_v23, %v73_v40  ;;  %v122_v42 = vmul.f32 %v10210_v24, %v73_v40  ;;  %v106_v46 = vpop.permute.xlu1 %105 }
 0xfc0   :  { %v2357_v15 = vsel %vm466_vm3, %v2356_v21, %v2355_v58  ;;  %173 = vst [vmem:[#allocation2 + $0x50] sm:$0xff] %v157_v5  ;;  %174 = vst [vmem:[#allocation2 + $0x58] sm:$0xff] %v158_v41  ;;  %v133_v47 = vmul.f32 %v10207_v23, %v106_v46  ;;  %v134_v48 = vmul.f32 %v10210_v24, %v106_v46 }
 0xfc1   :  { %v2358_v43 = vpack.c.b16 %v2357_v15, %v2357_v15  ;;  %v149_v44 = vadd.f32 %v10213_v25, %v121_v8  ;;  %v150_v45 = vadd.f32 %v10216_v26, %v122_v42 }
 0xfc2   :  { %v161_v49 = vadd.f32 %v10213_v25, %v133_v47  ;;  %v162_v50 = vadd.f32 %v10216_v26, %v134_v48 }
 0xfc3   :  { %8379 = vmatmul.mubr.msk.bf16.vlgmr.msra.gmra.mxu0 %vm234_vm4, %v2358_v43  ;;  %165 = vst [vmem:[#allocation2 + $0x10] sm:$0xff] %v149_v44  ;;  %166 = vst [vmem:[#allocation2 + $0x18] sm:$0xff] %v150_v45 }
 0xfc4   :  { %2951 = vmatpush1.bf16.msra.mxu0 %v10597_v30  ;;  %2974 = vmatprep.mubr.bf16.mxu0 %v12734_v4  ;;  %177 = vst [vmem:[#allocation2 + $0x70] sm:$0xff] %v161_v49  ;;  %178 = vst [vmem:[#allocation2 + $0x78] sm:$0xff] %v162_v50 }
 0xfc5   :  { %2952 = vmatprep.subr.bf16.mxu0 %v10626_v56 }
 0xfc6   :  { %v2327_v23 = vld [vmem:[#allocation2 + $0x30] ss:$8 sm:$0x3] }
 0xfc7   :  { %v2329_v59 = vld [vmem:[#allocation2 + $0x50] ss:$8 sm:$0x3] }
 0xfc8   :  { %2953 = vmatpush1.bf16.msra.mxu0 %v10631_v33 }
 0xfc9   :  { %2954 = vmatprep.subr.bf16.mxu0 %v10640_v34 }
 0xfca   :  { %v2325_v17 = vld [vmem:[#allocation2 + $0x10] ss:$8 sm:$0x3] }
 0xfcb   :  { %v2331_v26 = vld [vmem:[#allocation2 + $0x70] ss:$8 sm:$0x3] }
 0xfcc   :  { %2955 = vmatpush1.bf16.msra.mxu0 %v10645_v38 }
 0xfcd   :  { %2956 = vmatprep.subr.bf16.mxu0 %v10655_v39 }
 0xfd0   :  { %2957 = vmatpush1.bf16.msra.mxu0 %v10661_v2 }
0x1083   :  { %v2436_v52 = vpop.f32.mrf.mxu0 }
0x1085   :  { %v2438_v53 = vpop.f32.mrf.mxu0 }
0x1086   :  { %v2445_v54 = vcombine.low %v2436_v52, %v2438_v53 }
0x1087   :  { %v2440_v16 = vpop.f32.mrf.mxu0 }
0x1088   :  { %v2452_v55 = vrot.slane %v2445_v54, %v10235_v51 }
0x1089   :  { %v2441_v18 = vpop.f32.mrf.mxu0 }
0x108a   :  { %v2453_v20 = vcombine.high %v2452_v55, %v2452_v55  ;;  %v2460_v57 = vrot.slane %v2452_v55, %v10235_v51 }
0x108c   :  { %v2467_v24 = vrot.slane %v2453_v20, %v10235_v51  ;;  %v2468_v25 = vcombine.high %v2460_v57, %v2460_v57  ;;  %v2474_v61 = vadd.f32 %v2460_v57, %v2325_v17 }
0x108e   :  { %v2469_v62 = vcombine.high %v2467_v24, %v2467_v24  ;;  %v2475_v63 = vadd.f32 %v2467_v24, %v2327_v23  ;;  %v2476_v7 = vadd.f32 %v2468_v25, %v2329_v59  ;;  %v8380_v6 = vmul.f32 -1.442695, %v2474_v61 }
0x108f   :  { %v2506_v40 = vrot.slane %v2474_v61, 1 }
0x1090   :  { %v2477_v11 = vadd.f32 %v2469_v62, %v2331_v26  ;;  %9488 = vpow2.f32 %v8380_v6  ;;  %v8381_v1 = vmul.f32 -1.442695, %v2475_v63  ;;  %v8382_v22 = vmul.f32 -1.442695, %v2476_v7 }
0x1091   :  { %v2507_v28 = vrot.slane %v2475_v63, 1  ;;  %v2508_v29 = vrot.slane %v2476_v7, 1 }
0x1092   :  { %9490 = vpow2.f32 %v8381_v1  ;;  %v8383_v27 = vmul.f32 -1.442695, %v2477_v11  ;;  %v2509_v5 = vrot.slane %v2477_v11, 1 }
0x1093   :  { %9492 = vpow2.f32 %v8382_v22 }
0x1094   :  { %9494 = vpow2.f32 %v8383_v27 }
0x1095   :  { %9496 = vtanh.f32 %v2507_v28 }
0x1096   :  { %9498 = vtanh.f32 %v2508_v29 }
0x109d   :  { %v9489_v19 = vpop.eup %9488 }
0x109e   :  { %v2490_v35 = vadd.f32 1.0, %v9489_v19 }
0x109f   :  { %v9491_v31 = vpop.eup %9490 }
0x10a0   :  { %v9493_v32 = vpop.eup %9492  ;;  %v2491_v36 = vadd.f32 1.0, %v9491_v31 }
0x10a1   :  { %v9495_v37 = vpop.eup %9494  ;;  %v2492_v58 = vadd.f32 1.0, %v9493_v32 }
0x10a2   :  { %v2493_v21 = vadd.f32 1.0, %v9495_v37  ;;  %9500 = vrcp.f32 %v2491_v36  ;;  %v9497_v41 = vpop.eup %9496 }
0x10a3   :  { %9502 = vrcp.f32 %v2492_v58  ;;  %v9499_v8 = vpop.eup %9498 }
0x10a4   :  { %9504 = vrcp.f32 %v2490_v35 }
0x10a5   :  { %9506 = vrcp.f32 %v2493_v21 }
0x10a6   :  { %9508 = vtanh.f32 %v2506_v40 }
0x10a7   :  { %9510 = vtanh.f32 %v2509_v5 }
0x10af   :  { %v9501_v42 = vpop.eup %9500 }
0x10b0   :  { %v9503_v15 = vpop.eup %9502  ;;  %v2523_v43 = vmul.f32 %v9501_v42, %v9497_v41  ;;  %v2519_v52 = vmul.f32 %v9501_v42, %v10609_v3 }
0x10b1   :  { %v9505_v44 = vpop.eup %9504  ;;  %v2524_v45 = vmul.f32 %v9503_v15, %v9499_v8  ;;  %v2520_v54 = vmul.f32 %v9503_v15, %v10611_v14 }
0x10b2   :  { %v9507_v46 = vpop.eup %9506  ;;  %2532 = vrot.lane.b32.xlu0 %v2523_v43, %s9987_s3  ;;  %v2518_v18 = vmul.f32 %v9505_v44, %v10617_v0 }
0x10b3   :  { %v9509_v47 = vpop.eup %9508  ;;  %2534 = vrot.lane.b32.xlu1 %v2524_v45, %s9987_s3  ;;  %v2521_v57 = vmul.f32 %v9507_v46, %v10619_v60 }
0x10b4   :  { %v9511_v48 = vpop.eup %9510  ;;  %v2522_v49 = vmul.f32 %v9509_v47, %v9505_v44 }
0x10b5   :  { %v2525_v50 = vmul.f32 %v9511_v48, %v9507_v46 }
0x10b6   :  { %2530 = vrot.lane.b32.xlu0 %v2522_v49, %s9987_s3 }
0x10b7   :  { %2536 = vrot.lane.b32.xlu1 %v2525_v50, %s9987_s3 }
0x10ba   :  { %2556 = vrot.lane.b32.xlu0 %v9501_v42, %s9987_s3 }
0x10bb   :  { %2558 = vrot.lane.b32.xlu1 %v9503_v15, %s9987_s3 }
0x10be   :  { %2554 = vrot.lane.b32.xlu0 %v9505_v44, %s9987_s3 }
0x10bf   :  { %2560 = vrot.lane.b32.xlu1 %v9507_v46, %s9987_s3 }
0x1124   :  { %v2533_v53 = vpop.permute.xlu0 %2532 }
0x1125   :  { %v10718_v16 = vadd.f32 %v2533_v53, %v2519_v52  ;;  %v2535_v55 = vpop.permute.xlu1 %2534 }
0x1126   :  { %v10720_v17 = vadd.f32 %v2535_v55, %v2520_v54  ;;  %v2595_v54 = vld [vmem:[#allocation2 + $0x11] ss:$8 sm:$0x3] }
0x1127   :  { %9512 = vtanh.f32 %v10718_v16 }
0x1128   :  { %9514 = vtanh.f32 %v10720_v17  ;;  %v2531_v20 = vpop.permute.xlu0 %2530 }
0x1129   :  { %v10726_v23 = vadd.f32 %v2531_v20, %v2518_v18  ;;  %v2537_v3 = vpop.permute.xlu1 %2536  ;;  %v2599_v18 = vld [vmem:[#allocation2 + $0x51] ss:$8 sm:$0x3] }
0x112a   :  { %v10728_v59 = vadd.f32 %v2537_v3, %v2521_v57  ;;  %v2601_v3 = vld [vmem:[#allocation2 + $0x71] ss:$8 sm:$0x3] }
0x112b   :  { %9516 = vtanh.f32 %v10726_v23 }
0x112c   :  { %9518 = vtanh.f32 %v10728_v59  ;;  %v2557_v60 = vpop.permute.xlu0 %2556 }
0x112d   :  { %v2559_v61 = vpop.permute.xlu1 %2558  ;;  %v2563_v63 = vrot.slane %v2557_v60, 1 }
0x112e   :  { %v2564_v7 = vrot.slane %v2559_v61, 1 }
0x1130   :  { %v2555_v26 = vpop.permute.xlu0 %2554 }
0x1131   :  { %v2561_v62 = vpop.permute.xlu1 %2560  ;;  %v2562_v27 = vrot.slane %v2555_v26, 1 }
0x1132   :  { %v2565_v19 = vrot.slane %v2561_v62, 1 }
0x1134   :  { %v9513_v14 = vpop.eup %9512 }
0x1135   :  { %v9515_v24 = vpop.eup %9514  ;;  %2576 = vrot.lane.b32.xlu0 %v9513_v14, %s9987_s3 }
0x1136   :  { %2578 = vrot.lane.b32.xlu1 %v9515_v24, %s9987_s3 }
0x1138   :  { %v9517_v0 = vpop.eup %9516 }
0x1139   :  { %v9519_v25 = vpop.eup %9518  ;;  %2574 = vrot.lane.b32.xlu0 %v9517_v0, %s9987_s3 }
0x113a   :  { %2580 = vrot.lane.b32.xlu1 %v9519_v25, %s9987_s3 }
0x11a7   :  { %v2577_v6 = vpop.permute.xlu0 %2576 }
0x11a8   :  { %v2587_v11 = vmul.f32 %v2577_v6, %v2563_v63  ;;  %v2579_v1 = vpop.permute.xlu1 %2578 }
0x11a9   :  { %v2588_v22 = vmul.f32 %v2579_v1, %v2564_v7 }
0x11aa   :  { %2591 = vst.msk [vmem:[#allocation3 + $0x18] sm:$0x1] %vm426_vm0, %v2587_v11  ;;  %v2603_v28 = vpack.c.bf16 %v2587_v11, %v2587_v11 }
0x11ab   :  { %2592 = vst.msk [vmem:[#allocation3 + $0x28] sm:$0x1] %vm426_vm0, %v2588_v22  ;;  %v2604_v29 = vpack.c.bf16 %v2588_v22, %v2588_v22  ;;  %v2575_v31 = vpop.permute.xlu0 %2574 }
0x11ac   :  { %v2619_v32 = vunpack.c.l.b16 %v2603_v28  ;;  %v2586_v35 = vmul.f32 %v2575_v31, %v2562_v27  ;;  %v2581_v36 = vpop.permute.xlu1 %2580 }
0x11ad   :  { %v2620_v37 = vunpack.c.l.b16 %v2604_v29  ;;  %v2589_v58 = vmul.f32 %v2581_v36, %v2565_v19 }
0x11ae   :  { %2590 = vst.msk [vmem:[#allocation3 + $0x8] sm:$0x1] %vm426_vm0, %v2586_v35  ;;  %v2602_v21 = vpack.c.bf16 %v2586_v35, %v2586_v35  ;;  %v2622_v5 = vrot.slane %v2619_v32, 7 }
0x11af   :  { %2593 = vst.msk [vmem:[#allocation3 + $0x38] sm:$0x1] %vm426_vm0, %v2589_v58  ;;  %v2605_v40 = vpack.c.bf16 %v2589_v58, %v2589_v58  ;;  %v2624_v8 = vrot.slane %v2620_v37, 6 }
0x11b0   :  { %v2618_v41 = vunpack.c.l.b16 %v2602_v21 }
0x11b1   :  { %v2621_v42 = vunpack.c.l.b16 %v2605_v40 }
0x11b2   :  { %v2623_v15 = vsel %vm460_vm1, %v2622_v5, %v2618_v41 }
0x11b3   :  { %v2625_v43 = vsel %vm463_vm2, %v2624_v8, %v2623_v15  ;;  %v2626_v44 = vrot.slane %v2621_v42, 5 }
0x11b5   :  { %v2627_v45 = vsel %vm466_vm3, %v2626_v44, %v2625_v43 }
0x11b6   :  { %v2628_v46 = vpack.c.b16 %v2627_v45, %v2627_v45 }
0x11b8   :  { %8392 = vmatmul.mubr.msk.bf16.vlgmr.msra.gmra.mxu1 %vm234_vm4, %v2628_v46 }
0x11b9   :  { %3221 = vmatpush1.bf16.msra.mxu1 %v10597_v30  ;;  %3244 = vmatprep.mubr.bf16.mxu1 %v12734_v4 }
0x11ba   :  { %3222 = vmatprep.subr.bf16.mxu1 %v10626_v56 }
0x11bd   :  { %3223 = vmatpush1.bf16.msra.mxu1 %v10631_v33 }
0x11be   :  { %3224 = vmatprep.subr.bf16.mxu1 %v10640_v34 }
0x11c1   :  { %3225 = vmatpush1.bf16.msra.mxu1 %v10645_v38  ;;  %v2597_v38 = vld [vmem:[#allocation2 + $0x31] ss:$8 sm:$0x3] }
0x11c2   :  { %3226 = vmatprep.subr.bf16.mxu1 %v10655_v39 }
0x11c5   :  { %3227 = vmatpush1.bf16.msra.mxu1 %v10661_v2 }
0x1278   :  { %v2706_v47 = vpop.f32.mrf.mxu1 }
0x127a   :  { %v2708_v48 = vpop.f32.mrf.mxu1 }
0x127b   :  { %v2715_v49 = vcombine.low %v2706_v47, %v2708_v48 }
0x127c   :  { %v2710_v50 = vpop.f32.mrf.mxu1 }
0x127d   :  { %v2722_v30 = vrot.slane %v2715_v49, %v10235_v51 }
0x127e   :  { %v2711_v52 = vpop.f32.mrf.mxu1 }
0x127f   :  { %v2723_v53 = vcombine.high %v2722_v30, %v2722_v30  ;;  %v2730_v56 = vrot.slane %v2722_v30, %v10235_v51 }
0x1281   :  { %v2737_v33 = vrot.slane %v2723_v53, %v10235_v51  ;;  %v2738_v34 = vcombine.high %v2730_v56, %v2730_v56  ;;  %v2744_v55 = vadd.f32 %v2730_v56, %v2595_v54 }
0x1283   :  { %v2739_v39 = vcombine.high %v2737_v33, %v2737_v33  ;;  %v2745_v20 = vadd.f32 %v2737_v33, %v2597_v38  ;;  %v2746_v2 = vadd.f32 %v2738_v34, %v2599_v18  ;;  %v8393_v57 = vmul.f32 -1.442695, %v2744_v55 }
0x1284   :  { %v2776_v27 = vrot.slane %v2744_v55, 1 }
0x1285   :  { %v2747_v14 = vadd.f32 %v2739_v39, %v2601_v3  ;;  %9520 = vpow2.f32 %v8393_v57  ;;  %v8394_v24 = vmul.f32 -1.442695, %v2745_v20  ;;  %v8395_v0 = vmul.f32 -1.442695, %v2746_v2 }
0x1286   :  { %v2777_v60 = vrot.slane %v2745_v20, 1  ;;  %v2778_v26 = vrot.slane %v2746_v2, 1 }
0x1287   :  { %9522 = vpow2.f32 %v8394_v24  ;;  %v8396_v25 = vmul.f32 -1.442695, %v2747_v14  ;;  %v2779_v28 = vrot.slane %v2747_v14, 1 }
0x1288   :  { %9524 = vpow2.f32 %v8395_v0 }
0x1289   :  { %9526 = vpow2.f32 %v8396_v25 }
0x128a   :  { %9528 = vtanh.f32 %v2777_v60 }
0x128b   :  { %9530 = vtanh.f32 %v2778_v26 }
0x1292   :  { %v9521_v61 = vpop.eup %9520 }
0x1293   :  { %v2760_v7 = vadd.f32 1.0, %v9521_v61 }
0x1294   :  { %v9523_v62 = vpop.eup %9522 }
0x1295   :  { %v9525_v63 = vpop.eup %9524  ;;  %v2761_v6 = vadd.f32 1.0, %v9523_v62 }
0x1296   :  { %v9527_v11 = vpop.eup %9526  ;;  %v2762_v1 = vadd.f32 1.0, %v9525_v63 }
0x1297   :  { %v2763_v22 = vadd.f32 1.0, %v9527_v11  ;;  %9532 = vrcp.f32 %v2761_v6  ;;  %v9529_v19 = vpop.eup %9528 }
0x1298   :  { %9534 = vrcp.f32 %v2762_v1  ;;  %v9531_v29 = vpop.eup %9530 }
0x1299   :  { %9536 = vrcp.f32 %v2760_v7 }
0x129a   :  { %9538 = vrcp.f32 %v2763_v22 }
0x129b   :  { %9540 = vtanh.f32 %v2776_v27 }
0x129c   :  { %9542 = vtanh.f32 %v2779_v28 }
0x12a4   :  { %v9533_v31 = vpop.eup %9532 }
0x12a5   :  { %v9535_v32 = vpop.eup %9534  ;;  %v2793_v35 = vmul.f32 %v9533_v31, %v9529_v19  ;;  %v2789_v8 = vmul.f32 %v9533_v31, %v10718_v16 }
0x12a6   :  { %v9537_v36 = vpop.eup %9536  ;;  %v2794_v37 = vmul.f32 %v9535_v32, %v9531_v29  ;;  %v2790_v42 = vmul.f32 %v9535_v32, %v10720_v17 }
0x12a7   :  { %v9539_v58 = vpop.eup %9538  ;;  %2802 = vrot.lane.b32.xlu0 %v2793_v35, %s9987_s3  ;;  %v2788_v46 = vmul.f32 %v9537_v36, %v10726_v23 }
0x12a8   :  { %v9541_v21 = vpop.eup %9540  ;;  %2804 = vrot.lane.b32.xlu1 %v2794_v37, %s9987_s3  ;;  %v2791_v48 = vmul.f32 %v9539_v58, %v10728_v59 }
0x12a9   :  { %v9543_v40 = vpop.eup %9542  ;;  %v2792_v5 = vmul.f32 %v9541_v21, %v9537_v36 }
0x12aa   :  { %v2795_v41 = vmul.f32 %v9543_v40, %v9539_v58  ;;  %v2865_v40 = vld [vmem:[#allocation2 + $0x12] ss:$8 sm:$0x3] }
0x12ab   :  { %2800 = vrot.lane.b32.xlu0 %v2792_v5, %s9987_s3 }
0x12ac   :  { %2806 = vrot.lane.b32.xlu1 %v2795_v41, %s9987_s3 }
0x12af   :  { %2826 = vrot.lane.b32.xlu0 %v9533_v31, %s9987_s3 }
0x12b0   :  { %2828 = vrot.lane.b32.xlu1 %v9535_v32, %s9987_s3 }
0x12b3   :  { %2824 = vrot.lane.b32.xlu0 %v9537_v36, %s9987_s3 }
0x12b4   :  { %2830 = vrot.lane.b32.xlu1 %v9539_v58, %s9987_s3 }
0x1319   :  { %v2803_v15 = vpop.permute.xlu0 %2802 }
0x131a   :  { %v2805_v43 = vpop.permute.xlu1 %2804  ;;  %v10765_v44 = vadd.f32 %v2803_v15, %v2789_v8  ;;  %v2869_v15 = vld [vmem:[#allocation2 + $0x52] ss:$8 sm:$0x3] }
0x131b   :  { %v10767_v45 = vadd.f32 %v2805_v43, %v2790_v42  ;;  %v2867_v42 = vld [vmem:[#allocation2 + $0x32] ss:$8 sm:$0x3] }
0x131c   :  { %9544 = vtanh.f32 %v10765_v44 }
0x131d   :  { %9546 = vtanh.f32 %v10767_v45  ;;  %v2801_v47 = vpop.permute.xlu0 %2800 }
0x131e   :  { %v10773_v49 = vadd.f32 %v2801_v47, %v2788_v46  ;;  %v2807_v16 = vpop.permute.xlu1 %2806 }
0x131f   :  { %v10775_v50 = vadd.f32 %v2807_v16, %v2791_v48  ;;  %v2871_v16 = vld [vmem:[#allocation2 + $0x72] ss:$8 sm:$0x3] }
0x1320   :  { %9548 = vtanh.f32 %v10773_v49 }
0x1321   :  { %9550 = vtanh.f32 %v10775_v50  ;;  %v2827_v59 = vpop.permute.xlu0 %2826 }
0x1322   :  { %v2829_v53 = vpop.permute.xlu1 %2828  ;;  %v2833_v33 = vrot.slane %v2827_v59, 1 }
0x1323   :  { %v2834_v34 = vrot.slane %v2829_v53, 1 }
0x1325   :  { %v2825_v56 = vpop.permute.xlu0 %2824 }
0x1326   :  { %v2831_v54 = vpop.permute.xlu1 %2830  ;;  %v2832_v20 = vrot.slane %v2825_v56, 1 }
0x1327   :  { %v2835_v57 = vrot.slane %v2831_v54, 1 }
0x1329   :  { %v9545_v17 = vpop.eup %9544 }
0x132a   :  { %v9547_v30 = vpop.eup %9546  ;;  %2846 = vrot.lane.b32.xlu0 %v9545_v17, %s9987_s3 }
0x132b   :  { %2848 = vrot.lane.b32.xlu1 %v9547_v30, %s9987_s3 }
0x132d   :  { %v9549_v23 = vpop.eup %9548 }
0x132e   :  { %v9551_v52 = vpop.eup %9550  ;;  %2844 = vrot.lane.b32.xlu0 %v9549_v23, %s9987_s3 }
0x132f   :  { %2850 = vrot.lane.b32.xlu1 %v9551_v52, %s9987_s3 }
0x139c   :  { %v2847_v55 = vpop.permute.xlu0 %2846 }
0x139d   :  { %v2857_v38 = vmul.f32 %v2847_v55, %v2833_v33  ;;  %v2849_v18 = vpop.permute.xlu1 %2848 }
0x139e   :  { %v2858_v39 = vmul.f32 %v2849_v18, %v2834_v34 }
0x139f   :  { %2861 = vst.msk [vmem:[#allocation3 + $0x19] sm:$0x1] %vm426_vm0, %v2857_v38  ;;  %v2873_v2 = vpack.c.bf16 %v2857_v38, %v2857_v38 }
0x13a0   :  { %2862 = vst.msk [vmem:[#allocation3 + $0x29] sm:$0x1] %vm426_vm0, %v2858_v39  ;;  %v2874_v3 = vpack.c.bf16 %v2858_v39, %v2858_v39  ;;  %v2845_v14 = vpop.permute.xlu0 %2844 }
0x13a1   :  { %v2889_v24 = vunpack.c.l.b16 %v2873_v2  ;;  %v2856_v0 = vmul.f32 %v2845_v14, %v2832_v20  ;;  %v2851_v25 = vpop.permute.xlu1 %2850 }
0x13a2   :  { %v2890_v60 = vunpack.c.l.b16 %v2874_v3  ;;  %v2859_v61 = vmul.f32 %v2851_v25, %v2835_v57 }
0x13a3   :  { %2860 = vst.msk [vmem:[#allocation3 + $0x9] sm:$0x1] %vm426_vm0, %v2856_v0  ;;  %v2872_v26 = vpack.c.bf16 %v2856_v0, %v2856_v0  ;;  %v2892_v63 = vrot.slane %v2889_v24, 7 }
0x13a4   :  { %2863 = vst.msk [vmem:[#allocation3 + $0x39] sm:$0x1] %vm426_vm0, %v2859_v61  ;;  %v2875_v62 = vpack.c.bf16 %v2859_v61, %v2859_v61  ;;  %v2894_v6 = vrot.slane %v2890_v60, 6 }
0x13a5   :  { %v2888_v7 = vunpack.c.l.b16 %v2872_v26 }
0x13a6   :  { %v2891_v11 = vunpack.c.l.b16 %v2875_v62 }
0x13a7   :  { %v2893_v1 = vsel %vm460_vm1, %v2892_v63, %v2888_v7 }
0x13a8   :  { %v2895_v22 = vsel %vm463_vm2, %v2894_v6, %v2893_v1  ;;  %v2896_v27 = vrot.slane %v2891_v11, 5 }
0x13aa   :  { %v2897_v28 = vsel %vm466_vm3, %v2896_v27, %v2895_v22 }
0x13ab   :  { %v2898_v19 = vpack.c.b16 %v2897_v28, %v2897_v28 }
0x13ad   :  { %8405 = vmatmul.mubr.msk.bf16.vlgmr.msra.gmra.mxu0 %vm234_vm4, %v2898_v19 }
0x13ae   :  { %3514 = vmatprep.mubr.bf16.mxu0 %v12734_v4 }
0x146d   :  { %v2976_v29 = vpop.f32.mrf.mxu0 }
0x146f   :  { %v2978_v31 = vpop.f32.mrf.mxu0 }
0x1470   :  { %v2985_v32 = vcombine.low %v2976_v29, %v2978_v31 }
0x1471   :  { %v2980_v35 = vpop.f32.mrf.mxu0 }
0x1472   :  { %v2992_v36 = vrot.slane %v2985_v32, %v10235_v51 }
0x1473   :  { %v2981_v37 = vpop.f32.mrf.mxu0 }
0x1474   :  { %v2993_v58 = vcombine.high %v2992_v36, %v2992_v36  ;;  %v3000_v21 = vrot.slane %v2992_v36, %v10235_v51 }
0x1476   :  { %v3007_v5 = vrot.slane %v2993_v58, %v10235_v51  ;;  %v3008_v41 = vcombine.high %v3000_v21, %v3000_v21  ;;  %v3014_v8 = vadd.f32 %v3000_v21, %v2865_v40 }
0x1478   :  { %v3009_v43 = vcombine.high %v3007_v5, %v3007_v5  ;;  %v3015_v46 = vadd.f32 %v3007_v5, %v2867_v42  ;;  %v3016_v47 = vadd.f32 %v3008_v41, %v2869_v15  ;;  %v8406_v48 = vmul.f32 -1.442695, %v3014_v8 }
0x1479   :  { %v3046_v20 = vrot.slane %v3014_v8, 1 }
0x147a   :  { %v3017_v17 = vadd.f32 %v3009_v43, %v2871_v16  ;;  %9552 = vpow2.f32 %v8406_v48  ;;  %v8407_v30 = vmul.f32 -1.442695, %v3015_v46  ;;  %v8408_v23 = vmul.f32 -1.442695, %v3016_v47 }
0x147b   :  { %v3047_v59 = vrot.slane %v3015_v46, 1  ;;  %v3048_v56 = vrot.slane %v3016_v47, 1 }
0x147c   :  { %9554 = vpow2.f32 %v8407_v30  ;;  %v8409_v52 = vmul.f32 -1.442695, %v3017_v17  ;;  %v3049_v2 = vrot.slane %v3017_v17, 1 }
0x147d   :  { %9556 = vpow2.f32 %v8408_v23 }
0x147e   :  { %9558 = vpow2.f32 %v8409_v52 }
0x147f   :  { %9560 = vtanh.f32 %v3047_v59 }
0x1480   :  { %9562 = vtanh.f32 %v3048_v56 }
0x1487   :  { %v9553_v53 = vpop.eup %9552 }
0x1488   :  { %v3030_v34 = vadd.f32 1.0, %v9553_v53 }
0x1489   :  { %v9555_v54 = vpop.eup %9554 }
0x148a   :  { %v9557_v33 = vpop.eup %9556  ;;  %v3031_v55 = vadd.f32 1.0, %v9555_v54 }
0x148b   :  { %v9559_v38 = vpop.eup %9558  ;;  %v3032_v18 = vadd.f32 1.0, %v9557_v33 }
0x148c   :  { %v3033_v39 = vadd.f32 1.0, %v9559_v38  ;;  %9564 = vrcp.f32 %v3031_v55  ;;  %v9561_v57 = vpop.eup %9560 }
0x148d   :  { %9566 = vrcp.f32 %v3032_v18  ;;  %v9563_v3 = vpop.eup %9562 }
0x148e   :  { %9568 = vrcp.f32 %v3030_v34 }
0x148f   :  { %9570 = vrcp.f32 %v3033_v39 }
0x1490   :  { %9572 = vtanh.f32 %v3046_v20 }
0x1491   :  { %9574 = vtanh.f32 %v3049_v2 }
0x1499   :  { %v9565_v14 = vpop.eup %9564 }
0x149a   :  { %v9567_v24 = vpop.eup %9566  ;;  %v3063_v0 = vmul.f32 %v9565_v14, %v9561_v57  ;;  %v3059_v6 = vmul.f32 %v9565_v14, %v10765_v44 }
0x149b   :  { %v9569_v25 = vpop.eup %9568  ;;  %v3064_v60 = vmul.f32 %v9567_v24, %v9563_v3  ;;  %v3060_v11 = vmul.f32 %v9567_v24, %v10767_v45 }
0x149c   :  { %v9571_v61 = vpop.eup %9570  ;;  %3072 = vrot.lane.b32.xlu0 %v3063_v0, %s9987_s3  ;;  %v3058_v19 = vmul.f32 %v9569_v25, %v10773_v49 }
0x149d   :  { %v9573_v26 = vpop.eup %9572  ;;  %3074 = vrot.lane.b32.xlu1 %v3064_v60, %s9987_s3  ;;  %v3061_v31 = vmul.f32 %v9571_v61, %v10775_v50 }
0x149e   :  { %v9575_v62 = vpop.eup %9574  ;;  %v3062_v63 = vmul.f32 %v9573_v26, %v9569_v25 }
0x149f   :  { %v3065_v7 = vmul.f32 %v9575_v62, %v9571_v61  ;;  %v3135_v62 = vld [vmem:[#allocation2 + $0x13] ss:$8 sm:$0x3] }
0x14a0   :  { %3070 = vrot.lane.b32.xlu0 %v3062_v63, %s9987_s3 }
0x14a1   :  { %3076 = vrot.lane.b32.xlu1 %v3065_v7, %s9987_s3 }
0x14a4   :  { %3096 = vrot.lane.b32.xlu0 %v9565_v14, %s9987_s3 }
0x14a5   :  { %3098 = vrot.lane.b32.xlu1 %v9567_v24, %s9987_s3 }
0x14a8   :  { %3094 = vrot.lane.b32.xlu0 %v9569_v25, %s9987_s3 }
0x14a9   :  { %3100 = vrot.lane.b32.xlu1 %v9571_v61, %s9987_s3 }
0x150e   :  { %v3073_v1 = vpop.permute.xlu0 %3072 }
0x150f   :  { %v3075_v22 = vpop.permute.xlu1 %3074  ;;  %v10805_v27 = vadd.f32 %v3073_v1, %v3059_v6  ;;  %v3139_v1 = vld [vmem:[#allocation2 + $0x53] ss:$8 sm:$0x3] }
0x1510   :  { %v10807_v28 = vadd.f32 %v3075_v22, %v3060_v11  ;;  %v3137_v11 = vld [vmem:[#allocation2 + $0x33] ss:$8 sm:$0x3] }
0x1511   :  { %9576 = vtanh.f32 %v10805_v27 }
0x1512   :  { %9578 = vtanh.f32 %v10807_v28  ;;  %v3071_v29 = vpop.permute.xlu0 %3070 }
0x1513   :  { %v10813_v32 = vadd.f32 %v3071_v29, %v3058_v19  ;;  %v3077_v44 = vpop.permute.xlu1 %3076 }
0x1514   :  { %v10815_v35 = vadd.f32 %v3077_v44, %v3061_v31  ;;  %v3141_v44 = vld [vmem:[#allocation2 + $0x73] ss:$8 sm:$0x3] }
0x1515   :  { %9580 = vtanh.f32 %v10813_v32 }
0x1516   :  { %9582 = vtanh.f32 %v10815_v35  ;;  %v3097_v50 = vpop.permute.xlu0 %3096 }
0x1517   :  { %v3099_v58 = vpop.permute.xlu1 %3098  ;;  %v3103_v5 = vrot.slane %v3097_v50, 1 }
0x1518   :  { %v3104_v41 = vrot.slane %v3099_v58, 1 }
0x151a   :  { %v3095_v21 = vpop.permute.xlu0 %3094 }
0x151b   :  { %v3101_v40 = vpop.permute.xlu1 %3100  ;;  %v3102_v46 = vrot.slane %v3095_v21, 1 }
0x151c   :  { %v3105_v48 = vrot.slane %v3101_v40, 1 }
0x151e   :  { %v9577_v45 = vpop.eup %9576 }
0x151f   :  { %v9579_v36 = vpop.eup %9578  ;;  %3116 = vrot.lane.b32.xlu0 %v9577_v45, %s9987_s3 }
0x1520   :  { %3118 = vrot.lane.b32.xlu1 %v9579_v36, %s9987_s3 }
0x1522   :  { %v9581_v49 = vpop.eup %9580 }
0x1523   :  { %v9583_v37 = vpop.eup %9582  ;;  %3114 = vrot.lane.b32.xlu0 %v9581_v49, %s9987_s3 }
0x1524   :  { %3120 = vrot.lane.b32.xlu1 %v9583_v37, %s9987_s3 }
0x1591   :  { %v3117_v8 = vpop.permute.xlu0 %3116 }
0x1592   :  { %v3127_v42 = vmul.f32 %v3117_v8, %v3103_v5  ;;  %v3119_v15 = vpop.permute.xlu1 %3118 }
0x1593   :  { %v3128_v43 = vmul.f32 %v3119_v15, %v3104_v41 }
0x1594   :  { %3131 = vst.msk [vmem:[#allocation3 + $0x1a] sm:$0x1] %vm426_vm0, %v3127_v42  ;;  %v3143_v47 = vpack.c.bf16 %v3127_v42, %v3127_v42 }
0x1595   :  { %3132 = vst.msk [vmem:[#allocation3 + $0x2a] sm:$0x1] %vm426_vm0, %v3128_v43  ;;  %v3144_v16 = vpack.c.bf16 %v3128_v43, %v3128_v43  ;;  %v3115_v17 = vpop.permute.xlu0 %3114 }
0x1596   :  { %v3159_v30 = vunpack.c.l.b16 %v3143_v47  ;;  %v3126_v23 = vmul.f32 %v3115_v17, %v3102_v46  ;;  %v3121_v52 = vpop.permute.xlu1 %3120 }
0x1597   :  { %v3160_v59 = vunpack.c.l.b16 %v3144_v16  ;;  %v3129_v53 = vmul.f32 %v3121_v52, %v3105_v48 }
0x1598   :  { %3130 = vst.msk [vmem:[#allocation3 + $0xa] sm:$0x1] %vm426_vm0, %v3126_v23  ;;  %v3142_v56 = vpack.c.bf16 %v3126_v23, %v3126_v23  ;;  %v3162_v33 = vrot.slane %v3159_v30, 7 }
0x1599   :  { %3133 = vst.msk [vmem:[#allocation3 + $0x3a] sm:$0x1] %vm426_vm0, %v3129_v53  ;;  %v3145_v54 = vpack.c.bf16 %v3129_v53, %v3129_v53  ;;  %v3164_v55 = vrot.slane %v3160_v59, 6 }
0x159a   :  { %v3158_v34 = vunpack.c.l.b16 %v3142_v56 }
0x159b   :  { %v3161_v38 = vunpack.c.l.b16 %v3145_v54 }
0x159c   :  { %v3163_v18 = vsel %vm460_vm1, %v3162_v33, %v3158_v34 }
0x159d   :  { %v3165_v39 = vsel %vm463_vm2, %v3164_v55, %v3163_v18  ;;  %v3166_v20 = vrot.slane %v3161_v38, 5  ;;  %v10843_v55 = vld [vmem:[%s12825_s0 + $0x30] ss:$8 sps:$4 sm:$0xff]   ;;  %v9182_v38 = vld [vmem:[%s12825_s0 + $0x34] ss:$8 sps:$4 sm:$0xff]  }
0x159e   :  { %3490 = vmatprep.subr.bf16.mxu0 %v9182_v38  ;;  %3760 = vmatprep.subr.bf16.mxu1 %v9182_v38 }
0x159f   :  { %v3167_v2 = vsel %vm466_vm3, %v3166_v20, %v3165_v39  ;;  %3491 = vmatpush1.bf16.msra.mxu0 %v10843_v55 }
0x15a0   :  { %v3168_v57 = vpack.c.b16 %v3167_v2, %v3167_v2 }
0x15a2   :  { %8418 = vmatmul.mubr.msk.bf16.vlgmr.msra.gmra.mxu1 %vm234_vm4, %v3168_v57 }
0x15a3   :  { %3784 = vmatprep.mubr.bf16.mxu1 %v12734_v4  ;;  %3761 = vmatpush1.bf16.msra.mxu1 %v10843_v55 }
0x1662   :  { %v3246_v3 = vpop.f32.mrf.mxu1 }
0x1664   :  { %v3248_v14 = vpop.f32.mrf.mxu1 }
0x1665   :  { %v3255_v24 = vcombine.low %v3246_v3, %v3248_v14 }
0x1666   :  { %v3250_v0 = vpop.f32.mrf.mxu1 }
0x1667   :  { %v3262_v25 = vrot.slane %v3255_v24, %v10235_v51 }
0x1668   :  { %v3251_v60 = vpop.f32.mrf.mxu1 }
0x1669   :  { %v3263_v61 = vcombine.high %v3262_v25, %v3262_v25  ;;  %v3270_v26 = vrot.slane %v3262_v25, %v10235_v51 }
0x166b   :  { %v3277_v63 = vrot.slane %v3263_v61, %v10235_v51  ;;  %v3278_v7 = vcombine.high %v3270_v26, %v3270_v26  ;;  %v3284_v6 = vadd.f32 %v3270_v26, %v3135_v62  ;;  %v10891_v61 = vld [vmem:[%s12825_s0 + $0x10] ss:$8 sps:$4 sm:$0xff]  }
0x166d   :  { %v3279_v22 = vcombine.high %v3277_v63, %v3277_v63  ;;  %v3285_v19 = vadd.f32 %v3277_v63, %v3137_v11  ;;  %v3286_v29 = vadd.f32 %v3278_v7, %v3139_v1  ;;  %v8419_v31 = vmul.f32 -1.442695, %v3284_v6  ;;  %v10901_v63 = vld [vmem:[%s12825_s0 + $0x4] ss:$8 sps:$4 sm:$0xff]   ;;  %v10907_v7 = vld [vmem:[%s12825_s0] ss:$8 sps:$4 sm:$0xff]  }
0x166e   :  { %v3316_v46 = vrot.slane %v3284_v6, 1 }
0x166f   :  { %v3287_v45 = vadd.f32 %v3279_v22, %v3141_v44  ;;  %9584 = vpow2.f32 %v8419_v31  ;;  %v8420_v36 = vmul.f32 -1.442695, %v3285_v19  ;;  %v8421_v49 = vmul.f32 -1.442695, %v3286_v29 }
0x1670   :  { %v3317_v50 = vrot.slane %v3285_v19, 1  ;;  %v3318_v21 = vrot.slane %v3286_v29, 1 }
0x1671   :  { %9586 = vpow2.f32 %v8420_v36  ;;  %v8422_v37 = vmul.f32 -1.442695, %v3287_v45  ;;  %v3319_v47 = vrot.slane %v3287_v45, 1 }
0x1672   :  { %9588 = vpow2.f32 %v8421_v49 }
0x1673   :  { %9590 = vpow2.f32 %v8422_v37 }
0x1674   :  { %9592 = vtanh.f32 %v3317_v50 }
0x1675   :  { %9594 = vtanh.f32 %v3318_v21 }
0x167c   :  { %v9585_v58 = vpop.eup %9584 }
0x167d   :  { %v3300_v41 = vadd.f32 1.0, %v9585_v58 }
0x167e   :  { %v9587_v40 = vpop.eup %9586 }
0x167f   :  { %v9589_v5 = vpop.eup %9588  ;;  %v3301_v8 = vadd.f32 1.0, %v9587_v40 }
0x1680   :  { %v9591_v42 = vpop.eup %9590  ;;  %v3302_v15 = vadd.f32 1.0, %v9589_v5 }
0x1681   :  { %v3303_v43 = vadd.f32 1.0, %v9591_v42  ;;  %9596 = vrcp.f32 %v3301_v8  ;;  %v9593_v48 = vpop.eup %9592 }
0x1682   :  { %9598 = vrcp.f32 %v3302_v15  ;;  %v9595_v16 = vpop.eup %9594 }
0x1683   :  { %9600 = vrcp.f32 %v3300_v41 }
0x1684   :  { %9602 = vrcp.f32 %v3303_v43 }
0x1685   :  { %9604 = vtanh.f32 %v3316_v46 }
0x1686   :  { %9606 = vtanh.f32 %v3319_v47 }
0x168e   :  { %v9597_v17 = vpop.eup %9596 }
0x168f   :  { %v9599_v30 = vpop.eup %9598  ;;  %v3333_v23 = vmul.f32 %v9597_v17, %v9593_v48  ;;  %v3329_v18 = vmul.f32 %v9597_v17, %v10805_v27 }
0x1690   :  { %v9601_v52 = vpop.eup %9600  ;;  %v3334_v59 = vmul.f32 %v9599_v30, %v9595_v16  ;;  %v3330_v39 = vmul.f32 %v9599_v30, %v10807_v28  ;;  %v10872_v28 = vld [vmem:[%s12825_s0 + $0x24] ss:$8 sps:$4 sm:$0xff]  }
0x1691   :  { %v9603_v53 = vpop.eup %9602  ;;  %3342 = vrot.lane.b32.xlu0 %v3333_v23, %s9987_s3  ;;  %v3328_v14 = vmul.f32 %v9601_v52, %v10813_v32  ;;  %v10877_v32 = vld [vmem:[%s12825_s0 + $0x20] ss:$8 sps:$4 sm:$0xff]   ;;  %3492 = vmatprep.subr.bf16.mxu0 %v10872_v28 }
0x1692   :  { %v9605_v56 = vpop.eup %9604  ;;  %3344 = vrot.lane.b32.xlu1 %v3334_v59, %s9987_s3  ;;  %v3331_v0 = vmul.f32 %v9603_v53, %v10815_v35  ;;  %3762 = vmatprep.subr.bf16.mxu1 %v10872_v28  ;;  %v10886_v35 = vld [vmem:[%s12825_s0 + $0x14] ss:$8 sps:$4 sm:$0xff]   ;;  %s9996_s0 = smov 4  }
0x1693   :  { %v9607_v54 = vpop.eup %9606  ;;  %v3332_v33 = vmul.f32 %v9605_v56, %v9601_v52  ;;  %3493 = vmatpush1.bf16.msra.mxu0 %v10877_v32  ;;  %3763 = vmatpush1.bf16.msra.mxu1 %v10877_v32 }
0x1694   :  { %v3335_v34 = vmul.f32 %v9607_v54, %v9603_v53  ;;  %3494 = vmatprep.subr.bf16.mxu0 %v10886_v35  ;;  %3764 = vmatprep.subr.bf16.mxu1 %v10886_v35 }
0x1695   :  { %3340 = vrot.lane.b32.xlu0 %v3332_v33, %s9987_s3 }
0x1696   :  { %3346 = vrot.lane.b32.xlu1 %v3335_v34, %s9987_s3 }
0x1697   :  { %3495 = vmatpush1.bf16.msra.mxu0 %v10891_v61  ;;  %3765 = vmatpush1.bf16.msra.mxu1 %v10891_v61 }
0x1698   :  { %3496 = vmatprep.subr.bf16.mxu0 %v10901_v63  ;;  %3766 = vmatprep.subr.bf16.mxu1 %v10901_v63 }
0x1699   :  { %3366 = vrot.lane.b32.xlu0 %v9597_v17, %s9987_s3 }
0x169a   :  { %3368 = vrot.lane.b32.xlu1 %v9599_v30, %s9987_s3 }
0x169b   :  { %3497 = vmatpush1.bf16.msra.mxu0 %v10907_v7  ;;  %3767 = vmatpush1.bf16.msra.mxu1 %v10907_v7 }
0x169c   :  { %4030 = vmatprep.subr.bf16.mxu0 %v9182_v38  ;;  %4300 = vmatprep.subr.bf16.mxu1 %v9182_v38 }
0x169d   :  { %3364 = vrot.lane.b32.xlu0 %v9601_v52, %s9987_s3 }
0x169e   :  { %3370 = vrot.lane.b32.xlu1 %v9603_v53, %s9987_s3 }
0x1703   :  { %v3343_v20 = vpop.permute.xlu0 %3342 }
0x1704   :  { %v3345_v2 = vpop.permute.xlu1 %3344  ;;  %v10855_v57 = vadd.f32 %v3343_v20, %v3329_v18 }
0x1705   :  { %v10857_v3 = vadd.f32 %v3345_v2, %v3330_v39 }
0x1706   :  { %9608 = vtanh.f32 %v10855_v57 }
0x1707   :  { %9610 = vtanh.f32 %v10857_v3  ;;  %v3341_v24 = vpop.permute.xlu0 %3340 }
0x1708   :  { %v10863_v25 = vadd.f32 %v3341_v24, %v3328_v14  ;;  %v3347_v27 = vpop.permute.xlu1 %3346  ;;  %v3405_v14 = vld [vmem:[#allocation2 + $0x14] ss:$8 sm:$0x3] }
0x1709   :  { %v10865_v60 = vadd.f32 %v3347_v27, %v3331_v0 }
0x170a   :  { %9612 = vtanh.f32 %v10863_v25 }
0x170b   :  { %9614 = vtanh.f32 %v10865_v60  ;;  %v3367_v1 = vpop.permute.xlu0 %3366 }
0x170c   :  { %v3369_v22 = vpop.permute.xlu1 %3368  ;;  %v3373_v31 = vrot.slane %v3367_v1, 1 }
0x170d   :  { %v3374_v44 = vrot.slane %v3369_v22, 1 }
0x170f   :  { %v3365_v19 = vpop.permute.xlu0 %3364 }
0x1710   :  { %v3371_v29 = vpop.permute.xlu1 %3370  ;;  %v3372_v50 = vrot.slane %v3365_v19, 1  ;;  %v3411_v19 = vld [vmem:[#allocation2 + $0x74] ss:$8 sm:$0x3] }
0x1711   :  { %v3375_v21 = vrot.slane %v3371_v29, 1 }
0x1713   :  { %v9609_v26 = vpop.eup %9608 }
0x1714   :  { %v9611_v62 = vpop.eup %9610  ;;  %3386 = vrot.lane.b32.xlu0 %v9609_v26, %s9987_s3  ;;  %v3407_v26 = vld [vmem:[#allocation2 + $0x34] ss:$8 sm:$0x3] }
0x1715   :  { %3388 = vrot.lane.b32.xlu1 %v9611_v62, %s9987_s3  ;;  %v3409_v62 = vld [vmem:[#allocation2 + $0x54] ss:$8 sm:$0x3] }
0x1717   :  { %v9613_v6 = vpop.eup %9612 }
0x1718   :  { %v9615_v11 = vpop.eup %9614  ;;  %3384 = vrot.lane.b32.xlu0 %v9613_v6, %s9987_s3 }
0x1719   :  { %3390 = vrot.lane.b32.xlu1 %v9615_v11, %s9987_s3 }
0x1786   :  { %v3387_v45 = vpop.permute.xlu0 %3386 }
0x1787   :  { %v3397_v36 = vmul.f32 %v3387_v45, %v3373_v31  ;;  %v3389_v49 = vpop.permute.xlu1 %3388 }
0x1788   :  { %v3398_v37 = vmul.f32 %v3389_v49, %v3374_v44 }
0x1789   :  { %3401 = vst.msk [vmem:[#allocation3 + $0x1b] sm:$0x1] %vm426_vm0, %v3397_v36  ;;  %v3413_v58 = vpack.c.bf16 %v3397_v36, %v3397_v36 }
0x178a   :  { %3402 = vst.msk [vmem:[#allocation3 + $0x2b] sm:$0x1] %vm426_vm0, %v3398_v37  ;;  %v3414_v40 = vpack.c.bf16 %v3398_v37, %v3398_v37  ;;  %v3385_v5 = vpop.permute.xlu0 %3384 }
0x178b   :  { %v3429_v41 = vunpack.c.l.b16 %v3413_v58  ;;  %v3396_v8 = vmul.f32 %v3385_v5, %v3372_v50  ;;  %v3391_v42 = vpop.permute.xlu1 %3390 }
0x178c   :  { %v3430_v15 = vunpack.c.l.b16 %v3414_v40  ;;  %v3399_v43 = vmul.f32 %v3391_v42, %v3375_v21 }
0x178d   :  { %3400 = vst.msk [vmem:[#allocation3 + $0xb] sm:$0x1] %vm426_vm0, %v3396_v8  ;;  %v3412_v46 = vpack.c.bf16 %v3396_v8, %v3396_v8  ;;  %v3432_v48 = vrot.slane %v3429_v41, 7 }
0x178e   :  { %3403 = vst.msk [vmem:[#allocation3 + $0x3b] sm:$0x1] %vm426_vm0, %v3399_v43  ;;  %v3415_v47 = vpack.c.bf16 %v3399_v43, %v3399_v43  ;;  %v3434_v17 = vrot.slane %v3430_v15, 6 }
0x178f   :  { %v3428_v16 = vunpack.c.l.b16 %v3412_v46 }
0x1790   :  { %v3431_v30 = vunpack.c.l.b16 %v3415_v47 }
0x1791   :  { %v3433_v23 = vsel %vm460_vm1, %v3432_v48, %v3428_v16 }
0x1792   :  { %v3435_v52 = vsel %vm463_vm2, %v3434_v17, %v3433_v23  ;;  %v3436_v59 = vrot.slane %v3431_v30, 5 }
0x1794   :  { %v3437_v53 = vsel %vm466_vm3, %v3436_v59, %v3435_v52 }
0x1795   :  { %v3438_v56 = vpack.c.b16 %v3437_v53, %v3437_v53 }
0x1797   :  { %8431 = vmatmul.mubr.msk.bf16.vlgmr.msra.gmra.mxu0 %vm234_vm4, %v3438_v56 }
0x1798   :  { %4031 = vmatpush1.bf16.msra.mxu0 %v10843_v55  ;;  %4054 = vmatprep.mubr.bf16.mxu0 %v12734_v4 }
0x1799   :  { %4032 = vmatprep.subr.bf16.mxu0 %v10872_v28 }
0x179c   :  { %4033 = vmatpush1.bf16.msra.mxu0 %v10877_v32 }
0x179d   :  { %4034 = vmatprep.subr.bf16.mxu0 %v10886_v35 }
0x17a0   :  { %4035 = vmatpush1.bf16.msra.mxu0 %v10891_v61 }
0x17a1   :  { %4036 = vmatprep.subr.bf16.mxu0 %v10901_v63 }
0x17a4   :  { %4037 = vmatpush1.bf16.msra.mxu0 %v10907_v7 }
0x1857   :  { %v3516_v54 = vpop.f32.mrf.mxu0 }
0x1859   :  { %v3518_v33 = vpop.f32.mrf.mxu0 }
0x185a   :  { %v3525_v34 = vcombine.low %v3516_v54, %v3518_v33 }
0x185b   :  { %v3520_v38 = vpop.f32.mrf.mxu0 }
0x185c   :  { %v3532_v18 = vrot.slane %v3525_v34, %v10235_v51 }
0x185d   :  { %v3521_v39 = vpop.f32.mrf.mxu0 }
0x185e   :  { %v3533_v20 = vcombine.high %v3532_v18, %v3532_v18  ;;  %v3540_v2 = vrot.slane %v3532_v18, %v10235_v51 }
0x1860   :  { %v3547_v24 = vrot.slane %v3533_v20, %v10235_v51  ;;  %v3548_v0 = vcombine.high %v3540_v2, %v3540_v2  ;;  %v3554_v27 = vadd.f32 %v3540_v2, %v3405_v14 }
0x1862   :  { %v3549_v6 = vcombine.high %v3547_v24, %v3547_v24  ;;  %v3555_v11 = vadd.f32 %v3547_v24, %v3407_v26  ;;  %v3556_v1 = vadd.f32 %v3548_v0, %v3409_v62  ;;  %v8432_v22 = vmul.f32 -1.442695, %v3554_v27 }
0x1863   :  { %v3586_v42 = vrot.slane %v3554_v27, 1 }
0x1864   :  { %v3557_v29 = vadd.f32 %v3549_v6, %v3411_v19  ;;  %9616 = vpow2.f32 %v8432_v22  ;;  %v8433_v31 = vmul.f32 -1.442695, %v3555_v11  ;;  %v8434_v44 = vmul.f32 -1.442695, %v3556_v1 }
0x1865   :  { %v3587_v36 = vrot.slane %v3555_v11, 1  ;;  %v3588_v37 = vrot.slane %v3556_v1, 1 }
0x1866   :  { %9618 = vpow2.f32 %v8433_v31  ;;  %v8435_v45 = vmul.f32 -1.442695, %v3557_v29  ;;  %v3589_v15 = vrot.slane %v3557_v29, 1 }
0x1867   :  { %9620 = vpow2.f32 %v8434_v44 }
0x1868   :  { %9622 = vpow2.f32 %v8435_v45 }
0x1869   :  { %9624 = vtanh.f32 %v3587_v36 }
0x186a   :  { %9626 = vtanh.f32 %v3588_v37 }
0x1871   :  { %v9617_v49 = vpop.eup %9616 }
0x1872   :  { %v3570_v21 = vadd.f32 1.0, %v9617_v49 }
0x1873   :  { %v9619_v50 = vpop.eup %9618 }
0x1874   :  { %v9621_v58 = vpop.eup %9620  ;;  %v3571_v40 = vadd.f32 1.0, %v9619_v50 }
0x1875   :  { %v9623_v5 = vpop.eup %9622  ;;  %v3572_v41 = vadd.f32 1.0, %v9621_v58 }
0x1876   :  { %v3573_v8 = vadd.f32 1.0, %v9623_v5  ;;  %9628 = vrcp.f32 %v3571_v40  ;;  %v9625_v43 = vpop.eup %9624 }
0x1877   :  { %9630 = vrcp.f32 %v3572_v41  ;;  %v9627_v46 = vpop.eup %9626 }
0x1878   :  { %9632 = vrcp.f32 %v3570_v21 }
0x1879   :  { %9634 = vrcp.f32 %v3573_v8 }
0x187a   :  { %9636 = vtanh.f32 %v3586_v42 }
0x187b   :  { %9638 = vtanh.f32 %v3589_v15 }
0x1883   :  { %v9629_v47 = vpop.eup %9628 }
0x1884   :  { %v9631_v48 = vpop.eup %9630  ;;  %v3603_v16 = vmul.f32 %v9629_v47, %v9625_v43  ;;  %v3599_v54 = vmul.f32 %v9629_v47, %v10855_v57 }
0x1885   :  { %v9633_v17 = vpop.eup %9632  ;;  %v3604_v30 = vmul.f32 %v9631_v48, %v9627_v46  ;;  %v3600_v33 = vmul.f32 %v9631_v48, %v10857_v3 }
0x1886   :  { %v9635_v23 = vpop.eup %9634  ;;  %3612 = vrot.lane.b32.xlu0 %v3603_v16, %s9987_s3  ;;  %v3598_v20 = vmul.f32 %v9633_v17, %v10863_v25 }
0x1887   :  { %v9637_v52 = vpop.eup %9636  ;;  %3614 = vrot.lane.b32.xlu1 %v3604_v30, %s9987_s3  ;;  %v3601_v14 = vmul.f32 %v9635_v23, %v10865_v60 }
0x1888   :  { %v9639_v59 = vpop.eup %9638  ;;  %v3602_v53 = vmul.f32 %v9637_v52, %v9633_v17 }
0x1889   :  { %v3605_v56 = vmul.f32 %v9639_v59, %v9635_v23 }
0x188a   :  { %3610 = vrot.lane.b32.xlu0 %v3602_v53, %s9987_s3 }
0x188b   :  { %3616 = vrot.lane.b32.xlu1 %v3605_v56, %s9987_s3 }
0x188e   :  { %3636 = vrot.lane.b32.xlu0 %v9629_v47, %s9987_s3 }
0x188f   :  { %3638 = vrot.lane.b32.xlu1 %v9631_v48, %s9987_s3 }
0x1892   :  { %3634 = vrot.lane.b32.xlu0 %v9633_v17, %s9987_s3 }
0x1893   :  { %3640 = vrot.lane.b32.xlu1 %v9635_v23, %s9987_s3 }
0x18f8   :  { %v3613_v34 = vpop.permute.xlu0 %3612 }
0x18f9   :  { %v3615_v38 = vpop.permute.xlu1 %3614  ;;  %v10944_v18 = vadd.f32 %v3613_v34, %v3599_v54  ;;  %v3675_v34 = vld [vmem:[#allocation2 + $0x15] ss:$8 sm:$0x3] }
0x18fa   :  { %v10946_v39 = vadd.f32 %v3615_v38, %v3600_v33 }
0x18fb   :  { %9640 = vtanh.f32 %v10944_v18 }
0x18fc   :  { %9642 = vtanh.f32 %v10946_v39  ;;  %v3611_v2 = vpop.permute.xlu0 %3610 }
0x18fd   :  { %v10952_v24 = vadd.f32 %v3611_v2, %v3598_v20  ;;  %v3617_v57 = vpop.permute.xlu1 %3616  ;;  %v3679_v20 = vld [vmem:[#allocation2 + $0x55] ss:$8 sm:$0x3] }
0x18fe   :  { %v10954_v0 = vadd.f32 %v3617_v57, %v3601_v14  ;;  %v3681_v57 = vld [vmem:[#allocation2 + $0x75] ss:$8 sm:$0x3] }
0x18ff   :  { %9644 = vtanh.f32 %v10952_v24 }
0x1900   :  { %9646 = vtanh.f32 %v10954_v0  ;;  %v3637_v60 = vpop.permute.xlu0 %3636 }
0x1901   :  { %v3639_v62 = vpop.permute.xlu1 %3638  ;;  %v3643_v1 = vrot.slane %v3637_v60, 1 }
0x1902   :  { %v3644_v22 = vrot.slane %v3639_v62, 1 }
0x1904   :  { %v3635_v6 = vpop.permute.xlu0 %3634 }
0x1905   :  { %v3641_v11 = vpop.permute.xlu1 %3640  ;;  %v3642_v45 = vrot.slane %v3635_v6, 1 }
0x1906   :  { %v3645_v49 = vrot.slane %v3641_v11, 1 }
0x1908   :  { %v9641_v3 = vpop.eup %9640 }
0x1909   :  { %v9643_v27 = vpop.eup %9642  ;;  %3656 = vrot.lane.b32.xlu0 %v9641_v3, %s9987_s3 }
0x190a   :  { %3658 = vrot.lane.b32.xlu1 %v9643_v27, %s9987_s3 }
0x190c   :  { %v9645_v25 = vpop.eup %9644 }
0x190d   :  { %v9647_v26 = vpop.eup %9646  ;;  %3654 = vrot.lane.b32.xlu0 %v9645_v25, %s9987_s3 }
0x190e   :  { %3660 = vrot.lane.b32.xlu1 %v9647_v26, %s9987_s3 }
0x197b   :  { %v3657_v19 = vpop.permute.xlu0 %3656 }
0x197c   :  { %v3667_v29 = vmul.f32 %v3657_v19, %v3643_v1  ;;  %v3659_v31 = vpop.permute.xlu1 %3658 }
0x197d   :  { %v3668_v44 = vmul.f32 %v3659_v31, %v3644_v22 }
0x197e   :  { %3671 = vst.msk [vmem:[#allocation3 + $0x1c] sm:$0x1] %vm426_vm0, %v3667_v29  ;;  %v3683_v36 = vpack.c.bf16 %v3667_v29, %v3667_v29 }
0x197f   :  { %3672 = vst.msk [vmem:[#allocation3 + $0x2c] sm:$0x1] %vm426_vm0, %v3668_v44  ;;  %v3684_v37 = vpack.c.bf16 %v3668_v44, %v3668_v44  ;;  %v3655_v50 = vpop.permute.xlu0 %3654 }
0x1980   :  { %v3699_v58 = vunpack.c.l.b16 %v3683_v36  ;;  %v3666_v21 = vmul.f32 %v3655_v50, %v3642_v45  ;;  %v3661_v40 = vpop.permute.xlu1 %3660 }
0x1981   :  { %v3700_v5 = vunpack.c.l.b16 %v3684_v37  ;;  %v3669_v41 = vmul.f32 %v3661_v40, %v3645_v49 }
0x1982   :  { %3670 = vst.msk [vmem:[#allocation3 + $0xc] sm:$0x1] %vm426_vm0, %v3666_v21  ;;  %v3682_v8 = vpack.c.bf16 %v3666_v21, %v3666_v21  ;;  %v3702_v15 = vrot.slane %v3699_v58, 7 }
0x1983   :  { %3673 = vst.msk [vmem:[#allocation3 + $0x3c] sm:$0x1] %vm426_vm0, %v3669_v41  ;;  %v3685_v42 = vpack.c.bf16 %v3669_v41, %v3669_v41  ;;  %v3704_v46 = vrot.slane %v3700_v5, 6 }
0x1984   :  { %v3698_v43 = vunpack.c.l.b16 %v3682_v8 }
0x1985   :  { %v3701_v47 = vunpack.c.l.b16 %v3685_v42 }
0x1986   :  { %v3703_v48 = vsel %vm460_vm1, %v3702_v15, %v3698_v43 }
0x1987   :  { %v3705_v16 = vsel %vm463_vm2, %v3704_v46, %v3703_v48  ;;  %v3706_v17 = vrot.slane %v3701_v47, 5 }
0x1989   :  { %v3707_v30 = vsel %vm466_vm3, %v3706_v17, %v3705_v16 }
0x198a   :  { %v3708_v23 = vpack.c.b16 %v3707_v30, %v3707_v30 }
0x198c   :  { %8444 = vmatmul.mubr.msk.bf16.vlgmr.msra.gmra.mxu1 %vm234_vm4, %v3708_v23 }
0x198d   :  { %4301 = vmatpush1.bf16.msra.mxu1 %v10843_v55  ;;  %4324 = vmatprep.mubr.bf16.mxu1 %v12734_v4 }
0x198e   :  { %4302 = vmatprep.subr.bf16.mxu1 %v10872_v28 }
0x1991   :  { %4303 = vmatpush1.bf16.msra.mxu1 %v10877_v32 }
0x1992   :  { %4304 = vmatprep.subr.bf16.mxu1 %v10886_v35 }
0x1995   :  { %4305 = vmatpush1.bf16.msra.mxu1 %v10891_v61  ;;  %v3677_v61 = vld [vmem:[#allocation2 + $0x35] ss:$8 sm:$0x3] }
0x1996   :  { %4306 = vmatprep.subr.bf16.mxu1 %v10901_v63 }
0x1999   :  { %4307 = vmatpush1.bf16.msra.mxu1 %v10907_v7 }
0x1a4c   :  { %v3786_v52 = vpop.f32.mrf.mxu1 }
0x1a4e   :  { %v3788_v59 = vpop.f32.mrf.mxu1 }
0x1a4f   :  { %v3795_v53 = vcombine.low %v3786_v52, %v3788_v59 }
0x1a50   :  { %v3790_v56 = vpop.f32.mrf.mxu1 }
0x1a51   :  { %v3802_v55 = vrot.slane %v3795_v53, %v10235_v51 }
0x1a52   :  { %v3791_v54 = vpop.f32.mrf.mxu1 }
0x1a53   :  { %v3803_v33 = vcombine.high %v3802_v55, %v3802_v55  ;;  %v3810_v28 = vrot.slane %v3802_v55, %v10235_v51 }
0x1a55   :  { %v3817_v32 = vrot.slane %v3803_v33, %v10235_v51  ;;  %v3818_v35 = vcombine.high %v3810_v28, %v3810_v28  ;;  %v3824_v38 = vadd.f32 %v3810_v28, %v3675_v34 }
0x1a57   :  { %v3819_v63 = vcombine.high %v3817_v32, %v3817_v32  ;;  %v3825_v2 = vadd.f32 %v3817_v32, %v3677_v61  ;;  %v3826_v7 = vadd.f32 %v3818_v35, %v3679_v20  ;;  %v8445_v14 = vmul.f32 -1.442695, %v3824_v38 }
0x1a58   :  { %v3856_v45 = vrot.slane %v3824_v38, 1 }
0x1a59   :  { %v3827_v3 = vadd.f32 %v3819_v63, %v3681_v57  ;;  %9648 = vpow2.f32 %v8445_v14  ;;  %v8446_v27 = vmul.f32 -1.442695, %v3825_v2  ;;  %v8447_v25 = vmul.f32 -1.442695, %v3826_v7 }
0x1a5a   :  { %v3857_v60 = vrot.slane %v3825_v2, 1  ;;  %v3858_v6 = vrot.slane %v3826_v7, 1 }
0x1a5b   :  { %9650 = vpow2.f32 %v8446_v27  ;;  %v8448_v26 = vmul.f32 -1.442695, %v3827_v3  ;;  %v3859_v36 = vrot.slane %v3827_v3, 1 }
0x1a5c   :  { %9652 = vpow2.f32 %v8447_v25 }
0x1a5d   :  { %9654 = vpow2.f32 %v8448_v26 }
0x1a5e   :  { %9656 = vtanh.f32 %v3857_v60 }
0x1a5f   :  { %9658 = vtanh.f32 %v3858_v6 }
0x1a66   :  { %v9649_v62 = vpop.eup %9648 }
0x1a67   :  { %v3840_v22 = vadd.f32 1.0, %v9649_v62 }
0x1a68   :  { %v9651_v11 = vpop.eup %9650 }
0x1a69   :  { %v9653_v1 = vpop.eup %9652  ;;  %v3841_v19 = vadd.f32 1.0, %v9651_v11 }
0x1a6a   :  { %v9655_v29 = vpop.eup %9654  ;;  %v3842_v31 = vadd.f32 1.0, %v9653_v1 }
0x1a6b   :  { %v3843_v44 = vadd.f32 1.0, %v9655_v29  ;;  %9660 = vrcp.f32 %v3841_v19  ;;  %v9657_v49 = vpop.eup %9656 }
0x1a6c   :  { %9662 = vrcp.f32 %v3842_v31  ;;  %v9659_v37 = vpop.eup %9658 }
0x1a6d   :  { %9664 = vrcp.f32 %v3840_v22 }
0x1a6e   :  { %9666 = vrcp.f32 %v3843_v44 }
0x1a6f   :  { %9668 = vtanh.f32 %v3856_v45 }
0x1a70   :  { %9670 = vtanh.f32 %v3859_v36 }
0x1a78   :  { %v9661_v50 = vpop.eup %9660 }
0x1a79   :  { %v9663_v58 = vpop.eup %9662  ;;  %v3873_v21 = vmul.f32 %v9661_v50, %v9657_v49  ;;  %v3869_v46 = vmul.f32 %v9661_v50, %v10944_v18 }
0x1a7a   :  { %v9665_v40 = vpop.eup %9664  ;;  %v3874_v5 = vmul.f32 %v9663_v58, %v9659_v37  ;;  %v3870_v47 = vmul.f32 %v9663_v58, %v10946_v39 }
0x1a7b   :  { %v9667_v41 = vpop.eup %9666  ;;  %3882 = vrot.lane.b32.xlu0 %v3873_v21, %s9987_s3  ;;  %v3868_v23 = vmul.f32 %v9665_v40, %v10952_v24 }
0x1a7c   :  { %v9669_v8 = vpop.eup %9668  ;;  %3884 = vrot.lane.b32.xlu1 %v3874_v5, %s9987_s3  ;;  %v3871_v59 = vmul.f32 %v9667_v41, %v10954_v0 }
0x1a7d   :  { %v9671_v42 = vpop.eup %9670  ;;  %v3872_v15 = vmul.f32 %v9669_v8, %v9665_v40 }
0x1a7e   :  { %v3875_v43 = vmul.f32 %v9671_v42, %v9667_v41  ;;  %v3945_v42 = vld [vmem:[#allocation2 + $0x16] ss:$8 sm:$0x3] }
0x1a7f   :  { %3880 = vrot.lane.b32.xlu0 %v3872_v15, %s9987_s3 }
0x1a80   :  { %3886 = vrot.lane.b32.xlu1 %v3875_v43, %s9987_s3 }
0x1a83   :  { %3906 = vrot.lane.b32.xlu0 %v9661_v50, %s9987_s3 }
0x1a84   :  { %3908 = vrot.lane.b32.xlu1 %v9663_v58, %s9987_s3 }
0x1a87   :  { %3904 = vrot.lane.b32.xlu0 %v9665_v40, %s9987_s3 }
0x1a88   :  { %3910 = vrot.lane.b32.xlu1 %v9667_v41, %s9987_s3 }
0x1aed   :  { %v3883_v48 = vpop.permute.xlu0 %3882 }
0x1aee   :  { %v3885_v16 = vpop.permute.xlu1 %3884  ;;  %v10991_v17 = vadd.f32 %v3883_v48, %v3869_v46  ;;  %v3949_v48 = vld [vmem:[#allocation2 + $0x56] ss:$8 sm:$0x3] }
0x1aef   :  { %v10993_v30 = vadd.f32 %v3885_v16, %v3870_v47  ;;  %v3947_v47 = vld [vmem:[#allocation2 + $0x36] ss:$8 sm:$0x3] }
0x1af0   :  { %9672 = vtanh.f32 %v10991_v17 }
0x1af1   :  { %9674 = vtanh.f32 %v10993_v30  ;;  %v3881_v52 = vpop.permute.xlu0 %3880 }
0x1af2   :  { %v10999_v53 = vadd.f32 %v3881_v52, %v3868_v23  ;;  %v3887_v18 = vpop.permute.xlu1 %3886 }
0x1af3   :  { %v11001_v56 = vadd.f32 %v3887_v18, %v3871_v59  ;;  %v3951_v18 = vld [vmem:[#allocation2 + $0x76] ss:$8 sm:$0x3] }
0x1af4   :  { %9676 = vtanh.f32 %v10999_v53 }
0x1af5   :  { %9678 = vtanh.f32 %v11001_v56  ;;  %v3907_v0 = vpop.permute.xlu0 %3906 }
0x1af6   :  { %v3909_v33 = vpop.permute.xlu1 %3908  ;;  %v3913_v32 = vrot.slane %v3907_v0, 1 }
0x1af7   :  { %v3914_v35 = vrot.slane %v3909_v33, 1 }
0x1af9   :  { %v3905_v28 = vpop.permute.xlu0 %3904 }
0x1afa   :  { %v3911_v34 = vpop.permute.xlu1 %3910  ;;  %v3912_v2 = vrot.slane %v3905_v28, 1 }
0x1afb   :  { %v3915_v14 = vrot.slane %v3911_v34, 1 }
0x1afd   :  { %v9673_v39 = vpop.eup %9672 }
0x1afe   :  { %v9675_v55 = vpop.eup %9674  ;;  %3926 = vrot.lane.b32.xlu0 %v9673_v39, %s9987_s3 }
0x1aff   :  { %3928 = vrot.lane.b32.xlu1 %v9675_v55, %s9987_s3 }
0x1b01   :  { %v9677_v24 = vpop.eup %9676 }
0x1b02   :  { %v9679_v54 = vpop.eup %9678  ;;  %3924 = vrot.lane.b32.xlu0 %v9677_v24, %s9987_s3 }
0x1b03   :  { %3930 = vrot.lane.b32.xlu1 %v9679_v54, %s9987_s3 }
0x1b70   :  { %v3927_v38 = vpop.permute.xlu0 %3926 }
0x1b71   :  { %v3937_v61 = vmul.f32 %v3927_v38, %v3913_v32  ;;  %v3929_v20 = vpop.permute.xlu1 %3928 }
0x1b72   :  { %v3938_v63 = vmul.f32 %v3929_v20, %v3914_v35 }
0x1b73   :  { %3941 = vst.msk [vmem:[#allocation3 + $0x1d] sm:$0x1] %vm426_vm0, %v3937_v61  ;;  %v3953_v7 = vpack.c.bf16 %v3937_v61, %v3937_v61 }
0x1b74   :  { %3942 = vst.msk [vmem:[#allocation3 + $0x2d] sm:$0x1] %vm426_vm0, %v3938_v63  ;;  %v3954_v57 = vpack.c.bf16 %v3938_v63, %v3938_v63  ;;  %v3925_v3 = vpop.permute.xlu0 %3924 }
0x1b75   :  { %v3969_v27 = vunpack.c.l.b16 %v3953_v7  ;;  %v3936_v25 = vmul.f32 %v3925_v3, %v3912_v2  ;;  %v3931_v26 = vpop.permute.xlu1 %3930 }
0x1b76   :  { %v3970_v60 = vunpack.c.l.b16 %v3954_v57  ;;  %v3939_v62 = vmul.f32 %v3931_v26, %v3915_v14 }
0x1b77   :  { %3940 = vst.msk [vmem:[#allocation3 + $0xd] sm:$0x1] %vm426_vm0, %v3936_v25  ;;  %v3952_v6 = vpack.c.bf16 %v3936_v25, %v3936_v25  ;;  %v3972_v1 = vrot.slane %v3969_v27, 7 }
0x1b78   :  { %3943 = vst.msk [vmem:[#allocation3 + $0x3d] sm:$0x1] %vm426_vm0, %v3939_v62  ;;  %v3955_v11 = vpack.c.bf16 %v3939_v62, %v3939_v62  ;;  %v3974_v19 = vrot.slane %v3970_v60, 6 }
0x1b79   :  { %v3968_v22 = vunpack.c.l.b16 %v3952_v6 }
0x1b7a   :  { %v3971_v29 = vunpack.c.l.b16 %v3955_v11 }
0x1b7b   :  { %v3973_v31 = vsel %vm460_vm1, %v3972_v1, %v3968_v22 }
0x1b7c   :  { %v3975_v44 = vsel %vm463_vm2, %v3974_v19, %v3973_v31  ;;  %v3976_v45 = vrot.slane %v3971_v29, 5 }
0x1b7e   :  { %v3977_v36 = vsel %vm466_vm3, %v3976_v45, %v3975_v44 }
0x1b7f   :  { %v3978_v49 = vpack.c.b16 %v3977_v36, %v3977_v36 }
0x1b81   :  { %8457 = vmatmul.mubr.msk.bf16.vlgmr.msra.gmra.mxu0 %vm234_vm4, %v3978_v49 }
0x1c41   :  { %v4056_v37 = vpop.f32.mrf.mxu0 }
0x1c43   :  { %v4058_v50 = vpop.f32.mrf.mxu0 }
0x1c44   :  { %v4065_v58 = vcombine.low %v4056_v37, %v4058_v50 }
0x1c45   :  { %v4060_v21 = vpop.f32.mrf.mxu0 }
0x1c46   :  { %v4072_v40 = vrot.slane %v4065_v58, %v10235_v51 }
0x1c47   :  { %v4061_v5 = vpop.f32.mrf.mxu0 }
0x1c48   :  { %v4073_v41 = vcombine.high %v4072_v40, %v4072_v40  ;;  %v4080_v8 = vrot.slane %v4072_v40, %v10235_v51 }
0x1c4a   :  { %v4087_v15 = vrot.slane %v4073_v41, %v10235_v51  ;;  %v4088_v43 = vcombine.high %v4080_v8, %v4080_v8  ;;  %v4094_v46 = vadd.f32 %v4080_v8, %v3945_v42 }
0x1c4c   :  { %v4089_v16 = vcombine.high %v4087_v15, %v4087_v15  ;;  %v4095_v23 = vadd.f32 %v4087_v15, %v3947_v47  ;;  %v4096_v52 = vadd.f32 %v4088_v43, %v3949_v48  ;;  %v8458_v59 = vmul.f32 -1.442695, %v4094_v46 }
0x1c4d   :  { %v4126_v2 = vrot.slane %v4094_v46, 1 }
0x1c4e   :  { %v4097_v39 = vadd.f32 %v4089_v16, %v3951_v18  ;;  %9680 = vpow2.f32 %v8458_v59  ;;  %v8459_v55 = vmul.f32 -1.442695, %v4095_v23  ;;  %v8460_v24 = vmul.f32 -1.442695, %v4096_v52 }
0x1c4f   :  { %v4127_v0 = vrot.slane %v4095_v23, 1  ;;  %v4128_v28 = vrot.slane %v4096_v52, 1 }
0x1c50   :  { %9682 = vpow2.f32 %v8459_v55  ;;  %v8461_v54 = vmul.f32 -1.442695, %v4097_v39  ;;  %v4129_v7 = vrot.slane %v4097_v39, 1 }
0x1c51   :  { %9684 = vpow2.f32 %v8460_v24 }
0x1c52   :  { %9686 = vpow2.f32 %v8461_v54 }
0x1c53   :  { %9688 = vtanh.f32 %v4127_v0 }
0x1c54   :  { %9690 = vtanh.f32 %v4128_v28 }
0x1c5b   :  { %v9681_v33 = vpop.eup %9680 }
0x1c5c   :  { %v4110_v35 = vadd.f32 1.0, %v9681_v33 }
0x1c5d   :  { %v9683_v34 = vpop.eup %9682 }
0x1c5e   :  { %v9685_v32 = vpop.eup %9684  ;;  %v4111_v38 = vadd.f32 1.0, %v9683_v34 }
0x1c5f   :  { %v9687_v61 = vpop.eup %9686  ;;  %v4112_v20 = vadd.f32 1.0, %v9685_v32 }
0x1c60   :  { %v4113_v63 = vadd.f32 1.0, %v9687_v61  ;;  %9692 = vrcp.f32 %v4111_v38  ;;  %v9689_v14 = vpop.eup %9688 }
0x1c61   :  { %9694 = vrcp.f32 %v4112_v20  ;;  %v9691_v57 = vpop.eup %9690 }
0x1c62   :  { %9696 = vrcp.f32 %v4110_v35 }
0x1c63   :  { %9698 = vrcp.f32 %v4113_v63 }
0x1c64   :  { %9700 = vtanh.f32 %v4126_v2 }
0x1c65   :  { %9702 = vtanh.f32 %v4129_v7 }
0x1c6d   :  { %v9693_v3 = vpop.eup %9692 }
0x1c6e   :  { %v9695_v27 = vpop.eup %9694  ;;  %v4143_v25 = vmul.f32 %v9693_v3, %v9689_v14  ;;  %v4139_v19 = vmul.f32 %v9693_v3, %v10991_v17 }
0x1c6f   :  { %v9697_v26 = vpop.eup %9696  ;;  %v4144_v60 = vmul.f32 %v9695_v27, %v9691_v57  ;;  %v4140_v29 = vmul.f32 %v9695_v27, %v10993_v30 }
0x1c70   :  { %v9699_v62 = vpop.eup %9698  ;;  %4152 = vrot.lane.b32.xlu0 %v4143_v25, %s9987_s3  ;;  %v4138_v49 = vmul.f32 %v9697_v26, %v10999_v53 }
0x1c71   :  { %v9701_v6 = vpop.eup %9700  ;;  %4154 = vrot.lane.b32.xlu1 %v4144_v60, %s9987_s3  ;;  %v4141_v50 = vmul.f32 %v9699_v62, %v11001_v56 }
0x1c72   :  { %v9703_v11 = vpop.eup %9702  ;;  %v4142_v1 = vmul.f32 %v9701_v6, %v9697_v26 }
0x1c73   :  { %v4145_v22 = vmul.f32 %v9703_v11, %v9699_v62  ;;  %v4215_v11 = vld [vmem:[#allocation2 + $0x17] ss:$8 sm:$0x3] }
0x1c74   :  { %4150 = vrot.lane.b32.xlu0 %v4142_v1, %s9987_s3 }
0x1c75   :  { %4156 = vrot.lane.b32.xlu1 %v4145_v22, %s9987_s3 }
0x1c78   :  { %4176 = vrot.lane.b32.xlu0 %v9693_v3, %s9987_s3 }
0x1c79   :  { %4178 = vrot.lane.b32.xlu1 %v9695_v27, %s9987_s3 }
0x1c7c   :  { %4174 = vrot.lane.b32.xlu0 %v9697_v26, %s9987_s3 }
0x1c7d   :  { %4180 = vrot.lane.b32.xlu1 %v9699_v62, %s9987_s3 }
0x1ce2   :  { %v4153_v31 = vpop.permute.xlu0 %4152 }
0x1ce3   :  { %v4155_v44 = vpop.permute.xlu1 %4154  ;;  %v11030_v45 = vadd.f32 %v4153_v31, %v4139_v19  ;;  %v4219_v31 = vld [vmem:[#allocation2 + $0x57] ss:$8 sm:$0x3] }
0x1ce4   :  { %v11032_v36 = vadd.f32 %v4155_v44, %v4140_v29  ;;  %v4217_v29 = vld [vmem:[#allocation2 + $0x37] ss:$8 sm:$0x3] }
0x1ce5   :  { %9704 = vtanh.f32 %v11030_v45 }
0x1ce6   :  { %9706 = vtanh.f32 %v11032_v36  ;;  %v4151_v37 = vpop.permute.xlu0 %4150 }
0x1ce7   :  { %v11038_v58 = vadd.f32 %v4151_v37, %v4138_v49  ;;  %v4157_v17 = vpop.permute.xlu1 %4156 }
0x1ce8   :  { %v11040_v21 = vadd.f32 %v4157_v17, %v4141_v50  ;;  %v4221_v17 = vld [vmem:[#allocation2 + $0x77] ss:$8 sm:$0x3] }
0x1ce9   :  { %9708 = vtanh.f32 %v11038_v58 }
0x1cea   :  { %9710 = vtanh.f32 %v11040_v21  ;;  %v4177_v56 = vpop.permute.xlu0 %4176 }
0x1ceb   :  { %v4179_v41 = vpop.permute.xlu1 %4178  ;;  %v4183_v15 = vrot.slane %v4177_v56, 1 }
0x1cec   :  { %v4184_v43 = vrot.slane %v4179_v41, 1 }
0x1cee   :  { %v4175_v8 = vpop.permute.xlu0 %4174 }
0x1cef   :  { %v4181_v42 = vpop.permute.xlu1 %4180  ;;  %v4182_v23 = vrot.slane %v4175_v8, 1 }
0x1cf0   :  { %v4185_v59 = vrot.slane %v4181_v42, 1 }
0x1cf2   :  { %v9705_v30 = vpop.eup %9704 }
0x1cf3   :  { %v9707_v40 = vpop.eup %9706  ;;  %4196 = vrot.lane.b32.xlu0 %v9705_v30, %s9987_s3 }
0x1cf4   :  { %4198 = vrot.lane.b32.xlu1 %v9707_v40, %s9987_s3 }
0x1cf6   :  { %v9709_v53 = vpop.eup %9708 }
0x1cf7   :  { %v9711_v5 = vpop.eup %9710  ;;  %4194 = vrot.lane.b32.xlu0 %v9709_v53, %s9987_s3 }
0x1cf8   :  { %4200 = vrot.lane.b32.xlu1 %v9711_v5, %s9987_s3 }
0x1d65   :  { %v4197_v46 = vpop.permute.xlu0 %4196 }
0x1d66   :  { %v4207_v47 = vmul.f32 %v4197_v46, %v4183_v15  ;;  %v4199_v48 = vpop.permute.xlu1 %4198 }
0x1d67   :  { %v4208_v16 = vmul.f32 %v4199_v48, %v4184_v43 }
0x1d68   :  { %4211 = vst.msk [vmem:[#allocation3 + $0x1e] sm:$0x1] %vm426_vm0, %v4207_v47  ;;  %v4223_v52 = vpack.c.bf16 %v4207_v47, %v4207_v47 }
0x1d69   :  { %4212 = vst.msk [vmem:[#allocation3 + $0x2e] sm:$0x1] %vm426_vm0, %v4208_v16  ;;  %v4224_v18 = vpack.c.bf16 %v4208_v16, %v4208_v16  ;;  %v4195_v39 = vpop.permute.xlu0 %4194 }
0x1d6a   :  { %v4239_v55 = vunpack.c.l.b16 %v4223_v52  ;;  %v4206_v24 = vmul.f32 %v4195_v39, %v4182_v23  ;;  %v4201_v54 = vpop.permute.xlu1 %4200 }
0x1d6b   :  { %v4240_v0 = vunpack.c.l.b16 %v4224_v18  ;;  %v4209_v33 = vmul.f32 %v4201_v54, %v4185_v59 }
0x1d6c   :  { %4210 = vst.msk [vmem:[#allocation3 + $0xe] sm:$0x1] %vm426_vm0, %v4206_v24  ;;  %v4222_v28 = vpack.c.bf16 %v4206_v24, %v4206_v24  ;;  %v4242_v32 = vrot.slane %v4239_v55, 7 }
0x1d6d   :  { %4213 = vst.msk [vmem:[#allocation3 + $0x3e] sm:$0x1] %vm426_vm0, %v4209_v33  ;;  %v4225_v34 = vpack.c.bf16 %v4209_v33, %v4209_v33  ;;  %v4244_v38 = vrot.slane %v4240_v0, 6 }
0x1d6e   :  { %v4238_v35 = vunpack.c.l.b16 %v4222_v28 }
0x1d6f   :  { %v4241_v61 = vunpack.c.l.b16 %v4225_v34 }
0x1d70   :  { %v4243_v20 = vsel %vm460_vm1, %v4242_v32, %v4238_v35 }
0x1d71   :  { %v4245_v63 = vsel %vm463_vm2, %v4244_v38, %v4243_v20  ;;  %v4246_v2 = vrot.slane %v4241_v61, 5  ;;  %v9988_v38 = vmov 15  }
0x1d72   :  { %9141 = vset.pattern.permute.xlu0 %v9988_v38 }
0x1d73   :  { %v4247_v7 = vsel %vm466_vm3, %v4246_v2, %v4245_v63 }
0x1d74   :  { %v4248_v14 = vpack.c.b16 %v4247_v7, %v4247_v7 }
0x1d76   :  { %8470 = vmatmul.mubr.msk.bf16.vlgmr.msra.gmra.mxu1 %vm234_vm4, %v4248_v14 }
0x1e36   :  { %v4326_v57 = vpop.f32.mrf.mxu1 }
0x1e38   :  { %v4328_v3 = vpop.f32.mrf.mxu1 }
0x1e39   :  { %v4335_v27 = vcombine.low %v4326_v57, %v4328_v3 }
0x1e3a   :  { %v4330_v25 = vpop.f32.mrf.mxu1 }
0x1e3b   :  { %v4342_v26 = vrot.slane %v4335_v27, %v10235_v51 }
0x1e3c   :  { %v4331_v60 = vpop.f32.mrf.mxu1 }
0x1e3d   :  { %v4343_v62 = vcombine.high %v4342_v26, %v4342_v26  ;;  %v4350_v6 = vrot.slane %v4342_v26, %v10235_v51 }
0x1e3f   :  { %v4357_v1 = vrot.slane %v4343_v62, %v10235_v51  ;;  %v4358_v22 = vcombine.high %v4350_v6, %v4350_v6  ;;  %v4364_v19 = vadd.f32 %v4350_v6, %v4215_v11 }
0x1e41   :  { %v4359_v44 = vcombine.high %v4357_v1, %v4357_v1  ;;  %v4365_v49 = vadd.f32 %v4357_v1, %v4217_v29  ;;  %v4366_v37 = vadd.f32 %v4358_v22, %v4219_v31  ;;  %v8471_v50 = vmul.f32 -1.442695, %v4364_v19  ;;  %v11091_v1 = vld [vmem:[%s12718_s7 + $0x10] sm:$0xff]   ;;  %v11105_v31 = vld [vmem:[%s12718_s7 + $0x8] sm:$0xff]  }
0x1e42   :  { %v4396_v23 = vrot.slane %v4364_v19, 1  ;;  %v11096_v19 = vld [vmem:[%s12717_s6 + $0x18] sm:$0xff]  }
0x1e43   :  { %v4367_v30 = vadd.f32 %v4359_v44, %v4221_v17  ;;  %9712 = vpow2.f32 %v8471_v50  ;;  %v8472_v40 = vmul.f32 -1.442695, %v4365_v49  ;;  %v8473_v53 = vmul.f32 -1.442695, %v4366_v37  ;;  %v11126_v50 = vld [vmem:[%s12717_s6 + $0x8] sm:$0xff]  }
0x1e44   :  { %v4397_v56 = vrot.slane %v4365_v49, 1  ;;  %v4398_v8 = vrot.slane %v4366_v37, 1  ;;  %v11112_v49 = vld [vmem:[%s12717_s6 + $0x10] sm:$0xff]   ;;  %v11119_v37 = vld [vmem:[%s12718_s7] sm:$0xff]   ;;  %12832 = vst [vmem:[#allocation12_spill] sm:$0xff] %v11126_v50 }
0x1e45   :  { %9714 = vpow2.f32 %v8472_v40  ;;  %v8474_v5 = vmul.f32 -1.442695, %v4367_v30  ;;  %v4399_v52 = vrot.slane %v4367_v30, 1  ;;  %v9872_v30 = vld [vmem:[%s12828_s26] sm:$0xf]  ;;  %s9999_s26 = smov 80  }
0x1e46   :  { %9716 = vpow2.f32 %v8473_v53  ;;  %v11144_v40 = vld [vmem:[%s12717_s6] sm:$0xff]  }
0x1e47   :  { %9718 = vpow2.f32 %v8474_v5  ;;  %12833 = vst [vmem:[#allocation13_spill] sm:$0xff] %v11144_v40 }
0x1e48   :  { %9720 = vtanh.f32 %v4397_v56 }
0x1e49   :  { %9722 = vtanh.f32 %v4398_v8 }
0x1e50   :  { %v9713_v41 = vpop.eup %9712 }
0x1e51   :  { %v4380_v43 = vadd.f32 1.0, %v9713_v41 }
0x1e52   :  { %v9715_v42 = vpop.eup %9714 }
0x1e53   :  { %v9717_v15 = vpop.eup %9716  ;;  %v4381_v46 = vadd.f32 1.0, %v9715_v42 }
0x1e54   :  { %v9719_v47 = vpop.eup %9718  ;;  %v4382_v48 = vadd.f32 1.0, %v9717_v15 }
0x1e55   :  { %v4383_v16 = vadd.f32 1.0, %v9719_v47  ;;  %9724 = vrcp.f32 %v4381_v46  ;;  %v9721_v59 = vpop.eup %9720 }
0x1e56   :  { %9726 = vrcp.f32 %v4382_v48  ;;  %v9723_v18 = vpop.eup %9722 }
0x1e57   :  { %9728 = vrcp.f32 %v4380_v43 }
0x1e58   :  { %9730 = vrcp.f32 %v4383_v16 }
0x1e59   :  { %9732 = vtanh.f32 %v4396_v23 }
0x1e5a   :  { %9734 = vtanh.f32 %v4399_v52 }
0x1e62   :  { %v9725_v39 = vpop.eup %9724 }
0x1e63   :  { %v9727_v55 = vpop.eup %9726  ;;  %v4413_v24 = vmul.f32 %v9725_v39, %v9721_v59  ;;  %v4409_v7 = vmul.f32 %v9725_v39, %v11030_v45  ;;  %v11080_v45 = vld [vmem:[%s12718_s7 + $0x18] sm:$0xff]  }
0x1e64   :  { %v9729_v54 = vpop.eup %9728  ;;  %v4414_v0 = vmul.f32 %v9727_v55, %v9723_v18  ;;  %v4410_v61 = vmul.f32 %v9727_v55, %v11032_v36 }
0x1e65   :  { %v9731_v33 = vpop.eup %9730  ;;  %4422 = vrot.lane.b32.xlu0 %v4413_v24, %s9987_s3  ;;  %v4408_v14 = vmul.f32 %v9729_v54, %v11038_v58 }
0x1e66   :  { %v9733_v28 = vpop.eup %9732  ;;  %4424 = vrot.lane.b32.xlu1 %v4414_v0, %s9987_s3  ;;  %v4411_v3 = vmul.f32 %v9731_v33, %v11040_v21  ;;  %v12732_v21 = vmov 0.0  }
0x1e67   :  { %v9735_v34 = vpop.eup %9734  ;;  %v4412_v32 = vmul.f32 %v9733_v28, %v9729_v54  ;;  %8737 = vmatprep.subr.bf16.mxu0 %v12732_v21  ;;  %8749 = vmatprep.subr.bf16.mxu1 %v12732_v21 }
0x1e68   :  { %v4415_v35 = vmul.f32 %v9735_v34, %v9731_v33  ;;  %8738 = vmatpush3.bf16.msra.mxu0 %v11080_v45  ;;  %8750 = vmatpush3.bf16.msra.mxu1 %v11096_v19 }
0x1e69   :  { %4420 = vrot.lane.b32.xlu0 %v4412_v32, %s9987_s3  ;;  %8739 = vmatprep.subr.bf16.mxu0 %v12732_v21 }
0x1e6a   :  { %4426 = vrot.lane.b32.xlu1 %v4415_v35, %s9987_s3  ;;  %8751 = vmatprep.subr.bf16.mxu1 %v12732_v21 }
0x1e6b   :  { %8745 = vmatprep.mubr.msk.bf16.mxu0 %vm9990_vm5, %v12732_v21  ;;  %8757 = vmatprep.mubr.msk.bf16.mxu1 %vm9990_vm5, %v12732_v21 }
0x1e6c   :  { %8740 = vmatpush3.bf16.msra.mxu0 %v11091_v1  ;;  %8752 = vmatpush3.bf16.msra.mxu1 %v11112_v49 }
0x1e6d   :  { %4446 = vrot.lane.b32.xlu0 %v9725_v39, %s9987_s3  ;;  %8741 = vmatprep.subr.bf16.mxu0 %v12732_v21 }
0x1e6e   :  { %4448 = vrot.lane.b32.xlu1 %v9727_v55, %s9987_s3  ;;  %8753 = vmatprep.subr.bf16.mxu1 %v12732_v21 }
0x1e70   :  { %8742 = vmatpush3.bf16.msra.mxu0 %v11105_v31  ;;  %8754 = vmatpush3.bf16.msra.mxu1 %v11126_v50 }
0x1e71   :  { %4444 = vrot.lane.b32.xlu0 %v9729_v54, %s9987_s3  ;;  %8743 = vmatprep.subr.bf16.mxu0 %v12732_v21 }
0x1e72   :  { %4450 = vrot.lane.b32.xlu1 %v9731_v33, %s9987_s3  ;;  %8755 = vmatprep.subr.bf16.mxu1 %v12732_v21 }
0x1e74   :  { %8744 = vmatpush3.bf16.msra.mxu0 %v11119_v37  ;;  %8756 = vmatpush3.bf16.msra.mxu1 %v11144_v40 }
0x1e75   :  { %8761 = vmatprep.subr.bf16.mxu0 %v12732_v21  ;;  %8773 = vmatprep.subr.bf16.mxu1 %v12732_v21 }
0x1ed7   :  { %v4423_v20 = vpop.permute.xlu0 %4422 }
0x1ed8   :  { %v4425_v63 = vpop.permute.xlu1 %4424  ;;  %v4433_v27 = vadd.f32 %v4423_v20, %v4409_v7 }
0x1ed9   :  { %v4434_v2 = vadd.f32 %v4425_v63, %v4410_v61  ;;  %v11158_v63 = vld [vmem:[%s12715_s4] ss:$0 sm:$0xff] }
0x1edb   :  { %9736 = vtanh.f32 %v4434_v2  ;;  %v4421_v57 = vpop.permute.xlu0 %4420 }
0x1edc   :  { %v4432_v25 = vadd.f32 %v4421_v57, %v4408_v14  ;;  %v4427_v26 = vpop.permute.xlu1 %4426  ;;  %v11166_v14 = vld [vmem:[%s12716_s5] ss:$0 sm:$0xff] }
0x1edd   :  { %v4435_v60 = vadd.f32 %v4427_v26, %v4411_v3 }
0x1ede   :  { %9738 = vtanh.f32 %v4432_v25  ;;  %v5178_v62 = vcombine.low %v4432_v25, %v4433_v27  ;;  %v11177_v25 = vld [vmem:[%s12720_s9 + $0x18] sm:$0xff]  }
0x1edf   :  { %9740 = vtanh.f32 %v4435_v60  ;;  %v5179_v6 = vcombine.low %v4434_v2, %v4435_v60  ;;  %v4447_v5 = vpop.permute.xlu0 %4446  ;;  %v11184_v60 = vld [vmem:[%s12720_s9 + $0x10] sm:$0xff]  }
0x1ee0   :  { %v11072_v36 = vrot.slane %v5178_v62, %v10235_v51  ;;  %9742 = vtanh.f32 %v4433_v27  ;;  %v4449_v53 = vpop.permute.xlu1 %4448  ;;  %v4453_v52 = vrot.slane %v4447_v5, 1  ;;  %v11193_v62 = vld [vmem:[%s12720_s9 + $0x8] sm:$0xff]  }
0x1ee1   :  { %v11075_v11 = vrot.slane %v5179_v6, %v10235_v51  ;;  %v4454_v41 = vrot.slane %v4449_v53, 1  ;;  %v11200_v6 = vld [vmem:[%s12720_s9] sm:$0xff]  }
0x1ee3   :  { %v4445_v8 = vpop.permute.xlu0 %4444 }
0x1ee4   :  { %v4451_v56 = vpop.permute.xlu1 %4450  ;;  %v4452_v43 = vrot.slane %v4445_v8, 1 }
0x1ee5   :  { %v4455_v46 = vrot.slane %v4451_v56, 1 }
0x1ee8   :  { %v9737_v22 = vpop.eup %9736 }
0x1ee9   :  { %4468 = vrot.lane.b32.xlu1 %v9737_v22, %s9987_s3 }
0x1eeb   :  { %v9739_v29 = vpop.eup %9738 }
0x1eec   :  { %v9741_v44 = vpop.eup %9740  ;;  %4464 = vrot.lane.b32.xlu0 %v9739_v29, %s9987_s3 }
0x1eed   :  { %4470 = vrot.lane.b32.xlu1 %v9741_v44, %s9987_s3  ;;  %v9743_v17 = vpop.eup %9742 }
0x1ef0   :  { %4466 = vrot.lane.b32.xlu0 %v9743_v17, %s9987_s3 }
0x1ef4   :  { %4526 = vperm.xlu0 %9141, %v9872_v30   ;;  %v11209_v30 = vld [vmem:[%s12719_s8] ss:$0 sm:$0xff] }
0x1ef5   :  { %12834 = vst [vmem:[#allocation14_spill] sm:$0xff] %v11209_v30 }
0x1ef8   :  { %9142 = vset.pattern.permute.xlu0 %v12734_v4 }
0x1f5b   :  { %v4469_v42 = vpop.permute.xlu1 %4468 }
0x1f5c   :  { %v4478_v15 = vmul.f32 %v4469_v42, %v4454_v41 }
0x1f5e   :  { %4482 = vst.msk [vmem:[#allocation3 + $0x2f] sm:$0x1] %vm426_vm0, %v4478_v15  ;;  %v4465_v47 = vpop.permute.xlu0 %4464  ;;  %v4522_v59 = vpack.c.bf16 %v4478_v15, %v4478_v15 }
0x1f5f   :  { %v4476_v48 = vmul.f32 %v4465_v47, %v4452_v43  ;;  %v4471_v16 = vpop.permute.xlu1 %4470 }
0x1f60   :  { %v4479_v23 = vmul.f32 %v4471_v16, %v4455_v46  ;;  %v4560_v0 = vunpack.c.l.b16 %v4522_v59 }
0x1f61   :  { %4480 = vst.msk [vmem:[#allocation3 + $0xf] sm:$0x1] %vm426_vm0, %v4476_v48  ;;  %v4520_v24 = vpack.c.bf16 %v4476_v48, %v4476_v48 }
0x1f62   :  { %4483 = vst.msk [vmem:[#allocation3 + $0x3f] sm:$0x1] %vm426_vm0, %v4479_v23  ;;  %v4467_v18 = vpop.permute.xlu0 %4466  ;;  %v4523_v39 = vpack.c.bf16 %v4479_v23, %v4479_v23  ;;  %v4564_v35 = vrot.slane %v4560_v0, 6 }
0x1f63   :  { %v4477_v55 = vmul.f32 %v4467_v18, %v4453_v52  ;;  %v4558_v34 = vunpack.c.l.b16 %v4520_v24 }
0x1f64   :  { %v4561_v33 = vunpack.c.l.b16 %v4523_v39 }
0x1f65   :  { %4481 = vst.msk [vmem:[#allocation3 + $0x1f] sm:$0x1] %vm426_vm0, %v4477_v55  ;;  %v4521_v54 = vpack.c.bf16 %v4477_v55, %v4477_v55  ;;  %vm8240_vm0 = vcmask 392192  }
0x1f66   :  { %v4566_v38 = vrot.slane %v4561_v33, 5 }
0x1f67   :  { %v4559_v28 = vunpack.c.l.b16 %v4521_v54 }
0x1f69   :  { %v4562_v32 = vrot.slane %v4559_v28, 7 }
0x1f6b   :  { %v4563_v61 = vsel %vm460_vm1, %v4562_v32, %v4558_v34  ;;  %v11229_v34 = vld [vmem:[%s12721_s10 + $0x18] sm:$0xff]   ;;  %v11236_v32 = vld [vmem:[%s12721_s10 + $0x10] sm:$0xff]  }
0x1f6c   :  { %v4565_v20 = vsel %vm463_vm2, %v4564_v35, %v4563_v61  ;;  %v11243_v35 = vld [vmem:[%s12721_s10 + $0x8] sm:$0xff]   ;;  %v11255_v61 = vld [vmem:[%s12724_s13 + $0x34] ss:$8 sps:$4 sm:$0xff]  }
0x1f6d   :  { %v4567_v2 = vsel %vm466_vm3, %v4566_v38, %v4565_v20  ;;  %v11249_v38 = vld [vmem:[%s12721_s10] sm:$0xff]   ;;  %v11262_v20 = vld [vmem:[%s12723_s12 + $0x34] ss:$8 sps:$4 sm:$0xff]  }
0x1f6e   :  { %v11161_v7 = vpack.c.b16 %v4567_v2, %v4567_v2  ;;  %v11267_v2 = vld [vmem:[%s12723_s12 + $0x30] ss:$8 sps:$4 sm:$0xff]  }
0x1f6f   :  { %v4527_v57 = vpop.permute.xlu0 %4526 }
0x1f70   :  { %v4535_v3 = vmul.f32 %v11158_v63, %v4527_v57  ;;  %8746 = vmatmul.mubr.msk.bf16.vlgmr.msra.gmra.mxu0 %vm234_vm4, %v11161_v7  ;;  %v11272_v57 = vld [vmem:[%s12723_s12 + $0x24] ss:$8 sps:$4 sm:$0xff]  }
0x1f71   :  { %8769 = vmatprep.mubr.msk.bf16.mxu0 %vm9990_vm5, %v12732_v21  ;;  %8762 = vmatpush3.bf16.msra.mxu0 %v11229_v34 }
0x1f72   :  { %v4536_v27 = vadd.f32 %v11166_v14, %v4535_v3  ;;  %8763 = vmatprep.subr.bf16.mxu0 %v12732_v21  ;;  %v11279_v3 = vld [vmem:[%s12723_s12 + $0x20] ss:$8 sps:$4 sm:$0xff]  }
0x1f73   :  { %12836 = vst [vmem:[#allocation16_spill] sm:$0xff] %v11279_v3 }
0x1f74   :  { %v4537_v26 = vpack.c.bf16 %v4536_v27, %v4536_v27  ;;  %v11283_v27 = vld [vmem:[#allocation3 + $0x8] sm:$0xff] }
0x1f75   :  { %8764 = vmatpush3.bf16.msra.mxu0 %v11236_v32  ;;  %12837 = vst [vmem:[#allocation17_spill] sm:$0xff] %v11283_v27 }
0x1f76   :  { %8758 = vmatmul.mubr.msk.bf16.vlgmr.msra.gmra.mxu1 %vm234_vm4, %v4537_v26  ;;  %8765 = vmatprep.subr.bf16.mxu0 %v12732_v21 }
0x1f77   :  { %8774 = vmatpush3.bf16.msra.mxu1 %v11177_v25  ;;  %8781 = vmatprep.mubr.msk.bf16.mxu1 %vm9990_vm5, %v12732_v21 }
0x1f78   :  { %8775 = vmatprep.subr.bf16.mxu1 %v12732_v21 }
0x1f79   :  { %8766 = vmatpush3.bf16.msra.mxu0 %v11243_v35 }
0x1f7a   :  { %8767 = vmatprep.subr.bf16.mxu0 %v12732_v21 }
0x1f7b   :  { %8776 = vmatpush3.bf16.msra.mxu1 %v11184_v60 }
0x1f7c   :  { %8777 = vmatprep.subr.bf16.mxu1 %v12732_v21 }
0x1f7d   :  { %8768 = vmatpush3.bf16.msra.mxu0 %v11249_v38 }
0x1f7e   :  { %5042 = vmatprep.subr.bf16.mxu0 %v11255_v61 }
0x1f7f   :  { %8778 = vmatpush3.bf16.msra.mxu1 %v11193_v62 }
0x1f80   :  { %8779 = vmatprep.subr.bf16.mxu1 %v12732_v21 }
0x1f83   :  { %8780 = vmatpush3.bf16.msra.mxu1 %v11200_v6 }
0x1f84   :  { %5126 = vmatprep.subr.bf16.mxu1 %v11262_v20 }
0x1f86   :  { %8782 = vmatmul.mubr.msk.bf16.vlgmr.msra.gmra.mxu1 %vm234_vm4, %v4537_v26 }
0x1f87   :  { %5150 = vmatprep.mubr.bf16.mxu1 %v12734_v4  ;;  %5127 = vmatpush1.bf16.msra.mxu1 %v11267_v2 }
0x1f88   :  { %5128 = vmatprep.subr.bf16.mxu1 %v11272_v57 }
0x1f8b   :  { %5129 = vmatpush1.bf16.msra.mxu1 %v11279_v3 }
0x2030   :  { %v4630_v22 = vpop.f32.mrf.mxu0 }
0x2032   :  { %v8747_v29 = vpop.f32.mrf.mxu0 }
0x2034   :  { %v4633_v44 = vpop.f32.mrf.mxu0 }
0x2036   :  { %v8748_v17 = vpop.f32.mrf.mxu0  ;;  %v4697_v53 = vpop.f32.mrf.mxu1 }
0x2037   :  { %v4698_v5 = vadd.f32 %v4697_v53, %v4630_v22  ;;  %v11285_v22 = vld [vmem:[#allocation3] sm:$0xff] }
0x2038   :  { %v8759_v56 = vpop.f32.mrf.mxu1  ;;  %12838 = vst [vmem:[#allocation18_spill] sm:$0xff] %v11285_v22 }
0x2039   :  { %v4703_v41 = vadd.f32 %v11209_v30, %v4698_v5 }
0x203a   :  { %v4700_v8 = vpop.f32.mrf.mxu1 }
0x203b   :  { %v4705_v42 = vsel %vm4704_vm6, %v4703_v41, -inf }
0x203c   :  { %4706 = vmax.xlane.f32.xlu1 %v4705_v42  ;;  %v8760_v15 = vpop.f32.mrf.mxu1 }
0x203d   :  { %v11291_v15 = vld [vmem:[#allocation3 + $0x10] sm:$0xff] }
0x203e   :  { %12839 = vst [vmem:[#allocation19_spill] sm:$0xff] %v11291_v15 }
0x2046   :  { %v11213_v43 = vpop.f32.mrf.mxu1 }
0x2048   :  { %v8783_v46 = vpop.f32.mrf.mxu1 }
0x204a   :  { %v4972_v47 = vpop.f32.mrf.mxu1 }
0x204b   :  { %v11294_v47 = vld [vmem:[#allocation3 + $0x18] sm:$0xff] }
0x204c   :  { %v8784_v48 = vpop.f32.mrf.mxu1  ;;  %12840 = vst [vmem:[#allocation20_spill] sm:$0xff] %v11294_v47 }
0x20c5   :  { %v4707_v16 = vpop.xlane.xlu1 %4706 }
0x20c6   :  { %v4708_v23 = vsub.f32 %v4703_v41, %v4707_v16 }
0x20c8   :  { %v4709_v52 = vmul.f32 1.442695, %v4708_v23 }
0x20ca   :  { %9744 = vpow2.f32 %v4709_v52  ;;  %v11297_v52 = vld [vmem:[#allocation3 + $0x20] sm:$0xff] }
0x20cb   :  { %12841 = vst [vmem:[#allocation21_spill] sm:$0xff] %v11297_v52 }
0x20d7   :  { %v9745_v59 = vpop.eup %9744 }
0x20d8   :  { %v4711_v18 = vsel %vm4704_vm6, %v9745_v59, 0.0 }
0x20d9   :  { %4712 = vadd.xlane.f32.xlu0 %v4711_v18 }
0x2162   :  { %v4713_v39 = vpop.xlane.xlu0 %4712 }
0x2163   :  { %9746 = vrcp.f32 %v4713_v39 }
0x2170   :  { %v9747_v55 = vpop.eup %9746 }
0x2171   :  { %v11216_v24 = vmul.f32 %v9747_v55, %v9745_v59 }
0x2173   :  { %12835 = vst [vmem:[#allocation15_spill] sm:$0xff] %v11216_v24  ;;  %v4719_v54 = vrot.slane %v11216_v24, %v10137_v10  ;;  %v4741_v0 = vrot.slane %v11216_v24, %v10144_v12  ;;  %v4730_v33 = vrot.slane %v11216_v24, %v10134_v9  ;;  %v4752_v28 = vrot.slane %v11216_v24, %v10147_v13 }
0x2175   :  { %4725 = vbcast.lane.b32.xlu0 %v4719_v54, 264  ;;  %4721 = vbcast.lane.b32.xlu1 %v4719_v54, 256 }
0x2179   :  { %4743 = vbcast.lane.b32.xlu0 %v4741_v0, 256  ;;  %4732 = vbcast.lane.b32.xlu1 %v4730_v33, 256 }
0x217d   :  { %4754 = vbcast.lane.b32.xlu0 %v4752_v28, 256  ;;  %4736 = vbcast.lane.b32.xlu1 %v4730_v33, 264 }
0x2181   :  { %4747 = vbcast.lane.b32.xlu1 %v4741_v0, 264  ;;  %v11302_v0 = vld [vmem:[#allocation3 + $0x28] sm:$0xff] }
0x2182   :  { %12842 = vst [vmem:[#allocation22_spill] sm:$0xff] %v11302_v0 }
0x2185   :  { %4758 = vbcast.lane.b32.xlu1 %v4752_v28, 264 }
0x21e7   :  { %v4726_v26 = vpop.permute.xlu0 %4725  ;;  %v4722_v29 = vpop.permute.xlu1 %4721 }
0x21e8   :  { %v4769_v44 = vmul.f32 %v11283_v27, %v4726_v26  ;;  %v4768_v17 = vmul.f32 %v11285_v22, %v4722_v29  ;;  %v11305_v29 = vld [vmem:[#allocation3 + $0x30] sm:$0xff] }
0x21e9   :  { %12843 = vst [vmem:[#allocation23_spill] sm:$0xff] %v11305_v29 }
0x21ea   :  { %v4777_v53 = vsel %vm234_vm4, %v4769_v44, 0.0  ;;  %v4776_v5 = vsel %vm234_vm4, %v4768_v17, 0.0 }
0x21eb   :  { %v4778_v56 = vadd.f32 %v4777_v53, %v4776_v5  ;;  %v4733_v41 = vpop.permute.xlu1 %4732  ;;  %v4744_v42 = vpop.permute.xlu0 %4743 }
0x21ec   :  { %v4770_v46 = vmul.f32 %v11291_v15, %v4733_v41  ;;  %v4772_v59 = vmul.f32 %v11297_v52, %v4744_v42 }
0x21ed   :  { %v4779_v8 = vrot.slane %v4778_v56, 4 }
0x21ee   :  { %v4785_v18 = vsel %vm234_vm4, %v4770_v46, 0.0  ;;  %v4794_v17 = vsel %vm234_vm4, %v4772_v59, 0.0 }
0x21ef   :  { %v4737_v48 = vpop.permute.xlu1 %4736  ;;  %v4780_v23 = vadd.f32 %v4779_v8, %v4778_v56  ;;  %v4755_v55 = vpop.permute.xlu0 %4754  ;;  %v11310_v8 = vld [vmem:[#allocation3 + $0x38] sm:$0xff] }
0x21f0   :  { %v4771_v16 = vmul.f32 %v11294_v47, %v4737_v48  ;;  %v4774_v53 = vmul.f32 %v11305_v29, %v4755_v55  ;;  %12844 = vst [vmem:[#allocation24_spill] sm:$0xff] %v11310_v8 }
0x21f1   :  { %v4781_v26 = vrot.slane %v4780_v23, 2 }
0x21f2   :  { %v4786_v39 = vsel %vm234_vm4, %v4771_v16, 0.0 }
0x21f3   :  { %v4787_v54 = vadd.f32 %v4786_v39, %v4785_v18  ;;  %v4748_v33 = vpop.permute.xlu1 %4747  ;;  %v4782_v48 = vadd.f32 %v4781_v26, %v4780_v23  ;;  %v4803_v39 = vsel %vm234_vm4, %v4774_v53, 0.0 }
0x21f4   :  { %v4773_v28 = vmul.f32 %v11302_v0, %v4748_v33 }
0x21f5   :  { %v4788_v44 = vrot.slane %v4787_v54, 4  ;;  %v4783_v55 = vrot.slane %v4782_v48, 1 }
0x21f6   :  { %v4795_v5 = vsel %vm234_vm4, %v4773_v28, 0.0 }
0x21f7   :  { %v4789_v56 = vadd.f32 %v4788_v44, %v4787_v54  ;;  %v4796_v41 = vadd.f32 %v4795_v5, %v4794_v17  ;;  %v4759_v42 = vpop.permute.xlu1 %4758  ;;  %v4784_v24 = vadd.f32 %v4783_v55, %v4782_v48  ;;  %v11346_v48 = vld [vmem:[%s12724_s13 + $0x10] ss:$8 sps:$4 sm:$0xff]   ;;  %v11358_v55 = vld [vmem:[%s12724_s13] ss:$8 sps:$4 sm:$0xff]  }
0x21f8   :  { %v4775_v46 = vmul.f32 %v11310_v8, %v4759_v42 }
0x21f9   :  { %v4790_v16 = vrot.slane %v4789_v56, 2  ;;  %v4797_v18 = vrot.slane %v4796_v41, 4  ;;  %v4820_v52 = vpack.c.bf16 %v4784_v24, %v4784_v24 }
0x21fa   :  { %v4804_v33 = vsel %vm234_vm4, %v4775_v46, 0.0 }
0x21fb   :  { %v4791_v58 = vadd.f32 %v4790_v16, %v4789_v56  ;;  %v4798_v59 = vadd.f32 %v4797_v18, %v4796_v41  ;;  %v4805_v21 = vadd.f32 %v4804_v33, %v4803_v39  ;;  %v4836_v16 = vunpack.c.l.b16 %v4820_v52  ;;  %v11333_v52 = vld [vmem:[%s12724_s13 + $0x20] ss:$8 sps:$4 sm:$0xff]  }
0x21fd   :  { %v4792_v4 = vrot.slane %v4791_v58, 1  ;;  %v4799_v28 = vrot.slane %v4798_v59, 2  ;;  %v4806_v54 = vrot.slane %v4805_v21, 4 }
0x21ff   :  { %v4793_v44 = vadd.f32 %v4792_v4, %v4791_v58  ;;  %v4800_v17 = vadd.f32 %v4799_v28, %v4798_v59  ;;  %v4807_v5 = vadd.f32 %v4806_v54, %v4805_v21  ;;  %v11321_v21 = vld [vmem:[%s12724_s13 + $0x30] ss:$8 sps:$4 sm:$0xff]   ;;  %v11352_v59 = vld [vmem:[%s12724_s13 + $0x4] ss:$8 sps:$4 sm:$0xff]   ;;  %v12846_v28 = vmov 0.0  }
0x2200   :  { %v11383_v54 = vld [vmem:[%s12723_s12 + $0x10] ss:$8 sps:$4 sm:$0xff]  }
0x2201   :  { %v4801_v29 = vrot.slane %v4800_v17, 1  ;;  %v4808_v42 = vrot.slane %v4807_v5, 2  ;;  %v4821_v23 = vpack.c.bf16 %v4793_v44, %v4793_v44  ;;  %12848 = vst [vmem:[#allocation26_spill] sm:$0xff] %v11383_v54  ;;  %v11390_v44 = vld [vmem:[%s12723_s12 + $0x4] ss:$8 sps:$4 sm:$0xff]  }
0x2202   :  { %12849 = vst [vmem:[#allocation27_spill] sm:$0xff] %v11390_v44 }
0x2203   :  { %v4802_v26 = vadd.f32 %v4801_v29, %v4800_v17  ;;  %v4809_v8 = vadd.f32 %v4808_v42, %v4807_v5  ;;  %v4837_v46 = vunpack.c.l.b16 %v4821_v23  ;;  %v12845_v29 = vmov 0   ;;  %v11395_v17 = vld [vmem:[%s12723_s12] ss:$8 sps:$4 sm:$0xff]  }
0x2204   :  { %12850 = vst [vmem:[#allocation28_spill] sm:$0xff] %v11395_v17  ;;  %v11403_v5 = vld [vmem:[%s12722_s11] ss:$0 sm:$0xff] }
0x2205   :  { %v4822_v53 = vpack.c.bf16 %v4802_v26, %v4802_v26  ;;  %v4810_v0 = vrot.slane %v4809_v8, 1  ;;  %v4840_v39 = vsel %vm460_vm1, %v4837_v46, %v4836_v16 }
0x2207   :  { %v4811_v56 = vadd.f32 %v4810_v0, %v4809_v8  ;;  %v4838_v41 = vunpack.c.l.b16 %v4822_v53  ;;  %v11326_v0 = vld [vmem:[%s12724_s13 + $0x24] ss:$8 sps:$4 sm:$0xff]   ;;  %v11340_v8 = vld [vmem:[%s12724_s13 + $0x14] ss:$8 sps:$4 sm:$0xff]  }
0x2209   :  { %v4823_v18 = vpack.c.bf16 %v4811_v56, %v4811_v56  ;;  %v4841_v4 = vsel %vm463_vm2, %v4838_v41, %v4840_v39 }
0x220b   :  { %v4839_v33 = vunpack.c.l.b16 %v4823_v18 }
0x220d   :  { %v4842_v58 = vsel %vm466_vm3, %v4839_v33, %v4841_v4  ;;  %v8519_v4 = vld [vmem:[%s12726_s15] ss:$0 sm:$0xff]  ;;  %s9992_s15 = smov 2  }
0x220e   :  { %v4843_v24 = vpack.c.b16 %v4842_v58, %v4842_v58  ;;  %5217 = vrot.lane.b32.xlu1 %v8519_v4, %s9987_s3  ;;  %v4506_v58 = vld [vmem:[%s12725_s14] sm:$0x3] }
0x2210   :  { %8770 = vmatmul.mubr.msk.bf16.vlgmr.msra.gmra.mxu0 %vm234_vm4, %v4843_v24  ;;  %v11426_v24 = vrot.slane %v4506_v58, %v10137_v10 }
0x2211   :  { %5043 = vmatpush1.bf16.msra.mxu0 %v11321_v21  ;;  %5066 = vmatprep.mubr.bf16.mxu0 %v12845_v29 }
0x2212   :  { %5044 = vmatprep.subr.bf16.mxu0 %v11326_v0 }
0x2215   :  { %5045 = vmatpush1.bf16.msra.mxu0 %v11333_v52 }
0x2216   :  { %5046 = vmatprep.subr.bf16.mxu0 %v11340_v8 }
0x2219   :  { %5047 = vmatpush1.bf16.msra.mxu0 %v11346_v48 }
0x221a   :  { %5048 = vmatprep.subr.bf16.mxu0 %v11352_v59 }
0x221d   :  { %5049 = vmatpush1.bf16.msra.mxu0 %v11358_v55 }
0x221e   :  { %8785 = vmatprep.subr.bf16.mxu0 %v12846_v28 }
0x2220   :  { %8507 = vmatmul.mubr.msk.bf16.vlgmr.msra.gmra.mxu0 %vm234_vm4, %v11161_v7  ;;  %v11378_v7 = vld [vmem:[%s12723_s12 + $0x14] ss:$8 sps:$4 sm:$0xff]  }
0x2221   :  { %8786 = vmatpush3.bf16.msra.mxu0 %v11080_v45  ;;  %8793 = vmatprep.mubr.msk.bf16.mxu0 %vm9990_vm5, %v12846_v28  ;;  %12847 = vst [vmem:[#allocation25_spill] sm:$0xff] %v11378_v7 }
0x2222   :  { %8787 = vmatprep.subr.bf16.mxu0 %v12846_v28  ;;  %5130 = vmatprep.subr.bf16.mxu1 %v11378_v7 }
0x2223   :  { %5131 = vmatpush1.bf16.msra.mxu1 %v11383_v54 }
0x2224   :  { %5132 = vmatprep.subr.bf16.mxu1 %v11390_v44 }
0x2225   :  { %8788 = vmatpush3.bf16.msra.mxu0 %v11091_v1 }
0x2226   :  { %8789 = vmatprep.subr.bf16.mxu0 %v12846_v28 }
0x2227   :  { %5133 = vmatpush1.bf16.msra.mxu1 %v11395_v17 }
0x2228   :  { %8797 = vmatprep.subr.bf16.mxu1 %v12846_v28 }
0x2229   :  { %8790 = vmatpush3.bf16.msra.mxu0 %v11105_v31 }
0x222a   :  { %8791 = vmatprep.subr.bf16.mxu0 %v12846_v28 }
0x222d   :  { %8792 = vmatpush3.bf16.msra.mxu0 %v11119_v37 }
0x222e   :  { %8809 = vmatprep.subr.bf16.mxu0 %v12846_v28 }
0x22d0   :  { %v4905_v42 = vpop.f32.mrf.mxu0 }
0x22d1   :  { %v4970_v23 = vadd.f32 %v11213_v43, %v4905_v42 }
0x22d2   :  { %v8771_v26 = vpop.f32.mrf.mxu0 }
0x22d3   :  { %v4975_v53 = vadd.f32 %v11403_v5, %v4970_v23 }
0x22d4   :  { %v4908_v46 = vpop.f32.mrf.mxu0 }
0x22d5   :  { %v4976_v56 = vmax.f32 %v4975_v53, 0.0 }
0x22d6   :  { %v8772_v41 = vpop.f32.mrf.mxu0 }
0x22d7   :  { %v4977_v16 = vpack.c.bf16 %v4976_v56, %v4976_v56 }
0x22d9   :  { %8516 = vmatmul.mubr.msk.bf16.vlgmr.msra.gmra.mxu1 %vm234_vm4, %v4977_v16  ;;  %v11430_v16 = vrot.slane %v4506_v58, %v10134_v9 }
0x22da   :  { %8798 = vmatpush3.bf16.msra.mxu1 %v11096_v19  ;;  %8805 = vmatprep.mubr.msk.bf16.mxu1 %vm9990_vm5, %v12846_v28 }
0x22db   :  { %8799 = vmatprep.subr.bf16.mxu1 %v12846_v28 }
0x22de   :  { %8800 = vmatpush3.bf16.msra.mxu1 %v11112_v49 }
0x22df   :  { %8801 = vmatprep.subr.bf16.mxu1 %v12846_v28 }
0x22e0   :  { %v5068_v43 = vpop.f32.mrf.mxu0 }
0x22e2   :  { %v5070_v18 = vpop.f32.mrf.mxu0  ;;  %8802 = vmatpush3.bf16.msra.mxu1 %v11126_v50 }
0x22e3   :  { %8803 = vmatprep.subr.bf16.mxu1 %v12846_v28 }
0x22e4   :  { %v5072_v39 = vpop.f32.mrf.mxu0 }
0x22e6   :  { %v5073_v33 = vpop.f32.mrf.mxu0  ;;  %8804 = vmatpush3.bf16.msra.mxu1 %v11144_v40 }
0x22e7   :  { %8821 = vmatprep.subr.bf16.mxu1 %v12846_v28 }
0x2399   :  { %v5152_v42 = vpop.f32.mrf.mxu1 }
0x239a   :  { %v5153_v23 = vadd.f32 %v5152_v42, %v5068_v43  ;;  %v12851_v43 = vcombine.low %v11072_v36, %v11075_v11 }
0x239b   :  { %v5154_v26 = vpop.f32.mrf.mxu1 }
0x239c   :  { %v5159_v53 = vadd.f32 %v5153_v23, %v11426_v24  ;;  %v5155_v39 = vadd.f32 %v5154_v26, %v5070_v18  ;;  %v5201_v42 = vrot.slane %v12851_v43, %v10235_v51 }
0x239d   :  { %v5156_v46 = vpop.f32.mrf.mxu1 }
0x239e   :  { %v8517_v56 = vmul.f32 -1.442695, %v5159_v53  ;;  %v5160_v33 = vadd.f32 %v5155_v39, %v11430_v16 }
0x239f   :  { %v5157_v41 = vpop.f32.mrf.mxu1 }
0x23a0   :  { %9748 = vpow2.f32 %v8517_v56  ;;  %v8518_v58 = vmul.f32 -1.442695, %v5160_v33 }
0x23a1   :  { %9750 = vtanh.f32 %v5160_v33  ;;  %v11446_v33 = vld [vmem:[#allocation4] ss:$0 sm:$0xff] }
0x23ad   :  { %v9749_v4 = vpop.eup %9748 }
0x23ae   :  { %v5167_v40 = vadd.f32 1.0, %v9749_v4  ;;  %v9751_v50 = vpop.eup %9750  ;;  %v11441_v4 = vpop.permute.xlu1 %5217 }
0x23b0   :  { %9752 = vrcp.f32 %v5167_v40 }
0x23b1   :  { %9754 = vpow2.f32 %v8518_v58 }
0x23bd   :  { %v9753_v23 = vpop.eup %9752 }
0x23be   :  { %v5204_v53 = vmul.f32 %v9753_v23, %v9751_v50  ;;  %v5203_v46 = vmul.f32 %v9753_v23, %v5201_v42  ;;  %v9755_v18 = vpop.eup %9754 }
0x23bf   :  { %v5168_v26 = vadd.f32 1.0, %v9755_v18 }
0x23c0   :  { %5206 = vrot.lane.b32.xlu0 %v5204_v53, %s9987_s3 }
0x23c1   :  { %9756 = vrcp.f32 %v5168_v26 }
0x23ce   :  { %v9757_v40 = vpop.eup %9756 }
0x2432   :  { %v5207_v56 = vpop.permute.xlu0 %5206 }
0x2433   :  { %v11438_v41 = vadd.f32 %v5207_v56, %v5203_v46 }
0x2435   :  { %9758 = vtanh.f32 %v11438_v41 }
0x2442   :  { %v9759_v39 = vpop.eup %9758 }
0x2443   :  { %v5211_v51 = vmul.f32 %v9759_v39, %v9757_v40 }
0x2445   :  { %v5220_v36 = vmul.f32 %v11441_v4, %v5211_v51  ;;  %v5237_v53 = vpack.c.bf16 %v5211_v51, %v5211_v51 }
0x2447   :  { %5222 = vrot.lane.b32.xlu0 %v5220_v36, %s9987_s3 }
0x24b9   :  { %v5223_v11 = vpop.permute.xlu0 %5222 }
0x24ba   :  { %v5226_v50 = vsel %vm5225_vm7, %v5223_v11, 0.0 }
0x24bb   :  { %5227 = vadd.xlane.f32.xlu1 %v5226_v50 }
0x2544   :  { %v5228_v43 = vpop.xlane.xlu1 %5227 }
0x2545   :  { %v11449_v42 = vadd.f32 %v11446_v33, %v5228_v43 }
0x2547   :  { %12852 = vst [vmem:[#allocation29_spill] sm:$0xff] %v11449_v42  ;;  %v12747_v23 = vmax.f32 %v11449_v42, 0.0 }
0x2549   :  { %5240 = vperm.xlu0 %9142, %v12747_v23  }
0x254d   :  { %5247 = vrot.lane.b32.xlu0 %v5237_v53, %s9987_s3 }
0x25c4   :  { %v5241_v46 = vpop.permute.xlu0 %5240 }
0x25c5   :  { %v5243_v58 = vmul.f32 %v11158_v63, %v5241_v46 }
0x25c7   :  { %v5244_v18 = vadd.f32 %v11166_v14, %v5243_v58 }
0x25c8   :  { %v11457_v26 = vpop.permute.xlu0 %5247 }
0x25c9   :  { %v5245_v56 = vpack.c.bf16 %v5244_v18, %v5244_v18  ;;  %8794 = vmatmul.mubr.msk.bf16.vlgmr.msra.gmra.mxu0 %vm234_vm4, %v11457_v26 }
0x25ca   :  { %8810 = vmatpush3.bf16.msra.mxu0 %v11229_v34  ;;  %8817 = vmatprep.mubr.msk.bf16.mxu0 %vm9990_vm5, %v12846_v28 }
0x25cb   :  { %8806 = vmatmul.mubr.msk.bf16.vlgmr.msra.gmra.mxu1 %vm234_vm4, %v5245_v56  ;;  %8811 = vmatprep.subr.bf16.mxu0 %v12846_v28 }
0x25cc   :  { %8822 = vmatpush3.bf16.msra.mxu1 %v11177_v25  ;;  %8829 = vmatprep.mubr.msk.bf16.mxu1 %vm9990_vm5, %v12846_v28 }
0x25cd   :  { %8823 = vmatprep.subr.bf16.mxu1 %v12846_v28 }
0x25ce   :  { %8812 = vmatpush3.bf16.msra.mxu0 %v11236_v32 }
0x25cf   :  { %8813 = vmatprep.subr.bf16.mxu0 %v12846_v28 }
0x25d0   :  { %8824 = vmatpush3.bf16.msra.mxu1 %v11184_v60 }
0x25d1   :  { %8825 = vmatprep.subr.bf16.mxu1 %v12846_v28 }
0x25d2   :  { %8814 = vmatpush3.bf16.msra.mxu0 %v11243_v35 }
0x25d3   :  { %8815 = vmatprep.subr.bf16.mxu0 %v12846_v28 }
0x25d4   :  { %8826 = vmatpush3.bf16.msra.mxu1 %v11193_v62 }
0x25d5   :  { %8827 = vmatprep.subr.bf16.mxu1 %v12846_v28 }
0x25d6   :  { %8816 = vmatpush3.bf16.msra.mxu0 %v11249_v38 }
0x25d7   :  { %5545 = vmatprep.subr.bf16.mxu0 %v11255_v61 }
0x25d8   :  { %8828 = vmatpush3.bf16.msra.mxu1 %v11200_v6 }
0x25d9   :  { %5589 = vmatprep.subr.bf16.mxu1 %v11262_v20 }
0x25db   :  { %8830 = vmatmul.mubr.msk.bf16.vlgmr.msra.gmra.mxu1 %vm234_vm4, %v5245_v56 }
0x25dc   :  { %5590 = vmatpush1.bf16.msra.mxu1 %v11267_v2  ;;  %5613 = vmatprep.mubr.bf16.mxu1 %v12845_v29 }
0x25dd   :  { %5591 = vmatprep.subr.bf16.mxu1 %v11272_v57 }
0x25e0   :  { %5592 = vmatpush1.bf16.msra.mxu1 %v11279_v3 }
0x25e1   :  { %5593 = vmatprep.subr.bf16.mxu1 %v11378_v7 }
0x25e4   :  { %5594 = vmatpush1.bf16.msra.mxu1 %v11383_v54 }
0x25e5   :  { %5595 = vmatprep.subr.bf16.mxu1 %v11390_v44 }
0x25e8   :  { %5596 = vmatpush1.bf16.msra.mxu1 %v11395_v17 }
0x25e9   :  { %8845 = vmatprep.subr.bf16.mxu1 %v12846_v28 }
0x2689   :  { %v5286_v40 = vpop.f32.mrf.mxu0 }
0x268b   :  { %v8795_v39 = vpop.f32.mrf.mxu0  ;;  %v5329_v51 = vpop.f32.mrf.mxu1 }
0x268c   :  { %v5330_v36 = vadd.f32 %v5329_v51, %v5286_v40 }
0x268d   :  { %v5289_v11 = vpop.f32.mrf.mxu0  ;;  %v8807_v50 = vpop.f32.mrf.mxu1 }
0x268e   :  { %v5335_v43 = vadd.f32 %v11209_v30, %v5330_v36 }
0x268f   :  { %v8796_v53 = vpop.f32.mrf.mxu0  ;;  %v5332_v46 = vpop.f32.mrf.mxu1 }
0x2690   :  { %v5336_v58 = vsel %vm4704_vm6, %v5335_v43, -inf }
0x2691   :  { %v8808_v18 = vpop.f32.mrf.mxu1  ;;  %5337 = vmax.xlane.f32.xlu0 %v5336_v58 }
0x269b   :  { %v11494_v56 = vpop.f32.mrf.mxu1 }
0x269d   :  { %v8831_v23 = vpop.f32.mrf.mxu1 }
0x269f   :  { %v5531_v42 = vpop.f32.mrf.mxu1 }
0x26a1   :  { %v8832_v17 = vpop.f32.mrf.mxu1 }
0x271a   :  { %v5338_v44 = vpop.xlane.xlu0 %5337 }
0x271b   :  { %v5339_v54 = vsub.f32 %v5335_v43, %v5338_v44 }
0x271d   :  { %v5340_v39 = vmul.f32 1.442695, %v5339_v54 }
0x271f   :  { %9760 = vpow2.f32 %v5340_v39 }
0x272c   :  { %v9761_v40 = vpop.eup %9760 }
0x272d   :  { %v5342_v51 = vsel %vm4704_vm6, %v9761_v40, 0.0 }
0x272e   :  { %5343 = vadd.xlane.f32.xlu1 %v5342_v51 }
0x27b7   :  { %v5344_v36 = vpop.xlane.xlu1 %5343 }
0x27b8   :  { %9762 = vrcp.f32 %v5344_v36 }
0x27c5   :  { %v9763_v11 = vpop.eup %9762 }
0x27c6   :  { %v11497_v50 = vmul.f32 %v9763_v11, %v9761_v40 }
0x27c8   :  { %12853 = vst [vmem:[#allocation30_spill] sm:$0xff] %v11497_v50  ;;  %v5350_v53 = vrot.slane %v11497_v50, %v10137_v10  ;;  %v5372_v17 = vrot.slane %v11497_v50, %v10144_v12  ;;  %v5361_v54 = vrot.slane %v11497_v50, %v10134_v9  ;;  %v5383_v44 = vrot.slane %v11497_v50, %v10147_v13 }
0x27ca   :  { %5356 = vbcast.lane.b32.xlu0 %v5350_v53, 264  ;;  %5352 = vbcast.lane.b32.xlu1 %v5350_v53, 256 }
0x27ce   :  { %5378 = vbcast.lane.b32.xlu0 %v5372_v17, 264  ;;  %5363 = vbcast.lane.b32.xlu1 %v5361_v54, 256 }
0x27d2   :  { %5389 = vbcast.lane.b32.xlu0 %v5383_v44, 264  ;;  %5367 = vbcast.lane.b32.xlu1 %v5361_v54, 264 }
0x27d6   :  { %5374 = vbcast.lane.b32.xlu1 %v5372_v17, 256 }
0x27da   :  { %5385 = vbcast.lane.b32.xlu1 %v5383_v44, 256  ;;  %v12854_v44 = vld [vmem:[#allocation22_spill] sm:$0xff] }
0x283c   :  { %v5357_v42 = vpop.permute.xlu0 %5356  ;;  %v5353_v23 = vpop.permute.xlu1 %5352 }
0x283d   :  { %v5392_v43 = vmul.f32 %v5357_v42, %v11283_v27  ;;  %v5391_v46 = vmul.f32 %v5353_v23, %v11285_v22 }
0x283f   :  { %v5400_v58 = vsel %vm234_vm4, %v5392_v43, 0.0  ;;  %v5399_v18 = vsel %vm234_vm4, %v5391_v46, 0.0  ;;  %v12855_v46 = vld [vmem:[#allocation21_spill] sm:$0xff] }
0x2840   :  { %v5401_v39 = vadd.f32 %v5400_v58, %v5399_v18  ;;  %v5364_v40 = vpop.permute.xlu1 %5363  ;;  %v5379_v36 = vpop.permute.xlu0 %5378 }
0x2841   :  { %v5393_v11 = vmul.f32 %v5364_v40, %v11291_v15  ;;  %v5396_v50 = vmul.f32 %v5379_v36, %v12854_v44  ;;  %v12856_v40 = vld [vmem:[#allocation24_spill] sm:$0xff]  ;;  %v12857_v44 = vld [vmem:[#allocation23_spill] sm:$0xff] }
0x2842   :  { %v5402_v51 = vrot.slane %v5401_v39, 4 }
0x2843   :  { %v5408_v42 = vsel %vm234_vm4, %v5393_v11, 0.0  ;;  %v5418_v9 = vsel %vm234_vm4, %v5396_v50, 0.0 }
0x2844   :  { %v5368_v53 = vpop.permute.xlu1 %5367  ;;  %v5403_v54 = vadd.f32 %v5402_v51, %v5401_v39  ;;  %v5390_v22 = vpop.permute.xlu0 %5389 }
0x2845   :  { %v5394_v17 = vmul.f32 %v5368_v53, %v11294_v47  ;;  %v5398_v15 = vmul.f32 %v5390_v22, %v12856_v40 }
0x2846   :  { %v5404_v18 = vrot.slane %v5403_v54, 2 }
0x2847   :  { %v5409_v23 = vsel %vm234_vm4, %v5394_v17, 0.0 }
0x2848   :  { %v5410_v43 = vadd.f32 %v5409_v23, %v5408_v42  ;;  %v5375_v27 = vpop.permute.xlu1 %5374  ;;  %v5405_v47 = vadd.f32 %v5404_v18, %v5403_v54  ;;  %v5427_v42 = vsel %vm234_vm4, %v5398_v15, 0.0 }
0x2849   :  { %v5395_v58 = vmul.f32 %v5375_v27, %v12855_v46 }
0x284a   :  { %v5411_v13 = vrot.slane %v5410_v43, 4  ;;  %v5406_v50 = vrot.slane %v5405_v47, 1 }
0x284b   :  { %v5417_v53 = vsel %vm234_vm4, %v5395_v58, 0.0 }
0x284c   :  { %v5412_v39 = vadd.f32 %v5411_v13, %v5410_v43  ;;  %v5419_v51 = vadd.f32 %v5418_v9, %v5417_v53  ;;  %v5386_v36 = vpop.permute.xlu1 %5385  ;;  %v5407_v43 = vadd.f32 %v5406_v50, %v5405_v47 }
0x284d   :  { %v5397_v11 = vmul.f32 %v5386_v36, %v12857_v44 }
0x284e   :  { %v5413_v17 = vrot.slane %v5412_v39, 2  ;;  %v5420_v12 = vrot.slane %v5419_v51, 4  ;;  %v5435_v7 = vpack.c.bf16 %v5407_v43, %v5407_v43 }
0x284f   :  { %v5426_v27 = vsel %vm234_vm4, %v5397_v11, 0.0 }
0x2850   :  { %v5414_v23 = vadd.f32 %v5413_v17, %v5412_v39  ;;  %v5421_v46 = vadd.f32 %v5420_v12, %v5419_v51  ;;  %v5428_v10 = vadd.f32 %v5427_v42, %v5426_v27  ;;  %v5443_v51 = vunpack.c.l.b16 %v5435_v7 }
0x2852   :  { %v5415_v30 = vrot.slane %v5414_v23, 1  ;;  %v5422_v22 = vrot.slane %v5421_v46, 2  ;;  %v5429_v40 = vrot.slane %v5428_v10, 4 }
0x2854   :  { %v5416_v58 = vadd.f32 %v5415_v30, %v5414_v23  ;;  %v5423_v13 = vadd.f32 %v5422_v22, %v5421_v46  ;;  %v5430_v9 = vadd.f32 %v5429_v40, %v5428_v10  ;;  %v12859_v22 = vld [vmem:[#allocation13_spill] sm:$0xff] }
0x2856   :  { %v5424_v53 = vrot.slane %v5423_v13, 1  ;;  %v5431_v36 = vrot.slane %v5430_v9, 2  ;;  %v5436_v54 = vpack.c.bf16 %v5416_v58, %v5416_v58 }
0x2858   :  { %v5425_v18 = vadd.f32 %v5424_v53, %v5423_v13  ;;  %v5432_v44 = vadd.f32 %v5431_v36, %v5430_v9  ;;  %v5444_v11 = vunpack.c.l.b16 %v5436_v54 }
0x285a   :  { %v5437_v15 = vpack.c.bf16 %v5425_v18, %v5425_v18  ;;  %v5433_v3 = vrot.slane %v5432_v44, 1  ;;  %v5447_v42 = vsel %vm460_vm1, %v5444_v11, %v5443_v51 }
0x285c   :  { %v5434_v39 = vadd.f32 %v5433_v3, %v5432_v44  ;;  %v5445_v12 = vunpack.c.l.b16 %v5437_v15 }
0x285e   :  { %v5438_v17 = vpack.c.bf16 %v5434_v39, %v5434_v39  ;;  %v5448_v30 = vsel %vm463_vm2, %v5445_v12, %v5447_v42 }
0x2860   :  { %v5446_v27 = vunpack.c.l.b16 %v5438_v17 }
0x2862   :  { %v5449_v10 = vsel %vm466_vm3, %v5446_v27, %v5448_v30 }
0x2863   :  { %v5450_v47 = vpack.c.b16 %v5449_v10, %v5449_v10 }
0x2865   :  { %8818 = vmatmul.mubr.msk.bf16.vlgmr.msra.gmra.mxu0 %vm234_vm4, %v5450_v47 }
0x2866   :  { %5546 = vmatpush1.bf16.msra.mxu0 %v11321_v21  ;;  %5569 = vmatprep.mubr.bf16.mxu0 %v12845_v29 }
0x2867   :  { %5547 = vmatprep.subr.bf16.mxu0 %v11326_v0 }
0x286a   :  { %5548 = vmatpush1.bf16.msra.mxu0 %v11333_v52 }
0x286b   :  { %5549 = vmatprep.subr.bf16.mxu0 %v11340_v8 }
0x286e   :  { %5550 = vmatpush1.bf16.msra.mxu0 %v11346_v48 }
0x286f   :  { %5551 = vmatprep.subr.bf16.mxu0 %v11352_v59 }
0x2872   :  { %5552 = vmatpush1.bf16.msra.mxu0 %v11358_v55 }
0x2873   :  { %8833 = vmatprep.subr.bf16.mxu0 %v12846_v28 }
0x2875   :  { %8525 = vmatmul.mubr.msk.bf16.vlgmr.msra.gmra.mxu0 %vm234_vm4, %v11457_v26 }
0x2876   :  { %8834 = vmatpush3.bf16.msra.mxu0 %v11080_v45  ;;  %8841 = vmatprep.mubr.msk.bf16.mxu0 %vm9990_vm5, %v12846_v28 }
0x2877   :  { %8835 = vmatprep.subr.bf16.mxu0 %v12846_v28 }
0x287a   :  { %8836 = vmatpush3.bf16.msra.mxu0 %v11091_v1 }
0x287b   :  { %8837 = vmatprep.subr.bf16.mxu0 %v12846_v28 }
0x287e   :  { %8838 = vmatpush3.bf16.msra.mxu0 %v11105_v31 }
0x287f   :  { %8839 = vmatprep.subr.bf16.mxu0 %v12846_v28 }
0x2882   :  { %8840 = vmatpush3.bf16.msra.mxu0 %v11119_v37 }
0x2883   :  { %8857 = vmatprep.subr.bf16.mxu0 %v12846_v28 }
0x2925   :  { %v5488_v3 = vpop.f32.mrf.mxu0 }
0x2926   :  { %v5529_v45 = vadd.f32 %v11494_v56, %v5488_v3  ;;  %v12858_v56 = vld [vmem:[#allocation12_spill] sm:$0xff] }
0x2927   :  { %v8819_v7 = vpop.f32.mrf.mxu0 }
0x2928   :  { %v5534_v26 = vadd.f32 %v11403_v5, %v5529_v45 }
0x2929   :  { %v5491_v44 = vpop.f32.mrf.mxu0 }
0x292a   :  { %v5535_v46 = vmax.f32 %v5534_v26, 0.0 }
0x292b   :  { %v8820_v40 = vpop.f32.mrf.mxu0 }
0x292c   :  { %v5536_v1 = vpack.c.bf16 %v5535_v46, %v5535_v46 }
0x292e   :  { %8526 = vmatmul.mubr.msk.bf16.vlgmr.msra.gmra.mxu1 %vm234_vm4, %v5536_v1 }
0x292f   :  { %8846 = vmatpush3.bf16.msra.mxu1 %v11096_v19  ;;  %8853 = vmatprep.mubr.msk.bf16.mxu1 %vm9990_vm5, %v12846_v28 }
0x2930   :  { %8847 = vmatprep.subr.bf16.mxu1 %v12846_v28 }
0x2933   :  { %8848 = vmatpush3.bf16.msra.mxu1 %v11112_v49 }
0x2934   :  { %8849 = vmatprep.subr.bf16.mxu1 %v12846_v28 }
0x2935   :  { %v5571_v31 = vpop.f32.mrf.mxu0 }
0x2937   :  { %v5573_v37 = vpop.f32.mrf.mxu0  ;;  %8850 = vmatpush3.bf16.msra.mxu1 %v12858_v56 }
0x2938   :  { %8851 = vmatprep.subr.bf16.mxu1 %v12846_v28 }
0x2939   :  { %v5575_v23 = vpop.f32.mrf.mxu0 }
0x293b   :  { %v5576_v50 = vpop.f32.mrf.mxu0  ;;  %8852 = vmatpush3.bf16.msra.mxu1 %v12859_v22 }
0x293c   :  { %8869 = vmatprep.subr.bf16.mxu1 %v12846_v28 }
0x29ee   :  { %v5615_v19 = vpop.f32.mrf.mxu1 }
0x29ef   :  { %v5616_v58 = vadd.f32 %v5615_v19, %v5571_v31 }
0x29f0   :  { %v5617_v13 = vpop.f32.mrf.mxu1 }
0x29f1   :  { %v5622_v9 = vadd.f32 %v5616_v58, %v11426_v24  ;;  %v5618_v36 = vadd.f32 %v5617_v13, %v5573_v37 }
0x29f2   :  { %v5619_v49 = vpop.f32.mrf.mxu1 }
0x29f3   :  { %v8527_v43 = vmul.f32 -1.442695, %v5622_v9  ;;  %v5623_v54 = vadd.f32 %v5618_v36, %v11430_v16 }
0x29f4   :  { %v5620_v53 = vpop.f32.mrf.mxu1 }
0x29f5   :  { %9764 = vpow2.f32 %v8527_v43  ;;  %v8528_v51 = vmul.f32 -1.442695, %v5623_v54 }
0x29f6   :  { %9766 = vtanh.f32 %v5623_v54 }
0x2a02   :  { %v9765_v18 = vpop.eup %9764 }
0x2a03   :  { %v5630_v15 = vadd.f32 1.0, %v9765_v18  ;;  %v9767_v11 = vpop.eup %9766 }
0x2a05   :  { %9768 = vrcp.f32 %v5630_v15 }
0x2a06   :  { %9770 = vpow2.f32 %v8528_v51  ;;  %v12868_v51 = vld [vmem:[#allocation9_spill] sm:$0xff] }
0x2a12   :  { %v9769_v39 = vpop.eup %9768 }
0x2a13   :  { %v5638_v12 = vmul.f32 %v9769_v39, %v9767_v11  ;;  %v9771_v17 = vpop.eup %9770  ;;  %v5637_v27 = vmul.f32 %v9769_v39, %v11438_v41 }
0x2a14   :  { %v5631_v42 = vadd.f32 1.0, %v9771_v17 }
0x2a15   :  { %5640 = vrot.lane.b32.xlu1 %v5638_v12, %s9987_s3 }
0x2a16   :  { %9772 = vrcp.f32 %v5631_v42  ;;  %v12869_v42 = vld [vmem:[#allocation10_spill] sm:$0xff] }
0x2a23   :  { %v9773_v47 = vpop.eup %9772 }
0x2a87   :  { %v5641_v30 = vpop.permute.xlu1 %5640 }
0x2a88   :  { %v11565_v10 = vadd.f32 %v5641_v30, %v5637_v27  ;;  %v12870_v30 = vld [vmem:[#allocation8_spill] sm:$0xff] }
0x2a8a   :  { %9774 = vtanh.f32 %v11565_v10 }
0x2a97   :  { %v9775_v3 = vpop.eup %9774 }
0x2a98   :  { %v5645_v45 = vmul.f32 %v9775_v3, %v9773_v47  ;;  %v12871_v3 = vld [vmem:[#allocation11_spill] sm:$0xff] }
0x2a9a   :  { %v5646_v7 = vmul.f32 %v5645_v45, %v11441_v4  ;;  %v5656_v1 = vpack.c.bf16 %v5645_v45, %v5645_v45 }
0x2a9c   :  { %5648 = vrot.lane.b32.xlu0 %v5646_v7, %s9987_s3 }
0x2b0e   :  { %v5649_v26 = vpop.permute.xlu0 %5648 }
0x2b0f   :  { %v5651_v44 = vsel %vm5225_vm7, %v5649_v26, 0.0 }
0x2b10   :  { %5652 = vadd.xlane.f32.xlu1 %v5651_v44  ;;  %v12872_v44 = vld [vmem:[#allocation17_spill] sm:$0xff] }
0x2b99   :  { %v5653_v46 = vpop.xlane.xlu1 %5652 }
0x2b9a   :  { %v11572_v41 = vadd.f32 %v11446_v33, %v5653_v46 }
0x2b9c   :  { %12860 = vst [vmem:[#allocation12_spill] sm:$0xff] %v11572_v41  ;;  %v12769_v40 = vmax.f32 %v11572_v41, 0.0  ;;  %v11920_v41 = vld [vmem:[#allocation3 + $0x38] sm:$0xff] }
0x2b9d   :  { %12897 = vst [vmem:[#allocation34_spill] sm:$0xff] %v11920_v41 }
0x2b9e   :  { %5659 = vperm.xlu0 %9142, %v12769_v40   ;;  %v11912_v40 = vld [vmem:[#allocation3 + $0x28] sm:$0xff] }
0x2b9f   :  { %12895 = vst [vmem:[#allocation32_spill] sm:$0xff] %v11912_v40 }
0x2ba2   :  { %5666 = vrot.lane.b32.xlu0 %v5656_v1, %s9987_s3  ;;  %v12873_v1 = vld [vmem:[#allocation18_spill] sm:$0xff] }
0x2c19   :  { %v5660_v31 = vpop.permute.xlu0 %5659 }
0x2c1a   :  { %v5662_v37 = vmul.f32 %v11158_v63, %v5660_v31  ;;  %v12861_v63 = vld [vmem:[#allocation16_spill] sm:$0xff] }
0x2c1c   :  { %v5663_v56 = vadd.f32 %v11166_v14, %v5662_v37  ;;  %v12862_v14 = vld [vmem:[#allocation25_spill] sm:$0xff] }
0x2c1d   :  { %v11580_v23 = vpop.permute.xlu0 %5666 }
0x2c1e   :  { %v5664_v50 = vpack.c.bf16 %v5663_v56, %v5663_v56  ;;  %8842 = vmatmul.mubr.msk.bf16.vlgmr.msra.gmra.mxu0 %vm234_vm4, %v11580_v23 }
0x2c1f   :  { %8858 = vmatpush3.bf16.msra.mxu0 %v11229_v34  ;;  %8865 = vmatprep.mubr.msk.bf16.mxu0 %vm9990_vm5, %v12846_v28 }
0x2c20   :  { %8854 = vmatmul.mubr.msk.bf16.vlgmr.msra.gmra.mxu1 %vm234_vm4, %v5664_v50  ;;  %8859 = vmatprep.subr.bf16.mxu0 %v12846_v28 }
0x2c21   :  { %8870 = vmatpush3.bf16.msra.mxu1 %v11177_v25  ;;  %8877 = vmatprep.mubr.msk.bf16.mxu1 %vm9990_vm5, %v12846_v28  ;;  %v12863_v25 = vld [vmem:[#allocation26_spill] sm:$0xff] }
0x2c22   :  { %8871 = vmatprep.subr.bf16.mxu1 %v12846_v28 }
0x2c23   :  { %8860 = vmatpush3.bf16.msra.mxu0 %v11236_v32 }
0x2c24   :  { %8861 = vmatprep.subr.bf16.mxu0 %v12846_v28 }
0x2c25   :  { %8872 = vmatpush3.bf16.msra.mxu1 %v11184_v60  ;;  %v12864_v60 = vld [vmem:[#allocation27_spill] sm:$0xff] }
0x2c26   :  { %8873 = vmatprep.subr.bf16.mxu1 %v12846_v28 }
0x2c27   :  { %8862 = vmatpush3.bf16.msra.mxu0 %v11243_v35 }
0x2c28   :  { %8863 = vmatprep.subr.bf16.mxu0 %v12846_v28 }
0x2c29   :  { %8874 = vmatpush3.bf16.msra.mxu1 %v11193_v62  ;;  %v12865_v62 = vld [vmem:[#allocation28_spill] sm:$0xff] }
0x2c2a   :  { %8875 = vmatprep.subr.bf16.mxu1 %v12846_v28 }
0x2c2b   :  { %8864 = vmatpush3.bf16.msra.mxu0 %v11249_v38 }
0x2c2c   :  { %5964 = vmatprep.subr.bf16.mxu0 %v11255_v61 }
0x2c2d   :  { %8876 = vmatpush3.bf16.msra.mxu1 %v11200_v6 }
0x2c2e   :  { %6008 = vmatprep.subr.bf16.mxu1 %v11262_v20  ;;  %v12866_v20 = vld [vmem:[#allocation14_spill] sm:$0xff] }
0x2c30   :  { %8878 = vmatmul.mubr.msk.bf16.vlgmr.msra.gmra.mxu1 %vm234_vm4, %v5664_v50 }
0x2c31   :  { %6009 = vmatpush1.bf16.msra.mxu1 %v11267_v2  ;;  %6032 = vmatprep.mubr.bf16.mxu1 %v12845_v29 }
0x2c32   :  { %6010 = vmatprep.subr.bf16.mxu1 %v11272_v57 }
0x2c35   :  { %6011 = vmatpush1.bf16.msra.mxu1 %v12861_v63 }
0x2c36   :  { %6012 = vmatprep.subr.bf16.mxu1 %v12862_v14 }
0x2c39   :  { %6013 = vmatpush1.bf16.msra.mxu1 %v12863_v25 }
0x2c3a   :  { %6014 = vmatprep.subr.bf16.mxu1 %v12864_v60  ;;  %v12874_v60 = vld [vmem:[#allocation19_spill] sm:$0xff] }
0x2c3d   :  { %6015 = vmatpush1.bf16.msra.mxu1 %v12865_v62 }
0x2c3e   :  { %8893 = vmatprep.subr.bf16.mxu1 %v12846_v28 }
0x2cde   :  { %v5705_v6 = vpop.f32.mrf.mxu0 }
0x2ce0   :  { %v8843_v34 = vpop.f32.mrf.mxu0  ;;  %v5748_v32 = vpop.f32.mrf.mxu1 }
0x2ce1   :  { %v5749_v35 = vadd.f32 %v5748_v32, %v5705_v6  ;;  %v12875_v34 = vld [vmem:[#allocation20_spill] sm:$0xff] }
0x2ce2   :  { %v5708_v38 = vpop.f32.mrf.mxu0  ;;  %v8855_v61 = vpop.f32.mrf.mxu1 }
0x2ce3   :  { %v5754_v2 = vadd.f32 %v12866_v20, %v5749_v35  ;;  %v12876_v38 = vld [vmem:[#allocation21_spill] sm:$0xff] }
0x2ce4   :  { %v8844_v57 = vpop.f32.mrf.mxu0  ;;  %v5751_v22 = vpop.f32.mrf.mxu1 }
0x2ce5   :  { %v5755_v19 = vsel %vm4704_vm6, %v5754_v2, -inf }
0x2ce6   :  { %v8856_v58 = vpop.f32.mrf.mxu1  ;;  %5756 = vmax.xlane.f32.xlu0 %v5755_v19 }
0x2ce7   :  { %v12877_v58 = vld [vmem:[#allocation22_spill] sm:$0xff] }
0x2cf0   :  { %v11617_v13 = vpop.f32.mrf.mxu1 }
0x2cf2   :  { %v8879_v9 = vpop.f32.mrf.mxu1 }
0x2cf4   :  { %v5950_v49 = vpop.f32.mrf.mxu1 }
0x2cf6   :  { %v8880_v43 = vpop.f32.mrf.mxu1 }
0x2d6f   :  { %v5757_v53 = vpop.xlane.xlu0 %5756 }
0x2d70   :  { %v5758_v36 = vsub.f32 %v5754_v2, %v5757_v53 }
0x2d72   :  { %v5759_v54 = vmul.f32 1.442695, %v5758_v36  ;;  %v12878_v36 = vld [vmem:[#allocation23_spill] sm:$0xff] }
0x2d74   :  { %9776 = vpow2.f32 %v5759_v54 }
0x2d81   :  { %v9777_v18 = vpop.eup %9776 }
0x2d82   :  { %v5761_v15 = vsel %vm4704_vm6, %v9777_v18, 0.0 }
0x2d83   :  { %5762 = vadd.xlane.f32.xlu1 %v5761_v15 }
0x2e0c   :  { %v5763_v11 = vpop.xlane.xlu1 %5762 }
0x2e0d   :  { %9778 = vrcp.f32 %v5763_v11 }
0x2e1a   :  { %v9779_v39 = vpop.eup %9778 }
0x2e1b   :  { %v11620_v12 = vmul.f32 %v9779_v39, %v9777_v18 }
0x2e1d   :  { %12867 = vst [vmem:[#allocation13_spill] sm:$0xff] %v11620_v12  ;;  %v5769_v17 = vrot.slane %v11620_v12, %v12868_v51  ;;  %v5791_v27 = vrot.slane %v11620_v12, %v12869_v42  ;;  %v5780_v47 = vrot.slane %v11620_v12, %v12870_v30  ;;  %v5802_v45 = vrot.slane %v11620_v12, %v12871_v3 }
0x2e1f   :  { %5775 = vbcast.lane.b32.xlu0 %v5769_v17, 264  ;;  %5771 = vbcast.lane.b32.xlu1 %v5769_v17, 256  ;;  %v12879_v17 = vld [vmem:[#allocation24_spill] sm:$0xff] }
0x2e23   :  { %5793 = vbcast.lane.b32.xlu0 %v5791_v27, 256  ;;  %5782 = vbcast.lane.b32.xlu1 %v5780_v47, 256 }
0x2e27   :  { %5804 = vbcast.lane.b32.xlu0 %v5802_v45, 256  ;;  %5786 = vbcast.lane.b32.xlu1 %v5780_v47, 264 }
0x2e2b   :  { %5797 = vbcast.lane.b32.xlu1 %v5791_v27, 264 }
0x2e2f   :  { %5808 = vbcast.lane.b32.xlu1 %v5802_v45, 264 }
0x2e91   :  { %v5776_v7 = vpop.permute.xlu0 %5775  ;;  %v5772_v26 = vpop.permute.xlu1 %5771 }
0x2e92   :  { %v5811_v46 = vmul.f32 %v5776_v7, %v12872_v44  ;;  %v5810_v31 = vmul.f32 %v5772_v26, %v12873_v1 }
0x2e94   :  { %v5819_v37 = vsel %vm234_vm4, %v5811_v46, 0.0  ;;  %v5818_v56 = vsel %vm234_vm4, %v5810_v31, 0.0 }
0x2e95   :  { %v5820_v50 = vadd.f32 %v5819_v37, %v5818_v56  ;;  %v5783_v63 = vpop.permute.xlu1 %5782  ;;  %v5794_v25 = vpop.permute.xlu0 %5793 }
0x2e96   :  { %v5812_v62 = vmul.f32 %v5783_v63, %v12874_v60  ;;  %v5814_v61 = vmul.f32 %v5794_v25, %v12876_v38 }
0x2e97   :  { %v5821_v14 = vrot.slane %v5820_v50, 4 }
0x2e98   :  { %v5827_v20 = vsel %vm234_vm4, %v5812_v62, 0.0  ;;  %v5836_v53 = vsel %vm234_vm4, %v5814_v61, 0.0 }
0x2e99   :  { %v5787_v6 = vpop.permute.xlu1 %5786  ;;  %v5822_v35 = vadd.f32 %v5821_v14, %v5820_v50  ;;  %v5805_v57 = vpop.permute.xlu0 %5804 }
0x2e9a   :  { %v5813_v32 = vmul.f32 %v5787_v6, %v12875_v34  ;;  %v5816_v54 = vmul.f32 %v5805_v57, %v12878_v36 }
0x2e9b   :  { %v5823_v49 = vrot.slane %v5822_v35, 2 }
0x2e9c   :  { %v5828_v2 = vsel %vm234_vm4, %v5813_v32, 0.0  ;;  %v5845_v26 = vsel %vm234_vm4, %v5816_v54, 0.0 }
0x2e9d   :  { %v5829_v22 = vadd.f32 %v5828_v2, %v5827_v20  ;;  %v5798_v19 = vpop.permute.xlu1 %5797  ;;  %v5824_v47 = vadd.f32 %v5823_v49, %v5822_v35 }
0x2e9e   :  { %v5815_v9 = vmul.f32 %v5798_v19, %v12877_v58 }
0x2e9f   :  { %v5830_v43 = vrot.slane %v5829_v22, 4  ;;  %v5825_v37 = vrot.slane %v5824_v47, 1 }
0x2ea0   :  { %v5837_v18 = vsel %vm234_vm4, %v5815_v9, 0.0 }
0x2ea1   :  { %v5831_v15 = vadd.f32 %v5830_v43, %v5829_v22  ;;  %v5838_v11 = vadd.f32 %v5837_v18, %v5836_v53  ;;  %v5809_v39 = vpop.permute.xlu1 %5808  ;;  %v5826_v62 = vadd.f32 %v5825_v37, %v5824_v47  ;;  %v11713_v47 = vld [vmem:[%s12717_s6 + $0x8] sm:$0xff]  }
0x2ea2   :  { %v5817_v27 = vmul.f32 %v5809_v39, %v12879_v17  ;;  %v11697_v17 = vld [vmem:[%s12717_s6 + $0x18] sm:$0xff]  }
0x2ea3   :  { %v5832_v45 = vrot.slane %v5831_v15, 2  ;;  %v5839_v7 = vrot.slane %v5838_v11, 4  ;;  %v5854_v61 = vpack.c.bf16 %v5826_v62, %v5826_v62 }
0x2ea4   :  { %v5846_v44 = vsel %vm234_vm4, %v5817_v27, 0.0 }
0x2ea5   :  { %v5833_v46 = vadd.f32 %v5832_v45, %v5831_v15  ;;  %v5840_v1 = vadd.f32 %v5839_v7, %v5838_v11  ;;  %v5847_v31 = vadd.f32 %v5846_v44, %v5845_v26  ;;  %v5862_v58 = vunpack.c.l.b16 %v5854_v61  ;;  %v11720_v26 = vld [vmem:[%s12717_s6] sm:$0xff]  }
0x2ea7   :  { %v5834_v56 = vrot.slane %v5833_v46, 1  ;;  %v5841_v50 = vrot.slane %v5840_v1, 2  ;;  %v5848_v63 = vrot.slane %v5847_v31, 4 }
0x2ea9   :  { %v5835_v14 = vadd.f32 %v5834_v56, %v5833_v46  ;;  %v5842_v25 = vadd.f32 %v5841_v50, %v5840_v1  ;;  %v5849_v60 = vadd.f32 %v5848_v63, %v5847_v31 }
0x2eab   :  { %v5843_v6 = vrot.slane %v5842_v25, 1  ;;  %v5850_v34 = vrot.slane %v5849_v60, 2  ;;  %v5855_v32 = vpack.c.bf16 %v5835_v14, %v5835_v14 }
0x2ead   :  { %v5844_v35 = vadd.f32 %v5843_v6, %v5842_v25  ;;  %v5851_v38 = vadd.f32 %v5850_v34, %v5849_v60  ;;  %v5863_v57 = vunpack.c.l.b16 %v5855_v32 }
0x2eaf   :  { %v5856_v20 = vpack.c.bf16 %v5844_v35, %v5844_v35  ;;  %v5852_v2 = vrot.slane %v5851_v38, 1  ;;  %v5866_v49 = vsel %vm460_vm1, %v5863_v57, %v5862_v58 }
0x2eb1   :  { %v5853_v22 = vadd.f32 %v5852_v2, %v5851_v38  ;;  %v5864_v19 = vunpack.c.l.b16 %v5856_v20 }
0x2eb3   :  { %v5857_v9 = vpack.c.bf16 %v5853_v22, %v5853_v22  ;;  %v5867_v53 = vsel %vm463_vm2, %v5864_v19, %v5866_v49 }
0x2eb5   :  { %v5865_v43 = vunpack.c.l.b16 %v5857_v9 }
0x2eb7   :  { %v5868_v36 = vsel %vm466_vm3, %v5865_v43, %v5867_v53 }
0x2eb8   :  { %v5869_v54 = vpack.c.b16 %v5868_v36, %v5868_v36 }
0x2eba   :  { %8866 = vmatmul.mubr.msk.bf16.vlgmr.msra.gmra.mxu0 %vm234_vm4, %v5869_v54 }
0x2ebb   :  { %5965 = vmatpush1.bf16.msra.mxu0 %v11321_v21  ;;  %5988 = vmatprep.mubr.bf16.mxu0 %v12845_v29  ;;  %v11664_v21 = vld [vmem:[%s12718_s7 + $0x18] sm:$0xff]  }
0x2ebc   :  { %5966 = vmatprep.subr.bf16.mxu0 %v11326_v0  ;;  %v11673_v0 = vld [vmem:[%s12718_s7 + $0x10] sm:$0xff]  }
0x2ebf   :  { %5967 = vmatpush1.bf16.msra.mxu0 %v11333_v52  ;;  %v11680_v52 = vld [vmem:[%s12718_s7 + $0x8] sm:$0xff]  }
0x2ec0   :  { %5968 = vmatprep.subr.bf16.mxu0 %v11340_v8  ;;  %v11687_v8 = vld [vmem:[%s12718_s7] sm:$0xff]  }
0x2ec3   :  { %5969 = vmatpush1.bf16.msra.mxu0 %v11346_v48 }
0x2ec4   :  { %5970 = vmatprep.subr.bf16.mxu0 %v11352_v59 }
0x2ec7   :  { %5971 = vmatpush1.bf16.msra.mxu0 %v11358_v55 }
0x2ec8   :  { %8881 = vmatprep.subr.bf16.mxu0 %v12846_v28 }
0x2eca   :  { %8533 = vmatmul.mubr.msk.bf16.vlgmr.msra.gmra.mxu0 %vm234_vm4, %v11580_v23 }
0x2ecb   :  { %8882 = vmatpush3.bf16.msra.mxu0 %v11664_v21  ;;  %8889 = vmatprep.mubr.msk.bf16.mxu0 %vm9990_vm5, %v12846_v28 }
0x2ecc   :  { %8883 = vmatprep.subr.bf16.mxu0 %v12846_v28 }
0x2ecf   :  { %8884 = vmatpush3.bf16.msra.mxu0 %v11673_v0 }
0x2ed0   :  { %8885 = vmatprep.subr.bf16.mxu0 %v12846_v28 }
0x2ed3   :  { %8886 = vmatpush3.bf16.msra.mxu0 %v11680_v52 }
0x2ed4   :  { %8887 = vmatprep.subr.bf16.mxu0 %v12846_v28 }
0x2ed7   :  { %8888 = vmatpush3.bf16.msra.mxu0 %v11687_v8 }
0x2ed8   :  { %8905 = vmatprep.subr.bf16.mxu0 %v12846_v28 }
0x2f7a   :  { %v5907_v48 = vpop.f32.mrf.mxu0 }
0x2f7b   :  { %v5948_v59 = vadd.f32 %v11617_v13, %v5907_v48  ;;  %v11744_v48 = vld [vmem:[%s12715_s4] ss:$0 sm:$0xff] }
0x2f7c   :  { %v8867_v55 = vpop.f32.mrf.mxu0 }
0x2f7d   :  { %v5953_v23 = vadd.f32 %v11403_v5, %v5948_v59  ;;  %v11706_v5 = vld [vmem:[%s12717_s6 + $0x10] sm:$0xff]  }
0x2f7e   :  { %v5910_v18 = vpop.f32.mrf.mxu0 }
0x2f7f   :  { %v5954_v15 = vmax.f32 %v5953_v23, 0.0 }
0x2f80   :  { %v8868_v11 = vpop.f32.mrf.mxu0 }
0x2f81   :  { %v5955_v39 = vpack.c.bf16 %v5954_v15, %v5954_v15  ;;  %v11760_v15 = vld [vmem:[%s12721_s10 + $0x18] sm:$0xff]  }
0x2f82   :  { %v11770_v11 = vld [vmem:[%s12720_s9 + $0x18] sm:$0xff]  }
0x2f83   :  { %8534 = vmatmul.mubr.msk.bf16.vlgmr.msra.gmra.mxu1 %vm234_vm4, %v5955_v39  ;;  %v11779_v39 = vld [vmem:[%s12721_s10 + $0x10] sm:$0xff]  }
0x2f84   :  { %8894 = vmatpush3.bf16.msra.mxu1 %v11697_v17  ;;  %8901 = vmatprep.mubr.msk.bf16.mxu1 %vm9990_vm5, %v12846_v28 }
0x2f85   :  { %8895 = vmatprep.subr.bf16.mxu1 %v12846_v28 }
0x2f88   :  { %8896 = vmatpush3.bf16.msra.mxu1 %v11706_v5 }
0x2f89   :  { %8897 = vmatprep.subr.bf16.mxu1 %v12846_v28 }
0x2f8a   :  { %v5990_v13 = vpop.f32.mrf.mxu0 }
0x2f8c   :  { %v5992_v27 = vpop.f32.mrf.mxu0  ;;  %8898 = vmatpush3.bf16.msra.mxu1 %v11713_v47 }
0x2f8d   :  { %8899 = vmatprep.subr.bf16.mxu1 %v12846_v28 }
0x2f8e   :  { %v5994_v45 = vpop.f32.mrf.mxu0 }
0x2f8f   :  { %v11800_v45 = vld [vmem:[%s12720_s9 + $0x8] sm:$0xff]  }
0x2f90   :  { %v5995_v7 = vpop.f32.mrf.mxu0  ;;  %8900 = vmatpush3.bf16.msra.mxu1 %v11720_v26 }
0x2f91   :  { %8917 = vmatprep.subr.bf16.mxu1 %v12846_v28  ;;  %v11807_v7 = vld [vmem:[%s12721_s10] sm:$0xff]  }
0x3043   :  { %v6034_v44 = vpop.f32.mrf.mxu1 }
0x3044   :  { %v6035_v46 = vadd.f32 %v6034_v44, %v5990_v13  ;;  %v11786_v13 = vld [vmem:[%s12720_s9 + $0x10] sm:$0xff]  }
0x3045   :  { %v6036_v1 = vpop.f32.mrf.mxu1  ;;  %v11813_v44 = vld [vmem:[%s12724_s13 + $0x34] ss:$8 sps:$4 sm:$0xff]  }
0x3046   :  { %v6041_v31 = vadd.f32 %v6035_v46, %v11426_v24  ;;  %v6037_v63 = vadd.f32 %v6036_v1, %v5992_v27  ;;  %v11793_v27 = vld [vmem:[%s12721_s10 + $0x8] sm:$0xff]   ;;  %v11819_v46 = vld [vmem:[%s12720_s9] sm:$0xff]   ;;  %v11825_v1 = vld [vmem:[%s12723_s12 + $0x34] ss:$8 sps:$4 sm:$0xff]  }
0x3047   :  { %v6038_v37 = vpop.f32.mrf.mxu1 }
0x3048   :  { %v8535_v56 = vmul.f32 -1.442695, %v6041_v31  ;;  %v6042_v14 = vadd.f32 %v6037_v63, %v11430_v16  ;;  %v11832_v31 = vld [vmem:[%s12723_s12 + $0x30] ss:$8 sps:$4 sm:$0xff]   ;;  %v11839_v37 = vld [vmem:[%s12723_s12 + $0x24] ss:$8 sps:$4 sm:$0xff]  }
0x3049   :  { %v6039_v50 = vpop.f32.mrf.mxu1  ;;  %12881 = vst [vmem:[#allocation25_spill] sm:$0xff] %v11832_v31  ;;  %12882 = vst [vmem:[#allocation26_spill] sm:$0xff] %v11839_v37  ;;  %v11857_v63 = vld [vmem:[%s12723_s12 + $0x10] ss:$8 sps:$4 sm:$0xff]  }
0x304a   :  { %9780 = vpow2.f32 %v8535_v56  ;;  %v8536_v32 = vmul.f32 -1.442695, %v6042_v14  ;;  %v11845_v56 = vld [vmem:[%s12723_s12 + $0x20] ss:$8 sps:$4 sm:$0xff]   ;;  %v11851_v50 = vld [vmem:[%s12723_s12 + $0x14] ss:$8 sps:$4 sm:$0xff]  }
0x304b   :  { %9782 = vtanh.f32 %v6042_v14  ;;  %12883 = vst [vmem:[#allocation27_spill] sm:$0xff] %v11845_v56  ;;  %12884 = vst [vmem:[#allocation28_spill] sm:$0xff] %v11851_v50  ;;  %v11863_v14 = vld [vmem:[%s12723_s12 + $0x4] ss:$8 sps:$4 sm:$0xff]  }
0x304c   :  { %12885 = vst [vmem:[#allocation14_spill] sm:$0xff] %v11857_v63  ;;  %12886 = vst [vmem:[#allocation17_spill] sm:$0xff] %v11863_v14 }
0x3057   :  { %v9781_v25 = vpop.eup %9780 }
0x3058   :  { %v6049_v60 = vadd.f32 1.0, %v9781_v25  ;;  %v9783_v62 = vpop.eup %9782  ;;  %v11869_v25 = vld [vmem:[%s12723_s12] ss:$8 sps:$4 sm:$0xff]  }
0x3059   :  { %12887 = vst [vmem:[#allocation18_spill] sm:$0xff] %v11869_v25 }
0x305a   :  { %9784 = vrcp.f32 %v6049_v60 }
0x305b   :  { %9786 = vpow2.f32 %v8536_v32 }
0x3067   :  { %v9785_v6 = vpop.eup %9784 }
0x3068   :  { %v6057_v34 = vmul.f32 %v9785_v6, %v9783_v62  ;;  %v9787_v35 = vpop.eup %9786  ;;  %v6056_v61 = vmul.f32 %v9785_v6, %v11565_v10 }
0x3069   :  { %v6050_v38 = vadd.f32 1.0, %v9787_v35 }
0x306a   :  { %6059 = vrot.lane.b32.xlu0 %v6057_v34, %s9987_s3 }
0x306b   :  { %9788 = vrcp.f32 %v6050_v38  ;;  %v11876_v38 = vld [vmem:[%s12719_s8] ss:$0 sm:$0xff] }
0x306c   :  { %12888 = vst [vmem:[#allocation19_spill] sm:$0xff] %v11876_v38 }
0x3078   :  { %v9789_v57 = vpop.eup %9788 }
0x30dc   :  { %v6060_v20 = vpop.permute.xlu0 %6059 }
0x30dd   :  { %v11728_v2 = vadd.f32 %v6060_v20, %v6056_v61 }
0x30df   :  { %9790 = vtanh.f32 %v11728_v2 }
0x30ec   :  { %v9791_v22 = vpop.eup %9790 }
0x30ed   :  { %v6064_v19 = vmul.f32 %v9791_v22, %v9789_v57 }
0x30ef   :  { %v6065_v58 = vmul.f32 %v6064_v19, %v11441_v4  ;;  %v6075_v36 = vpack.c.bf16 %v6064_v19, %v6064_v19 }
0x30f1   :  { %6067 = vrot.lane.b32.xlu1 %v6065_v58, %s9987_s3 }
0x3163   :  { %v6068_v9 = vpop.permute.xlu1 %6067 }
0x3164   :  { %v6070_v49 = vsel %vm5225_vm7, %v6068_v9, 0.0 }
0x3165   :  { %6071 = vadd.xlane.f32.xlu0 %v6070_v49 }
0x31ee   :  { %v6072_v43 = vpop.xlane.xlu0 %6071 }
0x31ef   :  { %v11735_v10 = vadd.f32 %v11446_v33, %v6072_v43  ;;  %v11750_v33 = vld [vmem:[%s12716_s5] ss:$0 sm:$0xff] }
0x31f1   :  { %12880 = vst [vmem:[#allocation16_spill] sm:$0xff] %v11735_v10  ;;  %v12768_v53 = vmax.f32 %v11735_v10, 0.0 }
0x31f3   :  { %6078 = vperm.xlu1 %9143, %v12768_v53  }
0x31f7   :  { %6085 = vrot.lane.b32.xlu1 %v6075_v36, %s9987_s3 }
0x326e   :  { %v6079_v54 = vpop.permute.xlu1 %6078 }
0x326f   :  { %v6081_v59 = vmul.f32 %v11744_v48, %v6079_v54 }
0x3271   :  { %v6082_v55 = vadd.f32 %v11750_v33, %v6081_v59 }
0x3272   :  { %v11753_v23 = vpop.permute.xlu1 %6085 }
0x3273   :  { %v6083_v18 = vpack.c.bf16 %v6082_v55, %v6082_v55  ;;  %8890 = vmatmul.mubr.msk.bf16.vlgmr.msra.gmra.mxu0 %vm234_vm4, %v11753_v23 }
0x3274   :  { %8906 = vmatpush3.bf16.msra.mxu0 %v11760_v15  ;;  %8913 = vmatprep.mubr.msk.bf16.mxu0 %vm9990_vm5, %v12846_v28 }
0x3275   :  { %8902 = vmatmul.mubr.msk.bf16.vlgmr.msra.gmra.mxu1 %vm234_vm4, %v6083_v18  ;;  %8907 = vmatprep.subr.bf16.mxu0 %v12846_v28 }
0x3276   :  { %8918 = vmatpush3.bf16.msra.mxu1 %v11770_v11  ;;  %8925 = vmatprep.mubr.msk.bf16.mxu1 %vm9990_vm5, %v12846_v28 }
0x3277   :  { %8919 = vmatprep.subr.bf16.mxu1 %v12846_v28 }
0x3278   :  { %8908 = vmatpush3.bf16.msra.mxu0 %v11779_v39 }
0x3279   :  { %8909 = vmatprep.subr.bf16.mxu0 %v12846_v28 }
0x327a   :  { %8920 = vmatpush3.bf16.msra.mxu1 %v11786_v13 }
0x327b   :  { %8921 = vmatprep.subr.bf16.mxu1 %v12846_v28 }
0x327c   :  { %8910 = vmatpush3.bf16.msra.mxu0 %v11793_v27 }
0x327d   :  { %8911 = vmatprep.subr.bf16.mxu0 %v12846_v28 }
0x327e   :  { %8922 = vmatpush3.bf16.msra.mxu1 %v11800_v45 }
0x327f   :  { %8923 = vmatprep.subr.bf16.mxu1 %v12846_v28 }
0x3280   :  { %8912 = vmatpush3.bf16.msra.mxu0 %v11807_v7 }
0x3281   :  { %6383 = vmatprep.subr.bf16.mxu0 %v11813_v44 }
0x3282   :  { %8924 = vmatpush3.bf16.msra.mxu1 %v11819_v46 }
0x3283   :  { %6427 = vmatprep.subr.bf16.mxu1 %v11825_v1 }
0x3285   :  { %8926 = vmatmul.mubr.msk.bf16.vlgmr.msra.gmra.mxu1 %vm234_vm4, %v6083_v18 }
0x3286   :  { %6428 = vmatpush1.bf16.msra.mxu1 %v11832_v31  ;;  %6451 = vmatprep.mubr.bf16.mxu1 %v12845_v29 }
0x3287   :  { %6429 = vmatprep.subr.bf16.mxu1 %v11839_v37 }
0x328a   :  { %6430 = vmatpush1.bf16.msra.mxu1 %v11845_v56 }
0x328b   :  { %6431 = vmatprep.subr.bf16.mxu1 %v11851_v50 }
0x328e   :  { %6432 = vmatpush1.bf16.msra.mxu1 %v11857_v63 }
0x328f   :  { %6433 = vmatprep.subr.bf16.mxu1 %v11863_v14 }
0x3292   :  { %6434 = vmatpush1.bf16.msra.mxu1 %v11869_v25 }
0x3293   :  { %8941 = vmatprep.subr.bf16.mxu1 %v12846_v28 }
0x3333   :  { %v6124_v60 = vpop.f32.mrf.mxu0 }
0x3335   :  { %v8891_v62 = vpop.f32.mrf.mxu0  ;;  %v6167_v6 = vpop.f32.mrf.mxu1 }
0x3336   :  { %v6168_v34 = vadd.f32 %v6167_v6, %v6124_v60 }
0x3337   :  { %v6127_v32 = vpop.f32.mrf.mxu0  ;;  %v8903_v35 = vpop.f32.mrf.mxu1 }
0x3338   :  { %v6173_v61 = vadd.f32 %v11876_v38, %v6168_v34 }
0x3339   :  { %v8892_v20 = vpop.f32.mrf.mxu0  ;;  %v6170_v57 = vpop.f32.mrf.mxu1 }
0x333a   :  { %v6174_v22 = vsel %vm4704_vm6, %v6173_v61, -inf }
0x333b   :  { %v8904_v19 = vpop.f32.mrf.mxu1  ;;  %6175 = vmax.xlane.f32.xlu1 %v6174_v22  ;;  %v11893_v22 = vld [vmem:[#allocation3 + $0x8] sm:$0xff] }
0x333c   :  { %12890 = vst [vmem:[#allocation21_spill] sm:$0xff] %v11893_v22 }
0x3345   :  { %v11880_v58 = vpop.f32.mrf.mxu1 }
0x3347   :  { %v8927_v9 = vpop.f32.mrf.mxu1 }
0x3348   :  { %v11896_v9 = vld [vmem:[#allocation3] sm:$0xff] }
0x3349   :  { %v6369_v49 = vpop.f32.mrf.mxu1  ;;  %12891 = vst [vmem:[#allocation22_spill] sm:$0xff] %v11896_v9 }
0x334b   :  { %v8928_v43 = vpop.f32.mrf.mxu1 }
0x33c4   :  { %v6176_v36 = vpop.xlane.xlu1 %6175 }
0x33c5   :  { %v6177_v54 = vsub.f32 %v6173_v61, %v6176_v36 }
0x33c7   :  { %v6178_v59 = vmul.f32 1.442695, %v6177_v54 }
0x33c9   :  { %9792 = vpow2.f32 %v6178_v59 }
0x33d6   :  { %v9793_v55 = vpop.eup %9792 }
0x33d7   :  { %v6180_v18 = vsel %vm4704_vm6, %v9793_v55, 0.0 }
0x33d8   :  { %6181 = vadd.xlane.f32.xlu0 %v6180_v18 }
0x3461   :  { %v6182_v60 = vpop.xlane.xlu0 %6181 }
0x3462   :  { %9794 = vrcp.f32 %v6182_v60  ;;  %v11901_v60 = vld [vmem:[#allocation3 + $0x10] sm:$0xff] }
0x3463   :  { %12892 = vst [vmem:[#allocation23_spill] sm:$0xff] %v11901_v60 }
0x346f   :  { %v9795_v62 = vpop.eup %9794 }
0x3470   :  { %v11883_v6 = vmul.f32 %v9795_v62, %v9793_v55 }
0x3472   :  { %12889 = vst [vmem:[#allocation20_spill] sm:$0xff] %v11883_v6  ;;  %v6188_v34 = vrot.slane %v11883_v6, %v12868_v51  ;;  %v6210_v32 = vrot.slane %v11883_v6, %v12869_v42  ;;  %v6199_v35 = vrot.slane %v11883_v6, %v12870_v30  ;;  %v6221_v61 = vrot.slane %v11883_v6, %v12871_v3 }
0x3474   :  { %6194 = vbcast.lane.b32.xlu1 %v6188_v34, 264  ;;  %6190 = vbcast.lane.b32.xlu0 %v6188_v34, 256 }
0x3478   :  { %6212 = vbcast.lane.b32.xlu1 %v6210_v32, 256  ;;  %6201 = vbcast.lane.b32.xlu0 %v6199_v35, 256 }
0x347c   :  { %6223 = vbcast.lane.b32.xlu1 %v6221_v61, 256  ;;  %6205 = vbcast.lane.b32.xlu0 %v6199_v35, 264 }
0x3480   :  { %6216 = vbcast.lane.b32.xlu0 %v6210_v32, 264  ;;  %v11904_v32 = vld [vmem:[#allocation3 + $0x18] sm:$0xff] }
0x3481   :  { %12893 = vst [vmem:[#allocation24_spill] sm:$0xff] %v11904_v32 }
0x3484   :  { %6227 = vbcast.lane.b32.xlu0 %v6221_v61, 264 }
0x34e6   :  { %v6195_v20 = vpop.permute.xlu1 %6194  ;;  %v6191_v57 = vpop.permute.xlu0 %6190 }
0x34e7   :  { %v6230_v19 = vmul.f32 %v11893_v22, %v6195_v20  ;;  %v6229_v49 = vmul.f32 %v11896_v9, %v6191_v57  ;;  %v11907_v20 = vld [vmem:[#allocation3 + $0x20] sm:$0xff] }
0x34e8   :  { %12894 = vst [vmem:[#allocation31_spill] sm:$0xff] %v11907_v20 }
0x34e9   :  { %v6238_v43 = vsel %vm234_vm4, %v6230_v19, 0.0  ;;  %v6237_v36 = vsel %vm234_vm4, %v6229_v49, 0.0 }
0x34ea   :  { %v6239_v54 = vadd.f32 %v6238_v43, %v6237_v36  ;;  %v6202_v59 = vpop.permute.xlu0 %6201  ;;  %v6213_v18 = vpop.permute.xlu1 %6212 }
0x34eb   :  { %v6231_v62 = vmul.f32 %v11901_v60, %v6202_v59  ;;  %v6233_v57 = vmul.f32 %v11907_v20, %v6213_v18 }
0x34ec   :  { %v6240_v55 = vrot.slane %v6239_v54, 4 }
0x34ed   :  { %v6246_v19 = vsel %vm234_vm4, %v6231_v62, 0.0 }
0x34ee   :  { %v6206_v34 = vpop.permute.xlu0 %6205  ;;  %v6241_v61 = vadd.f32 %v6240_v55, %v6239_v54  ;;  %v6224_v43 = vpop.permute.xlu1 %6223  ;;  %v11916_v54 = vld [vmem:[#allocation3 + $0x30] sm:$0xff] }
0x34ef   :  { %v6232_v35 = vmul.f32 %v11904_v32, %v6206_v34  ;;  %v6255_v34 = vsel %vm234_vm4, %v6233_v57, 0.0  ;;  %12896 = vst [vmem:[#allocation33_spill] sm:$0xff] %v11916_v54  ;;  %v6235_v55 = vmul.f32 %v11916_v54, %v6224_v43 }
0x34f0   :  { %v6242_v6 = vrot.slane %v6241_v61, 2 }
0x34f1   :  { %v6247_v49 = vsel %vm234_vm4, %v6232_v35, 0.0 }
0x34f2   :  { %v6248_v36 = vadd.f32 %v6247_v49, %v6246_v19  ;;  %v6217_v53 = vpop.permute.xlu0 %6216  ;;  %v6243_v49 = vadd.f32 %v6242_v6, %v6241_v61 }
0x34f3   :  { %v6234_v59 = vmul.f32 %v11912_v40, %v6217_v53  ;;  %v6264_v40 = vsel %vm234_vm4, %v6235_v55, 0.0 }
0x34f4   :  { %v6249_v12 = vrot.slane %v6248_v36, 4  ;;  %v6244_v43 = vrot.slane %v6243_v49, 1 }
0x34f5   :  { %v6256_v18 = vsel %vm234_vm4, %v6234_v59, 0.0 }
0x34f6   :  { %v6250_v62 = vadd.f32 %v6249_v12, %v6248_v36  ;;  %v6257_v10 = vadd.f32 %v6256_v18, %v6255_v34  ;;  %v6228_v35 = vpop.permute.xlu0 %6227  ;;  %v6245_v22 = vadd.f32 %v6244_v43, %v6243_v49  ;;  %v11969_v49 = vld [vmem:[%s12724_s13] ss:$8 sps:$4 sm:$0xff]  }
0x34f7   :  { %v6236_v19 = vmul.f32 %v11920_v41, %v6228_v35 }
0x34f8   :  { %v6251_v20 = vrot.slane %v6250_v62, 2  ;;  %v6258_v53 = vrot.slane %v6257_v10, 4  ;;  %v6273_v30 = vpack.c.bf16 %v6245_v22, %v6245_v22  ;;  %v11957_v22 = vld [vmem:[%s12724_s13 + $0x10] ss:$8 sps:$4 sm:$0xff]  }
0x34f9   :  { %v6265_v57 = vsel %vm234_vm4, %v6236_v19, 0.0 }
0x34fa   :  { %v6252_v32 = vadd.f32 %v6251_v20, %v6250_v62  ;;  %v6259_v60 = vadd.f32 %v6258_v53, %v6257_v10  ;;  %v6266_v9 = vadd.f32 %v6265_v57, %v6264_v40  ;;  %v6281_v40 = vunpack.c.l.b16 %v6273_v30  ;;  %v11951_v30 = vld [vmem:[%s12724_s13 + $0x14] ss:$8 sps:$4 sm:$0xff]  }
0x34fc   :  { %v6253_v54 = vrot.slane %v6252_v32, 1  ;;  %v6260_v59 = vrot.slane %v6259_v60, 2  ;;  %v6267_v12 = vrot.slane %v6266_v9, 4 }
0x34fe   :  { %v6254_v36 = vadd.f32 %v6253_v54, %v6252_v32  ;;  %v6261_v34 = vadd.f32 %v6260_v59, %v6259_v60  ;;  %v6268_v18 = vadd.f32 %v6267_v12, %v6266_v9  ;;  %v11963_v54 = vld [vmem:[%s12724_s13 + $0x4] ss:$8 sps:$4 sm:$0xff]   ;;  %v11989_v12 = vld [vmem:[%s12722_s11] ss:$0 sm:$0xff] }
0x3500   :  { %v6262_v3 = vrot.slane %v6261_v34, 1  ;;  %v6269_v35 = vrot.slane %v6268_v18, 2  ;;  %v6274_v6 = vpack.c.bf16 %v6254_v36, %v6254_v36 }
0x3502   :  { %v6263_v61 = vadd.f32 %v6262_v3, %v6261_v34  ;;  %v6270_v41 = vadd.f32 %v6269_v35, %v6268_v18  ;;  %v6282_v19 = vunpack.c.l.b16 %v6274_v6  ;;  %v11932_v3 = vld [vmem:[%s12724_s13 + $0x30] ss:$8 sps:$4 sm:$0xff]  }
0x3504   :  { %v6275_v55 = vpack.c.bf16 %v6263_v61, %v6263_v61  ;;  %v6271_v42 = vrot.slane %v6270_v41, 1  ;;  %v6285_v53 = vsel %vm460_vm1, %v6282_v19, %v6281_v40 }
0x3506   :  { %v6272_v20 = vadd.f32 %v6271_v42, %v6270_v41  ;;  %v6283_v10 = vunpack.c.l.b16 %v6275_v55  ;;  %v11939_v41 = vld [vmem:[%s12724_s13 + $0x24] ss:$8 sps:$4 sm:$0xff]   ;;  %v11945_v42 = vld [vmem:[%s12724_s13 + $0x20] ss:$8 sps:$4 sm:$0xff]  }
0x3508   :  { %v6276_v62 = vpack.c.bf16 %v6272_v20, %v6272_v20  ;;  %v6286_v60 = vsel %vm463_vm2, %v6283_v10, %v6285_v53 }
0x350a   :  { %v6284_v57 = vunpack.c.l.b16 %v6276_v62 }
0x350c   :  { %v6287_v9 = vsel %vm466_vm3, %v6284_v57, %v6286_v60 }
0x350d   :  { %v6288_v32 = vpack.c.b16 %v6287_v9, %v6287_v9 }
0x350f   :  { %8914 = vmatmul.mubr.msk.bf16.vlgmr.msra.gmra.mxu0 %vm234_vm4, %v6288_v32 }
0x3510   :  { %6384 = vmatpush1.bf16.msra.mxu0 %v11932_v3  ;;  %6407 = vmatprep.mubr.bf16.mxu0 %v12845_v29 }
0x3511   :  { %6385 = vmatprep.subr.bf16.mxu0 %v11939_v41 }
0x3514   :  { %6386 = vmatpush1.bf16.msra.mxu0 %v11945_v42 }
0x3515   :  { %6387 = vmatprep.subr.bf16.mxu0 %v11951_v30 }
0x3518   :  { %6388 = vmatpush1.bf16.msra.mxu0 %v11957_v22 }
0x3519   :  { %6389 = vmatprep.subr.bf16.mxu0 %v11963_v54 }
0x351c   :  { %6390 = vmatpush1.bf16.msra.mxu0 %v11969_v49 }
0x351d   :  { %8929 = vmatprep.subr.bf16.mxu0 %v12846_v28 }
0x351f   :  { %8541 = vmatmul.mubr.msk.bf16.vlgmr.msra.gmra.mxu0 %vm234_vm4, %v11753_v23 }
0x3520   :  { %8930 = vmatpush3.bf16.msra.mxu0 %v11664_v21  ;;  %8937 = vmatprep.mubr.msk.bf16.mxu0 %vm9990_vm5, %v12846_v28 }
0x3521   :  { %8931 = vmatprep.subr.bf16.mxu0 %v12846_v28 }
0x3524   :  { %8932 = vmatpush3.bf16.msra.mxu0 %v11673_v0 }
0x3525   :  { %8933 = vmatprep.subr.bf16.mxu0 %v12846_v28 }
0x3528   :  { %8934 = vmatpush3.bf16.msra.mxu0 %v11680_v52 }
0x3529   :  { %8935 = vmatprep.subr.bf16.mxu0 %v12846_v28 }
0x352c   :  { %8936 = vmatpush3.bf16.msra.mxu0 %v11687_v8 }
0x352d   :  { %8953 = vmatprep.subr.bf16.mxu0 %v12846_v28 }
0x35cf   :  { %v6326_v23 = vpop.f32.mrf.mxu0 }
0x35d0   :  { %v6367_v43 = vadd.f32 %v11880_v58, %v6326_v23 }
0x35d1   :  { %v8915_v59 = vpop.f32.mrf.mxu0 }
0x35d2   :  { %v6372_v36 = vadd.f32 %v11989_v12, %v6367_v43 }
0x35d3   :  { %v6329_v34 = vpop.f32.mrf.mxu0 }
0x35d4   :  { %v6373_v18 = vmax.f32 %v6372_v36, 0.0 }
0x35d5   :  { %v8916_v35 = vpop.f32.mrf.mxu0 }
0x35d6   :  { %v6374_v6 = vpack.c.bf16 %v6373_v18, %v6373_v18 }
0x35d8   :  { %8542 = vmatmul.mubr.msk.bf16.vlgmr.msra.gmra.mxu1 %vm234_vm4, %v6374_v6 }
0x35d9   :  { %8942 = vmatpush3.bf16.msra.mxu1 %v11697_v17  ;;  %8949 = vmatprep.mubr.msk.bf16.mxu1 %vm9990_vm5, %v12846_v28 }
0x35da   :  { %8943 = vmatprep.subr.bf16.mxu1 %v12846_v28 }
0x35dd   :  { %8944 = vmatpush3.bf16.msra.mxu1 %v11706_v5 }
0x35de   :  { %8945 = vmatprep.subr.bf16.mxu1 %v12846_v28 }
0x35df   :  { %v6409_v58 = vpop.f32.mrf.mxu0 }
0x35e1   :  { %v6411_v61 = vpop.f32.mrf.mxu0  ;;  %8946 = vmatpush3.bf16.msra.mxu1 %v11713_v47 }
0x35e2   :  { %8947 = vmatprep.subr.bf16.mxu1 %v12846_v28 }
0x35e3   :  { %v6413_v55 = vpop.f32.mrf.mxu0 }
0x35e5   :  { %v6414_v19 = vpop.f32.mrf.mxu0  ;;  %8948 = vmatpush3.bf16.msra.mxu1 %v11720_v26 }
0x35e6   :  { %8965 = vmatprep.subr.bf16.mxu1 %v12846_v28 }
0x3698   :  { %v6453_v20 = vpop.f32.mrf.mxu1 }
0x3699   :  { %v6454_v10 = vadd.f32 %v6453_v20, %v6409_v58 }
0x369a   :  { %v6455_v40 = vpop.f32.mrf.mxu1 }
0x369b   :  { %v6460_v62 = vadd.f32 %v6454_v10, %v11426_v24  ;;  %v6456_v9 = vadd.f32 %v6455_v40, %v6411_v61 }
0x369c   :  { %v6457_v53 = vpop.f32.mrf.mxu1 }
0x369d   :  { %v8543_v57 = vmul.f32 -1.442695, %v6460_v62  ;;  %v6461_v32 = vadd.f32 %v6456_v9, %v11430_v16 }
0x369e   :  { %v6458_v60 = vpop.f32.mrf.mxu1 }
0x369f   :  { %9796 = vpow2.f32 %v8543_v57  ;;  %v8544_v18 = vmul.f32 -1.442695, %v6461_v32  ;;  %v12013_v60 = vld [vmem:[#allocation4] ss:$0 sm:$0xff] }
0x36a0   :  { %9798 = vtanh.f32 %v6461_v32 }
0x36ac   :  { %v9797_v23 = vpop.eup %9796 }
0x36ad   :  { %v6468_v43 = vadd.f32 1.0, %v9797_v23  ;;  %v9799_v59 = vpop.eup %9798 }
0x36af   :  { %9800 = vrcp.f32 %v6468_v43 }
0x36b0   :  { %9802 = vpow2.f32 %v8544_v18 }
0x36bc   :  { %v9801_v36 = vpop.eup %9800 }
0x36bd   :  { %v6476_v34 = vmul.f32 %v9801_v36, %v9799_v59  ;;  %v9803_v35 = vpop.eup %9802  ;;  %v6475_v58 = vmul.f32 %v9801_v36, %v11728_v2 }
0x36be   :  { %v6469_v6 = vadd.f32 1.0, %v9803_v35 }
0x36bf   :  { %6478 = vrot.lane.b32.xlu1 %v6476_v34, %s9987_s3 }
0x36c0   :  { %9804 = vrcp.f32 %v6469_v6 }
0x36cd   :  { %v9805_v61 = vpop.eup %9804 }
0x3731   :  { %v6479_v55 = vpop.permute.xlu1 %6478 }
0x3732   :  { %v12007_v19 = vadd.f32 %v6479_v55, %v6475_v58 }
0x3734   :  { %9806 = vtanh.f32 %v12007_v19 }
0x3741   :  { %v9807_v20 = vpop.eup %9806 }
0x3742   :  { %v6483_v10 = vmul.f32 %v9807_v20, %v9805_v61 }
0x3744   :  { %v6484_v40 = vmul.f32 %v6483_v10, %v11441_v4  ;;  %v6494_v32 = vpack.c.bf16 %v6483_v10, %v6483_v10 }
0x3746   :  { %6486 = vrot.lane.b32.xlu0 %v6484_v40, %s9987_s3 }
0x37b8   :  { %v6487_v62 = vpop.permute.xlu0 %6486 }
0x37b9   :  { %v6489_v53 = vsel %vm5225_vm7, %v6487_v62, 0.0 }
0x37ba   :  { %6490 = vadd.xlane.f32.xlu1 %v6489_v53 }
0x3843   :  { %v6491_v57 = vpop.xlane.xlu1 %6490 }
0x3844   :  { %v12016_v2 = vadd.f32 %v12013_v60, %v6491_v57 }
0x3846   :  { %12898 = vst [vmem:[#allocation35_spill] sm:$0xff] %v12016_v2  ;;  %v12793_v9 = vmax.f32 %v12016_v2, 0.0 }
0x3848   :  { %6497 = vperm.xlu0 %9142, %v12793_v9  }
0x384c   :  { %6504 = vrot.lane.b32.xlu0 %v6494_v32, %s9987_s3 }
0x38c3   :  { %v6498_v23 = vpop.permute.xlu0 %6497 }
0x38c4   :  { %v6500_v43 = vmul.f32 %v11744_v48, %v6498_v23 }
0x38c6   :  { %v6501_v59 = vadd.f32 %v11750_v33, %v6500_v43 }
0x38c7   :  { %v12024_v36 = vpop.permute.xlu0 %6504 }
0x38c8   :  { %v6502_v34 = vpack.c.bf16 %v6501_v59, %v6501_v59  ;;  %8938 = vmatmul.mubr.msk.bf16.vlgmr.msra.gmra.mxu0 %vm234_vm4, %v12024_v36 }
0x38c9   :  { %8954 = vmatpush3.bf16.msra.mxu0 %v11760_v15  ;;  %8961 = vmatprep.mubr.msk.bf16.mxu0 %vm9990_vm5, %v12846_v28 }
0x38ca   :  { %8950 = vmatmul.mubr.msk.bf16.vlgmr.msra.gmra.mxu1 %vm234_vm4, %v6502_v34  ;;  %8955 = vmatprep.subr.bf16.mxu0 %v12846_v28 }
0x38cb   :  { %8966 = vmatpush3.bf16.msra.mxu1 %v11770_v11  ;;  %8973 = vmatprep.mubr.msk.bf16.mxu1 %vm9990_vm5, %v12846_v28 }
0x38cc   :  { %8967 = vmatprep.subr.bf16.mxu1 %v12846_v28 }
0x38cd   :  { %8956 = vmatpush3.bf16.msra.mxu0 %v11779_v39 }
0x38ce   :  { %8957 = vmatprep.subr.bf16.mxu0 %v12846_v28 }
0x38cf   :  { %8968 = vmatpush3.bf16.msra.mxu1 %v11786_v13 }
0x38d0   :  { %8969 = vmatprep.subr.bf16.mxu1 %v12846_v28 }
0x38d1   :  { %8958 = vmatpush3.bf16.msra.mxu0 %v11793_v27 }
0x38d2   :  { %8959 = vmatprep.subr.bf16.mxu0 %v12846_v28 }
0x38d3   :  { %8970 = vmatpush3.bf16.msra.mxu1 %v11800_v45 }
0x38d4   :  { %8971 = vmatprep.subr.bf16.mxu1 %v12846_v28 }
0x38d5   :  { %8960 = vmatpush3.bf16.msra.mxu0 %v11807_v7 }
0x38d6   :  { %6802 = vmatprep.subr.bf16.mxu0 %v11813_v44 }
0x38d7   :  { %8972 = vmatpush3.bf16.msra.mxu1 %v11819_v46 }
0x38d8   :  { %6846 = vmatprep.subr.bf16.mxu1 %v11825_v1 }
0x38da   :  { %8974 = vmatmul.mubr.msk.bf16.vlgmr.msra.gmra.mxu1 %vm234_vm4, %v6502_v34 }
0x38db   :  { %6847 = vmatpush1.bf16.msra.mxu1 %v11832_v31  ;;  %6870 = vmatprep.mubr.bf16.mxu1 %v12845_v29 }
0x38dc   :  { %6848 = vmatprep.subr.bf16.mxu1 %v11839_v37 }
0x38df   :  { %6849 = vmatpush1.bf16.msra.mxu1 %v11845_v56 }
0x38e0   :  { %6850 = vmatprep.subr.bf16.mxu1 %v11851_v50 }
0x38e3   :  { %6851 = vmatpush1.bf16.msra.mxu1 %v11857_v63 }
0x38e4   :  { %6852 = vmatprep.subr.bf16.mxu1 %v11863_v14 }
0x38e7   :  { %6853 = vmatpush1.bf16.msra.mxu1 %v11869_v25 }
0x38e8   :  { %8989 = vmatprep.subr.bf16.mxu1 %v12846_v28 }
0x3988   :  { %v6543_v18 = vpop.f32.mrf.mxu0 }
0x398a   :  { %v8939_v35 = vpop.f32.mrf.mxu0  ;;  %v6586_v6 = vpop.f32.mrf.mxu1 }
0x398b   :  { %v6587_v58 = vadd.f32 %v6586_v6, %v6543_v18 }
0x398c   :  { %v6546_v55 = vpop.f32.mrf.mxu0  ;;  %v8951_v61 = vpop.f32.mrf.mxu1 }
0x398d   :  { %v6592_v20 = vadd.f32 %v11876_v38, %v6587_v58 }
0x398e   :  { %v8940_v10 = vpop.f32.mrf.mxu0  ;;  %v6589_v40 = vpop.f32.mrf.mxu1 }
0x398f   :  { %v6593_v62 = vsel %vm4704_vm6, %v6592_v20, -inf  ;;  %v12900_v40 = vld [vmem:[#allocation10_spill] sm:$0xff] }
0x3990   :  { %v8952_v53 = vpop.f32.mrf.mxu1  ;;  %6594 = vmax.xlane.f32.xlu0 %v6593_v62 }
0x399a   :  { %v12061_v57 = vpop.f32.mrf.mxu1 }
0x399c   :  { %v8975_v32 = vpop.f32.mrf.mxu1 }
0x399d   :  { %v12902_v32 = vld [vmem:[#allocation11_spill] sm:$0xff] }
0x399e   :  { %v6788_v23 = vpop.f32.mrf.mxu1 }
0x39a0   :  { %v8976_v43 = vpop.f32.mrf.mxu1 }
0x3a19   :  { %v6595_v59 = vpop.xlane.xlu0 %6594 }
0x3a1a   :  { %v6596_v34 = vsub.f32 %v6592_v20, %v6595_v59  ;;  %v12901_v20 = vld [vmem:[#allocation8_spill] sm:$0xff] }
0x3a1c   :  { %v6597_v35 = vmul.f32 1.442695, %v6596_v34  ;;  %v12903_v34 = vld [vmem:[#allocation21_spill] sm:$0xff] }
0x3a1e   :  { %9808 = vpow2.f32 %v6597_v35 }
0x3a2b   :  { %v9809_v18 = vpop.eup %9808 }
0x3a2c   :  { %v6599_v6 = vsel %vm4704_vm6, %v9809_v18, 0.0 }
0x3a2d   :  { %6600 = vadd.xlane.f32.xlu1 %v6599_v6 }
0x3ab6   :  { %v6601_v58 = vpop.xlane.xlu1 %6600 }
0x3ab7   :  { %9810 = vrcp.f32 %v6601_v58 }
0x3ac4   :  { %v9811_v55 = vpop.eup %9810 }
0x3ac5   :  { %v12064_v61 = vmul.f32 %v9811_v55, %v9809_v18  ;;  %v12904_v18 = vld [vmem:[#allocation22_spill] sm:$0xff] }
0x3ac7   :  { %12899 = vst [vmem:[#allocation36_spill] sm:$0xff] %v12064_v61  ;;  %v6607_v10 = vrot.slane %v12064_v61, %v12868_v51  ;;  %v6629_v62 = vrot.slane %v12064_v61, %v12900_v40  ;;  %v6618_v53 = vrot.slane %v12064_v61, %v12901_v20  ;;  %v6640_v23 = vrot.slane %v12064_v61, %v12902_v32  ;;  %v12905_v40 = vld [vmem:[#allocation23_spill] sm:$0xff] }
0x3ac8   :  { %v12907_v51 = vld [vmem:[#allocation31_spill] sm:$0xff] }
0x3ac9   :  { %6613 = vbcast.lane.b32.xlu0 %v6607_v10, 264  ;;  %6609 = vbcast.lane.b32.xlu1 %v6607_v10, 256 }
0x3acd   :  { %6631 = vbcast.lane.b32.xlu0 %v6629_v62, 256  ;;  %6620 = vbcast.lane.b32.xlu1 %v6618_v53, 256 }
0x3ad1   :  { %6642 = vbcast.lane.b32.xlu0 %v6640_v23, 256  ;;  %6624 = vbcast.lane.b32.xlu1 %v6618_v53, 264  ;;  %v12906_v53 = vld [vmem:[#allocation24_spill] sm:$0xff] }
0x3ad5   :  { %6635 = vbcast.lane.b32.xlu1 %v6629_v62, 264 }
0x3ad9   :  { %6646 = vbcast.lane.b32.xlu1 %v6640_v23, 264 }
0x3b3b   :  { %v6614_v43 = vpop.permute.xlu0 %6613  ;;  %v6610_v59 = vpop.permute.xlu1 %6609 }
0x3b3c   :  { %v6649_v35 = vmul.f32 %v12903_v34, %v6614_v43  ;;  %v6648_v6 = vmul.f32 %v12904_v18, %v6610_v59 }
0x3b3e   :  { %v6657_v58 = vsel %vm234_vm4, %v6649_v35, 0.0  ;;  %v6656_v55 = vsel %vm234_vm4, %v6648_v6, 0.0  ;;  %v12908_v6 = vld [vmem:[#allocation32_spill] sm:$0xff] }
0x3b3f   :  { %v6658_v10 = vadd.f32 %v6657_v58, %v6656_v55  ;;  %v6621_v9 = vpop.permute.xlu1 %6620  ;;  %v6632_v20 = vpop.permute.xlu0 %6631 }
0x3b40   :  { %v6650_v61 = vmul.f32 %v12905_v40, %v6621_v9  ;;  %v6652_v38 = vmul.f32 %v12907_v51, %v6632_v20  ;;  %v12909_v9 = vld [vmem:[#allocation33_spill] sm:$0xff]  ;;  %v12910_v51 = vld [vmem:[#allocation34_spill] sm:$0xff] }
0x3b41   :  { %v6659_v2 = vrot.slane %v6658_v10, 4 }
0x3b42   :  { %v6665_v43 = vsel %vm234_vm4, %v6650_v61, 0.0  ;;  %v6674_v14 = vsel %vm234_vm4, %v6652_v38, 0.0 }
0x3b43   :  { %v6625_v32 = vpop.permute.xlu1 %6624  ;;  %v6660_v23 = vadd.f32 %v6659_v2, %v6658_v10  ;;  %v6643_v18 = vpop.permute.xlu0 %6642 }
0x3b44   :  { %v6651_v62 = vmul.f32 %v12906_v53, %v6625_v32  ;;  %v6654_v40 = vmul.f32 %v12909_v9, %v6643_v18 }
0x3b45   :  { %v6661_v55 = vrot.slane %v6660_v23, 2 }
0x3b46   :  { %v6666_v59 = vsel %vm234_vm4, %v6651_v62, 0.0 }
0x3b47   :  { %v6667_v35 = vadd.f32 %v6666_v59, %v6665_v43  ;;  %v6636_v34 = vpop.permute.xlu1 %6635  ;;  %v6662_v53 = vadd.f32 %v6661_v55, %v6660_v23  ;;  %v6683_v43 = vsel %vm234_vm4, %v6654_v40, 0.0 }
0x3b48   :  { %v6653_v58 = vmul.f32 %v12908_v6, %v6636_v34 }
0x3b49   :  { %v6668_v25 = vrot.slane %v6667_v35, 4  ;;  %v6663_v38 = vrot.slane %v6662_v53, 1 }
0x3b4a   :  { %v6675_v32 = vsel %vm234_vm4, %v6653_v58, 0.0 }
0x3b4b   :  { %v6669_v2 = vadd.f32 %v6668_v25, %v6667_v35  ;;  %v6676_v10 = vadd.f32 %v6675_v32, %v6674_v14  ;;  %v6647_v20 = vpop.permute.xlu1 %6646  ;;  %v6664_v35 = vadd.f32 %v6663_v38, %v6662_v53 }
0x3b4c   :  { %v6655_v61 = vmul.f32 %v12910_v51, %v6647_v20 }
0x3b4d   :  { %v6670_v62 = vrot.slane %v6669_v2, 2  ;;  %v6677_v63 = vrot.slane %v6676_v10, 4  ;;  %v6692_v37 = vpack.c.bf16 %v6664_v35, %v6664_v35 }
0x3b4e   :  { %v6684_v34 = vsel %vm234_vm4, %v6655_v61, 0.0 }
0x3b4f   :  { %v6671_v59 = vadd.f32 %v6670_v62, %v6669_v2  ;;  %v6678_v6 = vadd.f32 %v6677_v63, %v6676_v10  ;;  %v6685_v50 = vadd.f32 %v6684_v34, %v6683_v43  ;;  %v6700_v10 = vunpack.c.l.b16 %v6692_v37 }
0x3b51   :  { %v6672_v56 = vrot.slane %v6671_v59, 1  ;;  %v6679_v18 = vrot.slane %v6678_v6, 2  ;;  %v6686_v9 = vrot.slane %v6685_v50, 4 }
0x3b53   :  { %v6673_v58 = vadd.f32 %v6672_v56, %v6671_v59  ;;  %v6680_v25 = vadd.f32 %v6679_v18, %v6678_v6  ;;  %v6687_v14 = vadd.f32 %v6686_v9, %v6685_v50 }
0x3b55   :  { %v6681_v32 = vrot.slane %v6680_v25, 1  ;;  %v6688_v20 = vrot.slane %v6687_v14, 2  ;;  %v6693_v23 = vpack.c.bf16 %v6673_v58, %v6673_v58 }
0x3b57   :  { %v6682_v55 = vadd.f32 %v6681_v32, %v6680_v25  ;;  %v6689_v51 = vadd.f32 %v6688_v20, %v6687_v14  ;;  %v6701_v61 = vunpack.c.l.b16 %v6693_v23 }
0x3b59   :  { %v6694_v40 = vpack.c.bf16 %v6682_v55, %v6682_v55  ;;  %v6690_v31 = vrot.slane %v6689_v51, 1  ;;  %v6704_v43 = vsel %vm460_vm1, %v6701_v61, %v6700_v10 }
0x3b5b   :  { %v6691_v2 = vadd.f32 %v6690_v31, %v6689_v51  ;;  %v6702_v63 = vunpack.c.l.b16 %v6694_v40 }
0x3b5d   :  { %v6695_v62 = vpack.c.bf16 %v6691_v2, %v6691_v2  ;;  %v6705_v56 = vsel %vm463_vm2, %v6702_v63, %v6704_v43 }
0x3b5f   :  { %v6703_v34 = vunpack.c.l.b16 %v6695_v62 }
0x3b61   :  { %v6706_v50 = vsel %vm466_vm3, %v6703_v34, %v6705_v56 }
0x3b62   :  { %v6707_v53 = vpack.c.b16 %v6706_v50, %v6706_v50 }
0x3b64   :  { %8962 = vmatmul.mubr.msk.bf16.vlgmr.msra.gmra.mxu0 %vm234_vm4, %v6707_v53 }
0x3b65   :  { %6803 = vmatpush1.bf16.msra.mxu0 %v11932_v3  ;;  %6826 = vmatprep.mubr.bf16.mxu0 %v12845_v29 }
0x3b66   :  { %6804 = vmatprep.subr.bf16.mxu0 %v11939_v41 }
0x3b69   :  { %6805 = vmatpush1.bf16.msra.mxu0 %v11945_v42 }
0x3b6a   :  { %6806 = vmatprep.subr.bf16.mxu0 %v11951_v30 }
0x3b6d   :  { %6807 = vmatpush1.bf16.msra.mxu0 %v11957_v22 }
0x3b6e   :  { %6808 = vmatprep.subr.bf16.mxu0 %v11963_v54 }
0x3b71   :  { %6809 = vmatpush1.bf16.msra.mxu0 %v11969_v49 }
0x3b72   :  { %8977 = vmatprep.subr.bf16.mxu0 %v12846_v28 }
0x3b74   :  { %8549 = vmatmul.mubr.msk.bf16.vlgmr.msra.gmra.mxu0 %vm234_vm4, %v12024_v36 }
0x3b75   :  { %8978 = vmatpush3.bf16.msra.mxu0 %v11664_v21  ;;  %8985 = vmatprep.mubr.msk.bf16.mxu0 %vm9990_vm5, %v12846_v28 }
0x3b76   :  { %8979 = vmatprep.subr.bf16.mxu0 %v12846_v28 }
0x3b79   :  { %8980 = vmatpush3.bf16.msra.mxu0 %v11673_v0 }
0x3b7a   :  { %8981 = vmatprep.subr.bf16.mxu0 %v12846_v28 }
0x3b7d   :  { %8982 = vmatpush3.bf16.msra.mxu0 %v11680_v52 }
0x3b7e   :  { %8983 = vmatprep.subr.bf16.mxu0 %v12846_v28 }
0x3b81   :  { %8984 = vmatpush3.bf16.msra.mxu0 %v11687_v8 }
0x3b82   :  { %9001 = vmatprep.subr.bf16.mxu0 %v12846_v28 }
0x3c24   :  { %v6745_v51 = vpop.f32.mrf.mxu0 }
0x3c25   :  { %v6786_v21 = vadd.f32 %v12061_v57, %v6745_v51 }
0x3c26   :  { %v8963_v31 = vpop.f32.mrf.mxu0 }
0x3c27   :  { %v6791_v37 = vadd.f32 %v11989_v12, %v6786_v21 }
0x3c28   :  { %v6748_v36 = vpop.f32.mrf.mxu0 }
0x3c29   :  { %v6792_v6 = vmax.f32 %v6791_v37, 0.0 }
0x3c2a   :  { %v8964_v9 = vpop.f32.mrf.mxu0 }
0x3c2b   :  { %v6793_v0 = vpack.c.bf16 %v6792_v6, %v6792_v6 }
0x3c2d   :  { %8550 = vmatmul.mubr.msk.bf16.vlgmr.msra.gmra.mxu1 %vm234_vm4, %v6793_v0 }
0x3c2e   :  { %8990 = vmatpush3.bf16.msra.mxu1 %v11697_v17  ;;  %8997 = vmatprep.mubr.msk.bf16.mxu1 %vm9990_vm5, %v12846_v28 }
0x3c2f   :  { %8991 = vmatprep.subr.bf16.mxu1 %v12846_v28 }
0x3c32   :  { %8992 = vmatpush3.bf16.msra.mxu1 %v11706_v5 }
0x3c33   :  { %8993 = vmatprep.subr.bf16.mxu1 %v12846_v28 }
0x3c34   :  { %v6828_v52 = vpop.f32.mrf.mxu0 }
0x3c36   :  { %v6830_v8 = vpop.f32.mrf.mxu0  ;;  %8994 = vmatpush3.bf16.msra.mxu1 %v11713_v47 }
0x3c37   :  { %8995 = vmatprep.subr.bf16.mxu1 %v12846_v28 }
0x3c38   :  { %v6832_v57 = vpop.f32.mrf.mxu0 }
0x3c39   :  { %v12919_v57 = vld [vmem:[#allocation19_spill] sm:$0xff] }
0x3c3a   :  { %v6833_v59 = vpop.f32.mrf.mxu0  ;;  %8996 = vmatpush3.bf16.msra.mxu1 %v11720_v26 }
0x3c3b   :  { %9013 = vmatprep.subr.bf16.mxu1 %v12846_v28 }
0x3ced   :  { %v6872_v17 = vpop.f32.mrf.mxu1 }
0x3cee   :  { %v6873_v38 = vadd.f32 %v6872_v17, %v6828_v52 }
0x3cef   :  { %v6874_v18 = vpop.f32.mrf.mxu1 }
0x3cf0   :  { %v6879_v58 = vadd.f32 %v6873_v38, %v11426_v24  ;;  %v6875_v35 = vadd.f32 %v6874_v18, %v6830_v8 }
0x3cf1   :  { %v6876_v5 = vpop.f32.mrf.mxu1 }
0x3cf2   :  { %v8551_v25 = vmul.f32 -1.442695, %v6879_v58  ;;  %v6880_v47 = vadd.f32 %v6875_v35, %v11430_v16 }
0x3cf3   :  { %v6877_v14 = vpop.f32.mrf.mxu1 }
0x3cf4   :  { %9812 = vpow2.f32 %v8551_v25  ;;  %v8552_v40 = vmul.f32 -1.442695, %v6880_v47 }
0x3cf5   :  { %9814 = vtanh.f32 %v6880_v47 }
0x3d01   :  { %v9813_v32 = vpop.eup %9812 }
0x3d02   :  { %v6887_v20 = vadd.f32 1.0, %v9813_v32  ;;  %v9815_v23 = vpop.eup %9814 }
0x3d04   :  { %9816 = vrcp.f32 %v6887_v20 }
0x3d05   :  { %9818 = vpow2.f32 %v8552_v40 }
0x3d11   :  { %v9817_v26 = vpop.eup %9816 }
0x3d12   :  { %v6895_v55 = vmul.f32 %v9817_v26, %v9815_v23  ;;  %v9819_v61 = vpop.eup %9818  ;;  %v6894_v63 = vmul.f32 %v9817_v26, %v12007_v19 }
0x3d13   :  { %v6888_v2 = vadd.f32 1.0, %v9819_v61 }
0x3d14   :  { %6897 = vrot.lane.b32.xlu0 %v6895_v55, %s9987_s3 }
0x3d15   :  { %9820 = vrcp.f32 %v6888_v2  ;;  %v12921_v2 = vld [vmem:[#allocation9_spill] sm:$0xff] }
0x3d22   :  { %v9821_v43 = vpop.eup %9820 }
0x3d86   :  { %v6898_v10 = vpop.permute.xlu0 %6897 }
0x3d87   :  { %v12132_v62 = vadd.f32 %v6898_v10, %v6894_v63  ;;  %v12922_v10 = vld [vmem:[#allocation10_spill] sm:$0xff] }
0x3d89   :  { %9822 = vtanh.f32 %v12132_v62 }
0x3d96   :  { %v9823_v34 = vpop.eup %9822 }
0x3d97   :  { %v6902_v56 = vmul.f32 %v9823_v34, %v9821_v43  ;;  %v12923_v34 = vld [vmem:[#allocation8_spill] sm:$0xff] }
0x3d99   :  { %v6903_v50 = vmul.f32 %v6902_v56, %v11441_v4  ;;  %v6913_v37 = vpack.c.bf16 %v6902_v56, %v6902_v56 }
0x3d9b   :  { %6905 = vrot.lane.b32.xlu1 %v6903_v50, %s9987_s3  ;;  %v12924_v50 = vld [vmem:[#allocation11_spill] sm:$0xff] }
0x3e0d   :  { %v6906_v53 = vpop.permute.xlu1 %6905 }
0x3e0e   :  { %v6908_v51 = vsel %vm5225_vm7, %v6906_v53, 0.0 }
0x3e0f   :  { %6909 = vadd.xlane.f32.xlu0 %v6908_v51 }
0x3e98   :  { %v6910_v21 = vpop.xlane.xlu0 %6909 }
0x3e99   :  { %v12139_v19 = vadd.f32 %v12013_v60, %v6910_v21 }
0x3e9b   :  { %12911 = vst [vmem:[#allocation37_spill] sm:$0xff] %v12139_v19  ;;  %v12806_v31 = vmax.f32 %v12139_v19, 0.0  ;;  %v12487_v19 = vld [vmem:[#allocation3 + $0x38] sm:$0xff] }
0x3e9d   :  { %6916 = vperm.xlu1 %9143, %v12806_v31   ;;  %v12479_v31 = vld [vmem:[#allocation3 + $0x28] sm:$0xff] }
0x3e9e   :  { %12940 = vst [vmem:[#allocation9_spill] sm:$0xff] %v12479_v31 }
0x3ea1   :  { %6923 = vrot.lane.b32.xlu1 %v6913_v37, %s9987_s3  ;;  %v12925_v37 = vld [vmem:[#allocation21_spill] sm:$0xff] }
0x3f18   :  { %v6917_v36 = vpop.permute.xlu1 %6916 }
0x3f19   :  { %v6919_v6 = vmul.f32 %v11744_v48, %v6917_v36  ;;  %v12912_v48 = vld [vmem:[#allocation25_spill] sm:$0xff] }
0x3f1b   :  { %v6920_v9 = vadd.f32 %v11750_v33, %v6919_v6  ;;  %v12913_v33 = vld [vmem:[#allocation26_spill] sm:$0xff] }
0x3f1c   :  { %v12147_v0 = vpop.permute.xlu1 %6923  ;;  %v12926_v6 = vld [vmem:[#allocation22_spill] sm:$0xff] }
0x3f1d   :  { %v6921_v52 = vpack.c.bf16 %v6920_v9, %v6920_v9  ;;  %8986 = vmatmul.mubr.msk.bf16.vlgmr.msra.gmra.mxu0 %vm234_vm4, %v12147_v0  ;;  %12942 = vst [vmem:[#allocation22_spill] sm:$0xff] %v12487_v19 }
0x3f1e   :  { %9002 = vmatpush3.bf16.msra.mxu0 %v11760_v15  ;;  %9009 = vmatprep.mubr.msk.bf16.mxu0 %vm9990_vm5, %v12846_v28  ;;  %v12914_v15 = vld [vmem:[#allocation27_spill] sm:$0xff] }
0x3f1f   :  { %8998 = vmatmul.mubr.msk.bf16.vlgmr.msra.gmra.mxu1 %vm234_vm4, %v6921_v52  ;;  %9003 = vmatprep.subr.bf16.mxu0 %v12846_v28 }
0x3f20   :  { %9014 = vmatpush3.bf16.msra.mxu1 %v11770_v11  ;;  %9021 = vmatprep.mubr.msk.bf16.mxu1 %vm9990_vm5, %v12846_v28  ;;  %v12915_v11 = vld [vmem:[#allocation28_spill] sm:$0xff] }
0x3f21   :  { %9015 = vmatprep.subr.bf16.mxu1 %v12846_v28 }
0x3f22   :  { %9004 = vmatpush3.bf16.msra.mxu0 %v11779_v39  ;;  %v12916_v39 = vld [vmem:[#allocation14_spill] sm:$0xff] }
0x3f23   :  { %9005 = vmatprep.subr.bf16.mxu0 %v12846_v28 }
0x3f24   :  { %9016 = vmatpush3.bf16.msra.mxu1 %v11786_v13  ;;  %v12917_v13 = vld [vmem:[#allocation17_spill] sm:$0xff] }
0x3f25   :  { %9017 = vmatprep.subr.bf16.mxu1 %v12846_v28 }
0x3f26   :  { %9006 = vmatpush3.bf16.msra.mxu0 %v11793_v27  ;;  %v12918_v27 = vld [vmem:[#allocation18_spill] sm:$0xff] }
0x3f27   :  { %9007 = vmatprep.subr.bf16.mxu0 %v12846_v28 }
0x3f28   :  { %9018 = vmatpush3.bf16.msra.mxu1 %v11800_v45 }
0x3f29   :  { %9019 = vmatprep.subr.bf16.mxu1 %v12846_v28 }
0x3f2a   :  { %9008 = vmatpush3.bf16.msra.mxu0 %v11807_v7 }
0x3f2b   :  { %7221 = vmatprep.subr.bf16.mxu0 %v11813_v44 }
0x3f2c   :  { %9020 = vmatpush3.bf16.msra.mxu1 %v11819_v46 }
0x3f2d   :  { %7265 = vmatprep.subr.bf16.mxu1 %v11825_v1 }
0x3f2f   :  { %9022 = vmatmul.mubr.msk.bf16.vlgmr.msra.gmra.mxu1 %vm234_vm4, %v6921_v52 }
0x3f30   :  { %7266 = vmatpush1.bf16.msra.mxu1 %v12912_v48  ;;  %7289 = vmatprep.mubr.bf16.mxu1 %v12845_v29 }
0x3f31   :  { %7267 = vmatprep.subr.bf16.mxu1 %v12913_v33 }
0x3f34   :  { %7268 = vmatpush1.bf16.msra.mxu1 %v12914_v15 }
0x3f35   :  { %7269 = vmatprep.subr.bf16.mxu1 %v12915_v11 }
0x3f38   :  { %7270 = vmatpush1.bf16.msra.mxu1 %v12916_v39 }
0x3f39   :  { %7271 = vmatprep.subr.bf16.mxu1 %v12917_v13  ;;  %v12927_v13 = vld [vmem:[#allocation23_spill] sm:$0xff] }
0x3f3c   :  { %7272 = vmatpush1.bf16.msra.mxu1 %v12918_v27 }
0x3f3d   :  { %9037 = vmatprep.subr.bf16.mxu1 %v12846_v28 }
0x3fdd   :  { %v6962_v45 = vpop.f32.mrf.mxu0 }
0x3fdf   :  { %v8987_v7 = vpop.f32.mrf.mxu0  ;;  %v7005_v44 = vpop.f32.mrf.mxu1 }
0x3fe0   :  { %v7006_v46 = vadd.f32 %v7005_v44, %v6962_v45  ;;  %v12928_v7 = vld [vmem:[#allocation24_spill] sm:$0xff] }
0x3fe1   :  { %v6965_v1 = vpop.f32.mrf.mxu0  ;;  %v8999_v8 = vpop.f32.mrf.mxu1 }
0x3fe2   :  { %v7011_v59 = vadd.f32 %v12919_v57, %v7006_v46  ;;  %v12929_v1 = vld [vmem:[#allocation31_spill] sm:$0xff] }
0x3fe3   :  { %v8988_v17 = vpop.f32.mrf.mxu0  ;;  %v7008_v38 = vpop.f32.mrf.mxu1 }
0x3fe4   :  { %v7012_v18 = vsel %vm4704_vm6, %v7011_v59, -inf }
0x3fe5   :  { %v9000_v58 = vpop.f32.mrf.mxu1  ;;  %7013 = vmax.xlane.f32.xlu1 %v7012_v18 }
0x3fe6   :  { %v12930_v58 = vld [vmem:[#allocation32_spill] sm:$0xff] }
0x3fef   :  { %v12184_v5 = vpop.f32.mrf.mxu1 }
0x3ff1   :  { %v9023_v25 = vpop.f32.mrf.mxu1 }
0x3ff3   :  { %v7207_v14 = vpop.f32.mrf.mxu1 }
0x3ff5   :  { %v9024_v35 = vpop.f32.mrf.mxu1 }
0x406e   :  { %v7014_v47 = vpop.xlane.xlu1 %7013 }
0x406f   :  { %v7015_v32 = vsub.f32 %v7011_v59, %v7014_v47 }
0x4071   :  { %v7016_v20 = vmul.f32 1.442695, %v7015_v32  ;;  %v12931_v32 = vld [vmem:[#allocation33_spill] sm:$0xff] }
0x4073   :  { %9824 = vpow2.f32 %v7016_v20 }
0x4080   :  { %v9825_v23 = vpop.eup %9824 }
0x4081   :  { %v7018_v26 = vsel %vm4704_vm6, %v9825_v23, 0.0 }
0x4082   :  { %7019 = vadd.xlane.f32.xlu0 %v7018_v26 }
0x410b   :  { %v7020_v55 = vpop.xlane.xlu0 %7019 }
0x410c   :  { %9826 = vrcp.f32 %v7020_v55 }
0x4119   :  { %v9827_v40 = vpop.eup %9826 }
0x411a   :  { %v12187_v61 = vmul.f32 %v9827_v40, %v9825_v23 }
0x411c   :  { %12920 = vst [vmem:[#allocation25_spill] sm:$0xff] %v12187_v61  ;;  %v7026_v63 = vrot.slane %v12187_v61, %v12921_v2  ;;  %v7048_v43 = vrot.slane %v12187_v61, %v12922_v10  ;;  %v7037_v56 = vrot.slane %v12187_v61, %v12923_v34  ;;  %v7059_v53 = vrot.slane %v12187_v61, %v12924_v50 }
0x411e   :  { %7032 = vbcast.lane.b32.xlu1 %v7026_v63, 264  ;;  %7028 = vbcast.lane.b32.xlu0 %v7026_v63, 256  ;;  %v12932_v63 = vld [vmem:[#allocation34_spill] sm:$0xff] }
0x4122   :  { %7050 = vbcast.lane.b32.xlu1 %v7048_v43, 256  ;;  %7039 = vbcast.lane.b32.xlu0 %v7037_v56, 256 }
0x4126   :  { %7061 = vbcast.lane.b32.xlu1 %v7059_v53, 256  ;;  %7043 = vbcast.lane.b32.xlu0 %v7037_v56, 264 }
0x412a   :  { %7054 = vbcast.lane.b32.xlu0 %v7048_v43, 264 }
0x412e   :  { %7065 = vbcast.lane.b32.xlu0 %v7059_v53, 264 }
0x4190   :  { %v7033_v51 = vpop.permute.xlu1 %7032  ;;  %v7029_v21 = vpop.permute.xlu0 %7028 }
0x4191   :  { %v7068_v36 = vmul.f32 %v12925_v37, %v7033_v51  ;;  %v7067_v9 = vmul.f32 %v12926_v6, %v7029_v21 }
0x4193   :  { %v7076_v52 = vsel %vm234_vm4, %v7068_v36, 0.0  ;;  %v7075_v48 = vsel %vm234_vm4, %v7067_v9, 0.0 }
0x4194   :  { %v7077_v33 = vadd.f32 %v7076_v52, %v7075_v48  ;;  %v7040_v15 = vpop.permute.xlu0 %7039  ;;  %v7051_v39 = vpop.permute.xlu1 %7050 }
0x4195   :  { %v7069_v27 = vmul.f32 %v12927_v13, %v7040_v15  ;;  %v7071_v8 = vmul.f32 %v12929_v1, %v7051_v39 }
0x4196   :  { %v7078_v11 = vrot.slane %v7077_v33, 4 }
0x4197   :  { %v7084_v57 = vsel %vm234_vm4, %v7069_v27, 0.0  ;;  %v7093_v47 = vsel %vm234_vm4, %v7071_v8, 0.0 }
0x4198   :  { %v7044_v45 = vpop.permute.xlu0 %7043  ;;  %v7079_v46 = vadd.f32 %v7078_v11, %v7077_v33  ;;  %v7062_v17 = vpop.permute.xlu1 %7061 }
0x4199   :  { %v7070_v44 = vmul.f32 %v12928_v7, %v7044_v45  ;;  %v7073_v20 = vmul.f32 %v12931_v32, %v7062_v17 }
0x419a   :  { %v7080_v14 = vrot.slane %v7079_v46, 2 }
0x419b   :  { %v7085_v59 = vsel %vm234_vm4, %v7070_v44, 0.0  ;;  %v7102_v21 = vsel %vm234_vm4, %v7073_v20, 0.0 }
0x419c   :  { %v7086_v38 = vadd.f32 %v7085_v59, %v7084_v57  ;;  %v7055_v18 = vpop.permute.xlu0 %7054  ;;  %v7081_v56 = vadd.f32 %v7080_v14, %v7079_v46 }
0x419d   :  { %v7072_v25 = vmul.f32 %v12930_v58, %v7055_v18 }
0x419e   :  { %v7087_v35 = vrot.slane %v7086_v38, 4  ;;  %v7082_v52 = vrot.slane %v7081_v56, 1 }
0x419f   :  { %v7094_v23 = vsel %vm234_vm4, %v7072_v25, 0.0 }
0x41a0   :  { %v7088_v26 = vadd.f32 %v7087_v35, %v7086_v38  ;;  %v7095_v55 = vadd.f32 %v7094_v23, %v7093_v47  ;;  %v7066_v40 = vpop.permute.xlu0 %7065  ;;  %v7083_v27 = vadd.f32 %v7082_v52, %v7081_v56  ;;  %v12280_v56 = vld [vmem:[%s12717_s6 + $0x8] sm:$0xff]  }
0x41a1   :  { %v7074_v43 = vmul.f32 %v12932_v63, %v7066_v40  ;;  %v12264_v63 = vld [vmem:[%s12717_s6 + $0x18] sm:$0xff]  }
0x41a2   :  { %v7089_v53 = vrot.slane %v7088_v26, 2  ;;  %v7096_v51 = vrot.slane %v7095_v55, 4  ;;  %v7111_v8 = vpack.c.bf16 %v7083_v27, %v7083_v27 }
0x41a3   :  { %v7103_v37 = vsel %vm234_vm4, %v7074_v43, 0.0 }
0x41a4   :  { %v7090_v36 = vadd.f32 %v7089_v53, %v7088_v26  ;;  %v7097_v6 = vadd.f32 %v7096_v51, %v7095_v55  ;;  %v7104_v9 = vadd.f32 %v7103_v37, %v7102_v21  ;;  %v7119_v58 = vunpack.c.l.b16 %v7111_v8  ;;  %v12287_v21 = vld [vmem:[%s12717_s6] sm:$0xff]  }
0x41a6   :  { %v7091_v48 = vrot.slane %v7090_v36, 1  ;;  %v7098_v33 = vrot.slane %v7097_v6, 2  ;;  %v7105_v15 = vrot.slane %v7104_v9, 4 }
0x41a8   :  { %v7092_v11 = vadd.f32 %v7091_v48, %v7090_v36  ;;  %v7099_v39 = vadd.f32 %v7098_v33, %v7097_v6  ;;  %v7106_v13 = vadd.f32 %v7105_v15, %v7104_v9 }
0x41aa   :  { %v7100_v45 = vrot.slane %v7099_v39, 1  ;;  %v7107_v7 = vrot.slane %v7106_v13, 2  ;;  %v7112_v44 = vpack.c.bf16 %v7092_v11, %v7092_v11 }
0x41ac   :  { %v7101_v46 = vadd.f32 %v7100_v45, %v7099_v39  ;;  %v7108_v1 = vadd.f32 %v7107_v7, %v7106_v13  ;;  %v7120_v17 = vunpack.c.l.b16 %v7112_v44 }
0x41ae   :  { %v7113_v57 = vpack.c.bf16 %v7101_v46, %v7101_v46  ;;  %v7109_v59 = vrot.slane %v7108_v1, 1  ;;  %v7123_v14 = vsel %vm460_vm1, %v7120_v17, %v7119_v58 }
0x41b0   :  { %v7110_v38 = vadd.f32 %v7109_v59, %v7108_v1  ;;  %v7121_v18 = vunpack.c.l.b16 %v7113_v57 }
0x41b2   :  { %v7114_v25 = vpack.c.bf16 %v7110_v38, %v7110_v38  ;;  %v7124_v47 = vsel %vm463_vm2, %v7121_v18, %v7123_v14 }
0x41b4   :  { %v7122_v35 = vunpack.c.l.b16 %v7114_v25 }
0x41b6   :  { %v7125_v32 = vsel %vm466_vm3, %v7122_v35, %v7124_v47 }
0x41b7   :  { %v7126_v20 = vpack.c.b16 %v7125_v32, %v7125_v32 }
0x41b9   :  { %9010 = vmatmul.mubr.msk.bf16.vlgmr.msra.gmra.mxu0 %vm234_vm4, %v7126_v20 }
0x41ba   :  { %7222 = vmatpush1.bf16.msra.mxu0 %v11932_v3  ;;  %7245 = vmatprep.mubr.bf16.mxu0 %v12845_v29  ;;  %v12231_v3 = vld [vmem:[%s12718_s7 + $0x18] sm:$0xff]  }
0x41bb   :  { %7223 = vmatprep.subr.bf16.mxu0 %v11939_v41  ;;  %v12240_v41 = vld [vmem:[%s12718_s7 + $0x10] sm:$0xff]  }
0x41be   :  { %7224 = vmatpush1.bf16.msra.mxu0 %v11945_v42  ;;  %v12247_v42 = vld [vmem:[%s12718_s7 + $0x8] sm:$0xff]  }
0x41bf   :  { %7225 = vmatprep.subr.bf16.mxu0 %v11951_v30  ;;  %v12254_v30 = vld [vmem:[%s12718_s7] sm:$0xff]  }
0x41c2   :  { %7226 = vmatpush1.bf16.msra.mxu0 %v11957_v22 }
0x41c3   :  { %7227 = vmatprep.subr.bf16.mxu0 %v11963_v54 }
0x41c6   :  { %7228 = vmatpush1.bf16.msra.mxu0 %v11969_v49 }
0x41c7   :  { %9025 = vmatprep.subr.bf16.mxu0 %v12846_v28 }
0x41c9   :  { %8557 = vmatmul.mubr.msk.bf16.vlgmr.msra.gmra.mxu0 %vm234_vm4, %v12147_v0 }
0x41ca   :  { %9026 = vmatpush3.bf16.msra.mxu0 %v12231_v3  ;;  %9033 = vmatprep.mubr.msk.bf16.mxu0 %vm9990_vm5, %v12846_v28 }
0x41cb   :  { %9027 = vmatprep.subr.bf16.mxu0 %v12846_v28 }
0x41ce   :  { %9028 = vmatpush3.bf16.msra.mxu0 %v12240_v41 }
0x41cf   :  { %9029 = vmatprep.subr.bf16.mxu0 %v12846_v28 }
0x41d2   :  { %9030 = vmatpush3.bf16.msra.mxu0 %v12247_v42 }
0x41d3   :  { %9031 = vmatprep.subr.bf16.mxu0 %v12846_v28 }
0x41d6   :  { %9032 = vmatpush3.bf16.msra.mxu0 %v12254_v30 }
0x41d7   :  { %9049 = vmatprep.subr.bf16.mxu0 %v12846_v28 }
0x4279   :  { %v7164_v22 = vpop.f32.mrf.mxu0 }
0x427a   :  { %v7205_v54 = vadd.f32 %v12184_v5, %v7164_v22  ;;  %v12311_v22 = vld [vmem:[%s12715_s4] ss:$0 sm:$0xff]  ;;  %s9993_s4 = smov 16  }
0x427b   :  { %v9011_v49 = vpop.f32.mrf.mxu0 }
0x427c   :  { %v7210_v0 = vadd.f32 %v11989_v12, %v7205_v54  ;;  %v12273_v12 = vld [vmem:[%s12717_s6 + $0x10] sm:$0xff]  }
0x427d   :  { %v7167_v23 = vpop.f32.mrf.mxu0 }
0x427e   :  { %v7211_v26 = vmax.f32 %v7210_v0, 0.0 }
0x427f   :  { %v9012_v55 = vpop.f32.mrf.mxu0 }
0x4280   :  { %v7212_v40 = vpack.c.bf16 %v7211_v26, %v7211_v26  ;;  %v12327_v26 = vld [vmem:[%s12721_s10 + $0x18] sm:$0xff]  }
0x4281   :  { %v12337_v55 = vld [vmem:[%s12720_s9 + $0x18] sm:$0xff]  }
0x4282   :  { %8558 = vmatmul.mubr.msk.bf16.vlgmr.msra.gmra.mxu1 %vm234_vm4, %v7212_v40  ;;  %v12346_v40 = vld [vmem:[%s12721_s10 + $0x10] sm:$0xff]  }
0x4283   :  { %9038 = vmatpush3.bf16.msra.mxu1 %v12264_v63  ;;  %9045 = vmatprep.mubr.msk.bf16.mxu1 %vm9990_vm5, %v12846_v28 }
0x4284   :  { %9039 = vmatprep.subr.bf16.mxu1 %v12846_v28 }
0x4287   :  { %9040 = vmatpush3.bf16.msra.mxu1 %v12273_v12 }
0x4288   :  { %9041 = vmatprep.subr.bf16.mxu1 %v12846_v28 }
0x4289   :  { %v7247_v5 = vpop.f32.mrf.mxu0 }
0x428b   :  { %v7249_v43 = vpop.f32.mrf.mxu0  ;;  %9042 = vmatpush3.bf16.msra.mxu1 %v12280_v56 }
0x428c   :  { %9043 = vmatprep.subr.bf16.mxu1 %v12846_v28 }
0x428d   :  { %v7251_v53 = vpop.f32.mrf.mxu0 }
0x428e   :  { %v12367_v53 = vld [vmem:[%s12720_s9 + $0x8] sm:$0xff]  }
0x428f   :  { %v7252_v51 = vpop.f32.mrf.mxu0  ;;  %9044 = vmatpush3.bf16.msra.mxu1 %v12287_v21 }
0x4290   :  { %9061 = vmatprep.subr.bf16.mxu1 %v12846_v28  ;;  %v12374_v51 = vld [vmem:[%s12721_s10] sm:$0xff]  }
0x4342   :  { %v7291_v37 = vpop.f32.mrf.mxu1 }
0x4343   :  { %v7292_v36 = vadd.f32 %v7291_v37, %v7247_v5  ;;  %v12353_v5 = vld [vmem:[%s12720_s9 + $0x10] sm:$0xff]  }
0x4344   :  { %v7293_v6 = vpop.f32.mrf.mxu1  ;;  %v12380_v37 = vld [vmem:[%s12724_s13 + $0x34] ss:$8 sps:$4 sm:$0xff]  }
0x4345   :  { %v7298_v9 = vadd.f32 %v7292_v36, %v11426_v24  ;;  %v7294_v15 = vadd.f32 %v7293_v6, %v7249_v43  ;;  %v12360_v43 = vld [vmem:[%s12721_s10 + $0x8] sm:$0xff]   ;;  %v12386_v36 = vld [vmem:[%s12720_s9] sm:$0xff]   ;;  %v12392_v6 = vld [vmem:[%s12723_s12 + $0x34] ss:$8 sps:$4 sm:$0xff]  }
0x4346   :  { %v7295_v52 = vpop.f32.mrf.mxu1 }
0x4347   :  { %v8559_v48 = vmul.f32 -1.442695, %v7298_v9  ;;  %v7299_v11 = vadd.f32 %v7294_v15, %v11430_v16  ;;  %v12399_v9 = vld [vmem:[%s12723_s12 + $0x30] ss:$8 sps:$4 sm:$0xff]   ;;  %v12406_v52 = vld [vmem:[%s12723_s12 + $0x24] ss:$8 sps:$4 sm:$0xff]  }
0x4348   :  { %v7296_v33 = vpop.f32.mrf.mxu1  ;;  %v12424_v15 = vld [vmem:[%s12723_s12 + $0x10] ss:$8 sps:$4 sm:$0xff]  }
0x4349   :  { %9828 = vpow2.f32 %v8559_v48  ;;  %v8560_v44 = vmul.f32 -1.442695, %v7299_v11  ;;  %v12412_v48 = vld [vmem:[%s12723_s12 + $0x20] ss:$8 sps:$4 sm:$0xff]   ;;  %v12418_v33 = vld [vmem:[%s12723_s12 + $0x14] ss:$8 sps:$4 sm:$0xff]  }
0x434a   :  { %9830 = vtanh.f32 %v7299_v11  ;;  %v12430_v11 = vld [vmem:[%s12723_s12 + $0x4] ss:$8 sps:$4 sm:$0xff]  }
0x4356   :  { %v9829_v39 = vpop.eup %9828 }
0x4357   :  { %v7306_v13 = vadd.f32 1.0, %v9829_v39  ;;  %v9831_v27 = vpop.eup %9830  ;;  %v12436_v39 = vld [vmem:[%s12723_s12] ss:$8 sps:$4 sm:$0xff]  }
0x4359   :  { %9832 = vrcp.f32 %v7306_v13 }
0x435a   :  { %9834 = vpow2.f32 %v8560_v44 }
0x4366   :  { %v9833_v45 = vpop.eup %9832 }
0x4367   :  { %v7314_v7 = vmul.f32 %v9833_v45, %v9831_v27  ;;  %v9835_v46 = vpop.eup %9834  ;;  %v7313_v8 = vmul.f32 %v9833_v45, %v12132_v62 }
0x4368   :  { %v7307_v1 = vadd.f32 1.0, %v9835_v46 }
0x4369   :  { %7316 = vrot.lane.b32.xlu1 %v7314_v7, %s9987_s3 }
0x436a   :  { %9836 = vrcp.f32 %v7307_v1  ;;  %v12443_v1 = vld [vmem:[%s12719_s8] ss:$0 sm:$0xff]  ;;  %s10004_s8 = smov [#allocation5]  }
0x436b   :  { %s8256_s12 = sshll.u32 %s10004_s8, 4  ;;  %s8257_s12 = int_to_ptr.vmem [resolvable:$true] %s8256_s12 }
0x436c   :  { %s9963_s7 = scalar_lea.vmem %s8257_s12, 64  ;;  %p9968_p1 = scmp.lt.s32.totalorder %s8257_s12, %s8257_s12 }
0x436d   :  { %p9964_p0 = scmp.ne.s32.totalorder %s8257_s12, %s9963_s7  ;;  %p9969_p2 = scmp.lt.s32.totalorder %s9963_s7, %s9963_s7 }
0x436f   :  { %p9970_p3 = por %p9969_p2, %p9968_p1 }
0x4371   :  { %p9971_p4 = pnand %p9970_p3, %p9964_p0 }
0x4377   :  { %v9837_v17 = vpop.eup %9836 }
0x43db   :  { %v7317_v57 = vpop.permute.xlu1 %7316 }
0x43dc   :  { %v12295_v59 = vadd.f32 %v7317_v57, %v7313_v8 }
0x43de   :  { %9838 = vtanh.f32 %v12295_v59 }
0x43eb   :  { %v9839_v38 = vpop.eup %9838 }
0x43ec   :  { %v7321_v18 = vmul.f32 %v9839_v38, %v9837_v17 }
0x43ee   :  { %v7322_v58 = vmul.f32 %v7321_v18, %v11441_v4  ;;  %v7332_v32 = vpack.c.bf16 %v7321_v18, %v7321_v18 }
0x43f0   :  { %7324 = vrot.lane.b32.xlu0 %v7322_v58, %s9987_s3 }
0x4462   :  { %v7325_v25 = vpop.permute.xlu0 %7324 }
0x4463   :  { %v7327_v14 = vsel %vm5225_vm7, %v7325_v25, 0.0 }
0x4464   :  { %7328 = vadd.xlane.f32.xlu1 %v7327_v14 }
0x44ed   :  { %v7329_v35 = vpop.xlane.xlu1 %7328 }
0x44ee   :  { %v12302_v62 = vadd.f32 %v12013_v60, %v7329_v35  ;;  %v12317_v60 = vld [vmem:[%s12716_s5] ss:$0 sm:$0xff]  ;;  %s9994_s5 = smov 3  }
0x44f0   :  { %12933 = vst [vmem:[#allocation26_spill] sm:$0xff] %v12302_v62  ;;  %v12805_v47 = vmax.f32 %v12302_v62, 0.0 }
0x44f2   :  { %7335 = vperm.xlu0 %9142, %v12805_v47  }
0x44f6   :  { %7342 = vrot.lane.b32.xlu0 %v7332_v32, %s9987_s3 }
0x456d   :  { %v7336_v20 = vpop.permute.xlu0 %7335 }
0x456e   :  { %v7338_v54 = vmul.f32 %v12311_v22, %v7336_v20 }
0x4570   :  { %v7339_v49 = vadd.f32 %v12317_v60, %v7338_v54 }
0x4571   :  { %v12320_v0 = vpop.permute.xlu0 %7342 }
0x4572   :  { %v7340_v23 = vpack.c.bf16 %v7339_v49, %v7339_v49  ;;  %9034 = vmatmul.mubr.msk.bf16.vlgmr.msra.gmra.mxu0 %vm234_vm4, %v12320_v0 }
0x4573   :  { %9050 = vmatpush3.bf16.msra.mxu0 %v12327_v26  ;;  %9057 = vmatprep.mubr.msk.bf16.mxu0 %vm9990_vm5, %v12846_v28 }
0x4574   :  { %9046 = vmatmul.mubr.msk.bf16.vlgmr.msra.gmra.mxu1 %vm234_vm4, %v7340_v23  ;;  %9051 = vmatprep.subr.bf16.mxu0 %v12846_v28 }
0x4575   :  { %9062 = vmatpush3.bf16.msra.mxu1 %v12337_v55  ;;  %9069 = vmatprep.mubr.msk.bf16.mxu1 %vm9990_vm5, %v12846_v28 }
0x4576   :  { %9063 = vmatprep.subr.bf16.mxu1 %v12846_v28 }
0x4577   :  { %9052 = vmatpush3.bf16.msra.mxu0 %v12346_v40 }
0x4578   :  { %9053 = vmatprep.subr.bf16.mxu0 %v12846_v28 }
0x4579   :  { %9064 = vmatpush3.bf16.msra.mxu1 %v12353_v5 }
0x457a   :  { %9065 = vmatprep.subr.bf16.mxu1 %v12846_v28 }
0x457b   :  { %9054 = vmatpush3.bf16.msra.mxu0 %v12360_v43 }
0x457c   :  { %9055 = vmatprep.subr.bf16.mxu0 %v12846_v28 }
0x457d   :  { %9066 = vmatpush3.bf16.msra.mxu1 %v12367_v53 }
0x457e   :  { %9067 = vmatprep.subr.bf16.mxu1 %v12846_v28 }
0x457f   :  { %9056 = vmatpush3.bf16.msra.mxu0 %v12374_v51 }
0x4580   :  { %7640 = vmatprep.subr.bf16.mxu0 %v12380_v37 }
0x4581   :  { %9068 = vmatpush3.bf16.msra.mxu1 %v12386_v36 }
0x4582   :  { %7684 = vmatprep.subr.bf16.mxu1 %v12392_v6 }
0x4584   :  { %9070 = vmatmul.mubr.msk.bf16.vlgmr.msra.gmra.mxu1 %vm234_vm4, %v7340_v23 }
0x4585   :  { %7685 = vmatpush1.bf16.msra.mxu1 %v12399_v9  ;;  %7708 = vmatprep.mubr.bf16.mxu1 %v12845_v29 }
0x4586   :  { %7686 = vmatprep.subr.bf16.mxu1 %v12406_v52 }
0x4589   :  { %7687 = vmatpush1.bf16.msra.mxu1 %v12412_v48 }
0x458a   :  { %7688 = vmatprep.subr.bf16.mxu1 %v12418_v33 }
0x458d   :  { %7689 = vmatpush1.bf16.msra.mxu1 %v12424_v15 }
0x458e   :  { %7690 = vmatprep.subr.bf16.mxu1 %v12430_v11 }
0x4591   :  { %7691 = vmatpush1.bf16.msra.mxu1 %v12436_v39 }
0x4592   :  { %9085 = vmatprep.subr.bf16.mxu1 %v12846_v28 }
0x4632   :  { %v7381_v13 = vpop.f32.mrf.mxu0 }
0x4634   :  { %v9035_v27 = vpop.f32.mrf.mxu0  ;;  %v7424_v45 = vpop.f32.mrf.mxu1 }
0x4635   :  { %v7425_v7 = vadd.f32 %v7424_v45, %v7381_v13 }
0x4636   :  { %v7384_v44 = vpop.f32.mrf.mxu0  ;;  %v9047_v46 = vpop.f32.mrf.mxu1 }
0x4637   :  { %v7430_v8 = vadd.f32 %v12443_v1, %v7425_v7 }
0x4638   :  { %v9036_v57 = vpop.f32.mrf.mxu0  ;;  %v7427_v17 = vpop.f32.mrf.mxu1 }
0x4639   :  { %v7431_v38 = vsel %vm4704_vm6, %v7430_v8, -inf }
0x463a   :  { %v9048_v18 = vpop.f32.mrf.mxu1  ;;  %7432 = vmax.xlane.f32.xlu0 %v7431_v38  ;;  %v12460_v38 = vld [vmem:[#allocation3 + $0x8] sm:$0xff] }
0x463b   :  { %12935 = vst [vmem:[#allocation28_spill] sm:$0xff] %v12460_v38 }
0x4644   :  { %v12447_v58 = vpop.f32.mrf.mxu1 }
0x4646   :  { %v9071_v25 = vpop.f32.mrf.mxu1 }
0x4647   :  { %v12463_v25 = vld [vmem:[#allocation3] sm:$0xff] }
0x4648   :  { %v7626_v14 = vpop.f32.mrf.mxu1  ;;  %12936 = vst [vmem:[#allocation14_spill] sm:$0xff] %v12463_v25 }
0x464a   :  { %v9072_v35 = vpop.f32.mrf.mxu1 }
0x46c3   :  { %v7433_v32 = vpop.xlane.xlu0 %7432 }
0x46c4   :  { %v7434_v20 = vsub.f32 %v7430_v8, %v7433_v32 }
0x46c6   :  { %v7435_v54 = vmul.f32 1.442695, %v7434_v20 }
0x46c8   :  { %9840 = vpow2.f32 %v7435_v54 }
0x46d5   :  { %v9841_v49 = vpop.eup %9840 }
0x46d6   :  { %v7437_v23 = vsel %vm4704_vm6, %v9841_v49, 0.0 }
0x46d7   :  { %7438 = vadd.xlane.f32.xlu1 %v7437_v23 }
0x4760   :  { %v7439_v13 = vpop.xlane.xlu1 %7438 }
0x4761   :  { %9842 = vrcp.f32 %v7439_v13  ;;  %v12468_v13 = vld [vmem:[#allocation3 + $0x10] sm:$0xff] }
0x4762   :  { %12937 = vst [vmem:[#allocation17_spill] sm:$0xff] %v12468_v13 }
0x476e   :  { %v9843_v27 = vpop.eup %9842 }
0x476f   :  { %v12450_v45 = vmul.f32 %v9843_v27, %v9841_v49 }
0x4771   :  { %12934 = vst [vmem:[#allocation27_spill] sm:$0xff] %v12450_v45  ;;  %v7445_v7 = vrot.slane %v12450_v45, %v12921_v2  ;;  %v7467_v44 = vrot.slane %v12450_v45, %v12922_v10  ;;  %v7456_v46 = vrot.slane %v12450_v45, %v12923_v34  ;;  %v7478_v8 = vrot.slane %v12450_v45, %v12924_v50 }
0x4773   :  { %7451 = vbcast.lane.b32.xlu0 %v7445_v7, 264  ;;  %7447 = vbcast.lane.b32.xlu1 %v7445_v7, 256 }
0x4777   :  { %7469 = vbcast.lane.b32.xlu0 %v7467_v44, 256  ;;  %7458 = vbcast.lane.b32.xlu1 %v7456_v46, 256 }
0x477b   :  { %7480 = vbcast.lane.b32.xlu0 %v7478_v8, 256  ;;  %7462 = vbcast.lane.b32.xlu1 %v7456_v46, 264 }
0x477f   :  { %7473 = vbcast.lane.b32.xlu1 %v7467_v44, 264  ;;  %v12471_v44 = vld [vmem:[#allocation3 + $0x18] sm:$0xff] }
0x4780   :  { %12938 = vst [vmem:[#allocation18_spill] sm:$0xff] %v12471_v44 }
0x4783   :  { %7484 = vbcast.lane.b32.xlu1 %v7478_v8, 264 }
0x47e5   :  { %v7452_v57 = vpop.permute.xlu0 %7451  ;;  %v7448_v17 = vpop.permute.xlu1 %7447 }
0x47e6   :  { %v7487_v18 = vmul.f32 %v12460_v38, %v7452_v57  ;;  %v7486_v14 = vmul.f32 %v12463_v25, %v7448_v17  ;;  %v12474_v57 = vld [vmem:[#allocation3 + $0x20] sm:$0xff] }
0x47e7   :  { %12939 = vst [vmem:[#allocation19_spill] sm:$0xff] %v12474_v57 }
0x47e8   :  { %v7495_v35 = vsel %vm234_vm4, %v7487_v18, 0.0  ;;  %v7494_v32 = vsel %vm234_vm4, %v7486_v14, 0.0 }
0x47e9   :  { %v7496_v20 = vadd.f32 %v7495_v35, %v7494_v32  ;;  %v7459_v54 = vpop.permute.xlu1 %7458  ;;  %v7470_v23 = vpop.permute.xlu0 %7469 }
0x47ea   :  { %v7488_v27 = vmul.f32 %v12468_v13, %v7459_v54  ;;  %v7490_v17 = vmul.f32 %v12474_v57, %v7470_v23 }
0x47eb   :  { %v7497_v49 = vrot.slane %v7496_v20, 4 }
0x47ec   :  { %v7503_v18 = vsel %vm234_vm4, %v7488_v27, 0.0 }
0x47ed   :  { %v7463_v7 = vpop.permute.xlu1 %7462  ;;  %v7498_v8 = vadd.f32 %v7497_v49, %v7496_v20  ;;  %v7481_v35 = vpop.permute.xlu0 %7480  ;;  %v12483_v20 = vld [vmem:[#allocation3 + $0x30] sm:$0xff] }
0x47ee   :  { %v7489_v46 = vmul.f32 %v12471_v44, %v7463_v7  ;;  %v7512_v7 = vsel %vm234_vm4, %v7490_v17, 0.0  ;;  %12941 = vst [vmem:[#allocation21_spill] sm:$0xff] %v12483_v20  ;;  %v7492_v49 = vmul.f32 %v12483_v20, %v7481_v35 }
0x47ef   :  { %v7499_v45 = vrot.slane %v7498_v8, 2 }
0x47f0   :  { %v7504_v14 = vsel %vm234_vm4, %v7489_v46, 0.0 }
0x47f1   :  { %v7505_v32 = vadd.f32 %v7504_v14, %v7503_v18  ;;  %v7474_v47 = vpop.permute.xlu1 %7473  ;;  %v7500_v14 = vadd.f32 %v7499_v45, %v7498_v8 }
0x47f2   :  { %v7491_v54 = vmul.f32 %v12479_v31, %v7474_v47  ;;  %v7521_v31 = vsel %vm234_vm4, %v7492_v49, 0.0 }
0x47f3   :  { %v7506_v61 = vrot.slane %v7505_v32, 4  ;;  %v7501_v35 = vrot.slane %v7500_v14, 1 }
0x47f4   :  { %v7513_v23 = vsel %vm234_vm4, %v7491_v54, 0.0 }
0x47f5   :  { %v7507_v27 = vadd.f32 %v7506_v61, %v7505_v32  ;;  %v7514_v62 = vadd.f32 %v7513_v23, %v7512_v7  ;;  %v7485_v46 = vpop.permute.xlu1 %7484  ;;  %v7502_v38 = vadd.f32 %v7501_v35, %v7500_v14  ;;  %v12536_v14 = vld [vmem:[%s12724_s13] ss:$8 sps:$4 sm:$0xff]  }
0x47f6   :  { %v7493_v18 = vmul.f32 %v12487_v19, %v7485_v46 }
0x47f7   :  { %v7508_v57 = vrot.slane %v7507_v27, 2  ;;  %v7515_v47 = vrot.slane %v7514_v62, 4  ;;  %v7530_v34 = vpack.c.bf16 %v7502_v38, %v7502_v38  ;;  %v12524_v38 = vld [vmem:[%s12724_s13 + $0x10] ss:$8 sps:$4 sm:$0xff]  }
0x47f8   :  { %v7522_v17 = vsel %vm234_vm4, %v7493_v18, 0.0 }
0x47f9   :  { %v7509_v44 = vadd.f32 %v7508_v57, %v7507_v27  ;;  %v7516_v13 = vadd.f32 %v7515_v47, %v7514_v62  ;;  %v7523_v25 = vadd.f32 %v7522_v17, %v7521_v31  ;;  %v7538_v31 = vunpack.c.l.b16 %v7530_v34  ;;  %v12518_v34 = vld [vmem:[%s12724_s13 + $0x14] ss:$8 sps:$4 sm:$0xff]  }
0x47fb   :  { %v7510_v20 = vrot.slane %v7509_v44, 1  ;;  %v7517_v54 = vrot.slane %v7516_v13, 2  ;;  %v7524_v61 = vrot.slane %v7523_v25, 4 }
0x47fd   :  { %v7511_v32 = vadd.f32 %v7510_v20, %v7509_v44  ;;  %v7518_v7 = vadd.f32 %v7517_v54, %v7516_v13  ;;  %v7525_v23 = vadd.f32 %v7524_v61, %v7523_v25  ;;  %v12530_v20 = vld [vmem:[%s12724_s13 + $0x4] ss:$8 sps:$4 sm:$0xff]   ;;  %v12556_v54 = vld [vmem:[%s12722_s11] ss:$0 sm:$0xff]  ;;  %s9991_s11 = smov 1  }
0x47ff   :  { %v7519_v50 = vrot.slane %v7518_v7, 1  ;;  %v7526_v46 = vrot.slane %v7525_v23, 2  ;;  %v7531_v45 = vpack.c.bf16 %v7511_v32, %v7511_v32 }
0x4801   :  { %v7520_v8 = vadd.f32 %v7519_v50, %v7518_v7  ;;  %v7527_v19 = vadd.f32 %v7526_v46, %v7525_v23  ;;  %v7539_v18 = vunpack.c.l.b16 %v7531_v45  ;;  %v12499_v50 = vld [vmem:[%s12724_s13 + $0x30] ss:$8 sps:$4 sm:$0xff]  }
0x4803   :  { %v7532_v49 = vpack.c.bf16 %v7520_v8, %v7520_v8  ;;  %v7528_v10 = vrot.slane %v7527_v19, 1  ;;  %v7542_v47 = vsel %vm460_vm1, %v7539_v18, %v7538_v31 }
0x4805   :  { %v7529_v57 = vadd.f32 %v7528_v10, %v7527_v19  ;;  %v7540_v62 = vunpack.c.l.b16 %v7532_v49  ;;  %v12506_v19 = vld [vmem:[%s12724_s13 + $0x24] ss:$8 sps:$4 sm:$0xff]   ;;  %v12512_v10 = vld [vmem:[%s12724_s13 + $0x20] ss:$8 sps:$4 sm:$0xff]  }
0x4807   :  { %v7533_v27 = vpack.c.bf16 %v7529_v57, %v7529_v57  ;;  %v7543_v13 = vsel %vm463_vm2, %v7540_v62, %v7542_v47 }
0x4809   :  { %v7541_v17 = vunpack.c.l.b16 %v7533_v27 }
0x480b   :  { %v7544_v25 = vsel %vm466_vm3, %v7541_v17, %v7543_v13 }
0x480c   :  { %v7545_v44 = vpack.c.b16 %v7544_v25, %v7544_v25 }
0x480e   :  { %9058 = vmatmul.mubr.msk.bf16.vlgmr.msra.gmra.mxu0 %vm234_vm4, %v7545_v44 }
0x480f   :  { %7641 = vmatpush1.bf16.msra.mxu0 %v12499_v50  ;;  %7664 = vmatprep.mubr.bf16.mxu0 %v12845_v29 }
0x4810   :  { %7642 = vmatprep.subr.bf16.mxu0 %v12506_v19 }
0x4813   :  { %7643 = vmatpush1.bf16.msra.mxu0 %v12512_v10 }
0x4814   :  { %7644 = vmatprep.subr.bf16.mxu0 %v12518_v34 }
0x4817   :  { %7645 = vmatpush1.bf16.msra.mxu0 %v12524_v38 }
0x4818   :  { %7646 = vmatprep.subr.bf16.mxu0 %v12530_v20 }
0x481b   :  { %7647 = vmatpush1.bf16.msra.mxu0 %v12536_v14 }
0x481c   :  { %9073 = vmatprep.subr.bf16.mxu0 %v12846_v28 }
0x481e   :  { %8565 = vmatmul.mubr.msk.bf16.vlgmr.msra.gmra.mxu0 %vm234_vm4, %v12320_v0 }
0x481f   :  { %9074 = vmatpush3.bf16.msra.mxu0 %v12231_v3  ;;  %9081 = vmatprep.mubr.msk.bf16.mxu0 %vm9990_vm5, %v12846_v28 }
0x4820   :  { %9075 = vmatprep.subr.bf16.mxu0 %v12846_v28 }
0x4823   :  { %9076 = vmatpush3.bf16.msra.mxu0 %v12240_v41 }
0x4824   :  { %9077 = vmatprep.subr.bf16.mxu0 %v12846_v28 }
0x4827   :  { %9078 = vmatpush3.bf16.msra.mxu0 %v12247_v42 }
0x4828   :  { %9079 = vmatprep.subr.bf16.mxu0 %v12846_v28 }
0x482b   :  { %9080 = vmatpush3.bf16.msra.mxu0 %v12254_v30 }
0x482c   :  { %9097 = vmatprep.subr.bf16.mxu0 %v12846_v28 }
0x48ce   :  { %v7583_v0 = vpop.f32.mrf.mxu0 }
0x48cf   :  { %v7624_v3 = vadd.f32 %v12447_v58, %v7583_v0 }
0x48d0   :  { %v9059_v35 = vpop.f32.mrf.mxu0 }
0x48d1   :  { %v7629_v41 = vadd.f32 %v12556_v54, %v7624_v3 }
0x48d2   :  { %v7586_v61 = vpop.f32.mrf.mxu0 }
0x48d3   :  { %v7630_v32 = vmax.f32 %v7629_v41, 0.0 }
0x48d4   :  { %v9060_v42 = vpop.f32.mrf.mxu0 }
0x48d5   :  { %v7631_v7 = vpack.c.bf16 %v7630_v32, %v7630_v32 }
0x48d7   :  { %8566 = vmatmul.mubr.msk.bf16.vlgmr.msra.gmra.mxu1 %vm234_vm4, %v7631_v7 }
0x48d8   :  { %9086 = vmatpush3.bf16.msra.mxu1 %v12264_v63  ;;  %9093 = vmatprep.mubr.msk.bf16.mxu1 %vm9990_vm5, %v12846_v28 }
0x48d9   :  { %9087 = vmatprep.subr.bf16.mxu1 %v12846_v28 }
0x48dc   :  { %9088 = vmatpush3.bf16.msra.mxu1 %v12273_v12 }
0x48dd   :  { %9089 = vmatprep.subr.bf16.mxu1 %v12846_v28 }
0x48de   :  { %v7666_v30 = vpop.f32.mrf.mxu0 }
0x48e0   :  { %v7668_v58 = vpop.f32.mrf.mxu0  ;;  %9090 = vmatpush3.bf16.msra.mxu1 %v12280_v56 }
0x48e1   :  { %9091 = vmatprep.subr.bf16.mxu1 %v12846_v28 }
0x48e2   :  { %v7670_v23 = vpop.f32.mrf.mxu0 }
0x48e3   :  { %v12580_v23 = vld [vmem:[#allocation4] ss:$0 sm:$0xff] }
0x48e4   :  { %v7671_v46 = vpop.f32.mrf.mxu0  ;;  %9092 = vmatpush3.bf16.msra.mxu1 %v12287_v21 }
0x48e5   :  { %9109 = vmatprep.subr.bf16.mxu1 %v12846_v28 }
0x4997   :  { %v7710_v63 = vpop.f32.mrf.mxu1 }
0x4998   :  { %v7711_v45 = vadd.f32 %v7710_v63, %v7666_v30 }
0x4999   :  { %v7712_v8 = vpop.f32.mrf.mxu1 }
0x499a   :  { %v7717_v49 = vadd.f32 %v7711_v45, %v11426_v24  ;;  %v7713_v62 = vadd.f32 %v7712_v8, %v7668_v58 }
0x499b   :  { %v7714_v12 = vpop.f32.mrf.mxu1 }
0x499c   :  { %v8567_v18 = vmul.f32 -1.442695, %v7717_v49  ;;  %v7718_v56 = vadd.f32 %v7713_v62, %v11430_v16 }
0x499d   :  { %v7715_v57 = vpop.f32.mrf.mxu1 }
0x499e   :  { %9844 = vpow2.f32 %v8567_v18  ;;  %v8568_v13 = vmul.f32 -1.442695, %v7718_v56 }
0x499f   :  { %9846 = vtanh.f32 %v7718_v56 }
0x49ab   :  { %v9845_v31 = vpop.eup %9844 }
0x49ac   :  { %v7725_v27 = vadd.f32 1.0, %v9845_v31  ;;  %v9847_v47 = vpop.eup %9846  ;;  %v12943_v31 = vld [vmem:[#allocation10_spill] sm:$0xff] }
0x49ae   :  { %9848 = vrcp.f32 %v7725_v27 }
0x49af   :  { %9850 = vpow2.f32 %v8568_v13 }
0x49bb   :  { %v9849_v21 = vpop.eup %9848 }
0x49bc   :  { %v7733_v17 = vmul.f32 %v9849_v21, %v9847_v47  ;;  %v9851_v25 = vpop.eup %9850  ;;  %v7732_v0 = vmul.f32 %v9849_v21, %v12295_v59  ;;  %v12944_v47 = vld [vmem:[#allocation8_spill] sm:$0xff] }
0x49bd   :  { %v7726_v44 = vadd.f32 1.0, %v9851_v25 }
0x49be   :  { %7735 = vrot.lane.b32.xlu0 %v7733_v17, %s9987_s3  ;;  %v12945_v17 = vld [vmem:[#allocation11_spill] sm:$0xff] }
0x49bf   :  { %9852 = vrcp.f32 %v7726_v44 }
0x49cc   :  { %v9853_v41 = vpop.eup %9852 }
0x4a30   :  { %v7736_v3 = vpop.permute.xlu0 %7735 }
0x4a31   :  { %v12574_v35 = vadd.f32 %v7736_v3, %v7732_v0  ;;  %v12947_v3 = vld [vmem:[#allocation14_spill] sm:$0xff] }
0x4a33   :  { %9854 = vtanh.f32 %v12574_v35 }
0x4a40   :  { %v9855_v61 = vpop.eup %9854 }
0x4a41   :  { %v7740_v32 = vmul.f32 %v9855_v61, %v9853_v41 }
0x4a43   :  { %v7741_v42 = vmul.f32 %v7740_v32, %v11441_v4  ;;  %v7751_v63 = vpack.c.bf16 %v7740_v32, %v7740_v32 }
0x4a45   :  { %7743 = vrot.lane.b32.xlu1 %v7741_v42, %s9987_s3 }
0x4ab7   :  { %v7744_v7 = vpop.permute.xlu1 %7743 }
0x4ab8   :  { %v7746_v30 = vsel %vm5225_vm7, %v7744_v7, 0.0 }
0x4ab9   :  { %7747 = vadd.xlane.f32.xlu0 %v7746_v30 }
0x4b42   :  { %v7748_v58 = vpop.xlane.xlu0 %7747 }
0x4b43   :  { %v12583_v59 = vadd.f32 %v12580_v23, %v7748_v58 }
0x4b45   :  { %v7750_v46 = vmax.f32 %v12583_v59, 0.0 }
0x4b47   :  { %7754 = vperm.xlu1 %9143, %v7750_v46  }
0x4b4b   :  { %7761 = vrot.lane.b32.xlu1 %v7751_v63, %s9987_s3  ;;  %v12948_v63 = vld [vmem:[#allocation17_spill] sm:$0xff] }
0x4bc2   :  { %v7755_v45 = vpop.permute.xlu1 %7754 }
0x4bc3   :  { %v7757_v8 = vmul.f32 %v12311_v22, %v7755_v45 }
0x4bc5   :  { %v7758_v49 = vadd.f32 %v12317_v60, %v7757_v8 }
0x4bc6   :  { %v12591_v12 = vpop.permute.xlu1 %7761 }
0x4bc7   :  { %v7759_v18 = vpack.c.bf16 %v7758_v49, %v7758_v49  ;;  %9082 = vmatmul.mubr.msk.bf16.vlgmr.msra.gmra.mxu0 %vm234_vm4, %v12591_v12  ;;  %v12949_v49 = vld [vmem:[#allocation18_spill] sm:$0xff] }
0x4bc8   :  { %9098 = vmatpush3.bf16.msra.mxu0 %v12327_v26  ;;  %9105 = vmatprep.mubr.msk.bf16.mxu0 %vm9990_vm5, %v12846_v28 }
0x4bc9   :  { %9094 = vmatmul.mubr.msk.bf16.vlgmr.msra.gmra.mxu1 %vm234_vm4, %v7759_v18  ;;  %9099 = vmatprep.subr.bf16.mxu0 %v12846_v28 }
0x4bca   :  { %9110 = vmatpush3.bf16.msra.mxu1 %v12337_v55  ;;  %9117 = vmatprep.mubr.msk.bf16.mxu1 %vm9990_vm5, %v12846_v28  ;;  %vm8245_vm5 = vcmask 785408  }
0x4bcb   :  { %9111 = vmatprep.subr.bf16.mxu1 %v12846_v28 }
0x4bcc   :  { %9100 = vmatpush3.bf16.msra.mxu0 %v12346_v40 }
0x4bcd   :  { %9101 = vmatprep.subr.bf16.mxu0 %v12846_v28 }
0x4bce   :  { %9112 = vmatpush3.bf16.msra.mxu1 %v12353_v5 }
0x4bcf   :  { %9113 = vmatprep.subr.bf16.mxu1 %v12846_v28 }
0x4bd0   :  { %9102 = vmatpush3.bf16.msra.mxu0 %v12360_v43 }
0x4bd1   :  { %9103 = vmatprep.subr.bf16.mxu0 %v12846_v28 }
0x4bd2   :  { %9114 = vmatpush3.bf16.msra.mxu1 %v12367_v53 }
0x4bd3   :  { %9115 = vmatprep.subr.bf16.mxu1 %v12846_v28 }
0x4bd4   :  { %9104 = vmatpush3.bf16.msra.mxu0 %v12374_v51 }
0x4bd5   :  { %8059 = vmatprep.subr.bf16.mxu0 %v12380_v37 }
0x4bd6   :  { %9116 = vmatpush3.bf16.msra.mxu1 %v12386_v36 }
0x4bd7   :  { %8103 = vmatprep.subr.bf16.mxu1 %v12392_v6 }
0x4bd9   :  { %9118 = vmatmul.mubr.msk.bf16.vlgmr.msra.gmra.mxu1 %vm234_vm4, %v7759_v18 }
0x4bda   :  { %8104 = vmatpush1.bf16.msra.mxu1 %v12399_v9  ;;  %8127 = vmatprep.mubr.bf16.mxu1 %v12845_v29 }
0x4bdb   :  { %8105 = vmatprep.subr.bf16.mxu1 %v12406_v52 }
0x4bde   :  { %8106 = vmatpush1.bf16.msra.mxu1 %v12412_v48 }
0x4bdf   :  { %8107 = vmatprep.subr.bf16.mxu1 %v12418_v33 }
0x4be2   :  { %8108 = vmatpush1.bf16.msra.mxu1 %v12424_v15 }
0x4be3   :  { %8109 = vmatprep.subr.bf16.mxu1 %v12430_v11 }
0x4be6   :  { %8110 = vmatpush1.bf16.msra.mxu1 %v12436_v39 }
0x4c87   :  { %v7800_v28 = vpop.f32.mrf.mxu0 }
0x4c89   :  { %v9083_v22 = vpop.f32.mrf.mxu0  ;;  %v7843_v60 = vpop.f32.mrf.mxu1 }
0x4c8a   :  { %v7844_v26 = vadd.f32 %v7843_v60, %v7800_v28  ;;  %v12950_v22 = vld [vmem:[#allocation19_spill] sm:$0xff] }
0x4c8b   :  { %v7803_v55 = vpop.f32.mrf.mxu0  ;;  %v9095_v40 = vpop.f32.mrf.mxu1 }
0x4c8c   :  { %v7849_v5 = vadd.f32 %v12443_v1, %v7844_v26 }
0x4c8d   :  { %v9084_v43 = vpop.f32.mrf.mxu0  ;;  %v7846_v53 = vpop.f32.mrf.mxu1 }
0x4c8e   :  { %v7850_v51 = vsel %vm4704_vm6, %v7849_v5, -inf  ;;  %v12951_v53 = vld [vmem:[#allocation9_spill] sm:$0xff] }
0x4c8f   :  { %v9096_v37 = vpop.f32.mrf.mxu1  ;;  %7851 = vmax.xlane.f32.xlu1 %v7850_v51 }
0x4c99   :  { %v12627_v36 = vpop.f32.mrf.mxu1 }
0x4c9b   :  { %v9119_v6 = vpop.f32.mrf.mxu1 }
0x4c9d   :  { %v8045_v9 = vpop.f32.mrf.mxu1 }
0x4c9f   :  { %v9120_v52 = vpop.f32.mrf.mxu1 }
0x4ca0   :  { %v12952_v52 = vld [vmem:[#allocation21_spill] sm:$0xff] }
0x4d18   :  { %v7852_v48 = vpop.xlane.xlu1 %7851 }
0x4d19   :  { %v7853_v33 = vsub.f32 %v7849_v5, %v7852_v48 }
0x4d1b   :  { %v7854_v15 = vmul.f32 1.442695, %v7853_v33 }
0x4d1d   :  { %9856 = vpow2.f32 %v7854_v15 }
0x4d2a   :  { %v9857_v11 = vpop.eup %9856 }
0x4d2b   :  { %v7856_v39 = vsel %vm4704_vm6, %v9857_v11, 0.0  ;;  %vm8247_vm6 = vcmask 916480  }
0x4d2c   :  { %7857 = vadd.xlane.f32.xlu0 %v7856_v39 }
0x4db5   :  { %v7858_v1 = vpop.xlane.xlu0 %7857 }
0x4db6   :  { %9858 = vrcp.f32 %v7858_v1  ;;  %v12953_v1 = vld [vmem:[#allocation22_spill] sm:$0xff] }
0x4dc3   :  { %v9859_v57 = vpop.eup %9858 }
0x4dc4   :  { %v12630_v62 = vmul.f32 %v9859_v57, %v9857_v11 }
0x4dc6   :  { %v7864_v56 = vrot.slane %v12630_v62, %v12921_v2  ;;  %v7886_v27 = vrot.slane %v12630_v62, %v12943_v31  ;;  %v7875_v21 = vrot.slane %v12630_v62, %v12944_v47  ;;  %v7897_v13 = vrot.slane %v12630_v62, %v12945_v17  ;;  %v12946_v2 = vld [vmem:[#allocation28_spill] sm:$0xff] }
0x4dc8   :  { %7870 = vbcast.lane.b32.xlu1 %v7864_v56, 264  ;;  %7866 = vbcast.lane.b32.xlu0 %v7864_v56, 256 }
0x4dcc   :  { %7888 = vbcast.lane.b32.xlu1 %v7886_v27, 256  ;;  %7877 = vbcast.lane.b32.xlu0 %v7875_v21, 256 }
0x4dd0   :  { %7899 = vbcast.lane.b32.xlu1 %v7897_v13, 256  ;;  %7881 = vbcast.lane.b32.xlu0 %v7875_v21, 264 }
0x4dd4   :  { %7892 = vbcast.lane.b32.xlu0 %v7886_v27, 264 }
0x4dd8   :  { %7903 = vbcast.lane.b32.xlu0 %v7897_v13, 264 }
0x4e3a   :  { %v7871_v25 = vpop.permute.xlu1 %7870  ;;  %v7867_v44 = vpop.permute.xlu0 %7866 }
0x4e3b   :  { %v7906_v0 = vmul.f32 %v12946_v2, %v7871_v25  ;;  %v7905_v41 = vmul.f32 %v12947_v3, %v7867_v44 }
0x4e3d   :  { %v7914_v61 = vsel %vm234_vm4, %v7906_v0, 0.0  ;;  %v7913_v32 = vsel %vm234_vm4, %v7905_v41, 0.0 }
0x4e3e   :  { %v7915_v42 = vadd.f32 %v7914_v61, %v7913_v32  ;;  %v7878_v7 = vpop.permute.xlu0 %7877  ;;  %v7889_v58 = vpop.permute.xlu1 %7888 }
0x4e3f   :  { %v7907_v45 = vmul.f32 %v12948_v63, %v7878_v7  ;;  %v7909_v60 = vmul.f32 %v12950_v22, %v7889_v58 }
0x4e40   :  { %v7916_v30 = vrot.slane %v7915_v42, 4 }
0x4e41   :  { %v7922_v26 = vsel %vm234_vm4, %v7907_v45, 0.0  ;;  %v7931_v9 = vsel %vm234_vm4, %v7909_v60, 0.0 }
0x4e42   :  { %v7882_v8 = vpop.permute.xlu0 %7881  ;;  %v7917_v28 = vadd.f32 %v7916_v30, %v7915_v42  ;;  %v7900_v40 = vpop.permute.xlu1 %7899 }
0x4e43   :  { %v7908_v18 = vmul.f32 %v12949_v49, %v7882_v8  ;;  %v7911_v48 = vmul.f32 %v12952_v52, %v7900_v40 }
0x4e44   :  { %v7918_v37 = vrot.slane %v7917_v28, 2 }
0x4e45   :  { %v7923_v55 = vsel %vm234_vm4, %v7908_v18, 0.0  ;;  %v7940_v47 = vsel %vm234_vm4, %v7911_v48, 0.0 }
0x4e46   :  { %v7924_v5 = vadd.f32 %v7923_v55, %v7922_v26  ;;  %v7893_v43 = vpop.permute.xlu0 %7892  ;;  %v7919_v56 = vadd.f32 %v7918_v37, %v7917_v28 }
0x4e47   :  { %v7910_v51 = vmul.f32 %v12951_v53, %v7893_v43 }
0x4e48   :  { %v7925_v6 = vrot.slane %v7924_v5, 4  ;;  %v7920_v44 = vrot.slane %v7919_v56, 1 }
0x4e49   :  { %v7932_v33 = vsel %vm234_vm4, %v7910_v51, 0.0 }
0x4e4a   :  { %v7926_v15 = vadd.f32 %v7925_v6, %v7924_v5  ;;  %v7933_v11 = vadd.f32 %v7932_v33, %v7931_v9  ;;  %v7904_v39 = vpop.permute.xlu0 %7903  ;;  %v7921_v42 = vadd.f32 %v7920_v44, %v7919_v56 }
0x4e4b   :  { %v7912_v57 = vmul.f32 %v12953_v1, %v7904_v39 }
0x4e4c   :  { %v7927_v31 = vrot.slane %v7926_v15, 2  ;;  %v7934_v27 = vrot.slane %v7933_v11, 4  ;;  %v7949_v8 = vpack.c.bf16 %v7921_v42, %v7921_v42 }
0x4e4d   :  { %v7941_v21 = vsel %vm234_vm4, %v7912_v57, 0.0 }
0x4e4e   :  { %v7928_v17 = vadd.f32 %v7927_v31, %v7926_v15  ;;  %v7935_v13 = vadd.f32 %v7934_v27, %v7933_v11  ;;  %v7942_v25 = vadd.f32 %v7941_v21, %v7940_v47  ;;  %v7957_v26 = vunpack.c.l.b16 %v7949_v8  ;;  %v12965_v8 = vld [vmem:[#allocation26_spill] sm:$0xff] }
0x4e50   :  { %v7929_v2 = vrot.slane %v7928_v17, 1  ;;  %v7936_v0 = vrot.slane %v7935_v13, 2  ;;  %v7943_v3 = vrot.slane %v7942_v25, 4 }
0x4e52   :  { %v7930_v41 = vadd.f32 %v7929_v2, %v7928_v17  ;;  %v7937_v61 = vadd.f32 %v7936_v0, %v7935_v13  ;;  %v7944_v32 = vadd.f32 %v7943_v3, %v7942_v25 }
0x4e54   :  { %v7938_v7 = vrot.slane %v7937_v61, 1  ;;  %v7945_v30 = vrot.slane %v7944_v32, 2  ;;  %v7950_v58 = vpack.c.bf16 %v7930_v41, %v7930_v41  ;;  %v12954_v41 = vld [vmem:[#allocation12_spill] sm:$0xff] }
0x4e56   :  { %v7939_v63 = vadd.f32 %v7938_v7, %v7937_v61  ;;  %v7946_v45 = vadd.f32 %v7945_v30, %v7944_v32  ;;  %v7958_v28 = vunpack.c.l.b16 %v7950_v58  ;;  %v12955_v61 = vmax.f32 %v12954_v41, 0.0  ;;  %v12956_v32 = vld [vmem:[#allocation16_spill] sm:$0xff]  ;;  %v12959_v7 = vld [vmem:[#allocation35_spill] sm:$0xff]  ;;  %v12961_v58 = vld [vmem:[#allocation13_spill] sm:$0xff] }
0x4e57   :  { %v12957_v42 = vmax.f32 %v12956_v32, 0.0  ;;  %v12960_v30 = vmax.f32 %v12959_v7, 0.0 }
0x4e58   :  { %v7951_v49 = vpack.c.bf16 %v7939_v63, %v7939_v63  ;;  %v7947_v18 = vrot.slane %v7946_v45, 1  ;;  %v7961_v40 = vsel %vm460_vm1, %v7958_v28, %v7957_v26  ;;  %v12968_v28 = vld [vmem:[#allocation25_spill] sm:$0xff]  ;;  %vm8204_vm1 = vcmask 56320  }
0x4e5a   :  { %v7948_v22 = vadd.f32 %v7947_v18, %v7946_v45  ;;  %v7959_v60 = vunpack.c.l.b16 %v7951_v49  ;;  %v12964_v45 = vld [vmem:[#allocation20_spill] sm:$0xff]  ;;  %v12966_v49 = vmax.f32 %v12965_v8, 0.0 }
0x4e5b   :  { %v12967_v18 = vld [vmem:[#allocation36_spill] sm:$0xff] }
0x4e5c   :  { %v7952_v55 = vpack.c.bf16 %v7948_v22, %v7948_v22  ;;  %v7962_v43 = vsel %vm463_vm2, %v7959_v60, %v7961_v40  ;;  %v12969_v22 = vld [vmem:[#allocation27_spill] sm:$0xff]  ;;  %vm8206_vm2 = vcmask 60416  }
0x4e5e   :  { %v7960_v5 = vunpack.c.l.b16 %v7952_v55 }
0x4e60   :  { %v7963_v53 = vsel %vm466_vm3, %v7960_v5, %v7962_v43  ;;  %vm8243_vm3 = vcmask 654336  }
0x4e61   :  { %v7964_v51 = vpack.c.b16 %v7963_v53, %v7963_v53 }
0x4e63   :  { %9106 = vmatmul.mubr.msk.bf16.vlgmr.msra.gmra.mxu0 %vm234_vm4, %v7964_v51 }
0x4e64   :  { %8060 = vmatpush1.bf16.msra.mxu0 %v12499_v50  ;;  %8083 = vmatprep.mubr.bf16.mxu0 %v12845_v29 }
0x4e65   :  { %8061 = vmatprep.subr.bf16.mxu0 %v12506_v19 }
0x4e68   :  { %8062 = vmatpush1.bf16.msra.mxu0 %v12512_v10 }
0x4e69   :  { %8063 = vmatprep.subr.bf16.mxu0 %v12518_v34 }
0x4e6c   :  { %8064 = vmatpush1.bf16.msra.mxu0 %v12524_v38 }
0x4e6d   :  { %8065 = vmatprep.subr.bf16.mxu0 %v12530_v20 }
0x4e70   :  { %8066 = vmatpush1.bf16.msra.mxu0 %v12536_v14 }
0x4e73   :  { %8573 = vmatmul.mubr.msk.bf16.vlgmr.msra.gmra.mxu0 %vm234_vm4, %v12591_v12 }
0x4f23   :  { %v8002_v37 = vpop.f32.mrf.mxu0 }
0x4f24   :  { %v8043_v50 = vadd.f32 %v12627_v36, %v8002_v37 }
0x4f25   :  { %v9107_v6 = vpop.f32.mrf.mxu0 }
0x4f26   :  { %v8048_v29 = vadd.f32 %v12556_v54, %v8043_v50 }
0x4f27   :  { %v8005_v19 = vpop.f32.mrf.mxu0 }
0x4f28   :  { %v8049_v9 = vmax.f32 %v8048_v29, 0.0 }
0x4f29   :  { %v9108_v10 = vpop.f32.mrf.mxu0 }
0x4f2a   :  { %v8050_v52 = vpack.c.bf16 %v8049_v9, %v8049_v9 }
0x4f2c   :  { %8574 = vmatmul.mubr.msk.bf16.vlgmr.msra.gmra.mxu1 %vm234_vm4, %v8050_v52 }
0x4f33   :  { %v8085_v34 = vpop.f32.mrf.mxu0 }
0x4f35   :  { %v8087_v38 = vpop.f32.mrf.mxu0 }
0x4f37   :  { %v8089_v20 = vpop.f32.mrf.mxu0 }
0x4f39   :  { %v8090_v48 = vpop.f32.mrf.mxu0 }
0x4f3a   :  { %v12972_v48 = vld [vmem:[#allocation15_spill] sm:$0xff] }
0x4fec   :  { %v8129_v14 = vpop.f32.mrf.mxu1 }
0x4fed   :  { %v8130_v33 = vadd.f32 %v8129_v14, %v8085_v34 }
0x4fee   :  { %v8131_v15 = vpop.f32.mrf.mxu1 }
0x4fef   :  { %v8136_v12 = vadd.f32 %v8130_v33, %v11426_v24  ;;  %v8132_v54 = vadd.f32 %v8131_v15, %v8087_v38 }
0x4ff0   :  { %v8133_v11 = vpop.f32.mrf.mxu1 }
0x4ff1   :  { %v8575_v36 = vmul.f32 -1.442695, %v8136_v12  ;;  %v8137_v1 = vadd.f32 %v8132_v54, %v11430_v16 }
0x4ff2   :  { %v8134_v39 = vpop.f32.mrf.mxu1 }
0x4ff3   :  { %9860 = vpow2.f32 %v8575_v36  ;;  %v8576_v21 = vmul.f32 -1.442695, %v8137_v1 }
0x4ff4   :  { %9862 = vtanh.f32 %v8137_v1 }
0x5000   :  { %v9861_v57 = vpop.eup %9860 }
0x5001   :  { %v8144_v56 = vadd.f32 1.0, %v9861_v57  ;;  %v9863_v31 = vpop.eup %9862 }
0x5003   :  { %9864 = vrcp.f32 %v8144_v56 }
0x5004   :  { %9866 = vpow2.f32 %v8576_v21 }
0x5010   :  { %v9865_v27 = vpop.eup %9864 }
0x5011   :  { %v8152_v47 = vmul.f32 %v9865_v27, %v9863_v31  ;;  %v9867_v17 = vpop.eup %9866  ;;  %v8151_v13 = vmul.f32 %v9865_v27, %v12574_v35  ;;  %v12958_v35 = vld [vmem:[#allocation30_spill] sm:$0xff] }
0x5012   :  { %v8145_v24 = vadd.f32 1.0, %v9867_v17 }
0x5013   :  { %8154 = vrot.lane.b32.xlu1 %v8152_v47, %s9987_s3 }
0x5014   :  { %9868 = vrcp.f32 %v8145_v24 }
0x5021   :  { %v9869_v16 = vpop.eup %9868 }
0x5085   :  { %v8155_v25 = vpop.permute.xlu1 %8154 }
0x5086   :  { %v8157_v44 = vadd.f32 %v8155_v25, %v8151_v13 }
0x5088   :  { %9870 = vtanh.f32 %v8157_v44 }
0x5095   :  { %v9871_v2 = vpop.eup %9870 }
0x5096   :  { %v8159_v0 = vmul.f32 %v9871_v2, %v9869_v16 }
0x5098   :  { %v8160_v3 = vmul.f32 %v8159_v0, %v11441_v4  ;;  %v12962_v4 = vld [vmem:[#allocation37_spill] sm:$0xff] }
0x5099   :  { %v12963_v63 = vmax.f32 %v12962_v4, 0.0 }
0x509a   :  { %8162 = vrot.lane.b32.xlu0 %v8160_v3, %s9987_s3 }
0x509e   :  { %8170 = vrot.lane.b32.xlu0 %v12955_v61, %s9991_s11 }
0x50a2   :  { %8173 = vrot.lane.b32.xlu0 %v12957_v42, %s9992_s15 }
0x50a6   :  { %8209 = vrot.lane.b32.xlu0 %v12958_v35, %s9993_s4 }
0x50aa   :  { %8176 = vrot.lane.b32.xlu0 %v12960_v30, %s9994_s5 }
0x50ae   :  { %8213 = vrot.lane.b32.xlu0 %v12961_v58, %s9995_s29 }
0x50b2   :  { %8179 = vrot.lane.b32.xlu0 %v12963_v63, %s9996_s0 }
0x50b6   :  { %8217 = vrot.lane.b32.xlu0 %v12964_v45, %s9997_s30 }
0x50ba   :  { %8182 = vrot.lane.b32.xlu0 %v12966_v49, %s9998_s19 }
0x50be   :  { %8221 = vrot.lane.b32.xlu0 %v12967_v18, %s9987_s3  ;;  %s10003_s3 = smov 112  }
0x50c2   :  { %8225 = vrot.lane.b32.xlu0 %v12968_v28, %s9999_s26 }
0x50c6   :  { %8229 = vrot.lane.b32.xlu0 %v12969_v22, %s10000_s1 }
0x510c   :  { %v8163_v60 = vpop.permute.xlu0 %8162 }
0x510d   :  { %v8165_v26 = vsel %vm5225_vm7, %v8163_v60, 0.0 }
0x510e   :  { %8166 = vadd.xlane.f32.xlu1 %v8165_v26 }
0x5110   :  { %v8171_v43 = vpop.permute.xlu0 %8170 }
0x5114   :  { %v8174_v53 = vpop.permute.xlu0 %8173 }
0x5118   :  { %v8210_v51 = vpop.permute.xlu0 %8209 }
0x5119   :  { %v8237_v14 = vsel %vm8236_vm12, %v12972_v48, %v8210_v51 }
0x511c   :  { %v8177_v37 = vpop.permute.xlu0 %8176 }
0x511f   :  { %8185 = vrot.lane.b32.xlu1 %v7750_v46, %s10001_s20 }
0x5120   :  { %v8214_v50 = vpop.permute.xlu0 %8213 }
0x5121   :  { %v8239_v15 = vsel %vm8238_vm14, %v8237_v14, %v8214_v50 }
0x5124   :  { %v8180_v6 = vpop.permute.xlu0 %8179 }
0x5128   :  { %v8218_v29 = vpop.permute.xlu0 %8217 }
0x5129   :  { %v8241_v36 = vsel %vm8240_vm0, %v8239_v15, %v8218_v29 }
0x512c   :  { %v8183_v19 = vpop.permute.xlu0 %8182 }
0x5130   :  { %v8222_v9 = vpop.permute.xlu0 %8221 }
0x5131   :  { %v8242_v54 = vsel %vm234_vm4, %v8241_v36, %v8222_v9 }
0x5134   :  { %v8226_v59 = vpop.permute.xlu0 %8225 }
0x5135   :  { %v8244_v1 = vsel %vm8243_vm3, %v8242_v54, %v8226_v59 }
0x5197   :  { %v8167_v55 = vpop.xlane.xlu1 %8166 }
0x5198   :  { %v8168_v40 = vadd.f32 %v12580_v23, %v8167_v55  ;;  %v12970_v23 = vld [vmem:[#allocation29_spill] sm:$0xff] }
0x5199   :  { %v12971_v46 = vmax.f32 %v12970_v23, 0.0 }
0x519a   :  { %v8169_v5 = vmax.f32 %v8168_v40, 0.0 }
0x519b   :  { %v8193_v10 = vsel %vm8192_vm8, %v12971_v46, %v8171_v43  ;;  %v8186_v38 = vpop.permute.xlu1 %8185 }
0x519c   :  { %8189 = vrot.lane.b32.xlu0 %v8169_v5, %s10002_s21  ;;  %v8195_v52 = vsel %vm8194_vm9, %v8193_v10, %v8174_v53 }
0x519d   :  { %v8197_v34 = vsel %vm8196_vm10, %v8195_v52, %v8177_v37 }
0x519e   :  { %v8199_v20 = vsel %vm8198_vm11, %v8197_v34, %v8180_v6 }
0x519f   :  { %v8201_v33 = vsel %vm8200_vm13, %v8199_v20, %v8183_v19 }
0x51a0   :  { %8233 = vrot.lane.b32.xlu0 %v12630_v62, %s10003_s3  ;;  %v8230_v62 = vpop.permute.xlu0 %8229  ;;  %v8203_v12 = vsel %vm8202_vm15, %v8201_v33, %v8186_v38 }
0x520e   :  { %v8190_v11 = vpop.permute.xlu0 %8189 }
0x520f   :  { %v8205_v39 = vsel %vm8204_vm1, %v8203_v12, %v8190_v11 }
0x5210   :  { %8207 = vst.msk [vmem:[#allocation5] sm:$0xf] %vm8206_vm2, %v8205_v39 }
0x5211   :  { %9974 = shalt.err (!%p9971_p4)
}
0x5212   :  { %8259 = dma.vmem_to_hbm [thread:$0]  %s8257_s12, 64, %s12728_s17, [#allocation6]   ;;  %v8246_v57 = vsel %vm8245_vm5, %v8244_v1, %v8230_v62  ;;  %v8234_v56 = vpop.permute.xlu0 %8233 }
0x5213   :  { %v8248_v31 = vsel %vm8247_vm6, %v8246_v57, %v8234_v56 }
0x5214   :  { %8249 = vst [vmem:[%s12729_s18] sm:$0xf] %v8248_v31 }
0x5215   :  { %9983 = dma.done.wait [#allocation6], 64  }
0x5216   :  { %9984 = vsyncadd [#allocation6], 4294967232 }
0x5217   :  { %8267 = vsyncpa [#allocation6], 1 }

</bundles_post_ra>
